<compile_context>
chip_gen: v6e
topology: v6e:2x2x1
jax: 0.10.0
libtpu: 0.0.40
codegen_flags: <defaults>
</compile_context>

<pallas_src>
import jax
import jax.numpy as jnp
from jax import lax
from jax.experimental import pallas as pl
from jax.experimental.pallas import tpu as pltpu

_EPS = 1e-4  # StudioGAN cBN internal BatchNorm eps


# ---------------------------------------------------------------------------
# small in-kernel helpers (value-level, no scratch buffers)
# ---------------------------------------------------------------------------
def _shift_w_plus(t):
    """out[:, j] = t[:, j-1], zero column at j == 0."""
    z = jnp.zeros((t.shape[0], 1, t.shape[2]), t.dtype)
    return jnp.concatenate([z, t[:, :-1, :]], axis=1)


def _shift_w_minus(t):
    """out[:, j] = t[:, j+1], zero column at j == last."""
    z = jnp.zeros((t.shape[0], 1, t.shape[2]), t.dtype)
    return jnp.concatenate([t[:, 1:, :], z], axis=1)


def _shift_h(a, up):
    """Row-shifted view of a with zero padding (row y reads y-1 if up else y+1)."""
    z = jnp.zeros((1,) + a.shape[1:], a.dtype)
    if up:
        return jnp.concatenate([z, a[:-1]], axis=0)
    return jnp.concatenate([a[1:], z], axis=0)


def _interleave_rows(p0, p1):
    """(H0,W0,C)x2 -> (2H0,W0,C) alternating rows; leading-dim regroup, free."""
    H0, W0, C = p0.shape
    return jnp.concatenate([p0[:, None], p1[:, None]], axis=1).reshape(2 * H0, W0, C)


# ---------------------------------------------------------------------------
# pass 1: cBN1 + ReLU + nearest-x2 + conv1 (full 2-D polyphase), BN2 stat partials
# ---------------------------------------------------------------------------
def _p1_kernel(x_ref, g1_ref, b1_ref, w1e_ref, w1o_ref, bc1_ref,
               h1e_ref, h1o_ref, st_ref):
    _, H0, W0, Cin = x_ref.shape
    Cout = bc1_ref.shape[-1]
    H = 2 * H0

    # cBN1 (batch stats + conditional affine pre-folded into per-sample scale/shift)
    # + ReLU, f32 VPU math, bf16 for the MXU.
    x = x_ref[0].astype(jnp.float32)                       # (H0, W0, Cin)
    a = jnp.maximum(x * g1_ref[0] + b1_ref[0], 0.0).astype(jnp.bfloat16)

    # conv1 (3x3, pad=1) of the x2-upsampled activation, full 2-D polyphase:
    # the upsample is never materialized; per output-row parity one fat matmul with
    # K = 2*Cin (row taps folded into K) and N = 4*Cout column chunks
    # [even@j-1 | even@j | odd@j | odd@j+1].
    a_up = _shift_h(a, True)
    a_dn = _shift_h(a, False)
    lhs_e = jnp.concatenate([a_up, a], axis=-1)            # even output rows
    lhs_o = jnp.concatenate([a, a_dn], axis=-1)            # odd output rows
    r_e = jnp.dot(lhs_e.reshape(H0 * W0, 2 * Cin), w1e_ref[...],
                  preferred_element_type=jnp.float32).reshape(H0, W0, 4 * Cout)
    r_o = jnp.dot(lhs_o.reshape(H0 * W0, 2 * Cin), w1o_ref[...],
                  preferred_element_type=jnp.float32).reshape(H0, W0, 4 * Cout)

    C = Cout
    p_ee = _shift_w_plus(r_e[..., 0:C]) + r_e[..., C:2 * C]          # even rows / even cols
    p_eo = r_e[..., 2 * C:3 * C] + _shift_w_minus(r_e[..., 3 * C:])  # even rows / odd cols
    p_oe = _shift_w_plus(r_o[..., 0:C]) + r_o[..., C:2 * C]          # odd rows  / even cols
    p_oo = r_o[..., 2 * C:3 * C] + _shift_w_minus(r_o[..., 3 * C:])  # odd rows  / odd cols

    h_e = _interleave_rows(p_ee, p_oe)                     # (H, W0, Cout), even cols
    h_o = _interleave_rows(p_eo, p_oo)                     # (H, W0, Cout), odd cols

    # per-sample partials for cBN2 batch stats, on the pre-bias values in f32
    # (variance is shift-invariant; slightly better E[x^2]-E[x]^2 conditioning).
    he2 = h_e.reshape(H * W0, Cout)
    ho2 = h_o.reshape(H * W0, Cout)
    s = jnp.sum(he2, axis=0, keepdims=True) + jnp.sum(ho2, axis=0, keepdims=True)
    ss = (jnp.sum(he2 * he2, axis=0, keepdims=True) +
          jnp.sum(ho2 * ho2, axis=0, keepdims=True))
    st_ref[0] = jnp.concatenate([s, ss], axis=0)

    bias = bc1_ref[...]                                    # (1, Cout)
    h1e_ref[0] = (h_e + bias).astype(jnp.bfloat16)
    h1o_ref[0] = (h_o + bias).astype(jnp.bfloat16)


# ---------------------------------------------------------------------------
# pass 2: cBN2 + ReLU + conv2 (polyphase, K-folded) + 1x1 shortcut + add
# ---------------------------------------------------------------------------
def _p2_kernel(h1e_ref, h1o_ref, x_ref, g2_ref, b2_ref,
               w2e_ref, w2o_ref, bc2_ref, w0_ref, bc0_ref, o_ref):
    _, H, W0, C = h1e_ref.shape                            # C == Cout
    _, H0, _, Cin = x_ref.shape

    g2 = g2_ref[0]                                         # (1, C)
    b2 = b2_ref[0]

    # cBN2 (folded per-sample scale/shift) + ReLU per column phase, f32 VPU math.
    te = jnp.maximum(h1e_ref[0].astype(jnp.float32) * g2 + b2, 0.0).astype(jnp.bfloat16)
    to = jnp.maximum(h1o_ref[0].astype(jnp.float32) * g2 + b2, 0.0).astype(jnp.bfloat16)

    # conv2 (3x3, pad=1) in the column-polyphase domain, dy taps folded into K:
    # one K=3*C, N=3*C matmul per column phase.
    lhs_e = jnp.concatenate([_shift_h(te, True), te, _shift_h(te, False)], axis=-1)
    lhs_o = jnp.concatenate([_shift_h(to, True), to, _shift_h(to, False)], axis=-1)
    re = jnp.dot(lhs_e.reshape(H * W0, 3 * C), w2e_ref[...],
                 preferred_element_type=jnp.float32).reshape(H, W0, 3 * C)
    ro = jnp.dot(lhs_o.reshape(H * W0, 3 * C), w2o_ref[...],
                 preferred_element_type=jnp.float32).reshape(H, W0, 3 * C)

    acc_e = re[..., 0:C] + ro[..., 0:C] + _shift_w_plus(ro[..., 2 * C:3 * C])
    acc_o = re[..., C:2 * C] + ro[..., C:2 * C] + _shift_w_minus(re[..., 2 * C:3 * C])

    # shortcut: 1x1 conv on the *un-upsampled* raw input (4x fewer FLOPs / DMA bytes),
    # then nearest-x2: rows replicated (free regroup), column phases identical.
    x2d = x_ref[0].reshape(H0 * W0, Cin)                   # bf16
    sc0 = (jnp.dot(x2d, w0_ref[...], preferred_element_type=jnp.float32)
           + bc0_ref[...]).reshape(H0, W0, C)
    scH = jnp.broadcast_to(sc0[:, None], (H0, 2, W0, C)).reshape(H, W0, C)

    add_term = scH + bc2_ref[...]
    o_ref[0, 0] = acc_e + add_term                         # even output columns
    o_ref[0, 1] = acc_o + add_term                         # odd output columns


# ---------------------------------------------------------------------------
# wrapper
# ---------------------------------------------------------------------------
def _vmem_limit_bytes():
    try:
        phys = int(pltpu.get_tpu_info().vmem_capacity_bytes)
    except Exception:
        phys = 128 * 1024 * 1024
    return int(min(phys * 3 // 4, 100 * 1024 * 1024))


@jax.jit
def gen_block_pallas(x_nchw, label, params):
    """x_nchw: (N, Cin, H0, W0) float32 (PyTorch layout). Returns (N, Cout, 2H0, 2W0)."""
    N, Cin, H0, W0 = x_nchw.shape
    H, W = 2 * H0, 2 * W0
    Cout = params["w1"].shape[-1]
    f32, bf16 = jnp.float32, jnp.bfloat16

    x = jnp.transpose(x_nchw, (0, 2, 3, 1)).astype(f32)    # (N, H0, W0, Cin)

    # cBN1: batch stats over the raw input (BN1 is applied before the upsample) and
    # per-sample conditional affine, folded into a single scale/shift per channel.
    m1 = jnp.mean(x, axis=(0, 1, 2))
    v1 = jnp.mean(jnp.square(x - m1), axis=(0, 1, 2))
    inv1 = lax.rsqrt(v1 + _EPS)
    gain1 = 1.0 + label @ params["g1"]                     # (N, Cin)
    bias1 = label @ params["b1"]
    eff_g1 = (gain1 * inv1)[:, None, :]                    # (N, 1, Cin)
    eff_b1 = (bias1 - gain1 * m1 * inv1)[:, None, :]

    x_bf = x.astype(bf16)                                  # halves x DMA in both passes

    # prepack conv weights (bf16 MXU operands) for the polyphase formulation.
    w1 = params["w1"]                                      # (3, 3, Cin, Cout) HWIO

    def _colpack(wdx):                                     # wdx: (3, Cin, Cout) over dx
        return jnp.concatenate([wdx[0], wdx[1] + wdx[2],
                                wdx[0] + wdx[1], wdx[2]], axis=-1)

    # K-block order matches the in-kernel lane concat of the LHS.
    w1e = jnp.concatenate([_colpack(w1[0]), _colpack(w1[1] + w1[2])],
                          axis=0).astype(bf16)             # (2*Cin, 4*Cout)
    w1o = jnp.concatenate([_colpack(w1[0] + w1[1]), _colpack(w1[2])],
                          axis=0).astype(bf16)
    w2 = params["w2"]                                      # (3, 3, Cout, Cout)
    w2e = jnp.concatenate([w2[:, 1], w2[:, 0], w2[:, 2]],
                          axis=-1).reshape(3 * Cout, 3 * Cout).astype(bf16)
    w2o = jnp.concatenate([w2[:, 2], w2[:, 1], w2[:, 0]],
                          axis=-1).reshape(3 * Cout, 3 * Cout).astype(bf16)
    w0 = params["w0"].astype(bf16)                         # (Cin, Cout)
    bc1 = params["bc1"].astype(f32)
    bc2 = params["bc2"].astype(f32)
    bc0 = params["bc0"].astype(f32)

    cparams = pltpu.CompilerParams(dimension_semantics=("parallel",),
                                   vmem_limit_bytes=_vmem_limit_bytes())

    # ---- pass 1 ----
    h1e, h1o, stats = pl.pallas_call(
        _p1_kernel,
        grid=(N,),
        in_specs=[
            pl.BlockSpec((1, H0, W0, Cin), lambda n: (n, 0, 0, 0)),
            pl.BlockSpec((1, 1, Cin), lambda n: (n, 0, 0)),
            pl.BlockSpec((1, 1, Cin), lambda n: (n, 0, 0)),
            pl.BlockSpec((2 * Cin, 4 * Cout), lambda n: (0, 0)),
            pl.BlockSpec((2 * Cin, 4 * Cout), lambda n: (0, 0)),
            pl.BlockSpec((1, Cout), lambda n: (0, 0)),
        ],
        out_specs=[
            pl.BlockSpec((1, H, W0, Cout), lambda n: (n, 0, 0, 0)),
            pl.BlockSpec((1, H, W0, Cout), lambda n: (n, 0, 0, 0)),
            pl.BlockSpec((1, 2, Cout), lambda n: (n, 0, 0)),
        ],
        out_shape=[
            jax.ShapeDtypeStruct((N, H, W0, Cout), bf16),
            jax.ShapeDtypeStruct((N, H, W0, Cout), bf16),
            jax.ShapeDtypeStruct((N, 2, Cout), f32),
        ],
        compiler_params=cparams,
    )(x_bf, eff_g1, eff_b1, w1e, w1o, bc1)

    # cBN2 statistics from the per-sample pre-bias partials; fold with the
    # conditional affine into a per-sample scale/shift.
    cnt = float(N * H * W)
    s = jnp.sum(stats[:, 0, :], axis=0)
    ss = jnp.sum(stats[:, 1, :], axis=0)
    mean_pre = s / cnt
    m2 = mean_pre + bc1.reshape(-1)                        # stored h1 includes bc1
    v2 = jnp.maximum(ss / cnt - mean_pre * mean_pre, 0.0)  # var is shift-invariant
    inv2 = lax.rsqrt(v2 + _EPS)
    gain2 = 1.0 + label @ params["g2"]                     # (N, Cout)
    bias2 = label @ params["b2"]
    eff_g2 = (gain2 * inv2)[:, None, :]
    eff_b2 = (bias2 - gain2 * m2 * inv2)[:, None, :]

    # ---- pass 2 ----
    out5 = pl.pallas_call(
        _p2_kernel,
        grid=(N,),
        in_specs=[
            pl.BlockSpec((1, H, W0, Cout), lambda n: (n, 0, 0, 0)),
            pl.BlockSpec((1, H, W0, Cout), lambda n: (n, 0, 0, 0)),
            pl.BlockSpec((1, H0, W0, Cin), lambda n: (n, 0, 0, 0)),
            pl.BlockSpec((1, 1, Cout), lambda n: (n, 0, 0)),
            pl.BlockSpec((1, 1, Cout), lambda n: (n, 0, 0)),
            pl.BlockSpec((3 * Cout, 3 * Cout), lambda n: (0, 0)),
            pl.BlockSpec((3 * Cout, 3 * Cout), lambda n: (0, 0)),
            pl.BlockSpec((1, Cout), lambda n: (0, 0)),
            pl.BlockSpec((Cin, Cout), lambda n: (0, 0)),
            pl.BlockSpec((1, Cout), lambda n: (0, 0)),
        ],
        out_specs=pl.BlockSpec((1, 2, H, W0, Cout), lambda n: (n, 0, 0, 0, 0)),
        out_shape=jax.ShapeDtypeStruct((N, 2, H, W0, Cout), f32),
        compiler_params=cparams,
    )(h1e, h1o, x_bf, eff_g2, eff_b2, w2e, w2o, bc2, w0, bc0)

    # (n, phase, h, j, c) -> (n, c, h, w=2j+phase): one fused XLA transpose plus a
    # free contiguous-dim merge; no separate interleave pass.
    return jnp.transpose(out5, (0, 4, 2, 3, 1)).reshape(N, Cout, H, W)


# ---------------------------------------------------------------------------
# pure-JAX reference mirroring the PyTorch forward
# ---------------------------------------------------------------------------
def gen_block_reference(x_nchw, label, params):
    x = jnp.transpose(x_nchw, (0, 2, 3, 1))

    def cbn(h, gw, bw):
        m = jnp.mean(h, axis=(0, 1, 2), keepdims=True)
        v = jnp.mean((h - m) ** 2, axis=(0, 1, 2), keepdims=True)
        hn = (h - m) / jnp.sqrt(v + _EPS)
        g = 1.0 + label @ gw
        b = label @ bw
        return hn * g[:, None, None, :] + b[:, None, None, :]

    def up2(h):
        return jnp.repeat(jnp.repeat(h, 2, axis=1), 2, axis=2)

    def conv(h, w, b, pad):
        y = lax.conv_general_dilated(h, w, (1, 1), [(pad, pad), (pad, pad)],
                                     dimension_numbers=("NHWC", "HWIO", "NHWC"))
        return y + b

    Cin, Cout = params["w0"].shape

    h = jax.nn.relu(cbn(x, params["g1"], params["b1"]))
    h = up2(h)
    h = conv(h, params["w1"], params["bc1"], 1)
    h = jax.nn.relu(cbn(h, params["g2"], params["b2"]))
    h = conv(h, params["w2"], params["bc2"], 1)

    x0 = up2(x)
    x0 = conv(x0, params["w0"].reshape(1, 1, Cin, Cout), params["bc0"], 0)

    return jnp.transpose(h + x0, (0, 3, 1, 2))


if __name__ == "__main__":
    N, Cin, Cout, H0, Z = 2, 4, 8, 16, 8   # hier_z_dim = 8

    key = jax.random.PRNGKey(0)
    ks = jax.random.split(key, 12)
    f32 = jnp.float32

    x = jax.random.normal(ks[0], (N, Cin, H0, H0), f32)
    label = jax.random.normal(ks[1], (N, Z), f32)

    params = {
        # cBN affine-generating linears (no bias), stored as (Z, C) for y @ W
        "g1": 0.10 * jax.random.normal(ks[2], (Z, Cin), f32),
        "b1": 0.10 * jax.random.normal(ks[3], (Z, Cin), f32),
        "g2": 0.10 * jax.random.normal(ks[4], (Z, Cout), f32),
        "b2": 0.10 * jax.random.normal(ks[5], (Z, Cout), f32),
        # conv2d1: 3x3, Cin->Cout (HWIO)
        "w1": 0.20 * jax.random.normal(ks[6], (3, 3, Cin, Cout), f32),
        "bc1": 0.05 * jax.random.normal(ks[7], (1, Cout), f32),
        # conv2d2: 3x3, Cout->Cout (HWIO)
        "w2": 0.20 * jax.random.normal(ks[8], (3, 3, Cout, Cout), f32),
        "bc2": 0.05 * jax.random.normal(ks[9], (1, Cout), f32),
        # conv2d0: 1x1 shortcut, Cin->Cout
        "w0": 0.20 * jax.random.normal(ks[10], (Cin, Cout), f32),
        "bc0": 0.05 * jax.random.normal(ks[11], (1, Cout), f32),
    }

    out = jax.block_until_ready(gen_block_pallas(x, label, params))
    ref = jax.block_until_ready(gen_block_reference(x, label, params))

    assert out.shape == (N, Cout, 2 * H0, 2 * H0), out.shape
    # Tolerance accounts for bf16 MXU operands (f32 accumulation) plus bf16 HBM
    # storage of x and of the conv1 intermediate (requested by the perf review)
    # against an all-f32 reference; outputs are O(1..6) in magnitude.
    max_err = float(jnp.max(jnp.abs(out - ref)))
    assert max_err < 7.5e-2, f"mismatch vs reference: max_err={max_err}"
    print("KERNEL_OK")
</pallas_src>

<mosaic_0001>
module attributes {stable_mosaic.version = 11 : i64} {
  func.func @_p1_kernel(%arg0: i32, %arg1: memref<1x16x16x4xbf16, #tpu.memory_space<vmem>>, %arg2: memref<1x1x4xf32, #tpu.memory_space<vmem>>, %arg3: memref<1x1x4xf32, #tpu.memory_space<vmem>>, %arg4: memref<8x32xbf16, #tpu.memory_space<vmem>>, %arg5: memref<8x32xbf16, #tpu.memory_space<vmem>>, %arg6: memref<1x8xf32, #tpu.memory_space<vmem>>, %arg7: memref<1x32x16x8xbf16, #tpu.memory_space<vmem>>, %arg8: memref<1x32x16x8xbf16, #tpu.memory_space<vmem>>, %arg9: memref<1x2x8xf32, #tpu.memory_space<vmem>>) attributes {dimension_semantics = [#tpu.dimension_semantics<parallel>], iteration_bounds = array<i64: 2>, scalar_prefetch = 0 : i64, scratch_operands = 0 : i64, tpu.core_type = #tpu.core_type<tc>, window_params = [{transform_indices = @transform_0, window_bounds = array<i64: 1, 16, 16, 4>}, {transform_indices = @transform_1, window_bounds = array<i64: 1, 1, 4>}, {transform_indices = @transform_2, window_bounds = array<i64: 1, 1, 4>}, {pipeline_mode = #tpu.pipeline_mode<synchronous>, transform_indices = @transform_3, window_bounds = array<i64: 8, 32>}, {pipeline_mode = #tpu.pipeline_mode<synchronous>, transform_indices = @transform_4, window_bounds = array<i64: 8, 32>}, {pipeline_mode = #tpu.pipeline_mode<synchronous>, transform_indices = @transform_5, window_bounds = array<i64: 1, 8>}, {transform_indices = @transform_6, window_bounds = array<i64: 1, 32, 16, 8>}, {transform_indices = @transform_7, window_bounds = array<i64: 1, 32, 16, 8>}, {transform_indices = @transform_8, window_bounds = array<i64: 1, 2, 8>}]} {
    %c0 = arith.constant 0 : index
    %c0_0 = arith.constant 0 : index
    %c0_1 = arith.constant 0 : index
    %c0_2 = arith.constant 0 : index
    %0 = vector.load %arg1[%c0, %c0_0, %c0_1, %c0_2] : memref<1x16x16x4xbf16, #tpu.memory_space<vmem>>, vector<1x16x16x4xbf16>
    %1 = vector.shape_cast %0 : vector<1x16x16x4xbf16> to vector<16x16x4xbf16>
    %2 = arith.extf %1 : vector<16x16x4xbf16> to vector<16x16x4xf32>
    %c0_3 = arith.constant 0 : index
    %c0_4 = arith.constant 0 : index
    %c0_5 = arith.constant 0 : index
    %3 = vector.load %arg2[%c0_3, %c0_4, %c0_5] : memref<1x1x4xf32, #tpu.memory_space<vmem>>, vector<1x1x4xf32>
    %4 = vector.shape_cast %3 : vector<1x1x4xf32> to vector<1x4xf32>
    %5 = vector.shape_cast %4 : vector<1x4xf32> to vector<1x1x4xf32>
    %6 = vector.broadcast %5 : vector<1x1x4xf32> to vector<16x16x4xf32>
    %7 = arith.mulf %2, %6 : vector<16x16x4xf32>
    %c0_6 = arith.constant 0 : index
    %c0_7 = arith.constant 0 : index
    %c0_8 = arith.constant 0 : index
    %8 = vector.load %arg3[%c0_6, %c0_7, %c0_8] : memref<1x1x4xf32, #tpu.memory_space<vmem>>, vector<1x1x4xf32>
    %9 = vector.shape_cast %8 : vector<1x1x4xf32> to vector<1x4xf32>
    %10 = vector.shape_cast %9 : vector<1x4xf32> to vector<1x1x4xf32>
    %11 = vector.broadcast %10 : vector<1x1x4xf32> to vector<16x16x4xf32>
    %12 = arith.addf %7, %11 : vector<16x16x4xf32>
    %cst = arith.constant 0.000000e+00 : f32
    %13 = vector.broadcast %cst : f32 to vector<16x16x4xf32>
    %14 = arith.maximumf %12, %13 : vector<16x16x4xf32>
    %15 = arith.truncf %14 : vector<16x16x4xf32> to vector<16x16x4xbf16>
    %cst_9 = arith.constant 0.000000e+00 : bf16
    %16 = vector.broadcast %cst_9 : bf16 to vector<1x16x4xbf16>
    %17 = vector.extract_strided_slice %15 {offsets = [0, 0, 0], sizes = [15, 16, 4], strides = [1, 1, 1]} : vector<16x16x4xbf16> to vector<15x16x4xbf16>
    %18 = tpu.concatenate %16, %17 in 0 : vector<1x16x4xbf16>, vector<15x16x4xbf16> -> vector<16x16x4xbf16>
    %cst_10 = arith.constant 0.000000e+00 : bf16
    %19 = vector.broadcast %cst_10 : bf16 to vector<1x16x4xbf16>
    %20 = vector.extract_strided_slice %15 {offsets = [1, 0, 0], sizes = [15, 16, 4], strides = [1, 1, 1]} : vector<16x16x4xbf16> to vector<15x16x4xbf16>
    %21 = tpu.concatenate %20, %19 in 0 : vector<15x16x4xbf16>, vector<1x16x4xbf16> -> vector<16x16x4xbf16>
    %22 = tpu.concatenate %18, %15 in 2 : vector<16x16x4xbf16>, vector<16x16x4xbf16> -> vector<16x16x8xbf16>
    %23 = tpu.concatenate %15, %21 in 2 : vector<16x16x4xbf16>, vector<16x16x4xbf16> -> vector<16x16x8xbf16>
    %24 = vector.shape_cast %22 : vector<16x16x8xbf16> to vector<256x8xbf16>
    %c0_11 = arith.constant 0 : index
    %c0_12 = arith.constant 0 : index
    %25 = vector.load %arg4[%c0_11, %c0_12] : memref<8x32xbf16, #tpu.memory_space<vmem>>, vector<8x32xbf16>
    %cst_13 = arith.constant dense<0.000000e+00> : vector<256x32xf32>
    %26 = tpu.matmul %24, %25, %cst_13 {dimension_numbers = #tpu.dot_dimension_numbers<[1], [0], [0], [1], [0, 0, 1, 1], [], []>} : vector<256x8xbf16>, vector<8x32xbf16>, vector<256x32xf32> -> vector<256x32xf32>
    %27 = vector.shape_cast %26 : vector<256x32xf32> to vector<16x16x32xf32>
    %28 = vector.shape_cast %23 : vector<16x16x8xbf16> to vector<256x8xbf16>
    %c0_14 = arith.constant 0 : index
    %c0_15 = arith.constant 0 : index
    %29 = vector.load %arg5[%c0_14, %c0_15] : memref<8x32xbf16, #tpu.memory_space<vmem>>, vector<8x32xbf16>
    %cst_16 = arith.constant dense<0.000000e+00> : vector<256x32xf32>
    %30 = tpu.matmul %28, %29, %cst_16 {dimension_numbers = #tpu.dot_dimension_numbers<[1], [0], [0], [1], [0, 0, 1, 1], [], []>} : vector<256x8xbf16>, vector<8x32xbf16>, vector<256x32xf32> -> vector<256x32xf32>
    %31 = vector.shape_cast %30 : vector<256x32xf32> to vector<16x16x32xf32>
    %32 = vector.extract_strided_slice %27 {offsets = [0, 0, 0], sizes = [16, 16, 8], strides = [1, 1, 1]} : vector<16x16x32xf32> to vector<16x16x8xf32>
    %cst_17 = arith.constant 0.000000e+00 : f32
    %33 = vector.broadcast %cst_17 : f32 to vector<16x1x8xf32>
    %34 = vector.extract_strided_slice %32 {offsets = [0, 0, 0], sizes = [16, 15, 8], strides = [1, 1, 1]} : vector<16x16x8xf32> to vector<16x15x8xf32>
    %35 = tpu.concatenate %33, %34 in 1 : vector<16x1x8xf32>, vector<16x15x8xf32> -> vector<16x16x8xf32>
    %36 = vector.extract_strided_slice %27 {offsets = [0, 0, 8], sizes = [16, 16, 8], strides = [1, 1, 1]} : vector<16x16x32xf32> to vector<16x16x8xf32>
    %37 = arith.addf %35, %36 : vector<16x16x8xf32>
    %38 = vector.extract_strided_slice %27 {offsets = [0, 0, 16], sizes = [16, 16, 8], strides = [1, 1, 1]} : vector<16x16x32xf32> to vector<16x16x8xf32>
    %39 = vector.extract_strided_slice %27 {offsets = [0, 0, 24], sizes = [16, 16, 8], strides = [1, 1, 1]} : vector<16x16x32xf32> to vector<16x16x8xf32>
    %cst_18 = arith.constant 0.000000e+00 : f32
    %40 = vector.broadcast %cst_18 : f32 to vector<16x1x8xf32>
    %41 = vector.extract_strided_slice %39 {offsets = [0, 1, 0], sizes = [16, 15, 8], strides = [1, 1, 1]} : vector<16x16x8xf32> to vector<16x15x8xf32>
    %42 = tpu.concatenate %41, %40 in 1 : vector<16x15x8xf32>, vector<16x1x8xf32> -> vector<16x16x8xf32>
    %43 = arith.addf %38, %42 : vector<16x16x8xf32>
    %44 = vector.extract_strided_slice %31 {offsets = [0, 0, 0], sizes = [16, 16, 8], strides = [1, 1, 1]} : vector<16x16x32xf32> to vector<16x16x8xf32>
    %cst_19 = arith.constant 0.000000e+00 : f32
    %45 = vector.broadcast %cst_19 : f32 to vector<16x1x8xf32>
    %46 = vector.extract_strided_slice %44 {offsets = [0, 0, 0], sizes = [16, 15, 8], strides = [1, 1, 1]} : vector<16x16x8xf32> to vector<16x15x8xf32>
    %47 = tpu.concatenate %45, %46 in 1 : vector<16x1x8xf32>, vector<16x15x8xf32> -> vector<16x16x8xf32>
    %48 = vector.extract_strided_slice %31 {offsets = [0, 0, 8], sizes = [16, 16, 8], strides = [1, 1, 1]} : vector<16x16x32xf32> to vector<16x16x8xf32>
    %49 = arith.addf %47, %48 : vector<16x16x8xf32>
    %50 = vector.extract_strided_slice %31 {offsets = [0, 0, 16], sizes = [16, 16, 8], strides = [1, 1, 1]} : vector<16x16x32xf32> to vector<16x16x8xf32>
    %51 = vector.extract_strided_slice %31 {offsets = [0, 0, 24], sizes = [16, 16, 8], strides = [1, 1, 1]} : vector<16x16x32xf32> to vector<16x16x8xf32>
    %cst_20 = arith.constant 0.000000e+00 : f32
    %52 = vector.broadcast %cst_20 : f32 to vector<16x1x8xf32>
    %53 = vector.extract_strided_slice %51 {offsets = [0, 1, 0], sizes = [16, 15, 8], strides = [1, 1, 1]} : vector<16x16x8xf32> to vector<16x15x8xf32>
    %54 = tpu.concatenate %53, %52 in 1 : vector<16x15x8xf32>, vector<16x1x8xf32> -> vector<16x16x8xf32>
    %55 = arith.addf %50, %54 : vector<16x16x8xf32>
    %56 = vector.shape_cast %37 : vector<16x16x8xf32> to vector<16x1x16x8xf32>
    %57 = vector.shape_cast %49 : vector<16x16x8xf32> to vector<16x1x16x8xf32>
    %58 = tpu.concatenate %56, %57 in 1 : vector<16x1x16x8xf32>, vector<16x1x16x8xf32> -> vector<16x2x16x8xf32>
    %59 = vector.shape_cast %58 : vector<16x2x16x8xf32> to vector<32x16x8xf32>
    %60 = vector.shape_cast %43 : vector<16x16x8xf32> to vector<16x1x16x8xf32>
    %61 = vector.shape_cast %55 : vector<16x16x8xf32> to vector<16x1x16x8xf32>
    %62 = tpu.concatenate %60, %61 in 1 : vector<16x1x16x8xf32>, vector<16x1x16x8xf32> -> vector<16x2x16x8xf32>
    %63 = vector.shape_cast %62 : vector<16x2x16x8xf32> to vector<32x16x8xf32>
    %64 = vector.shape_cast %59 : vector<32x16x8xf32> to vector<512x8xf32>
    %65 = vector.shape_cast %63 : vector<32x16x8xf32> to vector<512x8xf32>
    %cst_21 = arith.constant dense<0.000000e+00> : vector<8xf32>
    %66 = vector.multi_reduction <add>, %64, %cst_21 [0] : vector<512x8xf32> to vector<8xf32>
    %67 = vector.shape_cast %66 : vector<8xf32> to vector<1x8xf32>
    %cst_22 = arith.constant dense<0.000000e+00> : vector<8xf32>
    %68 = vector.multi_reduction <add>, %65, %cst_22 [0] : vector<512x8xf32> to vector<8xf32>
    %69 = vector.shape_cast %68 : vector<8xf32> to vector<1x8xf32>
    %70 = arith.addf %67, %69 : vector<1x8xf32>
    %71 = arith.mulf %64, %64 : vector<512x8xf32>
    %cst_23 = arith.constant dense<0.000000e+00> : vector<8xf32>
    %72 = vector.multi_reduction <add>, %71, %cst_23 [0] : vector<512x8xf32> to vector<8xf32>
    %73 = vector.shape_cast %72 : vector<8xf32> to vector<1x8xf32>
    %74 = arith.mulf %65, %65 : vector<512x8xf32>
    %cst_24 = arith.constant dense<0.000000e+00> : vector<8xf32>
    %75 = vector.multi_reduction <add>, %74, %cst_24 [0] : vector<512x8xf32> to vector<8xf32>
    %76 = vector.shape_cast %75 : vector<8xf32> to vector<1x8xf32>
    %77 = arith.addf %73, %76 : vector<1x8xf32>
    %78 = tpu.concatenate %70, %77 in 0 : vector<1x8xf32>, vector<1x8xf32> -> vector<2x8xf32>
    %c0_25 = arith.constant 0 : index
    %c0_26 = arith.constant 0 : index
    %c0_27 = arith.constant 0 : index
    %79 = vector.load %arg9[%c0_25, %c0_26, %c0_27] : memref<1x2x8xf32, #tpu.memory_space<vmem>>, vector<1x2x8xf32>
    %80 = vector.shape_cast %79 : vector<1x2x8xf32> to vector<2x8xf32>
    %81 = vector.shape_cast %78 : vector<2x8xf32> to vector<1x2x8xf32>
    tpu.vector_store %arg9[%c0_25, %c0_26, %c0_27], %81 {strides = array<i32>} : memref<1x2x8xf32, #tpu.memory_space<vmem>>, vector<1x2x8xf32>,
    %c0_28 = arith.constant 0 : index
    %c0_29 = arith.constant 0 : index
    %82 = vector.load %arg6[%c0_28, %c0_29] : memref<1x8xf32, #tpu.memory_space<vmem>>, vector<1x8xf32>
    %83 = vector.shape_cast %82 : vector<1x8xf32> to vector<1x1x8xf32>
    %84 = vector.broadcast %83 : vector<1x1x8xf32> to vector<32x16x8xf32>
    %85 = arith.addf %59, %84 : vector<32x16x8xf32>
    %86 = arith.truncf %85 : vector<32x16x8xf32> to vector<32x16x8xbf16>
    %c0_30 = arith.constant 0 : index
    %c0_31 = arith.constant 0 : index
    %c0_32 = arith.constant 0 : index
    %c0_33 = arith.constant 0 : index
    %87 = vector.load %arg7[%c0_30, %c0_31, %c0_32, %c0_33] : memref<1x32x16x8xbf16, #tpu.memory_space<vmem>>, vector<1x32x16x8xbf16>
    %88 = vector.shape_cast %87 : vector<1x32x16x8xbf16> to vector<32x16x8xbf16>
    %89 = vector.shape_cast %86 : vector<32x16x8xbf16> to vector<1x32x16x8xbf16>
    tpu.vector_store %arg7[%c0_30, %c0_31, %c0_32, %c0_33], %89 {strides = array<i32>} : memref<1x32x16x8xbf16, #tpu.memory_space<vmem>>, vector<1x32x16x8xbf16>,
    %90 = vector.shape_cast %82 : vector<1x8xf32> to vector<1x1x8xf32>
    %91 = vector.broadcast %90 : vector<1x1x8xf32> to vector<32x16x8xf32>
    %92 = arith.addf %63, %91 : vector<32x16x8xf32>
    %93 = arith.truncf %92 : vector<32x16x8xf32> to vector<32x16x8xbf16>
    %c0_34 = arith.constant 0 : index
    %c0_35 = arith.constant 0 : index
    %c0_36 = arith.constant 0 : index
    %c0_37 = arith.constant 0 : index
    %94 = vector.load %arg8[%c0_34, %c0_35, %c0_36, %c0_37] : memref<1x32x16x8xbf16, #tpu.memory_space<vmem>>, vector<1x32x16x8xbf16>
    %95 = vector.shape_cast %94 : vector<1x32x16x8xbf16> to vector<32x16x8xbf16>
    %96 = vector.shape_cast %93 : vector<32x16x8xbf16> to vector<1x32x16x8xbf16>
    tpu.vector_store %arg8[%c0_34, %c0_35, %c0_36, %c0_37], %96 {strides = array<i32>} : memref<1x32x16x8xbf16, #tpu.memory_space<vmem>>, vector<1x32x16x8xbf16>,
    return
  }
  func.func @transform_0(%arg0: i32) -> (i32, i32, i32, i32) {
    %c0_i32 = arith.constant 0 : i32
    %c0_i32_0 = arith.constant 0 : i32
    %c0_i32_1 = arith.constant 0 : i32
    %c0_i32_2 = arith.constant 0 : i32
    return %arg0, %c0_i32, %c0_i32_0, %c0_i32_1 : i32, i32, i32, i32
  }
  func.func @transform_1(%arg0: i32) -> (i32, i32, i32) {
    %c0_i32 = arith.constant 0 : i32
    %c0_i32_0 = arith.constant 0 : i32
    %c0_i32_1 = arith.constant 0 : i32
    return %arg0, %c0_i32, %c0_i32_0 : i32, i32, i32
  }
  func.func @transform_2(%arg0: i32) -> (i32, i32, i32) {
    %c0_i32 = arith.constant 0 : i32
    %c0_i32_0 = arith.constant 0 : i32
    %c0_i32_1 = arith.constant 0 : i32
    return %arg0, %c0_i32, %c0_i32_0 : i32, i32, i32
  }
  func.func @transform_3(%arg0: i32) -> (i32, i32) {
    %c0_i32 = arith.constant 0 : i32
    %c0_i32_0 = arith.constant 0 : i32
    %c0_i32_1 = arith.constant 0 : i32
    return %c0_i32, %c0_i32_0 : i32, i32
  }
  func.func @transform_4(%arg0: i32) -> (i32, i32) {
    %c0_i32 = arith.constant 0 : i32
    %c0_i32_0 = arith.constant 0 : i32
    %c0_i32_1 = arith.constant 0 : i32
    return %c0_i32, %c0_i32_0 : i32, i32
  }
  func.func @transform_5(%arg0: i32) -> (i32, i32) {
    %c0_i32 = arith.constant 0 : i32
    %c0_i32_0 = arith.constant 0 : i32
    %c0_i32_1 = arith.constant 0 : i32
    return %c0_i32, %c0_i32_0 : i32, i32
  }
  func.func @transform_6(%arg0: i32) -> (i32, i32, i32, i32) {
    %c0_i32 = arith.constant 0 : i32
    %c0_i32_0 = arith.constant 0 : i32
    %c0_i32_1 = arith.constant 0 : i32
    %c0_i32_2 = arith.constant 0 : i32
    return %arg0, %c0_i32, %c0_i32_0, %c0_i32_1 : i32, i32, i32, i32
  }
  func.func @transform_7(%arg0: i32) -> (i32, i32, i32, i32) {
    %c0_i32 = arith.constant 0 : i32
    %c0_i32_0 = arith.constant 0 : i32
    %c0_i32_1 = arith.constant 0 : i32
    %c0_i32_2 = arith.constant 0 : i32
    return %arg0, %c0_i32, %c0_i32_0, %c0_i32_1 : i32, i32, i32, i32
  }
  func.func @transform_8(%arg0: i32) -> (i32, i32, i32) {
    %c0_i32 = arith.constant 0 : i32
    %c0_i32_0 = arith.constant 0 : i32
    %c0_i32_1 = arith.constant 0 : i32
    return %arg0, %c0_i32, %c0_i32_0 : i32, i32, i32
  }
}

module attributes {stable_mosaic.version = 11 : i64} {
  func.func @_p2_kernel(%arg0: i32, %arg1: memref<1x32x16x8xbf16, #tpu.memory_space<vmem>>, %arg2: memref<1x32x16x8xbf16, #tpu.memory_space<vmem>>, %arg3: memref<1x16x16x4xbf16, #tpu.memory_space<vmem>>, %arg4: memref<1x1x8xf32, #tpu.memory_space<vmem>>, %arg5: memref<1x1x8xf32, #tpu.memory_space<vmem>>, %arg6: memref<24x24xbf16, #tpu.memory_space<vmem>>, %arg7: memref<24x24xbf16, #tpu.memory_space<vmem>>, %arg8: memref<1x8xf32, #tpu.memory_space<vmem>>, %arg9: memref<4x8xbf16, #tpu.memory_space<vmem>>, %arg10: memref<1x8xf32, #tpu.memory_space<vmem>>, %arg11: memref<1x2x32x16x8xf32, #tpu.memory_space<vmem>>) attributes {dimension_semantics = [#tpu.dimension_semantics<parallel>], iteration_bounds = array<i64: 2>, scalar_prefetch = 0 : i64, scratch_operands = 0 : i64, tpu.core_type = #tpu.core_type<tc>, window_params = [{transform_indices = @transform_0, window_bounds = array<i64: 1, 32, 16, 8>}, {transform_indices = @transform_1, window_bounds = array<i64: 1, 32, 16, 8>}, {transform_indices = @transform_2, window_bounds = array<i64: 1, 16, 16, 4>}, {transform_indices = @transform_3, window_bounds = array<i64: 1, 1, 8>}, {transform_indices = @transform_4, window_bounds = array<i64: 1, 1, 8>}, {pipeline_mode = #tpu.pipeline_mode<synchronous>, transform_indices = @transform_5, window_bounds = array<i64: 24, 24>}, {pipeline_mode = #tpu.pipeline_mode<synchronous>, transform_indices = @transform_6, window_bounds = array<i64: 24, 24>}, {pipeline_mode = #tpu.pipeline_mode<synchronous>, transform_indices = @transform_7, window_bounds = array<i64: 1, 8>}, {pipeline_mode = #tpu.pipeline_mode<synchronous>, transform_indices = @transform_8, window_bounds = array<i64: 4, 8>}, {pipeline_mode = #tpu.pipeline_mode<synchronous>, transform_indices = @transform_9, window_bounds = array<i64: 1, 8>}, {transform_indices = @transform_10, window_bounds = array<i64: 1, 2, 32, 16, 8>}]} {
    %c0 = arith.constant 0 : index
    %c0_0 = arith.constant 0 : index
    %c0_1 = arith.constant 0 : index
    %0 = vector.load %arg4[%c0, %c0_0, %c0_1] : memref<1x1x8xf32, #tpu.memory_space<vmem>>, vector<1x1x8xf32>
    %1 = vector.shape_cast %0 : vector<1x1x8xf32> to vector<1x8xf32>
    %c0_2 = arith.constant 0 : index
    %c0_3 = arith.constant 0 : index
    %c0_4 = arith.constant 0 : index
    %2 = vector.load %arg5[%c0_2, %c0_3, %c0_4] : memref<1x1x8xf32, #tpu.memory_space<vmem>>, vector<1x1x8xf32>
    %3 = vector.shape_cast %2 : vector<1x1x8xf32> to vector<1x8xf32>
    %c0_5 = arith.constant 0 : index
    %c0_6 = arith.constant 0 : index
    %c0_7 = arith.constant 0 : index
    %c0_8 = arith.constant 0 : index
    %4 = vector.load %arg1[%c0_5, %c0_6, %c0_7, %c0_8] : memref<1x32x16x8xbf16, #tpu.memory_space<vmem>>, vector<1x32x16x8xbf16>
    %5 = vector.shape_cast %4 : vector<1x32x16x8xbf16> to vector<32x16x8xbf16>
    %6 = arith.extf %5 : vector<32x16x8xbf16> to vector<32x16x8xf32>
    %7 = vector.shape_cast %1 : vector<1x8xf32> to vector<1x1x8xf32>
    %8 = vector.broadcast %7 : vector<1x1x8xf32> to vector<32x16x8xf32>
    %9 = arith.mulf %6, %8 : vector<32x16x8xf32>
    %10 = vector.shape_cast %3 : vector<1x8xf32> to vector<1x1x8xf32>
    %11 = vector.broadcast %10 : vector<1x1x8xf32> to vector<32x16x8xf32>
    %12 = arith.addf %9, %11 : vector<32x16x8xf32>
    %cst = arith.constant 0.000000e+00 : f32
    %13 = vector.broadcast %cst : f32 to vector<32x16x8xf32>
    %14 = arith.maximumf %12, %13 : vector<32x16x8xf32>
    %15 = arith.truncf %14 : vector<32x16x8xf32> to vector<32x16x8xbf16>
    %c0_9 = arith.constant 0 : index
    %c0_10 = arith.constant 0 : index
    %c0_11 = arith.constant 0 : index
    %c0_12 = arith.constant 0 : index
    %16 = vector.load %arg2[%c0_9, %c0_10, %c0_11, %c0_12] : memref<1x32x16x8xbf16, #tpu.memory_space<vmem>>, vector<1x32x16x8xbf16>
    %17 = vector.shape_cast %16 : vector<1x32x16x8xbf16> to vector<32x16x8xbf16>
    %18 = arith.extf %17 : vector<32x16x8xbf16> to vector<32x16x8xf32>
    %19 = vector.shape_cast %1 : vector<1x8xf32> to vector<1x1x8xf32>
    %20 = vector.broadcast %19 : vector<1x1x8xf32> to vector<32x16x8xf32>
    %21 = arith.mulf %18, %20 : vector<32x16x8xf32>
    %22 = vector.shape_cast %3 : vector<1x8xf32> to vector<1x1x8xf32>
    %23 = vector.broadcast %22 : vector<1x1x8xf32> to vector<32x16x8xf32>
    %24 = arith.addf %21, %23 : vector<32x16x8xf32>
    %cst_13 = arith.constant 0.000000e+00 : f32
    %25 = vector.broadcast %cst_13 : f32 to vector<32x16x8xf32>
    %26 = arith.maximumf %24, %25 : vector<32x16x8xf32>
    %27 = arith.truncf %26 : vector<32x16x8xf32> to vector<32x16x8xbf16>
    %cst_14 = arith.constant 0.000000e+00 : bf16
    %28 = vector.broadcast %cst_14 : bf16 to vector<1x16x8xbf16>
    %29 = vector.extract_strided_slice %15 {offsets = [0, 0, 0], sizes = [31, 16, 8], strides = [1, 1, 1]} : vector<32x16x8xbf16> to vector<31x16x8xbf16>
    %30 = tpu.concatenate %28, %29 in 0 : vector<1x16x8xbf16>, vector<31x16x8xbf16> -> vector<32x16x8xbf16>
    %cst_15 = arith.constant 0.000000e+00 : bf16
    %31 = vector.broadcast %cst_15 : bf16 to vector<1x16x8xbf16>
    %32 = vector.extract_strided_slice %15 {offsets = [1, 0, 0], sizes = [31, 16, 8], strides = [1, 1, 1]} : vector<32x16x8xbf16> to vector<31x16x8xbf16>
    %33 = tpu.concatenate %32, %31 in 0 : vector<31x16x8xbf16>, vector<1x16x8xbf16> -> vector<32x16x8xbf16>
    %34 = tpu.concatenate %30, %15, %33 in 2 : vector<32x16x8xbf16>, vector<32x16x8xbf16>, vector<32x16x8xbf16> -> vector<32x16x24xbf16>
    %cst_16 = arith.constant 0.000000e+00 : bf16
    %35 = vector.broadcast %cst_16 : bf16 to vector<1x16x8xbf16>
    %36 = vector.extract_strided_slice %27 {offsets = [0, 0, 0], sizes = [31, 16, 8], strides = [1, 1, 1]} : vector<32x16x8xbf16> to vector<31x16x8xbf16>
    %37 = tpu.concatenate %35, %36 in 0 : vector<1x16x8xbf16>, vector<31x16x8xbf16> -> vector<32x16x8xbf16>
    %cst_17 = arith.constant 0.000000e+00 : bf16
    %38 = vector.broadcast %cst_17 : bf16 to vector<1x16x8xbf16>
    %39 = vector.extract_strided_slice %27 {offsets = [1, 0, 0], sizes = [31, 16, 8], strides = [1, 1, 1]} : vector<32x16x8xbf16> to vector<31x16x8xbf16>
    %40 = tpu.concatenate %39, %38 in 0 : vector<31x16x8xbf16>, vector<1x16x8xbf16> -> vector<32x16x8xbf16>
    %41 = tpu.concatenate %37, %27, %40 in 2 : vector<32x16x8xbf16>, vector<32x16x8xbf16>, vector<32x16x8xbf16> -> vector<32x16x24xbf16>
    %42 = vector.shape_cast %34 : vector<32x16x24xbf16> to vector<512x24xbf16>
    %c0_18 = arith.constant 0 : index
    %c0_19 = arith.constant 0 : index
    %43 = vector.load %arg6[%c0_18, %c0_19] : memref<24x24xbf16, #tpu.memory_space<vmem>>, vector<24x24xbf16>
    %cst_20 = arith.constant dense<0.000000e+00> : vector<512x24xf32>
    %44 = tpu.matmul %42, %43, %cst_20 {dimension_numbers = #tpu.dot_dimension_numbers<[1], [0], [0], [1], [0, 0, 1, 1], [], []>} : vector<512x24xbf16>, vector<24x24xbf16>, vector<512x24xf32> -> vector<512x24xf32>
    %45 = vector.shape_cast %44 : vector<512x24xf32> to vector<32x16x24xf32>
    %46 = vector.shape_cast %41 : vector<32x16x24xbf16> to vector<512x24xbf16>
    %c0_21 = arith.constant 0 : index
    %c0_22 = arith.constant 0 : index
    %47 = vector.load %arg7[%c0_21, %c0_22] : memref<24x24xbf16, #tpu.memory_space<vmem>>, vector<24x24xbf16>
    %cst_23 = arith.constant dense<0.000000e+00> : vector<512x24xf32>
    %48 = tpu.matmul %46, %47, %cst_23 {dimension_numbers = #tpu.dot_dimension_numbers<[1], [0], [0], [1], [0, 0, 1, 1], [], []>} : vector<512x24xbf16>, vector<24x24xbf16>, vector<512x24xf32> -> vector<512x24xf32>
    %49 = vector.shape_cast %48 : vector<512x24xf32> to vector<32x16x24xf32>
    %50 = vector.extract_strided_slice %45 {offsets = [0, 0, 0], sizes = [32, 16, 8], strides = [1, 1, 1]} : vector<32x16x24xf32> to vector<32x16x8xf32>
    %51 = vector.extract_strided_slice %49 {offsets = [0, 0, 0], sizes = [32, 16, 8], strides = [1, 1, 1]} : vector<32x16x24xf32> to vector<32x16x8xf32>
    %52 = arith.addf %50, %51 : vector<32x16x8xf32>
    %53 = vector.extract_strided_slice %49 {offsets = [0, 0, 16], sizes = [32, 16, 8], strides = [1, 1, 1]} : vector<32x16x24xf32> to vector<32x16x8xf32>
    %cst_24 = arith.constant 0.000000e+00 : f32
    %54 = vector.broadcast %cst_24 : f32 to vector<32x1x8xf32>
    %55 = vector.extract_strided_slice %53 {offsets = [0, 0, 0], sizes = [32, 15, 8], strides = [1, 1, 1]} : vector<32x16x8xf32> to vector<32x15x8xf32>
    %56 = tpu.concatenate %54, %55 in 1 : vector<32x1x8xf32>, vector<32x15x8xf32> -> vector<32x16x8xf32>
    %57 = arith.addf %52, %56 : vector<32x16x8xf32>
    %58 = vector.extract_strided_slice %45 {offsets = [0, 0, 8], sizes = [32, 16, 8], strides = [1, 1, 1]} : vector<32x16x24xf32> to vector<32x16x8xf32>
    %59 = vector.extract_strided_slice %49 {offsets = [0, 0, 8], sizes = [32, 16, 8], strides = [1, 1, 1]} : vector<32x16x24xf32> to vector<32x16x8xf32>
    %60 = arith.addf %58, %59 : vector<32x16x8xf32>
    %61 = vector.extract_strided_slice %45 {offsets = [0, 0, 16], sizes = [32, 16, 8], strides = [1, 1, 1]} : vector<32x16x24xf32> to vector<32x16x8xf32>
    %cst_25 = arith.constant 0.000000e+00 : f32
    %62 = vector.broadcast %cst_25 : f32 to vector<32x1x8xf32>
    %63 = vector.extract_strided_slice %61 {offsets = [0, 1, 0], sizes = [32, 15, 8], strides = [1, 1, 1]} : vector<32x16x8xf32> to vector<32x15x8xf32>
    %64 = tpu.concatenate %63, %62 in 1 : vector<32x15x8xf32>, vector<32x1x8xf32> -> vector<32x16x8xf32>
    %65 = arith.addf %60, %64 : vector<32x16x8xf32>
    %c0_26 = arith.constant 0 : index
    %c0_27 = arith.constant 0 : index
    %c0_28 = arith.constant 0 : index
    %c0_29 = arith.constant 0 : index
    %66 = vector.load %arg3[%c0_26, %c0_27, %c0_28, %c0_29] : memref<1x16x16x4xbf16, #tpu.memory_space<vmem>>, vector<1x16x16x4xbf16>
    %67 = vector.shape_cast %66 : vector<1x16x16x4xbf16> to vector<16x16x4xbf16>
    %68 = vector.shape_cast %67 : vector<16x16x4xbf16> to vector<256x4xbf16>
    %c0_30 = arith.constant 0 : index
    %c0_31 = arith.constant 0 : index
    %69 = vector.load %arg9[%c0_30, %c0_31] : memref<4x8xbf16, #tpu.memory_space<vmem>>, vector<4x8xbf16>
    %cst_32 = arith.constant dense<0.000000e+00> : vector<256x8xf32>
    %70 = tpu.matmul %68, %69, %cst_32 {dimension_numbers = #tpu.dot_dimension_numbers<[1], [0], [0], [1], [0, 0, 1, 1], [], []>} : vector<256x4xbf16>, vector<4x8xbf16>, vector<256x8xf32> -> vector<256x8xf32>
    %c0_33 = arith.constant 0 : index
    %c0_34 = arith.constant 0 : index
    %71 = vector.load %arg10[%c0_33, %c0_34] : memref<1x8xf32, #tpu.memory_space<vmem>>, vector<1x8xf32>
    %72 = vector.broadcast %71 : vector<1x8xf32> to vector<256x8xf32>
    %73 = arith.addf %70, %72 : vector<256x8xf32>
    %74 = vector.shape_cast %73 : vector<256x8xf32> to vector<16x16x8xf32>
    %75 = vector.shape_cast %74 : vector<16x16x8xf32> to vector<16x1x16x8xf32>
    %76 = vector.shape_cast %75 : vector<16x1x16x8xf32> to vector<16x1x16x8xf32>
    %77 = vector.broadcast %76 : vector<16x1x16x8xf32> to vector<16x2x16x8xf32>
    %78 = vector.shape_cast %77 : vector<16x2x16x8xf32> to vector<32x16x8xf32>
    %c0_35 = arith.constant 0 : index
    %c0_36 = arith.constant 0 : index
    %79 = vector.load %arg8[%c0_35, %c0_36] : memref<1x8xf32, #tpu.memory_space<vmem>>, vector<1x8xf32>
    %80 = vector.shape_cast %79 : vector<1x8xf32> to vector<1x1x8xf32>
    %81 = vector.broadcast %80 : vector<1x1x8xf32> to vector<32x16x8xf32>
    %82 = arith.addf %78, %81 : vector<32x16x8xf32>
    %83 = arith.addf %57, %82 : vector<32x16x8xf32>
    %c0_37 = arith.constant 0 : index
    %c0_38 = arith.constant 0 : index
    %c0_39 = arith.constant 0 : index
    %c0_40 = arith.constant 0 : index
    %c0_41 = arith.constant 0 : index
    %84 = vector.load %arg11[%c0_37, %c0_38, %c0_39, %c0_40, %c0_41] : memref<1x2x32x16x8xf32, #tpu.memory_space<vmem>>, vector<1x1x32x16x8xf32>
    %85 = vector.shape_cast %84 : vector<1x1x32x16x8xf32> to vector<32x16x8xf32>
    %86 = vector.shape_cast %83 : vector<32x16x8xf32> to vector<1x1x32x16x8xf32>
    tpu.vector_store %arg11[%c0_37, %c0_38, %c0_39, %c0_40, %c0_41], %86 {strides = array<i32>} : memref<1x2x32x16x8xf32, #tpu.memory_space<vmem>>, vector<1x1x32x16x8xf32>,
    %87 = arith.addf %65, %82 : vector<32x16x8xf32>
    %c0_42 = arith.constant 0 : index
    %c1 = arith.constant 1 : index
    %c0_43 = arith.constant 0 : index
    %c0_44 = arith.constant 0 : index
    %c0_45 = arith.constant 0 : index
    %88 = vector.load %arg11[%c0_42, %c1, %c0_43, %c0_44, %c0_45] : memref<1x2x32x16x8xf32, #tpu.memory_space<vmem>>, vector<1x1x32x16x8xf32>
    %89 = vector.shape_cast %88 : vector<1x1x32x16x8xf32> to vector<32x16x8xf32>
    %90 = vector.shape_cast %87 : vector<32x16x8xf32> to vector<1x1x32x16x8xf32>
    tpu.vector_store %arg11[%c0_42, %c1, %c0_43, %c0_44, %c0_45], %90 {strides = array<i32>} : memref<1x2x32x16x8xf32, #tpu.memory_space<vmem>>, vector<1x1x32x16x8xf32>,
    return
  }
  func.func @transform_0(%arg0: i32) -> (i32, i32, i32, i32) {
    %c0_i32 = arith.constant 0 : i32
    %c0_i32_0 = arith.constant 0 : i32
    %c0_i32_1 = arith.constant 0 : i32
    %c0_i32_2 = arith.constant 0 : i32
    return %arg0, %c0_i32, %c0_i32_0, %c0_i32_1 : i32, i32, i32, i32
  }
  func.func @transform_1(%arg0: i32) -> (i32, i32, i32, i32) {
    %c0_i32 = arith.constant 0 : i32
    %c0_i32_0 = arith.constant 0 : i32
    %c0_i32_1 = arith.constant 0 : i32
    %c0_i32_2 = arith.constant 0 : i32
    return %arg0, %c0_i32, %c0_i32_0, %c0_i32_1 : i32, i32, i32, i32
  }
  func.func @transform_2(%arg0: i32) -> (i32, i32, i32, i32) {
    %c0_i32 = arith.constant 0 : i32
    %c0_i32_0 = arith.constant 0 : i32
    %c0_i32_1 = arith.constant 0 : i32
    %c0_i32_2 = arith.constant 0 : i32
    return %arg0, %c0_i32, %c0_i32_0, %c0_i32_1 : i32, i32, i32, i32
  }
  func.func @transform_3(%arg0: i32) -> (i32, i32, i32) {
    %c0_i32 = arith.constant 0 : i32
    %c0_i32_0 = arith.constant 0 : i32
    %c0_i32_1 = arith.constant 0 : i32
    return %arg0, %c0_i32, %c0_i32_0 : i32, i32, i32
  }
  func.func @transform_4(%arg0: i32) -> (i32, i32, i32) {
    %c0_i32 = arith.constant 0 : i32
    %c0_i32_0 = arith.constant 0 : i32
    %c0_i32_1 = arith.constant 0 : i32
    return %arg0, %c0_i32, %c0_i32_0 : i32, i32, i32
  }
  func.func @transform_5(%arg0: i32) -> (i32, i32) {
    %c0_i32 = arith.constant 0 : i32
    %c0_i32_0 = arith.constant 0 : i32
    %c0_i32_1 = arith.constant 0 : i32
    return %c0_i32, %c0_i32_0 : i32, i32
  }
  func.func @transform_6(%arg0: i32) -> (i32, i32) {
    %c0_i32 = arith.constant 0 : i32
    %c0_i32_0 = arith.constant 0 : i32
    %c0_i32_1 = arith.constant 0 : i32
    return %c0_i32, %c0_i32_0 : i32, i32
  }
  func.func @transform_7(%arg0: i32) -> (i32, i32) {
    %c0_i32 = arith.constant 0 : i32
    %c0_i32_0 = arith.constant 0 : i32
    %c0_i32_1 = arith.constant 0 : i32
    return %c0_i32, %c0_i32_0 : i32, i32
  }
  func.func @transform_8(%arg0: i32) -> (i32, i32) {
    %c0_i32 = arith.constant 0 : i32
    %c0_i32_0 = arith.constant 0 : i32
    %c0_i32_1 = arith.constant 0 : i32
    return %c0_i32, %c0_i32_0 : i32, i32
  }
  func.func @transform_9(%arg0: i32) -> (i32, i32) {
    %c0_i32 = arith.constant 0 : i32
    %c0_i32_0 = arith.constant 0 : i32
    %c0_i32_1 = arith.constant 0 : i32
    return %c0_i32, %c0_i32_0 : i32, i32
  }
  func.func @transform_10(%arg0: i32) -> (i32, i32, i32, i32, i32) {
    %c0_i32 = arith.constant 0 : i32
    %c0_i32_0 = arith.constant 0 : i32
    %c0_i32_1 = arith.constant 0 : i32
    %c0_i32_2 = arith.constant 0 : i32
    %c0_i32_3 = arith.constant 0 : i32
    return %arg0, %c0_i32, %c0_i32_0, %c0_i32_1, %c0_i32_2 : i32, i32, i32, i32, i32
  }
}

</mosaic_0001>

<bundles_post_ra>
// kernel: gen_block_pallas.2
= control target key start
LH: loop header
LB: loop body
LE: loop exit
PB: predicated region body
PF: predicated region fallthrough
CT: control target
= control target key end

     0   :  { %s4265_s27 = smov 0   ;;  %s7190_s0 = inlined_call_operand.vmem [shape: bf16[2,16,16,4], index: 0, kind: input, shape index: {}]   ;;  %s7191_s1 = inlined_call_operand.vmem [shape: f32[2,1,4], index: 1, kind: input, shape index: {}]   ;;  %s7192_s2 = inlined_call_operand.vmem [shape: f32[2,1,4], index: 2, kind: input, shape index: {}]   ;;  %s7193_s3 = inlined_call_operand.vmem [shape: bf16[8,32], index: 3, kind: input, shape index: {}]   ;;  %s7194_s4 = inlined_call_operand.vmem [shape: bf16[8,32], index: 4, kind: input, shape index: {}]   ;;  %s7195_s5 = inlined_call_operand.vmem [shape: f32[1,8], index: 5, kind: input, shape index: {}]   ;;  %s7196_s6 = inlined_call_operand.vmem [shape: bf16[2,32,16,8], index: 6, kind: output, shape index: {0}]   ;;  %s7197_s7 = inlined_call_operand.vmem [shape: bf16[2,32,16,8], index: 7, kind: output, shape index: {1}]   ;;  %s7198_s8 = inlined_call_operand.vmem [shape: f32[2,2,8], index: 8, kind: output, shape index: {2}]  }
   0x1 LB: > { %s3700_s28 = sadd.s32 4294967295, %s4213_s27   ;;  %p3704_p0 = scmp.ge.s32.totalorder %s4213_s27, 1  ;;  %s4213_s27 = sphi %s4265_s27, %s19_s27  }
   0x2   : > { %p283_p1 = scmp.lt.s32.totalorder %s4213_s27, 3 }
   0x4   : > { %p284_p2 = pnand %p3704_p0, %p283_p1 }
   0x6   : > { %287 = sbr.rel (%p284_p2) target bundleno = 870 (0x366), region = 44 }
   0xb   : > { %p332_p3 = scmp.lt.s32.totalorder %s3700_s28, 1  ;;  %v651_v0 = vld [vmem:[%s7193_s3] sm:$0xf]  ;;  %vm685_vm0 = vcmask 1043456   ;;  %s4215_s21 = smov 4   ;;  %vm596_vm1 = vcmask 31744  }
   0xc   : > { %4189 = vmatprep.subr.msk.bf16.mxu0 %vm685_vm0, %v651_v0  ;;  %v687_v1 = vsel %vm685_vm0, %v651_v0, 0  ;;  %v850_v2 = vld [vmem:[%s7194_s4] sm:$0xf]  ;;  %s4217_s24 = smov 16   ;;  %vm652_vm2 = vcmask 64512   ;;  %s4218_s25 = smov 120  }
   0xd   : > { %s7656_s28 = smov (!%p332_p3, %s3700_s28), 1  ;;  %4122 = vmatpush3.bf16.msra.mxu0 %v687_v1  ;;  %4190 = vmatprep.subr.msk.bf16.mxu1 %vm685_vm0, %v850_v2  ;;  %v854_v6 = vsel %vm685_vm0, %v850_v2, 0  ;;  %vm1274_vm3 = vcmask 1046528   ;;  %vm1049_vm4 = vcmask 1040384   ;;  %vm2983_vm5 = vcmask 60416   ;;  %s4219_s14 = smov 112  }
   0xe   : > { %s3877_s9 = sshll.u32 %s7656_s28, 7  ;;  %s339_s12 = scalar_lea.vmem %s7191_s1, %s7656_s28  ;;  %4156 = vmatpush3.bf16.msra.mxu1 %v854_v6  ;;  %vm2112_vm6 = vcmask 195712   ;;  %vm2654_vm7 = vcmask 58368  }
   0xf   : > { %s4286_s15 = scalar_lea.vmem %s7190_s0, %s3877_s9  ;;  %s342_s18 = scalar_lea.vmem %s7192_s2, %s7656_s28  ;;  %v4296_v4 = vld [vmem:[%s339_s12] ss:$0 sm:$0xff] }
  0x10   : > { %v4009_v3 = vld [vmem:[%s4286_s15] sm:$0xff]   ;;  %v4072_v5 = vld [vmem:[%s4286_s15 + $0x8] sm:$0xff]   ;;  %v4073_v11 = vld [vmem:[%s4286_s15 + $0x10] sm:$0xff]   ;;  %s3878_s26 = sshll.u32 %s7656_s28, 8  ;;  %s3711_s20 = sshll.u32 %s7656_s28, 1 }
  0x11   : > { %v4010_v7 = vunpack.c.l.bf16 %v4009_v3  ;;  %v4011_v8 = vunpack.c.h.bf16 %v4009_v3  ;;  %v4014_v9 = vunpack.c.l.bf16 %v4072_v5  ;;  %v4015_v10 = vunpack.c.h.bf16 %v4072_v5  ;;  %v4074_v12 = vld [vmem:[%s4286_s15 + $0x18] sm:$0xff]   ;;  %v4301_v13 = vld [vmem:[%s342_s18] ss:$0 sm:$0xff]  ;;  %v4076_v39 = vld [vmem:[%s4286_s15 + $0x28] sm:$0xff]   ;;  %s5111_s9 = scalar_lea.vmem %s7196_s6, %s3878_s26  ;;  %s6989_s19 = scalar_lea.vmem %s7197_s7, %s3878_s26 }
  0x12   : > { %v4018_v14 = vunpack.c.l.bf16 %v4073_v11  ;;  %v4019_v15 = vunpack.c.h.bf16 %v4073_v11  ;;  %v4022_v16 = vunpack.c.l.bf16 %v4074_v12  ;;  %v4023_v17 = vunpack.c.h.bf16 %v4074_v12  ;;  %v4075_v34 = vld [vmem:[%s4286_s15 + $0x20] sm:$0xff]   ;;  %v4077_v44 = vld [vmem:[%s4286_s15 + $0x30] sm:$0xff]   ;;  %v4078_v49 = vld [vmem:[%s4286_s15 + $0x38] sm:$0xff]   ;;  %s356_s23 = scalar_lea.vmem %s7198_s8, %s3711_s20 }
  0x13   : > { %v429_v18 = vmul.f32 %v4010_v7, %v4296_v4  ;;  %v430_v19 = vmul.f32 %v4011_v8, %v4296_v4  ;;  %v431_v20 = vmul.f32 %v4014_v9, %v4296_v4  ;;  %v432_v21 = vmul.f32 %v4015_v10, %v4296_v4  ;;  %v4079_v7 = vld [vmem:[%s4286_s15 + $0x40] sm:$0xff]  }
  0x14   : > { %v433_v22 = vmul.f32 %v4018_v14, %v4296_v4  ;;  %v434_v23 = vmul.f32 %v4019_v15, %v4296_v4  ;;  %v435_v24 = vmul.f32 %v4022_v16, %v4296_v4  ;;  %v436_v25 = vmul.f32 %v4023_v17, %v4296_v4  ;;  %v4080_v17 = vld [vmem:[%s4286_s15 + $0x48] sm:$0xff]  }
  0x15   : > { %v468_v26 = vadd.f32 %v4301_v13, %v429_v18  ;;  %v469_v27 = vadd.f32 %v4301_v13, %v430_v19  ;;  %v470_v28 = vadd.f32 %v4301_v13, %v431_v20  ;;  %v471_v29 = vadd.f32 %v4301_v13, %v432_v21 }
  0x16   : > { %v472_v30 = vadd.f32 %v4301_v13, %v433_v22  ;;  %v473_v31 = vadd.f32 %v4301_v13, %v434_v23  ;;  %v474_v32 = vadd.f32 %v4301_v13, %v435_v24  ;;  %v475_v33 = vadd.f32 %v4301_v13, %v436_v25  ;;  %v4081_v22 = vld [vmem:[%s4286_s15 + $0x50] sm:$0xff]  }
  0x17   : > { %v500_v35 = vmax.f32 %v468_v26, 0.0  ;;  %v501_v36 = vmax.f32 %v469_v27, 0.0  ;;  %v502_v37 = vmax.f32 %v470_v28, 0.0  ;;  %v503_v38 = vmax.f32 %v471_v29, 0.0  ;;  %v4082_v27 = vld [vmem:[%s4286_s15 + $0x58] sm:$0xff]  }
  0x18   : > { %v504_v40 = vmax.f32 %v472_v30, 0.0  ;;  %v505_v41 = vmax.f32 %v473_v31, 0.0  ;;  %v506_v42 = vmax.f32 %v474_v32, 0.0  ;;  %v507_v43 = vmax.f32 %v475_v33, 0.0 }
  0x19   : > { %v4322_v45 = vpack.c.bf16 %v501_v36, %v500_v35  ;;  %v4324_v46 = vpack.c.bf16 %v503_v38, %v502_v37  ;;  %v4026_v47 = vunpack.c.l.bf16 %v4075_v34  ;;  %v4027_v48 = vunpack.c.h.bf16 %v4075_v34 }
  0x1a   : > { %v4327_v50 = vpack.c.bf16 %v505_v41, %v504_v40  ;;  %v4329_v51 = vpack.c.bf16 %v507_v43, %v506_v42  ;;  %v4030_v52 = vunpack.c.l.bf16 %v4076_v39  ;;  %v4031_v53 = vunpack.c.h.bf16 %v4076_v39 }
  0x1b   : > { %564 = vrot.lane.b32.xlu0 %v4322_v45, %s4215_s21  ;;  %v437_v54 = vmul.f32 %v4026_v47, %v4296_v4  ;;  %v438_v55 = vmul.f32 %v4027_v48, %v4296_v4  ;;  %v4034_v56 = vunpack.c.l.bf16 %v4077_v44  ;;  %v4035_v57 = vunpack.c.h.bf16 %v4077_v44  ;;  %v4083_v44 = vld [vmem:[%s4286_s15 + $0x60] sm:$0xff]  }
  0x1c   : > { %568 = vrot.lane.b32.xlu1 %v4327_v50, %s4215_s21  ;;  %v439_v58 = vmul.f32 %v4030_v52, %v4296_v4  ;;  %v440_v59 = vmul.f32 %v4031_v53, %v4296_v4  ;;  %v4038_v60 = vunpack.c.l.bf16 %v4078_v49  ;;  %v4039_v61 = vunpack.c.h.bf16 %v4078_v49 }
  0x1d   : > { %v476_v62 = vadd.f32 %v4301_v13, %v437_v54  ;;  %v477_v63 = vadd.f32 %v4301_v13, %v438_v55  ;;  %v441_v0 = vmul.f32 %v4034_v56, %v4296_v4  ;;  %v442_v1 = vmul.f32 %v4035_v57, %v4296_v4 }
  0x1e   : > { %v478_v2 = vadd.f32 %v4301_v13, %v439_v58  ;;  %v479_v3 = vadd.f32 %v4301_v13, %v440_v59  ;;  %v443_v5 = vmul.f32 %v4038_v60, %v4296_v4  ;;  %v444_v6 = vmul.f32 %v4039_v61, %v4296_v4  ;;  %v4084_v61 = vld [vmem:[%s4286_s15 + $0x68] sm:$0xff]  }
  0x1f   : > { %566 = vrot.lane.b32.xlu0 %v4324_v46, %s4215_s21  ;;  %v508_v8 = vmax.f32 %v476_v62, 0.0  ;;  %v509_v9 = vmax.f32 %v477_v63, 0.0  ;;  %v480_v10 = vadd.f32 %v4301_v13, %v441_v0  ;;  %v481_v11 = vadd.f32 %v4301_v13, %v442_v1 }
  0x20   : > { %570 = vrot.lane.b32.xlu1 %v4329_v51, %s4215_s21  ;;  %v510_v12 = vmax.f32 %v478_v2, 0.0  ;;  %v511_v14 = vmax.f32 %v479_v3, 0.0  ;;  %v482_v15 = vadd.f32 %v4301_v13, %v443_v5  ;;  %v483_v16 = vadd.f32 %v4301_v13, %v444_v6  ;;  %v4085_v2 = vld [vmem:[%s4286_s15 + $0x70] sm:$0xff]  }
  0x21   : > { %v4357_v18 = vpack.c.bf16 %v509_v9, %v508_v8  ;;  %v512_v19 = vmax.f32 %v480_v10, 0.0  ;;  %v513_v20 = vmax.f32 %v481_v11, 0.0  ;;  %v4042_v21 = vunpack.c.l.bf16 %v4079_v7 }
  0x22   : > { %v4360_v23 = vpack.c.bf16 %v511_v14, %v510_v12  ;;  %v514_v24 = vmax.f32 %v482_v15, 0.0  ;;  %v515_v25 = vmax.f32 %v483_v16, 0.0  ;;  %v4043_v26 = vunpack.c.h.bf16 %v4079_v7  ;;  %v4086_v12 = vld [vmem:[%s4286_s15 + $0x78] sm:$0xff]  }
  0x23   : > { %572 = vrot.lane.b32.xlu0 %v4357_v18, %s4215_s21  ;;  %v4365_v28 = vpack.c.bf16 %v513_v20, %v512_v19  ;;  %v445_v29 = vmul.f32 %v4042_v21, %v4296_v4  ;;  %v4046_v30 = vunpack.c.l.bf16 %v4080_v17  ;;  %v4047_v31 = vunpack.c.h.bf16 %v4080_v17 }
  0x24   : > { %574 = vrot.lane.b32.xlu1 %v4360_v23, %s4215_s21  ;;  %v4370_v32 = vpack.c.bf16 %v515_v25, %v514_v24  ;;  %v446_v33 = vmul.f32 %v4043_v26, %v4296_v4  ;;  %v4050_v34 = vunpack.c.l.bf16 %v4081_v22  ;;  %v4051_v35 = vunpack.c.h.bf16 %v4081_v22 }
  0x25   : > { %v484_v36 = vadd.f32 %v4301_v13, %v445_v29  ;;  %v447_v37 = vmul.f32 %v4046_v30, %v4296_v4  ;;  %v448_v38 = vmul.f32 %v4047_v31, %v4296_v4  ;;  %v4054_v39 = vunpack.c.l.bf16 %v4082_v27 }
  0x26   : > { %v485_v40 = vadd.f32 %v4301_v13, %v446_v33  ;;  %v449_v41 = vmul.f32 %v4050_v34, %v4296_v4  ;;  %v450_v42 = vmul.f32 %v4051_v35, %v4296_v4  ;;  %v4055_v43 = vunpack.c.h.bf16 %v4082_v27 }
  0x27   : > { %576 = vrot.lane.b32.xlu0 %v4365_v28, %s4215_s21  ;;  %v516_v47 = vmax.f32 %v484_v36, 0.0  ;;  %v486_v48 = vadd.f32 %v4301_v13, %v447_v37  ;;  %v487_v49 = vadd.f32 %v4301_v13, %v448_v38  ;;  %v451_v52 = vmul.f32 %v4054_v39, %v4296_v4 }
  0x28   : > { %578 = vrot.lane.b32.xlu1 %v4370_v32, %s4215_s21  ;;  %v517_v53 = vmax.f32 %v485_v40, 0.0  ;;  %v488_v54 = vadd.f32 %v4301_v13, %v449_v41  ;;  %v489_v55 = vadd.f32 %v4301_v13, %v450_v42  ;;  %v452_v56 = vmul.f32 %v4055_v43, %v4296_v4 }
  0x29   : > { %v518_v57 = vmax.f32 %v486_v48, 0.0  ;;  %v519_v58 = vmax.f32 %v487_v49, 0.0  ;;  %v490_v59 = vadd.f32 %v4301_v13, %v451_v52  ;;  %v4058_v60 = vunpack.c.l.bf16 %v4083_v44 }
  0x2a   : > { %v4392_v62 = vpack.c.bf16 %v517_v53, %v516_v47  ;;  %v520_v63 = vmax.f32 %v488_v54, 0.0  ;;  %v521_v0 = vmax.f32 %v489_v55, 0.0  ;;  %v491_v1 = vadd.f32 %v4301_v13, %v452_v56 }
  0x2b   : > { %v4396_v3 = vpack.c.bf16 %v519_v58, %v518_v57  ;;  %v522_v5 = vmax.f32 %v490_v59, 0.0  ;;  %v4059_v6 = vunpack.c.h.bf16 %v4083_v44  ;;  %v453_v7 = vmul.f32 %v4058_v60, %v4296_v4 }
  0x2c   : > { %580 = vrot.lane.b32.xlu0 %v4392_v62, %s4215_s21  ;;  %v4401_v8 = vpack.c.bf16 %v521_v0, %v520_v63  ;;  %v523_v9 = vmax.f32 %v491_v1, 0.0  ;;  %v4062_v10 = vunpack.c.l.bf16 %v4084_v61  ;;  %v4063_v11 = vunpack.c.h.bf16 %v4084_v61 }
  0x2d   : > { %582 = vrot.lane.b32.xlu1 %v4396_v3, %s4215_s21  ;;  %v454_v14 = vmul.f32 %v4059_v6, %v4296_v4  ;;  %v492_v15 = vadd.f32 %v4301_v13, %v453_v7  ;;  %v4066_v16 = vunpack.c.l.bf16 %v4085_v2  ;;  %v4067_v17 = vunpack.c.h.bf16 %v4085_v2 }
  0x2e   : > { %v4408_v19 = vpack.c.bf16 %v523_v9, %v522_v5  ;;  %v455_v20 = vmul.f32 %v4062_v10, %v4296_v4  ;;  %v456_v21 = vmul.f32 %v4063_v11, %v4296_v4  ;;  %v4070_v22 = vunpack.c.l.bf16 %v4086_v12 }
  0x2f   : > { %v493_v24 = vadd.f32 %v4301_v13, %v454_v14  ;;  %v524_v25 = vmax.f32 %v492_v15, 0.0  ;;  %v457_v26 = vmul.f32 %v4066_v16, %v4296_v4  ;;  %v458_v27 = vmul.f32 %v4067_v17, %v4296_v4 }
  0x30   : > { %584 = vrot.lane.b32.xlu0 %v4401_v8, %s4215_s21  ;;  %v494_v29 = vadd.f32 %v4301_v13, %v455_v20  ;;  %v495_v30 = vadd.f32 %v4301_v13, %v456_v21  ;;  %v4071_v31 = vunpack.c.h.bf16 %v4086_v12  ;;  %v459_v33 = vmul.f32 %v4070_v22, %v4296_v4 }
  0x31   : > { %586 = vrot.lane.b32.xlu1 %v4408_v19, %s4215_s21  ;;  %v525_v34 = vmax.f32 %v493_v24, 0.0  ;;  %v496_v35 = vadd.f32 %v4301_v13, %v457_v26  ;;  %v497_v36 = vadd.f32 %v4301_v13, %v458_v27  ;;  %v4216_v53 = vmov 0  }
  0x32   : > { %v526_v37 = vmax.f32 %v494_v29, 0.0  ;;  %v527_v38 = vmax.f32 %v495_v30, 0.0  ;;  %v460_v39 = vmul.f32 %v4071_v31, %v4296_v4  ;;  %v498_v40 = vadd.f32 %v4301_v13, %v459_v33 }
  0x33   : > { %v4426_v41 = vpack.c.bf16 %v525_v34, %v524_v25  ;;  %v528_v42 = vmax.f32 %v496_v35, 0.0  ;;  %v529_v43 = vmax.f32 %v497_v36, 0.0 }
  0x34   : > { %v4428_v44 = vpack.c.bf16 %v527_v38, %v526_v37  ;;  %v499_v47 = vadd.f32 %v4301_v13, %v460_v39  ;;  %v530_v48 = vmax.f32 %v498_v40, 0.0  ;;  %v4447_v13 = vld [vmem:[%s7195_s5] ss:$0 sm:$0xff] }
  0x35   : > { %588 = vrot.lane.b32.xlu0 %v4426_v41, %s4215_s21  ;;  %v4433_v49 = vpack.c.bf16 %v529_v43, %v528_v42 }
  0x36   : > { %590 = vrot.lane.b32.xlu1 %v4428_v44, %s4215_s21  ;;  %v531_v4 = vmax.f32 %v499_v47, 0.0 }
  0x38   : > { %v4437_v52 = vpack.c.bf16 %v531_v4, %v530_v48 }
  0x39   : > { %592 = vrot.lane.b32.xlu0 %v4433_v49, %s4215_s21 }
  0x3a   : > { %594 = vrot.lane.b32.xlu1 %v4437_v52, %s4215_s21 }
  0x3d   : > { %646 = vrot.lane.b32.xlu0 %v4216_v53, %s4215_s21 }
  0x3e   : > { %3048 = vrot.lane.b32.xlu1 %v4447_v13, %s4217_s24 }
  0x8d   : > { %v565_v54 = vpop.permute.xlu0 %564 }
  0x8e   : > { %v599_v55 = vsel %vm596_vm1, 0, %v565_v54  ;;  %v569_v56 = vpop.permute.xlu1 %568 }
  0x8f   : > { %4123 = vmatprep.mubr.msk.bf16.mxu0 %vm652_vm2, %v599_v55  ;;  %v605_v58 = vsel %vm596_vm1, %v4324_v46, %v569_v56 }
  0x91   : > { %v567_v57 = vpop.permute.xlu0 %566 }
  0x92   : > { %v602_v59 = vsel %vm596_vm1, %v4322_v45, %v567_v57  ;;  %v571_v60 = vpop.permute.xlu1 %570 }
  0x93   : > { %4124 = vmatmul.mubr.msk.bf16.vlgmr.msra.gmra.mxu0 %vm652_vm2, %v602_v59  ;;  %4157 = vmatprep.mubr.msk.bf16.mxu1 %vm652_vm2, %v602_v59  ;;  %v608_v61 = vsel %vm596_vm1, %v4327_v50, %v571_v60 }
  0x94   : > { %4158 = vmatmul.mubr.msk.bf16.vlgmr.msra.gmra.mxu1 %vm652_vm2, %v605_v58  ;;  %4127 = vmatprep.mubr.msk.bf16.mxu0 %vm652_vm2, %v605_v58 }
  0x95   : > { %4161 = vmatprep.mubr.msk.bf16.mxu1 %vm652_vm2, %v608_v61  ;;  %v573_v63 = vpop.permute.xlu0 %572 }
  0x96   : > { %v611_v46 = vsel %vm596_vm1, %v4329_v51, %v573_v63  ;;  %v575_v0 = vpop.permute.xlu1 %574 }
  0x97   : > { %v614_v45 = vsel %vm596_vm1, %v4357_v18, %v575_v0 }
  0x99   : > { %v577_v1 = vpop.permute.xlu0 %576 }
  0x9a   : > { %v617_v50 = vsel %vm596_vm1, %v4360_v23, %v577_v1  ;;  %v579_v2 = vpop.permute.xlu1 %578 }
  0x9b   : > { %4128 = vmatmul.mubr.msk.bf16.gmra.mxu0 %vm652_vm2, %v608_v61  ;;  %v620_v51 = vsel %vm596_vm1, %v4365_v28, %v579_v2 }
  0x9c   : > { %4162 = vmatmul.mubr.msk.bf16.gmra.mxu1 %vm652_vm2, %v611_v46  ;;  %4131 = vmatprep.mubr.msk.bf16.mxu0 %vm652_vm2, %v611_v46 }
  0x9d   : > { %4165 = vmatprep.mubr.msk.bf16.mxu1 %vm652_vm2, %v614_v45 }
  0x9e   : > { %v581_v5 = vpop.permute.xlu0 %580 }
  0x9f   : > { %v623_v18 = vsel %vm596_vm1, %v4370_v32, %v581_v5  ;;  %v583_v6 = vpop.permute.xlu1 %582 }
  0xa0   : > { %v626_v23 = vsel %vm596_vm1, %v4392_v62, %v583_v6 }
  0xa2   : > { %v585_v7 = vpop.permute.xlu0 %584 }
  0xa3   : > { %4132 = vmatmul.mubr.msk.bf16.gmra.mxu0 %vm652_vm2, %v614_v45  ;;  %v629_v28 = vsel %vm596_vm1, %v4396_v3, %v585_v7  ;;  %v587_v9 = vpop.permute.xlu1 %586 }
  0xa4   : > { %4166 = vmatmul.mubr.msk.bf16.gmra.mxu1 %vm652_vm2, %v617_v50  ;;  %4135 = vmatprep.mubr.msk.bf16.mxu0 %vm652_vm2, %v617_v50  ;;  %v632_v32 = vsel %vm596_vm1, %v4401_v8, %v587_v9 }
  0xa5   : > { %4169 = vmatprep.mubr.msk.bf16.mxu1 %vm652_vm2, %v620_v51 }
  0xa7   : > { %v589_v10 = vpop.permute.xlu0 %588 }
  0xa8   : > { %v635_v62 = vsel %vm596_vm1, %v4408_v19, %v589_v10  ;;  %v591_v11 = vpop.permute.xlu1 %590 }
  0xa9   : > { %v638_v3 = vsel %vm596_vm1, %v4426_v41, %v591_v11 }
  0xab   : > { %4136 = vmatmul.mubr.msk.bf16.gmra.mxu0 %vm652_vm2, %v620_v51  ;;  %v593_v12 = vpop.permute.xlu0 %592 }
  0xac   : > { %4170 = vmatmul.mubr.msk.bf16.gmra.mxu1 %vm652_vm2, %v623_v18  ;;  %4139 = vmatprep.mubr.msk.bf16.mxu0 %vm652_vm2, %v623_v18  ;;  %v641_v8 = vsel %vm596_vm1, %v4428_v44, %v593_v12  ;;  %v595_v14 = vpop.permute.xlu1 %594 }
  0xad   : > { %4173 = vmatprep.mubr.msk.bf16.mxu1 %vm652_vm2, %v626_v23  ;;  %v644_v15 = vsel %vm596_vm1, %v4433_v49, %v595_v14 }
  0xaf   : > { %v647_v16 = vpop.permute.xlu0 %646 }
  0xb0   : > { %v650_v17 = vsel %vm596_vm1, %v4437_v52, %v647_v16 }
  0xb3   : > { %4140 = vmatmul.mubr.msk.bf16.gmra.mxu0 %vm652_vm2, %v626_v23 }
  0xb4   : > { %4174 = vmatmul.mubr.msk.bf16.gmra.mxu1 %vm652_vm2, %v629_v28  ;;  %4143 = vmatprep.mubr.msk.bf16.mxu0 %vm652_vm2, %v629_v28 }
  0xb5   : > { %4177 = vmatprep.mubr.msk.bf16.mxu1 %vm652_vm2, %v632_v32 }
  0xbb   : > { %4144 = vmatmul.mubr.msk.bf16.gmra.mxu0 %vm652_vm2, %v632_v32 }
  0xbc   : > { %4178 = vmatmul.mubr.msk.bf16.gmra.mxu1 %vm652_vm2, %v635_v62  ;;  %4147 = vmatprep.mubr.msk.bf16.mxu0 %vm652_vm2, %v635_v62 }
  0xbd   : > { %4181 = vmatprep.mubr.msk.bf16.mxu1 %vm652_vm2, %v638_v3 }
  0xc3   : > { %4148 = vmatmul.mubr.msk.bf16.gmra.mxu0 %vm652_vm2, %v638_v3 }
  0xc4   : > { %4182 = vmatmul.mubr.msk.bf16.gmra.mxu1 %vm652_vm2, %v641_v8  ;;  %4151 = vmatprep.mubr.msk.bf16.mxu0 %vm652_vm2, %v641_v8 }
  0xc5   : > { %4185 = vmatprep.mubr.msk.bf16.mxu1 %vm652_vm2, %v644_v15 }
  0xcb   : > { %4152 = vmatmul.mubr.msk.bf16.gmra.mxu0 %vm652_vm2, %v644_v15 }
  0xcc   : > { %4186 = vmatmul.mubr.msk.bf16.gmra.mxu1 %vm652_vm2, %v650_v17 }
 0x153   : > { %v4515_v19 = vpop.f32.mrf.mxu0 }
 0x154   : > { %v4517_v20 = vpop.f32.mrf.mxu1  ;;  %1150 = vrot.lane.b32.xlu1 %v4515_v19, %s4218_s25  ;;  %v1278_v29 = vrot.slane %v4515_v19, 1 }
 0x155   : > { %7299 = vst [vmem:[#allocation2_spill] sm:$0xff] %v4517_v20  ;;  %v4521_v21 = vpop.f32.mrf.mxu0  ;;  %v1758_v30 = vrot.slane %v4517_v20, 1 }
 0x156   : > { %7300 = vst [vmem:[#allocation3_spill] sm:$0xff] %v4521_v21  ;;  %v4523_v22 = vpop.f32.mrf.mxu1  ;;  %v1275_v43 = vrot.slane %v4521_v21, 1 }
 0x157   : > { %7301 = vst [vmem:[#allocation4_spill] sm:$0xff] %v4523_v22  ;;  %v4525_v24 = vpop.f32.mrf.mxu0  ;;  %v1755_v4 = vrot.slane %v4523_v22, 1 }
 0x158   : > { %7302 = vst [vmem:[#allocation5_spill] sm:$0xff] %v4525_v24  ;;  %1631 = vrot.lane.b32.xlu1 %v4517_v20, %s4218_s25  ;;  %1152 = vrot.lane.b32.xlu0 %v4525_v24, %s4218_s25  ;;  %v4531_v25 = vpop.f32.mrf.mxu1  ;;  %v1279_v26 = vrot.slane %v4525_v24, 1 }
 0x159   : > { %7303 = vst [vmem:[#allocation6_spill] sm:$0xff] %v4531_v25  ;;  %v4538_v27 = vpop.f32.mrf.mxu0  ;;  %v1759_v31 = vrot.slane %v4531_v25, 1 }
 0x15a   : > { %7304 = vst [vmem:[#allocation7_spill] sm:$0xff] %v4538_v27  ;;  %v4547_v33 = vpop.f32.mrf.mxu1  ;;  %v1280_v34 = vsel %vm1274_vm3, %v1278_v29, %v1279_v26  ;;  %v1340_v36 = vsel %vm1274_vm3, %v1279_v26, 0.0  ;;  %v1276_v39 = vrot.slane %v4538_v27, 1 }
 0x15b   : > { %7305 = vst [vmem:[#allocation8_spill] sm:$0xff] %v4547_v33  ;;  %v1760_v35 = vsel %vm1274_vm3, %v1758_v30, %v1759_v31  ;;  %v4557_v37 = vpop.f32.mrf.mxu0  ;;  %v1820_v38 = vsel %vm1274_vm3, %v1759_v31, 0.0  ;;  %v1756_v42 = vrot.slane %v4547_v33, 1  ;;  %v1053_v31 = vrot.slane %v4515_v19, 7 }
 0x15c   : > { %1146 = vrot.lane.b32.xlu1 %v4521_v21, %s4218_s25  ;;  %1633 = vrot.lane.b32.xlu0 %v4531_v25, %s4218_s25  ;;  %7306 = vst [vmem:[#allocation9_spill] sm:$0xff] %v4557_v37  ;;  %v4564_v40 = vpop.f32.mrf.mxu1  ;;  %v1339_v41 = vsel %vm1274_vm3, %v1276_v39, 0.0  ;;  %v1277_v49 = vsel %vm1274_vm3, %v1275_v43, %v1276_v39  ;;  %v1284_v59 = vrot.slane %v4557_v37, 1  ;;  %v1054_v39 = vrot.slane %v4525_v24, 7 }
 0x15d   : > { %7307 = vst [vmem:[#allocation10_spill] sm:$0xff] %v4564_v40  ;;  %v4572_v44 = vpop.f32.mrf.mxu0  ;;  %v1819_v48 = vsel %vm1274_vm3, %v1756_v42, 0.0  ;;  %v1757_v54 = vsel %vm1274_vm3, %v1755_v4, %v1756_v42  ;;  %v1764_v46 = vrot.slane %v4564_v40, 1  ;;  %v1051_v43 = vrot.slane %v4538_v27, 7 }
 0x15e   : > { %7308 = vst [vmem:[#allocation11_spill] sm:$0xff] %v4572_v44  ;;  %v4574_v47 = vpop.f32.mrf.mxu1  ;;  %v1281_v32 = vrot.slane %v4572_v44, 1  ;;  %v1059_v4 = vrot.slane %v4557_v37, 7 }
 0x15f   : > { %7309 = vst [vmem:[#allocation12_spill] sm:$0xff] %v4574_v47  ;;  %v4581_v52 = vpop.f32.mrf.mxu0  ;;  %v1761_v12 = vrot.slane %v4574_v47, 1 }
 0x160   : > { %1627 = vrot.lane.b32.xlu1 %v4523_v22, %s4218_s25  ;;  %1148 = vrot.lane.b32.xlu0 %v4538_v27, %s4218_s25  ;;  %7310 = vst [vmem:[#allocation13_spill] sm:$0xff] %v4581_v52  ;;  %v4583_v53 = vpop.f32.mrf.mxu1  ;;  %v1285_v60 = vrot.slane %v4581_v52, 1 }
 0x161   : > { %7311 = vst [vmem:[#allocation14_spill] sm:$0xff] %v4583_v53  ;;  %v4589_v55 = vpop.f32.mrf.mxu0  ;;  %v1765_v0 = vrot.slane %v4583_v53, 1 }
 0x162   : > { %7312 = vst [vmem:[#allocation15_spill] sm:$0xff] %v4589_v55  ;;  %v4591_v56 = vpop.f32.mrf.mxu1  ;;  %v1286_v45 = vsel %vm1274_vm3, %v1284_v59, %v1285_v60  ;;  %v1342_v51 = vsel %vm1274_vm3, %v1285_v60, 0.0  ;;  %v1282_v7 = vrot.slane %v4589_v55, 1 }
 0x163   : > { %7313 = vst [vmem:[#allocation16_spill] sm:$0xff] %v4591_v56  ;;  %v4593_v57 = vpop.f32.mrf.mxu0  ;;  %v1766_v2 = vsel %vm1274_vm3, %v1764_v46, %v1765_v0  ;;  %v1822_v23 = vsel %vm1274_vm3, %v1765_v0, 0.0  ;;  %v1762_v62 = vrot.slane %v4591_v56, 1  ;;  %v1540_v0 = vrot.slane %v4564_v40, 7 }
 0x164   : > { %1375 = vrot.lane.b32.xlu1 %v1280_v34, %s4218_s25  ;;  %1629 = vrot.lane.b32.xlu0 %v4547_v33, %s4218_s25  ;;  %7314 = vst [vmem:[#allocation17_spill] sm:$0xff] %v4593_v57  ;;  %v4599_v58 = vpop.f32.mrf.mxu1  ;;  %v1341_v10 = vsel %vm1274_vm3, %v1282_v7, 0.0  ;;  %v1283_v14 = vsel %vm1274_vm3, %v1281_v32, %v1282_v7  ;;  %v1541_v7 = vrot.slane %v4583_v53, 7  ;;  %v4711_v32 = vsel %vm1049_vm4, %v1053_v31, %v1054_v39 }
 0x165   : > { %7315 = vst [vmem:[#allocation18_spill] sm:$0xff] %v4599_v58  ;;  %v4603_v61 = vpop.f32.mrf.mxu0  ;;  %v1821_v8 = vsel %vm1274_vm3, %v1762_v62, 0.0  ;;  %v1763_v17 = vsel %vm1274_vm3, %v1761_v12, %v1762_v62  ;;  %v1537_v12 = vrot.slane %v4574_v47, 7 }
 0x166   : > { %7316 = vst [vmem:[#allocation19_spill] sm:$0xff] %v4603_v61  ;;  %v4609_v63 = vpop.f32.mrf.mxu1 }
 0x167   : > { %7317 = vst [vmem:[#allocation20_spill] sm:$0xff] %v4609_v63  ;;  %v4614_v1 = vpop.f32.mrf.mxu0 }
 0x168   : > { %1855 = vrot.lane.b32.xlu1 %v1760_v35, %s4218_s25  ;;  %1377 = vrot.lane.b32.xlu0 %v1340_v36, %s4218_s25  ;;  %7318 = vst [vmem:[#allocation21_spill] sm:$0xff] %v4614_v1  ;;  %v4619_v50 = vpop.f32.mrf.mxu1  ;;  %v1534_v35 = vrot.slane %v4517_v20, 7  ;;  %v1050_v36 = vrot.slane %v4521_v21, 7  ;;  %v1291_v59 = vrot.slane %v4614_v1, 1 }
 0x169   : > { %7319 = vst [vmem:[#allocation22_spill] sm:$0xff] %v4619_v50  ;;  %v4623_v5 = vpop.f32.mrf.mxu0 }
 0x16a   : > { %7320 = vst [vmem:[#allocation23_spill] sm:$0xff] %v4623_v5  ;;  %v4627_v18 = vpop.f32.mrf.mxu1  ;;  %v4692_v60 = vsel %vm1049_vm4, 0.0, %v1534_v35 }
 0x16b   : > { %7321 = vst [vmem:[#allocation24_spill] sm:$0xff] %v4627_v18  ;;  %v4629_v6 = vpop.f32.mrf.mxu0 }
 0x16c   : > { %1857 = vrot.lane.b32.xlu0 %v1820_v38, %s4218_s25  ;;  %1158 = vrot.lane.b32.xlu1 %v4557_v37, %s4218_s25  ;;  %7322 = vst [vmem:[#allocation25_spill] sm:$0xff] %v4629_v6  ;;  %v4633_v28 = vpop.f32.mrf.mxu1  ;;  %v1531_v38 = vrot.slane %v4523_v22, 7 }
 0x16d   : > { %7323 = vst [vmem:[#allocation26_spill] sm:$0xff] %v4633_v28  ;;  %v4638_v9 = vpop.f32.mrf.mxu0 }
 0x16e   : > { %7324 = vst [vmem:[#allocation27_spill] sm:$0xff] %v4638_v9  ;;  %v4643_v11 = vpop.f32.mrf.mxu1 }
 0x16f   : > { %7325 = vst [vmem:[#allocation28_spill] sm:$0xff] %v4643_v11  ;;  %v4648_v3 = vpop.f32.mrf.mxu0 }
 0x170   : > { %1373 = vrot.lane.b32.xlu0 %v1339_v41, %s4218_s25  ;;  %1639 = vrot.lane.b32.xlu1 %v4564_v40, %s4218_s25  ;;  %7326 = vst [vmem:[#allocation29_spill] sm:$0xff] %v4648_v3  ;;  %v4653_v15 = vpop.f32.mrf.mxu1  ;;  %v1535_v41 = vrot.slane %v4531_v25, 7 }
 0x171   : > { %7327 = vst [vmem:[#allocation30_spill] sm:$0xff] %v4653_v15  ;;  %v4657_v16 = vpop.f32.mrf.mxu0 }
 0x172   : > { %7328 = vst [vmem:[#allocation31_spill] sm:$0xff] %v4657_v16  ;;  %v4660_v26 = vpop.f32.mrf.mxu1 }
 0x173   : > { %7329 = vst [vmem:[#allocation32_spill] sm:$0xff] %v4660_v26  ;;  %v4662_v29 = vpop.f32.mrf.mxu0 }
 0x174   : > { %1853 = vrot.lane.b32.xlu0 %v1819_v48, %s4218_s25  ;;  %1371 = vrot.lane.b32.xlu1 %v1277_v49, %s4218_s25  ;;  %7330 = vst [vmem:[#allocation33_spill] sm:$0xff] %v4662_v29  ;;  %v4667_v30 = vpop.f32.mrf.mxu1  ;;  %v1532_v48 = vrot.slane %v4547_v33, 7  ;;  %v4686_v49 = vsel %vm1049_vm4, 0.0, %v1053_v31  ;;  %v1770_v31 = vrot.slane %v4599_v58, 1  ;;  %v1553_v33 = vrot.slane %v4653_v15, 7 }
 0x175   : > { %7331 = vst [vmem:[#allocation34_spill] sm:$0xff] %v4667_v30  ;;  %v4670_v34 = vpop.f32.mrf.mxu0 }
 0x176   : > { %7332 = vst [vmem:[#allocation35_spill] sm:$0xff] %v4670_v34  ;;  %v4681_v42 = vpop.f32.mrf.mxu1 }
 0x177   : > { %7333 = vst [vmem:[#allocation36_spill] sm:$0xff] %v4681_v42  ;;  %v4694_v46 = vpop.f32.mrf.mxu0  ;;  %v1779_v25 = vrot.slane %v4681_v42, 1 }
 0x178   : > { %1160 = vrot.lane.b32.xlu0 %v4581_v52, %s4218_s25  ;;  %1851 = vrot.lane.b32.xlu1 %v1757_v54, %s4218_s25  ;;  %v1290_v54 = vrot.slane %v4593_v57, 1  ;;  %7334 = vst [vmem:[#allocation37_spill] sm:$0xff] %v4694_v46  ;;  %v4716_v62 = vpop.f32.mrf.mxu1 }
 0x179   : > { %7335 = vst [vmem:[#allocation38_spill] sm:$0xff] %v4716_v62 }
 0x17a   : > { %v1292_v39 = vsel %vm1274_vm3, %v1290_v54, %v1291_v59  ;;  %v1287_v54 = vrot.slane %v4603_v61, 1 }
 0x17c   : > { %1154 = vrot.lane.b32.xlu1 %v4572_v44, %s4218_s25  ;;  %1641 = vrot.lane.b32.xlu0 %v4583_v53, %s4218_s25 }
 0x180   : > { %1635 = vrot.lane.b32.xlu1 %v4574_v47, %s4218_s25  ;;  %1156 = vrot.lane.b32.xlu0 %v4589_v55, %s4218_s25  ;;  %v4735_v47 = vsel %vm1049_vm4, 0.0, %v1540_v0 }
 0x181   : > { %7338 = vst [vmem:[#allocation41_spill] sm:$0xff] %v4735_v47 }
 0x184   : > { %1383 = vrot.lane.b32.xlu1 %v1286_v45, %s4218_s25  ;;  %1637 = vrot.lane.b32.xlu0 %v4591_v56, %s4218_s25  ;;  %v1060_v45 = vrot.slane %v4581_v52, 7  ;;  %v1767_v52 = vrot.slane %v4609_v63, 1 }
 0x188   : > { %1863 = vrot.lane.b32.xlu1 %v1766_v2, %s4218_s25  ;;  %1385 = vrot.lane.b32.xlu0 %v1342_v51, %s4218_s25  ;;  %v4703_v2 = vsel %vm1049_vm4, 0.0, %v1050_v36  ;;  %v4706_v51 = vsel %vm1049_vm4, 0.0, %v1531_v38 }
 0x18c   : > { %1865 = vrot.lane.b32.xlu0 %v1822_v23, %s4218_s25  ;;  %1166 = vrot.lane.b32.xlu1 %v4593_v57, %s4218_s25  ;;  %v1056_v23 = vrot.slane %v4572_v44, 7  ;;  %v4727_v44 = vsel %vm1049_vm4, 0.0, %v1059_v4 }
 0x18d   : > { %7336 = vst [vmem:[#allocation39_spill] sm:$0xff] %v4727_v44  ;;  %v1559_v44 = vrot.slane %v4716_v62, 7 }
 0x190   : > { %1381 = vrot.lane.b32.xlu0 %v1341_v10, %s4218_s25  ;;  %1647 = vrot.lane.b32.xlu1 %v4599_v58, %s4218_s25  ;;  %v4714_v10 = vsel %vm1049_vm4, %v1534_v35, %v1535_v41  ;;  %v1771_v35 = vrot.slane %v4619_v50, 1  ;;  %v4732_v41 = vpop.f32.mrf.mxu0 }
 0x191   : > { %7337 = vst [vmem:[#allocation40_spill] sm:$0xff] %v4732_v41  ;;  %v1300_v24 = vrot.slane %v4732_v41, 1 }
 0x192   : > { %v4751_v53 = vpop.f32.mrf.mxu0  ;;  %v1772_v37 = vsel %vm1274_vm3, %v1770_v31, %v1771_v35  ;;  %v1544_v31 = vrot.slane %v4627_v18, 7 }
 0x193   : > { %7342 = vst [vmem:[#allocation45_spill] sm:$0xff] %v4751_v53 }
 0x194   : > { %1861 = vrot.lane.b32.xlu0 %v1821_v8, %s4218_s25  ;;  %1379 = vrot.lane.b32.xlu1 %v1283_v14, %s4218_s25  ;;  %v1057_v8 = vrot.slane %v4589_v55, 7  ;;  %v4721_v14 = vsel %vm1049_vm4, %v1050_v36, %v1051_v43  ;;  %v1538_v36 = vrot.slane %v4591_v56, 7  ;;  %v4745_v43 = vsel %vm1049_vm4, 0.0, %v1056_v23  ;;  %v4749_v55 = vpop.f32.mrf.mxu1 }
 0x195   : > { %7340 = vst [vmem:[#allocation43_spill] sm:$0xff] %v4745_v43  ;;  %7341 = vst [vmem:[#allocation44_spill] sm:$0xff] %v4749_v55  ;;  %v4754_v56 = vsel %vm1049_vm4, %v1540_v0, %v1541_v7  ;;  %v1344_v43 = vsel %vm1274_vm3, %v1291_v59, 0.0  ;;  %v1768_v0 = vrot.slane %v4627_v18, 1  ;;  %v1543_v59 = vrot.slane %v4609_v63, 7 }
 0x196   : > { %7343 = vst [vmem:[#allocation46_spill] sm:$0xff] %v4754_v56  ;;  %v4764_v40 = vsel %vm1049_vm4, %v1056_v23, %v1057_v8  ;;  %v4769_v7 = vpop.f32.mrf.mxu1  ;;  %v1063_v8 = vrot.slane %v4623_v5, 7 }
 0x197   : > { %7345 = vst [vmem:[#allocation48_spill] sm:$0xff] %v4764_v40  ;;  %7346 = vst [vmem:[#allocation49_spill] sm:$0xff] %v4769_v7  ;;  %v4785_v40 = vpop.f32.mrf.mxu0  ;;  %v4829_v56 = vsel %vm1049_vm4, %v1543_v59, %v1544_v31 }
 0x198   : > { %1168 = vrot.lane.b32.xlu0 %v4614_v1, %s4218_s25  ;;  %1859 = vrot.lane.b32.xlu1 %v1763_v17, %s4218_s25  ;;  %v4724_v17 = vsel %vm1049_vm4, %v1531_v38, %v1532_v48  ;;  %v4742_v38 = vsel %vm1049_vm4, %v1059_v4, %v1060_v45  ;;  %v1065_v48 = vrot.slane %v4593_v57, 7  ;;  %v1546_v4 = vrot.slane %v4599_v58, 7  ;;  %7349 = vst [vmem:[#allocation52_spill] sm:$0xff] %v4785_v40 }
 0x199   : > { %7339 = vst [vmem:[#allocation42_spill] sm:$0xff] %v4742_v38  ;;  %v1066_v45 = vrot.slane %v4614_v1, 7  ;;  %v1288_v57 = vrot.slane %v4623_v5, 1  ;;  %v1547_v58 = vrot.slane %v4619_v50, 7  ;;  %v4776_v1 = vsel %vm1049_vm4, %v1537_v12, %v1538_v36  ;;  %7358 = vst [vmem:[#allocation61_spill] sm:$0xff] %v4829_v56 }
 0x19a   : > { %7347 = vst [vmem:[#allocation50_spill] sm:$0xff] %v4776_v1  ;;  %v4779_v23 = vsel %vm1049_vm4, 0.0, %v1065_v48  ;;  %v1297_v1 = vrot.slane %v4648_v3, 1 }
 0x19b   : > { %7348 = vst [vmem:[#allocation51_spill] sm:$0xff] %v4779_v23  ;;  %v1289_v36 = vsel %vm1274_vm3, %v1287_v54, %v1288_v57  ;;  %v1293_v23 = vrot.slane %v4638_v9, 1  ;;  %v4814_v54 = vpop.f32.mrf.mxu0 }
 0x19c   : > { %1162 = vrot.lane.b32.xlu1 %v4603_v61, %s4218_s25  ;;  %1649 = vrot.lane.b32.xlu0 %v4619_v50, %s4218_s25  ;;  %v4794_v50 = vsel %vm1049_vm4, %v1065_v48, %v1066_v45  ;;  %v1552_v48 = vrot.slane %v4633_v28, 7  ;;  %7354 = vst [vmem:[#allocation57_spill] sm:$0xff] %v4814_v54  ;;  %v4817_v45 = vsel %vm1049_vm4, %v1546_v4, %v1547_v58  ;;  %v1774_v58 = vrot.slane %v4660_v26, 1 }
 0x19d   : > { %7351 = vst [vmem:[#allocation54_spill] sm:$0xff] %v4794_v50  ;;  %7355 = vst [vmem:[#allocation58_spill] sm:$0xff] %v4817_v45  ;;  %v1773_v50 = vrot.slane %v4643_v11, 1  ;;  %v4855_v38 = vsel %vm1274_vm3, %v1297_v1, 0.0 }
 0x19e   : > { %v4848_v56 = vsel %vm1049_vm4, 0.0, %v1552_v48 }
 0x19f   : > { %7361 = vst [vmem:[#allocation64_spill] sm:$0xff] %v4848_v56 }
 0x1a0   : > { %1643 = vrot.lane.b32.xlu1 %v4609_v63, %s4218_s25  ;;  %1164 = vrot.lane.b32.xlu0 %v4623_v5, %s4218_s25  ;;  %v1776_v63 = vrot.slane %v4633_v28, 1  ;;  %v4801_v5 = vpop.f32.mrf.mxu1 }
 0x1a1   : > { %7352 = vst [vmem:[#allocation55_spill] sm:$0xff] %v4801_v5 }
 0x1a4   : > { %1391 = vrot.lane.b32.xlu1 %v1292_v39, %s4218_s25  ;;  %1645 = vrot.lane.b32.xlu0 %v4627_v18, %s4218_s25  ;;  %v4757_v39 = vsel %vm1049_vm4, 0.0, %v1537_v12  ;;  %v1343_v12 = vsel %vm1274_vm3, %v1288_v57, 0.0  ;;  %v1823_v18 = vsel %vm1274_vm3, %v1768_v0, 0.0  ;;  %v1071_v57 = vrot.slane %v4629_v6, 7 }
 0x1a5   : > { %7344 = vst [vmem:[#allocation47_spill] sm:$0xff] %v4757_v39  ;;  %v1062_v39 = vrot.slane %v4603_v61, 7  ;;  %v1824_v61 = vsel %vm1274_vm3, %v1771_v35, 0.0  ;;  %v4799_v35 = vsel %vm1274_vm3, %v1767_v52, %v1768_v0  ;;  %v1777_v52 = vrot.slane %v4653_v15, 1 }
 0x1a6   : > { %v4820_v0 = vsel %vm1049_vm4, 0.0, %v1543_v59  ;;  %v4845_v31 = vsel %vm1049_vm4, 0.0, %v1071_v57 }
 0x1a7   : > { %7356 = vst [vmem:[#allocation59_spill] sm:$0xff] %v4820_v0  ;;  %v1068_v0 = vrot.slane %v4638_v9, 7  ;;  %7360 = vst [vmem:[#allocation63_spill] sm:$0xff] %v4845_v31  ;;  %v4852_v45 = vsel %vm1274_vm3, %v1776_v63, %v1777_v52  ;;  %v1782_v63 = vrot.slane %v4667_v30, 1 }
 0x1a8   : > { %1871 = vrot.lane.b32.xlu1 %v1772_v37, %s4218_s25  ;;  %1393 = vrot.lane.b32.xlu0 %v1344_v43, %s4218_s25  ;;  %v4788_v37 = vsel %vm1049_vm4, 0.0, %v1546_v4  ;;  %v1296_v43 = vrot.slane %v4629_v6, 1  ;;  %v4833_v4 = vpop.f32.mrf.mxu1 }
 0x1a9   : > { %7350 = vst [vmem:[#allocation53_spill] sm:$0xff] %v4788_v37  ;;  %v4804_v37 = vsel %vm1049_vm4, 0.0, %v1062_v39  ;;  %7359 = vst [vmem:[#allocation62_spill] sm:$0xff] %v4833_v4  ;;  %v4884_v47 = vsel %vm1049_vm4, 0.0, %v1068_v0 }
 0x1aa   : > { %7353 = vst [vmem:[#allocation56_spill] sm:$0xff] %v4804_v37  ;;  %v4823_v37 = vsel %vm1049_vm4, %v1062_v39, %v1063_v8  ;;  %v1549_v39 = vrot.slane %v4643_v11, 7  ;;  %v1069_v8 = vrot.slane %v4657_v16, 7  ;;  %v4842_v59 = vsel %vm1274_vm3, %v1296_v43, %v1297_v1  ;;  %v4879_v21 = vpop.f32.mrf.mxu1  ;;  %7366 = vst [vmem:[#allocation69_spill] sm:$0xff] %v4884_v47 }
 0x1ab   : > { %7357 = vst [vmem:[#allocation60_spill] sm:$0xff] %v4823_v37  ;;  %v1550_v37 = vrot.slane %v4660_v26, 7  ;;  %v1302_v43 = vrot.slane %v4662_v29, 1  ;;  %v4874_v1 = vsel %vm1274_vm3, %v1774_v58, 0.0  ;;  %7364 = vst [vmem:[#allocation67_spill] sm:$0xff] %v4879_v21 }
 0x1ac   : > { %1873 = vrot.lane.b32.xlu0 %v1824_v61, %s4218_s25  ;;  %1174 = vrot.lane.b32.xlu1 %v4629_v6, %s4218_s25  ;;  %v1072_v61 = vrot.slane %v4648_v3, 7  ;;  %v1294_v6 = vrot.slane %v4657_v16, 1  ;;  %v4899_v47 = vsel %vm1049_vm4, 0.0, %v1549_v39 }
 0x1ad   : > { %7369 = vst [vmem:[#allocation72_spill] sm:$0xff] %v4899_v47  ;;  %v4908_v20 = vsel %vm1049_vm4, %v1549_v39, %v1550_v37  ;;  %v1074_v47 = vrot.slane %v4670_v34, 7 }
 0x1ae   : > { %v4864_v31 = vsel %vm1274_vm3, %v1294_v6, 0.0  ;;  %v4867_v56 = vsel %vm1274_vm3, %v1293_v23, %v1294_v6  ;;  %v4870_v22 = vsel %vm1049_vm4, %v1071_v57, %v1072_v61  ;;  %v1299_v6 = vrot.slane %v4670_v34, 1  ;;  %7371 = vst [vmem:[#allocation74_spill] sm:$0xff] %v4908_v20 }
 0x1af   : > { %7363 = vst [vmem:[#allocation66_spill] sm:$0xff] %v4870_v22  ;;  %v1303_v23 = vrot.slane %v4694_v46, 1  ;;  %v1077_v57 = vrot.slane %v4662_v29, 7  ;;  %v1783_v61 = vrot.slane %v4716_v62, 1  ;;  %v4896_v22 = vsel %vm1049_vm4, %v1552_v48, %v1553_v33 }
 0x1b0   : > { %1389 = vrot.lane.b32.xlu0 %v1343_v12, %s4218_s25  ;;  %1655 = vrot.lane.b32.xlu1 %v4633_v28, %s4218_s25  ;;  %v4858_v12 = vsel %vm1274_vm3, %v1777_v52, 0.0  ;;  %v4860_v28 = vpop.f32.mrf.mxu0  ;;  %v4877_v52 = vsel %vm1274_vm3, %v1773_v50, %v1774_v58  ;;  %v1558_v50 = vrot.slane %v4667_v30, 7  ;;  %v4893_v58 = vpop.f32.mrf.mxu1  ;;  %7368 = vst [vmem:[#allocation71_spill] sm:$0xff] %v4896_v22  ;;  %v1780_v33 = vrot.slane %v4749_v55, 1 }
 0x1b1   : > { %7362 = vst [vmem:[#allocation65_spill] sm:$0xff] %v4860_v28  ;;  %7367 = vst [vmem:[#allocation70_spill] sm:$0xff] %v4893_v58  ;;  %v4922_v37 = vsel %vm1274_vm3, %v1302_v43, %v1303_v23  ;;  %v4925_v39 = vsel %vm1049_vm4, 0.0, %v1077_v57  ;;  %v4932_v22 = vsel %vm1274_vm3, %v1782_v63, %v1783_v61  ;;  %v1308_v43 = vrot.slane %v4751_v53, 1 }
 0x1b2   : > { %v4881_v27 = vpop.f32.mrf.mxu0  ;;  %7373 = vst [vmem:[#allocation76_spill] sm:$0xff] %v4925_v39  ;;  %v4928_v20 = vsel %vm1049_vm4, 0.0, %v1558_v50  ;;  %v4944_v39 = vsel %vm1274_vm3, %v1300_v24, 0.0  ;;  %v1788_v63 = vrot.slane %v4769_v7, 1 }
 0x1b3   : > { %7365 = vst [vmem:[#allocation68_spill] sm:$0xff] %v4881_v27  ;;  %7374 = vst [vmem:[#allocation77_spill] sm:$0xff] %v4928_v20  ;;  %v4947_v20 = vsel %vm1274_vm3, %v1299_v6, %v1300_v24  ;;  %v1305_v24 = vrot.slane %v4785_v40, 1  ;;  %v4970_v6 = vsel %vm1049_vm4, %v1558_v50, %v1559_v44  ;;  %v1785_v44 = vrot.slane %v4801_v5, 1 }
 0x1b4   : > { %1869 = vrot.lane.b32.xlu0 %v1823_v18, %s4218_s25  ;;  %1387 = vrot.lane.b32.xlu1 %v1289_v36, %s4218_s25  ;;  %v4902_v18 = vsel %vm1049_vm4, %v1068_v0, %v1069_v8  ;;  %v1078_v36 = vrot.slane %v4694_v46, 7  ;;  %v4912_v48 = vpop.f32.mrf.mxu0  ;;  %v1555_v0 = vrot.slane %v4681_v42, 7  ;;  %v1075_v8 = vrot.slane %v4732_v41, 7  ;;  %v4940_v41 = vpop.f32.mrf.mxu1  ;;  %7378 = vst [vmem:[#allocation81_spill] sm:$0xff] %v4947_v20  ;;  %7384 = vst [vmem:[#allocation87_spill] sm:$0xff] %v4970_v6 }
 0x1b5   : > { %7370 = vst [vmem:[#allocation73_spill] sm:$0xff] %v4902_v18  ;;  %7372 = vst [vmem:[#allocation75_spill] sm:$0xff] %v4912_v48  ;;  %v1556_v18 = vrot.slane %v4749_v55, 7  ;;  %v1306_v50 = vrot.slane %v4860_v28, 1  ;;  %v1564_v6 = vrot.slane %v4769_v7, 7  ;;  %v1786_v20 = vrot.slane %v4879_v21, 1 }
 0x1b6   : > { %7377 = vst [vmem:[#allocation80_spill] sm:$0xff] %v4940_v41  ;;  %v4950_v55 = vsel %vm1049_vm4, %v1077_v57, %v1078_v36  ;;  %v1083_v57 = vrot.slane %v4751_v53, 7  ;;  %v1309_v36 = vrot.slane %v4814_v54, 1 }
 0x1b7   : > { %7379 = vst [vmem:[#allocation82_spill] sm:$0xff] %v4950_v55  ;;  %v4979_v55 = vsel %vm1049_vm4, 0.0, %v1555_v0 }
 0x1b8   : > { %1176 = vrot.lane.b32.xlu0 %v4648_v3, %s4218_s25  ;;  %1867 = vrot.lane.b32.xlu1 %v4799_v35, %s4218_s25  ;;  %v4935_v3 = vsel %vm1274_vm3, %v1303_v23, 0.0  ;;  %v4938_v35 = vsel %vm1274_vm3, %v1783_v61, 0.0  ;;  %v4954_v23 = vsel %vm1274_vm3, %v1780_v33, 0.0  ;;  %v4957_v61 = vsel %vm1274_vm3, %v1779_v25, %v1780_v33  ;;  %7386 = vst [vmem:[#allocation89_spill] sm:$0xff] %v4979_v55 }
 0x1b9   : > { %7375 = vst [vmem:[#allocation78_spill] sm:$0xff] %v4935_v3  ;;  %7376 = vst [vmem:[#allocation79_spill] sm:$0xff] %v4938_v35  ;;  %v4959_v35 = vpop.f32.mrf.mxu0  ;;  %v4962_v3 = vsel %vm1049_vm4, 0.0, %v1074_v47  ;;  %v1080_v25 = vrot.slane %v4785_v40, 7  ;;  %v1789_v33 = vrot.slane %v4833_v4, 1  ;;  %v1565_v40 = vrot.slane %v4833_v4, 7 }
 0x1ba   : > { %7380 = vst [vmem:[#allocation83_spill] sm:$0xff] %v4954_v23  ;;  %7381 = vst [vmem:[#allocation84_spill] sm:$0xff] %v4957_v61  ;;  %v4993_v23 = vsel %vm1049_vm4, %v1555_v0, %v1556_v18  ;;  %v1562_v55 = vrot.slane %v4879_v21, 7  ;;  %v5005_v4 = vsel %vm1049_vm4, 0.0, %v1083_v57  ;;  %v5011_v0 = vsel %vm1274_vm3, %v1308_v43, %v1309_v36 }
 0x1bb   : > { %7382 = vst [vmem:[#allocation85_spill] sm:$0xff] %v4959_v35  ;;  %7383 = vst [vmem:[#allocation86_spill] sm:$0xff] %v4962_v3  ;;  %v4976_v3 = vpop.f32.mrf.mxu1  ;;  %v4989_v61 = vpop.f32.mrf.mxu0  ;;  %v5008_v18 = vsel %vm1049_vm4, 0.0, %v1080_v25  ;;  %v5030_v43 = vsel %vm1274_vm3, %v1305_v24, %v1306_v50 }
 0x1bc   : > { %1170 = vrot.lane.b32.xlu1 %v4638_v9, %s4218_s25  ;;  %1657 = vrot.lane.b32.xlu0 %v4653_v15, %s4218_s25  ;;  %7385 = vst [vmem:[#allocation88_spill] sm:$0xff] %v4976_v3  ;;  %v4982_v9 = vsel %vm1049_vm4, %v1074_v47, %v1075_v8  ;;  %v1084_v15 = vrot.slane %v4814_v54, 7  ;;  %7388 = vst [vmem:[#allocation91_spill] sm:$0xff] %v4989_v61  ;;  %v1561_v47 = vrot.slane %v4801_v5, 7  ;;  %v5000_v8 = vpop.permute.xlu1 %3048 }
 0x1bd   : > { %7387 = vst [vmem:[#allocation90_spill] sm:$0xff] %v4982_v9  ;;  %7389 = vst [vmem:[#allocation92_spill] sm:$0xff] %v4993_v23  ;;  %v1081_v9 = vrot.slane %v4860_v28, 7  ;;  %v5014_v23 = vsel %vm1274_vm3, %v1788_v63, %v1789_v33  ;;  %v5022_v28 = vpop.f32.mrf.mxu1  ;;  %v5024_v21 = vpop.f32.mrf.mxu0  ;;  %v5033_v63 = vsel %vm1049_vm4, 0.0, %v1564_v6 }
 0x1be   : > { %7390 = vst [vmem:[#allocation93_spill] sm:$0xff] %v5005_v4  ;;  %7391 = vst [vmem:[#allocation94_spill] sm:$0xff] %v5008_v18  ;;  %v5027_v4 = vsel %vm1274_vm3, %v1306_v50, 0.0  ;;  %v5042_v18 = vsel %vm1274_vm3, %v1785_v44, %v1786_v20  ;;  %v5050_v24 = vsel %vm1049_vm4, 0.0, %v1561_v47  ;;  %v1090_v44 = vrot.slane %v4959_v35, 7 }
 0x1bf   : > { %7394 = vst [vmem:[#allocation97_spill] sm:$0xff] %v5022_v28  ;;  %7395 = vst [vmem:[#allocation98_spill] sm:$0xff] %v5024_v21  ;;  %v5067_v50 = vpop.f32.mrf.mxu0 }
 0x1c0   : > { %1651 = vrot.lane.b32.xlu1 %v4643_v11, %s4218_s25  ;;  %1172 = vrot.lane.b32.xlu0 %v4657_v16, %s4218_s25  ;;  %v5017_v11 = vsel %vm1274_vm3, %v1309_v36, 0.0  ;;  %v5020_v16 = vsel %vm1274_vm3, %v1789_v33, 0.0  ;;  %7396 = vst [vmem:[#allocation99_spill] sm:$0xff] %v5033_v63  ;;  %v5036_v36 = vsel %vm1049_vm4, %v1083_v57, %v1084_v15  ;;  %v5039_v33 = vsel %vm1274_vm3, %v1786_v20, 0.0  ;;  %7398 = vst [vmem:[#allocation101_spill] sm:$0xff] %v5042_v18 }
 0x1c1   : > { %7392 = vst [vmem:[#allocation95_spill] sm:$0xff] %v5017_v11  ;;  %7393 = vst [vmem:[#allocation96_spill] sm:$0xff] %v5020_v16  ;;  %v5044_v16 = vpop.f32.mrf.mxu1  ;;  %v5047_v11 = vsel %vm1049_vm4, %v1564_v6, %v1565_v40  ;;  %v1314_v15 = vrot.slane %v4881_v27, 1  ;;  %v1315_v20 = vrot.slane %v4959_v35, 1  ;;  %v5059_v57 = vsel %vm1049_vm4, %v1080_v25, %v1081_v9  ;;  %v5097_v35 = vpop.f32.mrf.mxu0 }
 0x1c2   : > { %7397 = vst [vmem:[#allocation100_spill] sm:$0xff] %v5036_v36  ;;  %7399 = vst [vmem:[#allocation102_spill] sm:$0xff] %v5044_v16  ;;  %v5062_v40 = vsel %vm1049_vm4, %v1561_v47, %v1562_v55  ;;  %v1311_v6 = vrot.slane %v4912_v48, 1  ;;  %v1087_v36 = vrot.slane %v4989_v61, 7  ;;  %v1791_v63 = vrot.slane %v4940_v41, 1 }
 0x1c3   : > { %7400 = vst [vmem:[#allocation103_spill] sm:$0xff] %v5047_v11  ;;  %7401 = vst [vmem:[#allocation104_spill] sm:$0xff] %v5050_v24  ;;  %v1312_v24 = vrot.slane %v4989_v61, 1  ;;  %v1089_v9 = vrot.slane %v4881_v27, 7  ;;  %v1086_v55 = vrot.slane %v4912_v48, 7  ;;  %v1571_v47 = vrot.slane %v4976_v3, 7 }
 0x1c4   : > { %1399 = vrot.lane.b32.xlu1 %v4842_v59, %s4218_s25  ;;  %1653 = vrot.lane.b32.xlu0 %v4660_v26, %s4218_s25  ;;  %7402 = vst [vmem:[#allocation105_spill] sm:$0xff] %v5059_v57  ;;  %7403 = vst [vmem:[#allocation106_spill] sm:$0xff] %v5062_v40  ;;  %v1794_v59 = vrot.slane %v4893_v58, 1  ;;  %v1795_v40 = vrot.slane %v4976_v3, 1  ;;  %v1568_v57 = vrot.slane %v5022_v28, 7  ;;  %v5081_v26 = vpop.f32.mrf.mxu1  ;;  %v5088_v61 = vsel %vm1274_vm3, %v1314_v15, %v1315_v20 }
 0x1c5   : > { %7404 = vst [vmem:[#allocation107_spill] sm:$0xff] %v5067_v50  ;;  %7405 = vst [vmem:[#allocation108_spill] sm:$0xff] %v5081_v26  ;;  %v1570_v3 = vrot.slane %v4893_v58, 7  ;;  %v1567_v15 = vrot.slane %v4940_v41, 7 }
 0x1c6   : > { %v1151_v11 = vpop.permute.xlu1 %1150  ;;  %7406 = vst [vmem:[#allocation109_spill] sm:$0xff] %v5088_v61  ;;  %7408 = vst [vmem:[#allocation111_spill] sm:$0xff] %v5097_v35  ;;  %v5117_v61 = vsel %vm1049_vm4, %v1089_v9, %v1090_v44  ;;  %v5132_v18 = vsel %vm1274_vm3, %v1794_v59, %v1795_v40  ;;  %v5156_v44 = vpop.f32.mrf.mxu0 }
 0x1c7   : > { %v5076_v25 = vadd.f32 %v1151_v11, %v4686_v49  ;;  %v5091_v11 = vsel %vm1274_vm3, %v1315_v20, 0.0  ;;  %v1792_v49 = vrot.slane %v5022_v28, 1  ;;  %v5114_v28 = vsel %vm1049_vm4, 0.0, %v1089_v9  ;;  %7412 = vst [vmem:[#allocation115_spill] sm:$0xff] %v5117_v61  ;;  %7417 = vst [vmem:[#allocation120_spill] sm:$0xff] %v5156_v44 }
 0x1c8   : > { %1879 = vrot.lane.b32.xlu1 %v4852_v45, %s4218_s25  ;;  %1401 = vrot.lane.b32.xlu0 %v4855_v38, %s4218_s25  ;;  %7407 = vst [vmem:[#allocation110_spill] sm:$0xff] %v5091_v11  ;;  %v5100_v45 = vsel %vm1274_vm3, %v1312_v24, 0.0  ;;  %v5103_v38 = vsel %vm1274_vm3, %v1311_v6, %v1312_v24  ;;  %7411 = vst [vmem:[#allocation114_spill] sm:$0xff] %v5114_v28  ;;  %v5120_v24 = vsel %vm1049_vm4, 0.0, %v1086_v55  ;;  %v5134_v28 = vpop.f32.mrf.mxu1  ;;  %v1095_v61 = vrot.slane %v5024_v21, 7 }
 0x1c9   : > { %v2667_v48 = vadd.f32 %v4447_v13, %v5076_v25  ;;  %7409 = vst [vmem:[#allocation112_spill] sm:$0xff] %v5100_v45  ;;  %7410 = vst [vmem:[#allocation113_spill] sm:$0xff] %v5103_v38  ;;  %v5123_v6 = vsel %vm1049_vm4, %v1086_v55, %v1087_v36  ;;  %v5141_v36 = vsel %vm1274_vm3, %v1795_v40, 0.0  ;;  %v5159_v59 = vsel %vm1049_vm4, %v1570_v3, %v1571_v47 }
 0x1ca   : > { %v1632_v20 = vpop.permute.xlu1 %1631  ;;  %v1153_v11 = vpop.permute.xlu0 %1152  ;;  %7413 = vst [vmem:[#allocation116_spill] sm:$0xff] %v5120_v24  ;;  %7414 = vst [vmem:[#allocation117_spill] sm:$0xff] %v5123_v6  ;;  %v5162_v40 = vsel %vm1049_vm4, 0.0, %v1567_v15  ;;  %v5165_v9 = vsel %vm1049_vm4, %v1567_v15, %v1568_v57  ;;  %v1321_v57 = vrot.slane %v5097_v35, 1 }
 0x1cb   : > { %v3884_v38 = vpack.c.bf16 %v2667_v48, %v2667_v48  ;;  %v5126_v45 = vadd.f32 %v1632_v20, %v4692_v60  ;;  %v5129_v41 = vadd.f32 %v1153_v11, %v4711_v32  ;;  %7415 = vst [vmem:[#allocation118_spill] sm:$0xff] %v5134_v28  ;;  %v5144_v60 = vsel %vm1274_vm3, %v1792_v49, 0.0  ;;  %7418 = vst [vmem:[#allocation121_spill] sm:$0xff] %v5159_v59  ;;  %v5177_v15 = vpop.f32.mrf.mxu1 }
 0x1cc   : > { %1881 = vrot.lane.b32.xlu0 %v4858_v12, %s4218_s25  ;;  %1182 = vrot.lane.b32.xlu1 %v4662_v29, %s4218_s25  ;;  %v5147_v32 = vsel %vm1274_vm3, %v1791_v63, %v1792_v49  ;;  %v5150_v48 = vsel %vm1049_vm4, 0.0, %v1570_v3  ;;  %7419 = vst [vmem:[#allocation122_spill] sm:$0xff] %v5162_v40  ;;  %7420 = vst [vmem:[#allocation123_spill] sm:$0xff] %v5165_v9  ;;  %v1320_v49 = vrot.slane %v5024_v21, 1  ;;  %v1096_v20 = vrot.slane %v5097_v35, 7 }
 0x1cd   : > { %7416 = vst [vmem:[#allocation119_spill] sm:$0xff] %v5150_v48  ;;  %2988 = vst.msk [vmem:[%s5111_s9 + $0x10] sm:$0xf] %vm2983_vm5, %v3884_v38  ;;  %v2669_v12 = vadd.f32 %v4447_v13, %v5126_v45  ;;  %v2668_v63 = vadd.f32 %v4447_v13, %v5129_v41  ;;  %v1317_v38 = vrot.slane %v5067_v50, 1 }
 0x1ce   : > { %v1147_v55 = vpop.permute.xlu1 %1146  ;;  %v1634_v11 = vpop.permute.xlu0 %1633  ;;  %7421 = vst [vmem:[#allocation124_spill] sm:$0xff] %v5177_v15  ;;  %v5207_v24 = vsel %vm1274_vm3, %v1320_v49, %v1321_v57 }
 0x1cf   : > { %v3886_v3 = vpack.c.bf16 %v2669_v12, %v2669_v12  ;;  %v1242_v47 = vadd.f32 %v1147_v55, %v4703_v2  ;;  %v5174_v6 = vadd.f32 %v1634_v11, %v4714_v10  ;;  %v3885_v9 = vpack.c.bf16 %v2668_v63, %v2668_v63  ;;  %7422 = vst [vmem:[#allocation125_spill] sm:$0xff] %v5207_v24 }
 0x1d0   : > { %1397 = vrot.lane.b32.xlu0 %v4864_v31, %s4218_s25  ;;  %1663 = vrot.lane.b32.xlu1 %v4667_v30, %s4218_s25  ;;  %v1093_v12 = vrot.slane %v5156_v44, 7  ;;  %v1318_v2 = vrot.slane %v5156_v44, 1  ;;  %v7470_v44 = vld [vmem:[#allocation50_spill] sm:$0xff] }
 0x1d1   : > { %2990 = vst.msk [vmem:[%s5111_s9 + $0x18] sm:$0xf] %vm2983_vm5, %v3886_v3  ;;  %v2663_v10 = vadd.f32 %v4447_v13, %v1242_v47  ;;  %2989 = vst.msk [vmem:[%s5111_s9 + $0x14] sm:$0xf] %vm2983_vm5, %v3885_v9  ;;  %v2670_v31 = vadd.f32 %v4447_v13, %v5174_v6  ;;  %v1092_v9 = vrot.slane %v5067_v50, 7  ;;  %v2251_v48 = vmul.f32 %v1242_v47, %v1242_v47 }
 0x1d2   : > { %v1628_v40 = vpop.permute.xlu1 %1627  ;;  %v1149_v59 = vpop.permute.xlu0 %1148  ;;  %v5210_v3 = vsel %vm1274_vm3, %v1321_v57, 0.0 }
 0x1d3   : > { %v3880_v55 = vpack.c.bf16 %v2663_v10, %v2663_v10  ;;  %v1723_v63 = vadd.f32 %v1628_v40, %v4706_v51  ;;  %v1243_v11 = vadd.f32 %v1149_v59, %v4721_v14  ;;  %v3887_v30 = vpack.c.bf16 %v2670_v31, %v2670_v31  ;;  %7423 = vst [vmem:[#allocation126_spill] sm:$0xff] %v5210_v3 }
 0x1d4   : > { %1877 = vrot.lane.b32.xlu0 %v4874_v1, %s4218_s25  ;;  %1395 = vrot.lane.b32.xlu1 %v4867_v56, %s4218_s25  ;;  %v1979_v51 = vsel %vm652_vm2, %v1242_v47, 0.0  ;;  %v5218_v40 = vsel %vm1274_vm3, %v1317_v38, %v1318_v2  ;;  %v5226_v3 = vsel %vm1274_vm3, %v1318_v2, 0.0  ;;  %v2315_v38 = vsel %vm652_vm2, %v2251_v48, 0.0 }
 0x1d5   : > { %2984 = vst.msk [vmem:[%s5111_s9] sm:$0xf] %vm2983_vm5, %v3880_v55  ;;  %v2665_v14 = vadd.f32 %v4447_v13, %v1723_v63  ;;  %v1980_v59 = vsel %vm652_vm2, %v1243_v11, 0.0  ;;  %7424 = vst [vmem:[#allocation127_spill] sm:$0xff] %v5218_v40  ;;  %v2253_v56 = vmul.f32 %v1723_v63, %v1723_v63  ;;  %v2252_v49 = vmul.f32 %v1243_v11, %v1243_v11 }
 0x1d6   : > { %2991 = vst.msk [vmem:[%s5111_s9 + $0x1c] sm:$0xf] %vm2983_vm5, %v3887_v30  ;;  %v1981_v1 = vadd.f32 %v1980_v59, %v1979_v51  ;;  %v2664_v57 = vadd.f32 %v4447_v13, %v1243_v11  ;;  %v1376_v10 = vpop.permute.xlu1 %1375  ;;  %v1630_v31 = vpop.permute.xlu0 %1629  ;;  %v1982_v47 = vsel %vm652_vm2, %v1723_v63, 0.0  ;;  %7425 = vst [vmem:[#allocation128_spill] sm:$0xff] %v5226_v3  ;;  %v2255_v63 = vmul.f32 %v5076_v25, %v5076_v25 }
 0x1d7   : > { %v3882_v55 = vpack.c.bf16 %v2665_v14, %v2665_v14  ;;  %v1724_v29 = vadd.f32 %v1630_v31, %v4724_v17  ;;  %v2316_v30 = vsel %vm652_vm2, %v2252_v49, 0.0  ;;  %v5239_v2 = vsel %vm1049_vm4, 0.0, %v1095_v61 }
 0x1d8   : > { %v3881_v51 = vpack.c.bf16 %v2664_v57, %v2664_v57  ;;  %v1983_v59 = vadd.f32 %v1982_v47, %v1981_v1  ;;  %1184 = vrot.lane.b32.xlu0 %v4694_v46, %s4218_s25  ;;  %1875 = vrot.lane.b32.xlu1 %v4877_v52, %s4218_s25  ;;  %v2317_v17 = vadd.f32 %v2316_v30, %v2315_v38  ;;  %v2318_v11 = vsel %vm652_vm2, %v2253_v56, 0.0 }
 0x1d9   : > { %2986 = vst.msk [vmem:[%s5111_s9 + $0x8] sm:$0xf] %vm2983_vm5, %v3882_v55  ;;  %7426 = vst [vmem:[#allocation129_spill] sm:$0xff] %v5239_v2  ;;  %v5242_v48 = vsel %vm1049_vm4, %v1095_v61, %v1096_v20  ;;  %v1984_v14 = vsel %vm652_vm2, %v1724_v29, 0.0  ;;  %v2254_v1 = vmul.f32 %v1724_v29, %v1724_v29  ;;  %v2666_v52 = vadd.f32 %v4447_v13, %v1724_v29  ;;  %v7445_v2 = vld [vmem:[#allocation41_spill] sm:$0xff] }
 0x1da   : > { %7427 = vst [vmem:[#allocation130_spill] sm:$0xff] %v5242_v48  ;;  %2985 = vst.msk [vmem:[%s5111_s9 + $0x4] sm:$0xf] %vm2983_vm5, %v3881_v51  ;;  %v1856_v49 = vpop.permute.xlu1 %1855  ;;  %v1378_v57 = vpop.permute.xlu0 %1377  ;;  %v2319_v31 = vadd.f32 %v2318_v11, %v2317_v17  ;;  %v1985_v47 = vadd.f32 %v1984_v14, %v1983_v59  ;;  %v5250_v55 = vsel %vm1049_vm4, 0.0, %v1092_v9  ;;  %v5253_v61 = vsel %vm1049_vm4, %v1092_v9, %v1093_v12 }
 0x1db   : > { %7428 = vst [vmem:[#allocation131_spill] sm:$0xff] %v5250_v55  ;;  %7429 = vst [vmem:[#allocation132_spill] sm:$0xff] %v5253_v61  ;;  %v1986_v20 = vsel %vm652_vm2, %v5076_v25, 0.0  ;;  %v2256_v56 = vmul.f32 %v5129_v41, %v5129_v41  ;;  %v2320_v13 = vsel %vm652_vm2, %v2254_v1, 0.0  ;;  %v3883_v29 = vpack.c.bf16 %v2666_v52, %v2666_v52  ;;  %v7435_v61 = vld [vmem:[#allocation39_spill] sm:$0xff] }
 0x1dc   : > { %1178 = vrot.lane.b32.xlu1 %v4670_v34, %s4218_s25  ;;  %1665 = vrot.lane.b32.xlu0 %v4716_v62, %s4218_s25  ;;  %v2257_v12 = vmul.f32 %v5126_v45, %v5126_v45  ;;  %v1987_v9 = vadd.f32 %v1986_v20, %v1985_v47  ;;  %v2321_v38 = vadd.f32 %v2320_v13, %v2319_v31  ;;  %v1576_v25 = vrot.slane %v5044_v16, 7 }
 0x1dd   : > { %v2322_v30 = vsel %vm652_vm2, %v2255_v63, 0.0  ;;  %v1988_v51 = vsel %vm652_vm2, %v5129_v41, 0.0  ;;  %2987 = vst.msk [vmem:[%s5111_s9 + $0xc] sm:$0xf] %vm2983_vm5, %v3883_v29  ;;  %v7430_v11 = vrot.slane %v5134_v28, 1  ;;  %v7431_v14 = vrot.slane %v5044_v16, 1 }
 0x1de   : > { %v1159_v59 = vpop.permute.xlu1 %1158  ;;  %v1858_v17 = vpop.permute.xlu0 %1857  ;;  %v1573_v52 = vrot.slane %v5081_v26, 7  ;;  %v1469_v31 = vadd.f32 %v4515_v19, %v1376_v10  ;;  %v1989_v47 = vadd.f32 %v1988_v51, %v1987_v9  ;;  %v2323_v63 = vadd.f32 %v2322_v30, %v2321_v38 }
 0x1df   : > { %v5277_v1 = vsel %vm1274_vm3, %v7431_v14, %v7430_v11  ;;  %v7433_v20 = vmov %v7430_v11  ;;  %v1990_v13 = vsel %vm652_vm2, %v5126_v45, 0.0  ;;  %v2324_v29 = vsel %vm652_vm2, %v2256_v56, 0.0  ;;  %v7436_v11 = vld [vmem:[#allocation40_spill] sm:$0xff]  ;;  %v7442_v14 = vld [vmem:[#allocation2_spill] sm:$0xff] }
 0x1e0   : > { %7432 = vst [vmem:[#allocation133_spill] sm:$0xff] %v5277_v1  ;;  %v5284_v41 = vsel %vm1274_vm3, %v7433_v20, 0.0  ;;  %v1248_v55 = vadd.f32 %v1159_v59, %v7435_v61  ;;  %1659 = vrot.lane.b32.xlu1 %v4681_v42, %s4218_s25  ;;  %1180 = vrot.lane.b32.xlu0 %v7436_v11, %s4218_s25  ;;  %v7437_v19 = vrot.slane %v5177_v15, 1  ;;  %v7438_v10 = vrot.slane %v5081_v26, 1  ;;  %v7466_v1 = vld [vmem:[#allocation47_spill] sm:$0xff] }
 0x1e1   : > { %7434 = vst [vmem:[#allocation134_spill] sm:$0xff] %v5284_v41  ;;  %v2326_v38 = vsel %vm652_vm2, %v2257_v12, 0.0  ;;  %v2325_v45 = vadd.f32 %v2324_v29, %v2323_v63  ;;  %v1991_v30 = vadd.f32 %v1990_v13, %v1989_v47  ;;  %v1992_v51 = vsel %vm652_vm2, %v5174_v6, 0.0  ;;  %v7443_v29 = vld [vmem:[#allocation5_spill] sm:$0xff] }
 0x1e2   : > { %v5299_v9 = vsel %vm1274_vm3, %v7438_v10, %v7437_v19  ;;  %v7440_v56 = vmov %v7437_v19  ;;  %v2258_v59 = vmul.f32 %v5174_v6, %v5174_v6  ;;  %v1949_v20 = vadd.f32 %v7442_v14, %v1856_v49  ;;  %v5315_v19 = vld [vmem:[%s7195_s5] ss:$0 sm:$0xff]  ;;  %v1640_v47 = vpop.permute.xlu1 %1639  ;;  %v1374_v63 = vpop.permute.xlu0 %1373  ;;  %v7446_v49 = vld [vmem:[#allocation44_spill] sm:$0xff] }
 0x1e3   : > { %7439 = vst [vmem:[#allocation39_spill] sm:$0xff] %v5299_v9  ;;  %v5305_v61 = vsel %vm1274_vm3, %v7440_v56, 0.0  ;;  %v2675_v12 = vadd.f32 %v5315_v19, %v1248_v55  ;;  %v2452_v13 = vmul.f32 %v1469_v31, %v1469_v31  ;;  %v1470_v10 = vadd.f32 %v7443_v29, %v1378_v57  ;;  %v7444_v56 = vld [vmem:[#allocation6_spill] sm:$0xff] }
 0x1e4   : > { %7441 = vst [vmem:[#allocation135_spill] sm:$0xff] %v5305_v61  ;;  %v1950_v48 = vadd.f32 %v7444_v56, %v1858_v17  ;;  %v5321_v42 = vadd.f32 %v1640_v47, %v7445_v2  ;;  %1407 = vrot.lane.b32.xlu1 %v4922_v37, %s4218_s25  ;;  %1661 = vrot.lane.b32.xlu0 %v7446_v49, %s4218_s25  ;;  %v5330_v34 = vsel %vm1049_vm4, 0.0, %v1576_v25  ;;  %v7449_v17 = vrot.slane %v5134_v28, 7  ;;  %v7459_v49 = vld [vmem:[#allocation3_spill] sm:$0xff] }
 0x1e5   : > { %v3892_v6 = vpack.c.bf16 %v2675_v12, %v2675_v12  ;;  %v5327_v14 = vadd.f32 %v1992_v51, %v1991_v30  ;;  %v2327_v11 = vadd.f32 %v2326_v38, %v2325_v45  ;;  %7447 = vst [vmem:[#allocation2_spill] sm:$0xff] %v5330_v34  ;;  %v5333_v57 = vadd.f32 %v5000_v8, %v1469_v31 }
 0x1e6   : > { %v5338_v2 = vsel %vm1049_vm4, %v1576_v25, %v7449_v17  ;;  %v5341_v12 = vsel %vm1049_vm4, 0.0, %v1573_v52  ;;  %v7452_v37 = vrot.slane %v5177_v15, 7  ;;  %v2328_v38 = vsel %vm652_vm2, %v2258_v59, 0.0  ;;  %v1372_v47 = vpop.permute.xlu1 %1371  ;;  %v1854_v29 = vpop.permute.xlu0 %1853 }
 0x1e7   : > { %7448 = vst [vmem:[#allocation5_spill] sm:$0xff] %v5333_v57  ;;  %7450 = vst [vmem:[#allocation6_spill] sm:$0xff] %v5338_v2  ;;  %v2454_v45 = vmul.f32 %v1949_v20, %v1949_v20  ;;  %v5350_v51 = vadd.f32 %v5000_v8, %v1949_v20  ;;  %v2677_v25 = vadd.f32 %v5315_v19, %v5321_v42  ;;  %v5357_v56 = vsel %vm2112_vm6, %v1469_v31, 0.0  ;;  %v7456_v2 = vld [vmem:[#allocation78_spill] sm:$0xff] }
 0x1e8   : > { %7451 = vst [vmem:[#allocation41_spill] sm:$0xff] %v5341_v12  ;;  %v5346_v30 = vsel %vm1049_vm4, %v1573_v52, %v7452_v37  ;;  %2996 = vst.msk [vmem:[%s5111_s9 + $0x30] sm:$0xf] %vm2983_vm5, %v3892_v6  ;;  %v2453_v17 = vmul.f32 %v1470_v10, %v1470_v10  ;;  %v5360_v52 = vadd.f32 %v5000_v8, %v1470_v10  ;;  %v5365_v37 = vsel %vm2112_vm6, %v2452_v13, 0.0 }
 0x1e9   : > { %7453 = vst [vmem:[#allocation136_spill] sm:$0xff] %v5346_v30  ;;  %7454 = vst [vmem:[#allocation137_spill] sm:$0xff] %v5350_v51  ;;  %v5362_v59 = vadd.f32 %v2328_v38, %v2327_v11  ;;  %v2263_v30 = vmul.f32 %v1248_v55, %v1248_v55  ;;  %v2455_v6 = vmul.f32 %v1950_v48, %v1950_v48  ;;  %1887 = vrot.lane.b32.xlu1 %v4932_v22, %s4218_s25  ;;  %v7458_v11 = vld [vmem:[#allocation7_spill] sm:$0xff] }
 0x1ea   : > { %7455 = vst [vmem:[#allocation138_spill] sm:$0xff] %v5360_v52  ;;  %v3894_v12 = vpack.c.bf16 %v2677_v25, %v2677_v25  ;;  %1409 = vrot.lane.b32.xlu0 %v7456_v2, %s4218_s25  ;;  %v5374_v34 = vadd.f32 %v5000_v8, %v1950_v48  ;;  %v1468_v38 = vadd.f32 %v1374_v63, %v7458_v11  ;;  %v5381_v62 = vsel %vm2112_vm6, %v1949_v20, 0.0  ;;  %v1852_v31 = vpop.permute.xlu1 %1851  ;;  %v1161_v46 = vpop.permute.xlu0 %1160  ;;  %v7462_v20 = vld [vmem:[#allocation79_spill] sm:$0xff]  ;;  %v7465_v52 = vld [vmem:[#allocation46_spill] sm:$0xff] }
 0x1eb   : > { %v5378_v13 = vadd.f32 %v1372_v47, %v7459_v49  ;;  %v5384_v25 = vsel %vm2112_vm6, %v2454_v45, 0.0  ;;  %v5389_v2 = vsel %vm2112_vm6, %v1470_v10, 0.0  ;;  %v5394_v63 = vsel %vm2112_vm6, %v2453_v17, 0.0  ;;  %v7460_v49 = vld [vmem:[#allocation4_spill] sm:$0xff]  ;;  %v7461_v45 = vld [vmem:[#allocation42_spill] sm:$0xff] }
 0x1ec   : > { %7457 = vst [vmem:[#allocation78_spill] sm:$0xff] %v5374_v34  ;;  %2998 = vst.msk [vmem:[%s5111_s9 + $0x38] sm:$0xf] %vm2983_vm5, %v3894_v12  ;;  %v5399_v47 = vadd.f32 %v1852_v31, %v7460_v49  ;;  %v5402_v11 = vadd.f32 %v1161_v46, %v7461_v45  ;;  %v5405_v22 = vsel %vm652_vm2, %v1248_v55, 0.0  ;;  %v5408_v10 = vsel %vm652_vm2, %v2263_v30, 0.0  ;;  %v7464_v34 = vld [vmem:[#allocation43_spill] sm:$0xff] }
 0x1ed   : > { %v5411_v12 = vsel %vm2112_vm6, %v1950_v48, 0.0  ;;  %v5414_v17 = vsel %vm2112_vm6, %v2455_v6, 0.0  ;;  %1190 = vrot.lane.b32.xlu1 %v4751_v53, %s4218_s25  ;;  %v2265_v55 = vmul.f32 %v5321_v42, %v5321_v42  ;;  %v2114_v30 = vsel %vm2112_vm6, %v1468_v38, 0.0  ;;  %v7463_v53 = vld [vmem:[#allocation8_spill] sm:$0xff] }
 0x1ee   : > { %1889 = vrot.lane.b32.xlu0 %v7462_v20, %s4218_s25  ;;  %v2113_v48 = vsel %vm2112_vm6, %v5378_v13, 0.0  ;;  %v2449_v31 = vmul.f32 %v1468_v38, %v1468_v38  ;;  %v5428_v6 = vadd.f32 %v5000_v8, %v1468_v38  ;;  %v2448_v20 = vmul.f32 %v5378_v13, %v5378_v13  ;;  %v1155_v45 = vpop.permute.xlu1 %1154  ;;  %v1642_v46 = vpop.permute.xlu0 %1641 }
 0x1ef   : > { %v2676_v49 = vadd.f32 %v5315_v19, %v5402_v11  ;;  %v5435_v51 = vadd.f32 %v1854_v29, %v7463_v53  ;;  %v2116_v57 = vsel %vm2112_vm6, %v5399_v47, 0.0  ;;  %v1246_v61 = vadd.f32 %v1155_v45, %v7464_v34 }
 0x1f0   : > { %v5441_v38 = vadd.f32 %v1642_v46, %v7465_v52  ;;  %v5445_v3 = vsel %vm652_vm2, %v5321_v42, 0.0  ;;  %v2115_v9 = vadd.f32 %v2114_v30, %v2113_v48  ;;  %v2450_v41 = vmul.f32 %v5399_v47, %v5399_v47 }
 0x1f1   : > { %v3893_v40 = vpack.c.bf16 %v2676_v49, %v2676_v49  ;;  %1671 = vrot.lane.b32.xlu1 %v4769_v7, %s4218_s25  ;;  %v5454_v53 = vsel %vm652_vm2, %v2265_v55, 0.0  ;;  %v1994_v34 = vsel %vm652_vm2, %v1246_v61, 0.0  ;;  %v2259_v29 = vmul.f32 %v1246_v61, %v1246_v61 }
 0x1f2   : > { %1405 = vrot.lane.b32.xlu0 %v4944_v39, %s4218_s25  ;;  %v2671_v42 = vadd.f32 %v5315_v19, %v1246_v61  ;;  %v2513_v52 = vsel %vm2112_vm6, %v2449_v31, 0.0  ;;  %v2512_v46 = vsel %vm2112_vm6, %v2448_v20, 0.0  ;;  %v2117_v30 = vadd.f32 %v2116_v57, %v2115_v9  ;;  %v1636_v48 = vpop.permute.xlu1 %1635  ;;  %v1157_v49 = vpop.permute.xlu0 %1156 }
 0x1f3   : > { %2997 = vst.msk [vmem:[%s5111_s9 + $0x34] sm:$0xf] %vm2983_vm5, %v3893_v40  ;;  %v1995_v39 = vadd.f32 %v1994_v34, %v5327_v14  ;;  %v2330_v55 = vsel %vm652_vm2, %v2259_v29, 0.0  ;;  %v2678_v7 = vadd.f32 %v5315_v19, %v5441_v38  ;;  %v1727_v61 = vadd.f32 %v1636_v48, %v7466_v1  ;;  %v7467_v40 = vld [vmem:[#allocation48_spill] sm:$0xff]  ;;  %v7468_v14 = vld [vmem:[#allocation83_spill] sm:$0xff]  ;;  %v7469_v34 = vld [vmem:[#allocation81_spill] sm:$0xff] }
 0x1f4   : > { %v3888_v45 = vpack.c.bf16 %v2671_v42, %v2671_v42  ;;  %v2451_v31 = vmul.f32 %v5435_v51, %v5435_v51  ;;  %v2515_v9 = vsel %vm2112_vm6, %v2450_v41, 0.0  ;;  %v2331_v57 = vadd.f32 %v2330_v55, %v5362_v59 }
 0x1f5   : > { %v1247_v20 = vadd.f32 %v1157_v49, %v7467_v40  ;;  %1403 = vrot.lane.b32.xlu1 %v7469_v34, %s4218_s25  ;;  %v2514_v29 = vadd.f32 %v2513_v52, %v2512_v46  ;;  %v3895_v1 = vpack.c.bf16 %v2678_v7, %v2678_v7  ;;  %v2261_v42 = vmul.f32 %v1727_v61, %v1727_v61 }
 0x1f6   : > { %1885 = vrot.lane.b32.xlu0 %v7468_v14, %s4218_s25  ;;  %2992 = vst.msk [vmem:[%s5111_s9 + $0x20] sm:$0xf] %vm2983_vm5, %v3888_v45  ;;  %v2673_v48 = vadd.f32 %v5315_v19, %v1727_v61  ;;  %v2118_v41 = vsel %vm2112_vm6, %v5435_v51, 0.0  ;;  %v1384_v40 = vpop.permute.xlu1 %1383  ;;  %v1638_v14 = vpop.permute.xlu0 %1637  ;;  %v5487_v45 = vadd.f32 %v5000_v8, %v5378_v13 }
 0x1f7   : > { %v1996_v59 = vsel %vm652_vm2, %v1247_v20, 0.0  ;;  %v2260_v49 = vmul.f32 %v1247_v20, %v1247_v20  ;;  %v2672_v55 = vadd.f32 %v5315_v19, %v1247_v20  ;;  %v2119_v15 = vadd.f32 %v2118_v41, %v2117_v30  ;;  %2999 = vst.msk [vmem:[%s5111_s9 + $0x3c] sm:$0xf] %vm2983_vm5, %v3895_v1  ;;  %v7471_v30 = vld [vmem:[#allocation84_spill] sm:$0xff] }
 0x1f8   : > { %v2516_v52 = vadd.f32 %v2515_v9, %v2514_v29  ;;  %v3890_v7 = vpack.c.bf16 %v2673_v48, %v2673_v48  ;;  %v1997_v46 = vadd.f32 %v1996_v59, %v1995_v39  ;;  %v1728_v26 = vadd.f32 %v1638_v14, %v7470_v44 }
 0x1f9   : > { %v2332_v34 = vsel %vm652_vm2, %v2260_v49, 0.0  ;;  %v3889_v24 = vpack.c.bf16 %v2672_v55, %v2672_v55  ;;  %1883 = vrot.lane.b32.xlu1 %v7471_v30, %s4218_s25  ;;  %v2517_v9 = vsel %vm2112_vm6, %v2451_v31, 0.0  ;;  %v1998_v20 = vsel %vm652_vm2, %v1727_v61, 0.0  ;;  %v7472_v55 = vld [vmem:[#allocation9_spill] sm:$0xff] }
 0x1fa   : > { %1192 = vrot.lane.b32.xlu0 %v4814_v54, %s4218_s25  ;;  %v2334_v39 = vsel %vm652_vm2, %v2261_v42, 0.0  ;;  %2994 = vst.msk [vmem:[%s5111_s9 + $0x28] sm:$0xf] %vm2983_vm5, %v3890_v7  ;;  %v2333_v13 = vadd.f32 %v2332_v34, %v2331_v57  ;;  %v1999_v29 = vadd.f32 %v1998_v20, %v1997_v46  ;;  %v2000_v44 = vsel %vm652_vm2, %v1728_v26, 0.0  ;;  %v1864_v41 = vpop.permute.xlu1 %1863  ;;  %v1386_v59 = vpop.permute.xlu0 %1385  ;;  %v7473_v46 = vld [vmem:[#allocation52_spill] sm:$0xff] }
 0x1fb   : > { %2993 = vst.msk [vmem:[%s5111_s9 + $0x24] sm:$0xf] %vm2983_vm5, %v3889_v24  ;;  %v2262_v1 = vmul.f32 %v1728_v26, %v1728_v26  ;;  %v2674_v48 = vadd.f32 %v5315_v19, %v1728_v26  ;;  %v2121_v49 = vadd.f32 %v5357_v56, %v2119_v15  ;;  %v2518_v31 = vadd.f32 %v2517_v9, %v2516_v52  ;;  %v7474_v26 = vld [vmem:[#allocation62_spill] sm:$0xff] }
 0x1fc   : > { %v2264_v61 = vmul.f32 %v5402_v11, %v5402_v11  ;;  %v2335_v42 = vadd.f32 %v2334_v39, %v2333_v13  ;;  %v1473_v57 = vadd.f32 %v7472_v55, %v1384_v40  ;;  %v2001_v14 = vadd.f32 %v2000_v44, %v1999_v29  ;;  %v7475_v44 = vld [vmem:[#allocation51_spill] sm:$0xff]  ;;  %v7476_v55 = vld [vmem:[#allocation10_spill] sm:$0xff] }
 0x1fd   : > { %v2336_v24 = vsel %vm652_vm2, %v2262_v1, 0.0  ;;  %v3891_v7 = vpack.c.bf16 %v2674_v48, %v2674_v48  ;;  %1186 = vrot.lane.b32.xlu1 %v7473_v46, %s4218_s25  ;;  %v5519_v52 = vadd.f32 %v5000_v8, %v5435_v51  ;;  %v5523_v34 = vadd.f32 %v5000_v8, %v5399_v47  ;;  %v7489_v15 = vld [vmem:[#allocation58_spill] sm:$0xff] }
 0x1fe   : > { %1673 = vrot.lane.b32.xlu0 %v7474_v26, %s4218_s25  ;;  %v2337_v40 = vadd.f32 %v2336_v24, %v2335_v42  ;;  %v2004_v30 = vsel %vm652_vm2, %v5402_v11, 0.0  ;;  %v2266_v9 = vmul.f32 %v5441_v38, %v5441_v38  ;;  %v2003_v20 = vadd.f32 %v5405_v22, %v2001_v14  ;;  %v1167_v39 = vpop.permute.xlu1 %1166  ;;  %v1866_v13 = vpop.permute.xlu0 %1865  ;;  %v7477_v22 = vld [vmem:[#allocation65_spill] sm:$0xff] }
 0x1ff   : > { %2995 = vst.msk [vmem:[%s5111_s9 + $0x2c] sm:$0xf] %vm2983_vm5, %v3891_v7  ;;  %v2520_v51 = vadd.f32 %v5365_v37, %v2518_v31  ;;  %v5535_v1 = vadd.f32 %v1167_v39, %v7475_v44  ;;  %v2123_v47 = vadd.f32 %v5389_v2, %v2121_v49  ;;  %v2340_v11 = vsel %vm652_vm2, %v2264_v61, 0.0  ;;  %v7478_v14 = vld [vmem:[#allocation13_spill] sm:$0xff] }
 0x200   : > { %v2339_v29 = vadd.f32 %v5408_v10, %v2337_v40  ;;  %v2460_v48 = vmul.f32 %v1473_v57, %v1473_v57  ;;  %v2005_v42 = vadd.f32 %v2004_v30, %v2003_v20  ;;  %v1953_v24 = vadd.f32 %v7476_v55, %v1864_v41 }
 0x201   : > { %1667 = vrot.lane.b32.xlu1 %v4801_v5, %s4218_s25  ;;  %v5547_v10 = vadd.f32 %v5000_v8, %v1473_v57  ;;  %v2683_v2 = vadd.f32 %v5315_v19, %v5535_v1  ;;  %v2008_v41 = vsel %vm652_vm2, %v5441_v38, 0.0  ;;  %v2344_v61 = vsel %vm652_vm2, %v2266_v9, 0.0 }
 0x202   : > { %1188 = vrot.lane.b32.xlu0 %v7477_v22, %s4218_s25  ;;  %v2341_v31 = vadd.f32 %v2340_v11, %v2339_v29  ;;  %v1474_v7 = vadd.f32 %v7478_v14, %v1386_v59  ;;  %v1648_v40 = vpop.permute.xlu1 %1647  ;;  %v1382_v30 = vpop.permute.xlu0 %1381  ;;  %v5558_v20 = vsel %vm2112_vm6, %v1473_v57, 0.0  ;;  %v7479_v29 = vld [vmem:[#allocation53_spill] sm:$0xff]  ;;  %v2125_v11 = vadd.f32 %v5381_v62, %v2123_v47  ;;  %v7480_v59 = vld [vmem:[#allocation67_spill] sm:$0xff]  ;;  %v7481_v62 = vld [vmem:[#allocation14_spill] sm:$0xff] }
 0x203   : > { %v3900_v39 = vpack.c.bf16 %v2683_v2, %v2683_v2  ;;  %v5561_v44 = vadd.f32 %v1648_v40, %v7479_v29  ;;  %v5565_v55 = vsel %vm2112_vm6, %v2460_v48, 0.0  ;;  %v2462_v38 = vmul.f32 %v1953_v24, %v1953_v24  ;;  %v7491_v22 = vld [vmem:[#allocation59_spill] sm:$0xff] }
 0x204   : > { %v2522_v9 = vadd.f32 %v5394_v63, %v2520_v51  ;;  %v2007_v57 = vadd.f32 %v5445_v3, %v2005_v42  ;;  %v5576_v14 = vsel %vm2112_vm6, %v1953_v24, 0.0  ;;  %v1954_v47 = vadd.f32 %v7481_v62, %v1866_v13  ;;  %v7482_v62 = vld [vmem:[#allocation11_spill] sm:$0xff] }
 0x205   : > { %1415 = vrot.lane.b32.xlu1 %v5011_v0, %s4218_s25  ;;  %3004 = vst.msk [vmem:[%s5111_s9 + $0x50] sm:$0xf] %vm2983_vm5, %v3900_v39  ;;  %v2685_v0 = vadd.f32 %v5315_v19, %v5561_v44  ;;  %v5584_v48 = vadd.f32 %v5000_v8, %v1953_v24  ;;  %v5587_v63 = vsel %vm2112_vm6, %v1474_v7, 0.0  ;;  %v2461_v3 = vmul.f32 %v1474_v7, %v1474_v7 }
 0x206   : > { %1669 = vrot.lane.b32.xlu0 %v7480_v59, %s4218_s25  ;;  %v1380_v51 = vpop.permute.xlu1 %1379  ;;  %v1862_v42 = vpop.permute.xlu0 %1861  ;;  %v2009_v40 = vadd.f32 %v2008_v41, %v2007_v57  ;;  %v5590_v29 = vadd.f32 %v5000_v8, %v1474_v7  ;;  %v2271_v13 = vmul.f32 %v5535_v1, %v5535_v1  ;;  %v5598_v24 = vsel %vm2112_vm6, %v2462_v38, 0.0  ;;  %v7483_v41 = vld [vmem:[#allocation95_spill] sm:$0xff] }
 0x207   : > { %v3902_v39 = vpack.c.bf16 %v2685_v0, %v2685_v0  ;;  %v5595_v2 = vadd.f32 %v1380_v51, %v7482_v62  ;;  %v2127_v49 = vadd.f32 %v5411_v12, %v2125_v11  ;;  %v2524_v56 = vadd.f32 %v5384_v25, %v2522_v9  ;;  %v7484_v0 = vld [vmem:[#allocation15_spill] sm:$0xff]  ;;  %v7485_v62 = vld [vmem:[#allocation12_spill] sm:$0xff] }
 0x208   : > { %v2343_v7 = vadd.f32 %v5454_v53, %v2341_v31  ;;  %v2463_v57 = vmul.f32 %v1954_v47, %v1954_v47  ;;  %v1472_v51 = vadd.f32 %v1382_v30, %v7484_v0  ;;  %v7486_v0 = vld [vmem:[#allocation54_spill] sm:$0xff] }
 0x209   : > { %1895 = vrot.lane.b32.xlu1 %v5014_v23, %s4218_s25  ;;  %3006 = vst.msk [vmem:[%s5111_s9 + $0x58] sm:$0xf] %vm2983_vm5, %v3902_v39  ;;  %v2128_v38 = vsel %vm2112_vm6, %v5595_v2, 0.0  ;;  %v2456_v12 = vmul.f32 %v5595_v2, %v5595_v2  ;;  %v5617_v23 = vadd.f32 %v5000_v8, %v1954_v47  ;;  %v5620_v39 = vsel %vm2112_vm6, %v2461_v3, 0.0 }
 0x20a   : > { %1417 = vrot.lane.b32.xlu0 %v7483_v41, %s4218_s25  ;;  %v2129_v11 = vadd.f32 %v2128_v38, %v2127_v49  ;;  %v1860_v9 = vpop.permute.xlu1 %1859  ;;  %v1169_v53 = vpop.permute.xlu0 %1168  ;;  %v2345_v31 = vadd.f32 %v2344_v61, %v2343_v7  ;;  %v5633_v49 = vsel %vm652_vm2, %v5535_v1, 0.0  ;;  %v5636_v61 = vsel %vm2112_vm6, %v1954_v47, 0.0  ;;  %v7487_v7 = vld [vmem:[#allocation96_spill] sm:$0xff] }
 0x20b   : > { %v2527_v30 = vsel %vm2112_vm6, %v2456_v12, 0.0  ;;  %v5624_v41 = vadd.f32 %v1860_v9, %v7485_v62  ;;  %v5627_v37 = vadd.f32 %v1169_v53, %v7486_v0  ;;  %v2526_v3 = vadd.f32 %v5414_v17, %v2524_v56 }
 0x20c   : > { %v5644_v38 = vsel %vm652_vm2, %v2271_v13, 0.0  ;;  %v5647_v12 = vsel %vm2112_vm6, %v2463_v57, 0.0  ;;  %v2130_v1 = vsel %vm2112_vm6, %v1472_v51, 0.0  ;;  %v2457_v9 = vmul.f32 %v1472_v51, %v1472_v51 }
 0x20d   : > { %1198 = vrot.lane.b32.xlu1 %v4881_v27, %s4218_s25  ;;  %v2528_v53 = vadd.f32 %v2527_v30, %v2526_v3  ;;  %v2131_v17 = vadd.f32 %v2130_v1, %v2129_v11  ;;  %v2684_v56 = vadd.f32 %v5315_v19, %v5627_v37  ;;  %v2273_v13 = vmul.f32 %v5561_v44, %v5561_v44  ;;  %v7490_v30 = vld [vmem:[#allocation16_spill] sm:$0xff] }
 0x20e   : > { %1897 = vrot.lane.b32.xlu0 %v7487_v7, %s4218_s25  ;;  %v1163_v62 = vpop.permute.xlu1 %1162  ;;  %v1650_v0 = vpop.permute.xlu0 %1649  ;;  %v2132_v57 = vsel %vm2112_vm6, %v5624_v41, 0.0  ;;  %v7488_v7 = vld [vmem:[#allocation56_spill] sm:$0xff]  ;;  %v5664_v11 = vsel %vm652_vm2, %v5561_v44, 0.0  ;;  %v5667_v3 = vadd.f32 %v1862_v42, %v7490_v30  ;;  %v2458_v1 = vmul.f32 %v5624_v41, %v5624_v41 }
 0x20f   : > { %v1250_v25 = vadd.f32 %v1163_v62, %v7488_v7  ;;  %v5660_v27 = vadd.f32 %v1650_v0, %v7489_v15  ;;  %v3901_v47 = vpack.c.bf16 %v2684_v56, %v2684_v56  ;;  %v2529_v15 = vsel %vm2112_vm6, %v2457_v9, 0.0 }
 0x210   : > { %v5679_v42 = vadd.f32 %v5000_v8, %v1472_v51  ;;  %v2133_v7 = vadd.f32 %v2132_v57, %v2131_v17  ;;  %v2530_v30 = vadd.f32 %v2529_v15, %v2528_v53  ;;  %v2531_v51 = vsel %vm2112_vm6, %v2458_v1, 0.0  ;;  %v7492_v17 = vld [vmem:[#allocation60_spill] sm:$0xff] }
 0x211   : > { %1679 = vrot.lane.b32.xlu1 %v4893_v58, %s4218_s25  ;;  %v2010_v62 = vsel %vm652_vm2, %v1250_v25, 0.0  ;;  %v2267_v0 = vmul.f32 %v1250_v25, %v1250_v25  ;;  %v2679_v44 = vadd.f32 %v5315_v19, %v1250_v25  ;;  %3005 = vst.msk [vmem:[%s5111_s9 + $0x54] sm:$0xf] %vm2983_vm5, %v3901_v47  ;;  %v2686_v9 = vadd.f32 %v5315_v19, %v5660_v27 }
 0x212   : > { %1413 = vrot.lane.b32.xlu0 %v5027_v4, %s4218_s25  ;;  %v2011_v56 = vadd.f32 %v2010_v62, %v2009_v40  ;;  %v1644_v4 = vpop.permute.xlu1 %1643  ;;  %v1165_v59 = vpop.permute.xlu0 %1164  ;;  %v5688_v25 = vsel %vm652_vm2, %v2273_v13, 0.0  ;;  %v2459_v40 = vmul.f32 %v5667_v3, %v5667_v3  ;;  %v2532_v62 = vadd.f32 %v2531_v51, %v2530_v30 }
 0x213   : > { %v2346_v58 = vsel %vm652_vm2, %v2267_v0, 0.0  ;;  %v3896_v5 = vpack.c.bf16 %v2679_v44, %v2679_v44  ;;  %v1731_v46 = vadd.f32 %v1644_v4, %v7491_v22  ;;  %v1251_v57 = vadd.f32 %v1165_v59, %v7492_v17  ;;  %v7493_v17 = vld [vmem:[#allocation61_spill] sm:$0xff] }
 0x214   : > { %v2347_v53 = vadd.f32 %v2346_v58, %v2345_v31  ;;  %v3903_v22 = vpack.c.bf16 %v2686_v9, %v2686_v9  ;;  %v2134_v58 = vsel %vm2112_vm6, %v5667_v3, 0.0  ;;  %v5709_v44 = vadd.f32 %v5000_v8, %v5595_v2 }
 0x215   : > { %1411 = vrot.lane.b32.xlu1 %v5030_v43, %s4218_s25  ;;  %3000 = vst.msk [vmem:[%s5111_s9 + $0x40] sm:$0xf] %vm2983_vm5, %v3896_v5  ;;  %v2269_v47 = vmul.f32 %v1731_v46, %v1731_v46  ;;  %v2681_v13 = vadd.f32 %v5315_v19, %v1731_v46  ;;  %v2012_v59 = vsel %vm652_vm2, %v1251_v57, 0.0  ;;  %v2268_v31 = vmul.f32 %v1251_v57, %v1251_v57 }
 0x216   : > { %1893 = vrot.lane.b32.xlu0 %v5039_v33, %s4218_s25  ;;  %v2680_v43 = vadd.f32 %v5315_v19, %v1251_v57  ;;  %v1392_v1 = vpop.permute.xlu1 %1391  ;;  %v1646_v33 = vpop.permute.xlu0 %1645  ;;  %v2135_v15 = vadd.f32 %v2134_v58, %v2133_v7  ;;  %3007 = vst.msk [vmem:[%s5111_s9 + $0x5c] sm:$0xf] %vm2983_vm5, %v3903_v22  ;;  %v2013_v0 = vadd.f32 %v2012_v59, %v2011_v56  ;;  %v7494_v57 = vld [vmem:[#allocation101_spill] sm:$0xff]  ;;  %v2533_v30 = vsel %vm2112_vm6, %v2459_v40, 0.0 }
 0x217   : > { %v3898_v5 = vpack.c.bf16 %v2681_v13, %v2681_v13  ;;  %v2348_v4 = vsel %vm652_vm2, %v2268_v31, 0.0  ;;  %v1732_v26 = vadd.f32 %v1646_v33, %v7493_v17  ;;  %v7495_v7 = vld [vmem:[#allocation85_spill] sm:$0xff]  ;;  %v2014_v51 = vsel %vm652_vm2, %v1731_v46, 0.0  ;;  %v7497_v17 = vld [vmem:[#allocation75_spill] sm:$0xff] }
 0x218   : > { %v3897_v9 = vpack.c.bf16 %v2680_v43, %v2680_v43  ;;  %v2350_v56 = vsel %vm652_vm2, %v2269_v47, 0.0  ;;  %v2349_v2 = vadd.f32 %v2348_v4, %v2347_v53  ;;  %v2015_v22 = vadd.f32 %v2014_v51, %v2013_v0 }
 0x219   : > { %1891 = vrot.lane.b32.xlu1 %v7494_v57, %s4218_s25  ;;  %3002 = vst.msk [vmem:[%s5111_s9 + $0x48] sm:$0xf] %vm2983_vm5, %v3898_v5  ;;  %v2016_v13 = vsel %vm652_vm2, %v1732_v26, 0.0  ;;  %v2270_v58 = vmul.f32 %v1732_v26, %v1732_v26  ;;  %v2682_v59 = vadd.f32 %v5315_v19, %v1732_v26  ;;  %v2137_v33 = vadd.f32 %v5558_v20, %v2135_v15  ;;  %v7496_v5 = vld [vmem:[#allocation17_spill] sm:$0xff]  ;;  %v7498_v26 = vld [vmem:[#allocation88_spill] sm:$0xff] }
 0x21a   : > { %1200 = vrot.lane.b32.xlu0 %v7495_v7, %s4218_s25  ;;  %3001 = vst.msk [vmem:[%s5111_s9 + $0x44] sm:$0xf] %vm2983_vm5, %v3897_v9  ;;  %v1872_v31 = vpop.permute.xlu1 %1871  ;;  %v1394_v43 = vpop.permute.xlu0 %1393  ;;  %v2534_v40 = vadd.f32 %v2533_v30, %v2532_v62  ;;  %v2272_v46 = vmul.f32 %v5627_v37, %v5627_v37  ;;  %v2351_v47 = vadd.f32 %v2350_v56, %v2349_v2  ;;  %v2020_v30 = vsel %vm652_vm2, %v5627_v37, 0.0  ;;  %v7519_v7 = vld [vmem:[#allocation72_spill] sm:$0xff] }
 0x21b   : > { %v1477_v53 = vadd.f32 %v7496_v5, %v1392_v1  ;;  %v2017_v4 = vadd.f32 %v2016_v13, %v2015_v22  ;;  %v2352_v0 = vsel %vm652_vm2, %v2270_v58, 0.0  ;;  %v3899_v9 = vpack.c.bf16 %v2682_v59, %v2682_v59  ;;  %v7499_v58 = vld [vmem:[#allocation63_spill] sm:$0xff] }
 0x21c   : > { %v5741_v62 = vadd.f32 %v5000_v8, %v5667_v3  ;;  %v2353_v1 = vadd.f32 %v2352_v0, %v2351_v47  ;;  %v5745_v57 = vadd.f32 %v5000_v8, %v5624_v41  ;;  %v2274_v51 = vmul.f32 %v5660_v27, %v5660_v27  ;;  %v7500_v0 = vld [vmem:[#allocation18_spill] sm:$0xff] }
 0x21d   : > { %1194 = vrot.lane.b32.xlu1 %v7497_v17, %s4218_s25  ;;  %v2019_v56 = vadd.f32 %v5633_v49, %v2017_v4  ;;  %3003 = vst.msk [vmem:[%s5111_s9 + $0x4c] sm:$0xf] %vm2983_vm5, %v3899_v9  ;;  %v2536_v3 = vadd.f32 %v5565_v55, %v2534_v40  ;;  %v2139_v41 = vadd.f32 %v5587_v63, %v2137_v33  ;;  %v2356_v37 = vsel %vm652_vm2, %v2272_v46, 0.0  ;;  %v7501_v49 = vld [vmem:[#allocation80_spill] sm:$0xff]  ;;  %v7502_v4 = vld [vmem:[#allocation91_spill] sm:$0xff]  ;;  %v7504_v9 = vld [vmem:[#allocation21_spill] sm:$0xff] }
 0x21e   : > { %1681 = vrot.lane.b32.xlu0 %v7498_v26, %s4218_s25  ;;  %v1175_v2 = vpop.permute.xlu1 %1174  ;;  %v1874_v22 = vpop.permute.xlu0 %1873  ;;  %v2355_v13 = vadd.f32 %v5644_v38, %v2353_v1  ;;  %v2468_v47 = vmul.f32 %v1477_v53, %v1477_v53  ;;  %v1957_v15 = vadd.f32 %v7500_v0, %v1872_v31  ;;  %v5769_v38 = vadd.f32 %v5000_v8, %v1477_v53  ;;  %v7518_v17 = vld [vmem:[#allocation112_spill] sm:$0xff] }
 0x21f   : > { %v5757_v59 = vadd.f32 %v1175_v2, %v7499_v58  ;;  %v2021_v5 = vadd.f32 %v2020_v30, %v2019_v56  ;;  %v2024_v31 = vsel %vm652_vm2, %v5660_v27, 0.0  ;;  %v2360_v46 = vsel %vm652_vm2, %v2274_v51, 0.0  ;;  %v7505_v58 = vld [vmem:[#allocation64_spill] sm:$0xff]  ;;  %v7506_v51 = vld [vmem:[#allocation109_spill] sm:$0xff] }
 0x220   : > { %7503 = vst [vmem:[#allocation7_spill] sm:$0xff] %v5769_v38  ;;  %v2357_v40 = vadd.f32 %v2356_v37, %v2355_v13  ;;  %v1478_v1 = vadd.f32 %v7504_v9, %v1394_v43  ;;  %v5780_v2 = vsel %vm2112_vm6, %v1477_v53, 0.0  ;;  %v2141_v0 = vadd.f32 %v5576_v14, %v2139_v41  ;;  %v7507_v43 = vld [vmem:[#allocation97_spill] sm:$0xff]  ;;  %v7508_v14 = vld [vmem:[#allocation22_spill] sm:$0xff] }
 0x221   : > { %1675 = vrot.lane.b32.xlu1 %v7501_v49, %s4218_s25  ;;  %v2691_v63 = vadd.f32 %v5315_v19, %v5757_v59  ;;  %v5787_v33 = vsel %vm2112_vm6, %v2468_v47, 0.0  ;;  %v2470_v27 = vmul.f32 %v1957_v15, %v1957_v15  ;;  %v2538_v9 = vadd.f32 %v5620_v39, %v2536_v3 }
 0x222   : > { %1196 = vrot.lane.b32.xlu0 %v7502_v4, %s4218_s25  ;;  %v1656_v30 = vpop.permute.xlu1 %1655  ;;  %v1390_v56 = vpop.permute.xlu0 %1389  ;;  %v2023_v53 = vadd.f32 %v5664_v11, %v2021_v5  ;;  %v1958_v41 = vadd.f32 %v7508_v14, %v1874_v22  ;;  %v5809_v39 = vsel %vm2112_vm6, %v1478_v1, 0.0  ;;  %v2469_v11 = vmul.f32 %v1478_v1, %v1478_v1  ;;  %v7510_v14 = vld [vmem:[#allocation19_spill] sm:$0xff] }
 0x223   : > { %v3908_v13 = vpack.c.bf16 %v2691_v63, %v2691_v63  ;;  %v5783_v37 = vadd.f32 %v1656_v30, %v7505_v58  ;;  %v5798_v30 = vsel %vm2112_vm6, %v1957_v15, 0.0  ;;  %v5806_v58 = vadd.f32 %v5000_v8, %v1957_v15 }
 0x224   : > { %v5812_v63 = vadd.f32 %v5000_v8, %v1478_v1  ;;  %v2279_v22 = vmul.f32 %v5757_v59, %v5757_v59  ;;  %v5820_v15 = vsel %vm2112_vm6, %v2470_v27, 0.0  ;;  %v2143_v20 = vadd.f32 %v5636_v61, %v2141_v0 }
 0x225   : > { %1423 = vrot.lane.b32.xlu1 %v7506_v51, %s4218_s25  ;;  %3012 = vst.msk [vmem:[%s5111_s9 + $0x70] sm:$0xf] %vm2983_vm5, %v3908_v13  ;;  %v2693_v47 = vadd.f32 %v5315_v19, %v5783_v37  ;;  %7509 = vst [vmem:[#allocation3_spill] sm:$0xff] %v5806_v58  ;;  %v2025_v51 = vadd.f32 %v2024_v31, %v2023_v53  ;;  %v7511_v31 = vld [vmem:[#allocation110_spill] sm:$0xff]  ;;  %v2359_v1 = vadd.f32 %v5688_v25, %v2357_v40 }
 0x226   : > { %1677 = vrot.lane.b32.xlu0 %v7507_v43, %s4218_s25  ;;  %v1388_v3 = vpop.permute.xlu1 %1387  ;;  %v1870_v5 = vpop.permute.xlu0 %1869  ;;  %v2540_v43 = vadd.f32 %v5598_v24, %v2538_v9  ;;  %v2471_v53 = vmul.f32 %v1958_v41, %v1958_v41  ;;  %v7516_v24 = vld [vmem:[#allocation71_spill] sm:$0xff]  ;;  %v7522_v58 = vld [vmem:[#allocation74_spill] sm:$0xff] }
 0x227   : > { %v3910_v13 = vpack.c.bf16 %v2693_v47, %v2693_v47  ;;  %v5817_v55 = vadd.f32 %v1388_v3, %v7510_v14  ;;  %v7512_v47 = vld [vmem:[#allocation23_spill] sm:$0xff]  ;;  %v2361_v40 = vadd.f32 %v2360_v46, %v2359_v1  ;;  %v7513_v14 = vld [vmem:[#allocation20_spill] sm:$0xff]  ;;  %v5858_v46 = vsel %vm2112_vm6, %v1958_v41, 0.0 }
 0x228   : > { %v1476_v3 = vadd.f32 %v1390_v56, %v7512_v47  ;;  %v7514_v47 = vld [vmem:[#allocation66_spill] sm:$0xff]  ;;  %v5866_v1 = vsel %vm652_vm2, %v2279_v22, 0.0 }
 0x229   : > { %1903 = vrot.lane.b32.xlu1 %v5132_v18, %s4218_s25  ;;  %3014 = vst.msk [vmem:[%s5111_s9 + $0x78] sm:$0xf] %vm2983_vm5, %v3910_v13  ;;  %v2144_v27 = vsel %vm2112_vm6, %v5817_v55, 0.0  ;;  %v2464_v61 = vmul.f32 %v5817_v55, %v5817_v55  ;;  %v5839_v18 = vadd.f32 %v5000_v8, %v1958_v41  ;;  %v5842_v13 = vsel %vm2112_vm6, %v2469_v11, 0.0 }
 0x22a   : > { %1425 = vrot.lane.b32.xlu0 %v7511_v31, %s4218_s25  ;;  %v2145_v0 = vadd.f32 %v2144_v27, %v2143_v20  ;;  %v1868_v9 = vpop.permute.xlu1 %1867  ;;  %v1177_v25 = vpop.permute.xlu0 %1176  ;;  %v5855_v20 = vsel %vm652_vm2, %v5757_v59, 0.0  ;;  %v2542_v11 = vadd.f32 %v5647_v12, %v2540_v43  ;;  %v5869_v27 = vsel %vm2112_vm6, %v2471_v53, 0.0  ;;  %v7515_v53 = vld [vmem:[#allocation69_spill] sm:$0xff] }
 0x22b   : > { %v2543_v56 = vsel %vm2112_vm6, %v2464_v61, 0.0  ;;  %v5846_v31 = vadd.f32 %v1868_v9, %v7513_v14  ;;  %v5849_v49 = vadd.f32 %v1177_v25, %v7514_v47  ;;  %v2146_v59 = vsel %vm2112_vm6, %v1476_v3, 0.0 }
 0x22c   : > { %v2465_v61 = vmul.f32 %v1476_v3, %v1476_v3  ;;  %v2544_v9 = vadd.f32 %v2543_v56, %v2542_v11  ;;  %v2147_v12 = vadd.f32 %v2146_v59, %v2145_v0  ;;  %v5886_v0 = vsel %vm652_vm2, %v5783_v37, 0.0  ;;  %v7517_v56 = vld [vmem:[#allocation24_spill] sm:$0xff] }
 0x22d   : > { %1206 = vrot.lane.b32.xlu1 %v5024_v21, %s4218_s25  ;;  %v2692_v43 = vadd.f32 %v5315_v19, %v5849_v49  ;;  %v2148_v22 = vsel %vm2112_vm6, %v5846_v31, 0.0  ;;  %v5889_v11 = vadd.f32 %v1870_v5, %v7517_v56  ;;  %v2466_v59 = vmul.f32 %v5846_v31, %v5846_v31 }
 0x22e   : > { %1905 = vrot.lane.b32.xlu0 %v5141_v36, %s4218_s25  ;;  %v1171_v25 = vpop.permute.xlu1 %1170  ;;  %v1658_v14 = vpop.permute.xlu0 %1657  ;;  %v2281_v36 = vmul.f32 %v5783_v37, %v5783_v37  ;;  %v5901_v5 = vadd.f32 %v5000_v8, %v1476_v3 }
 0x22f   : > { %v1254_v47 = vadd.f32 %v1171_v25, %v7515_v53  ;;  %v5882_v21 = vadd.f32 %v1658_v14, %v7516_v24  ;;  %v3909_v41 = vpack.c.bf16 %v2692_v43, %v2692_v43  ;;  %v2545_v24 = vsel %vm2112_vm6, %v2465_v61, 0.0 }
 0x230   : > { %v2149_v53 = vadd.f32 %v2148_v22, %v2147_v12  ;;  %v2546_v56 = vadd.f32 %v2545_v24, %v2544_v9  ;;  %v2547_v3 = vsel %vm2112_vm6, %v2466_v59, 0.0  ;;  %v7520_v12 = vld [vmem:[#allocation73_spill] sm:$0xff] }
 0x231   : > { %1687 = vrot.lane.b32.xlu1 %v5044_v16, %s4218_s25  ;;  %v2026_v25 = vsel %vm652_vm2, %v1254_v47, 0.0  ;;  %v2275_v14 = vmul.f32 %v1254_v47, %v1254_v47  ;;  %v2687_v37 = vadd.f32 %v5315_v19, %v1254_v47  ;;  %3013 = vst.msk [vmem:[%s5111_s9 + $0x74] sm:$0xf] %vm2983_vm5, %v3909_v41  ;;  %v2694_v61 = vadd.f32 %v5315_v19, %v5882_v21 }
 0x232   : > { %1421 = vrot.lane.b32.xlu0 %v7518_v17, %s4218_s25  ;;  %v2027_v43 = vadd.f32 %v2026_v25, %v2025_v51  ;;  %v1652_v16 = vpop.permute.xlu1 %1651  ;;  %v1173_v4 = vpop.permute.xlu0 %1172  ;;  %v5910_v47 = vsel %vm652_vm2, %v2281_v36, 0.0  ;;  %v7521_v51 = vld [vmem:[#allocation113_spill] sm:$0xff]  ;;  %v2467_v41 = vmul.f32 %v5889_v11, %v5889_v11 }
 0x233   : > { %v2362_v17 = vsel %vm652_vm2, %v2275_v14, 0.0  ;;  %v3904_v26 = vpack.c.bf16 %v2687_v37, %v2687_v37  ;;  %v1735_v54 = vadd.f32 %v1652_v16, %v7519_v7  ;;  %v1255_v22 = vadd.f32 %v1173_v4, %v7520_v12 }
 0x234   : > { %v2363_v9 = vadd.f32 %v2362_v17, %v2361_v40  ;;  %v3911_v16 = vpack.c.bf16 %v2694_v61, %v2694_v61  ;;  %v2150_v40 = vsel %vm2112_vm6, %v5889_v11, 0.0  ;;  %v2548_v37 = vadd.f32 %v2547_v3, %v2546_v56 }
 0x235   : > { %1419 = vrot.lane.b32.xlu1 %v7521_v51, %s4218_s25  ;;  %3008 = vst.msk [vmem:[%s5111_s9 + $0x60] sm:$0xf] %vm2983_vm5, %v3904_v26  ;;  %v2277_v7 = vmul.f32 %v1735_v54, %v1735_v54  ;;  %v2689_v36 = vadd.f32 %v5315_v19, %v1735_v54  ;;  %v2028_v4 = vsel %vm652_vm2, %v1255_v22, 0.0  ;;  %v2276_v59 = vmul.f32 %v1255_v22, %v1255_v22 }
 0x236   : > { %1901 = vrot.lane.b32.xlu0 %v5144_v60, %s4218_s25  ;;  %v2688_v24 = vadd.f32 %v5315_v19, %v1255_v22  ;;  %v1400_v25 = vpop.permute.xlu1 %1399  ;;  %v1654_v60 = vpop.permute.xlu0 %1653  ;;  %v2151_v14 = vadd.f32 %v2150_v40, %v2149_v53  ;;  %3015 = vst.msk [vmem:[%s5111_s9 + $0x7c] sm:$0xf] %vm2983_vm5, %v3911_v16  ;;  %v2029_v17 = vadd.f32 %v2028_v4, %v2027_v43  ;;  %v2549_v53 = vsel %vm2112_vm6, %v2467_v41, 0.0  ;;  %v7523_v4 = vld [vmem:[#allocation25_spill] sm:$0xff] }
 0x237   : > { %v3906_v26 = vpack.c.bf16 %v2689_v36, %v2689_v36  ;;  %v5931_v61 = vadd.f32 %v5000_v8, %v5817_v55  ;;  %v2364_v12 = vsel %vm652_vm2, %v2276_v59, 0.0  ;;  %v1736_v38 = vadd.f32 %v1654_v60, %v7522_v58 }
 0x238   : > { %v3905_v51 = vpack.c.bf16 %v2688_v24, %v2688_v24  ;;  %v2030_v56 = vsel %vm652_vm2, %v1735_v54, 0.0  ;;  %v2366_v43 = vsel %vm652_vm2, %v2277_v7, 0.0  ;;  %v2365_v55 = vadd.f32 %v2364_v12, %v2363_v9 }
 0x239   : > { %1899 = vrot.lane.b32.xlu1 %v5147_v32, %s4218_s25  ;;  %3010 = vst.msk [vmem:[%s5111_s9 + $0x68] sm:$0xf] %vm2983_vm5, %v3906_v26  ;;  %v2031_v3 = vadd.f32 %v2030_v56, %v2029_v17  ;;  %v2032_v58 = vsel %vm652_vm2, %v1736_v38, 0.0  ;;  %v2278_v22 = vmul.f32 %v1736_v38, %v1736_v38  ;;  %v2690_v32 = vadd.f32 %v5315_v19, %v1736_v38  ;;  %v7547_v38 = vld [vmem:[#allocation87_spill] sm:$0xff] }
 0x23a   : > { %1208 = vrot.lane.b32.xlu0 %v5097_v35, %s4218_s25  ;;  %3009 = vst.msk [vmem:[%s5111_s9 + $0x64] sm:$0xf] %vm2983_vm5, %v3905_v51  ;;  %v1880_v16 = vpop.permute.xlu1 %1879  ;;  %v1402_v36 = vpop.permute.xlu0 %1401  ;;  %v2153_v40 = vadd.f32 %v5780_v2, %v2151_v14  ;;  %v2550_v41 = vadd.f32 %v2549_v53, %v2548_v37  ;;  %v2280_v54 = vmul.f32 %v5849_v49, %v5849_v49  ;;  %v2036_v26 = vsel %vm652_vm2, %v5849_v49, 0.0  ;;  %v7538_v2 = vld [vmem:[#allocation133_spill] sm:$0xff]  ;;  %v7550_v35 = vld [vmem:[#allocation128_spill] sm:$0xff] }
 0x23b   : > { %v2367_v7 = vadd.f32 %v2366_v43, %v2365_v55  ;;  %v1481_v9 = vadd.f32 %v7523_v4, %v1400_v25  ;;  %v2033_v59 = vadd.f32 %v2032_v58, %v2031_v3  ;;  %v2368_v24 = vsel %vm652_vm2, %v2278_v22, 0.0  ;;  %v7525_v43 = vld [vmem:[#allocation76_spill] sm:$0xff]  ;;  %v7526_v22 = vld [vmem:[#allocation26_spill] sm:$0xff]  ;;  %v7530_v4 = vld [vmem:[#allocation29_spill] sm:$0xff] }
 0x23c   : > { %v3907_v60 = vpack.c.bf16 %v2690_v32, %v2690_v32  ;;  %v5963_v14 = vadd.f32 %v5000_v8, %v5889_v11  ;;  %v5967_v37 = vadd.f32 %v5000_v8, %v5846_v31  ;;  %v2282_v17 = vmul.f32 %v5882_v21, %v5882_v21 }
 0x23d   : > { %1202 = vrot.lane.b32.xlu1 %v5067_v50, %s4218_s25  ;;  %v2369_v25 = vadd.f32 %v2368_v24, %v2367_v7  ;;  %v2035_v12 = vadd.f32 %v5855_v20, %v2033_v59  ;;  %v2552_v11 = vadd.f32 %v5787_v33, %v2550_v41  ;;  %v2155_v31 = vadd.f32 %v5809_v39, %v2153_v40  ;;  %v7527_v20 = vld [vmem:[#allocation108_spill] sm:$0xff]  ;;  %v7551_v50 = vld [vmem:[#allocation89_spill] sm:$0xff] }
 0x23e   : > { %1689 = vrot.lane.b32.xlu0 %v5134_v28, %s4218_s25  ;;  %7524 = vst [vmem:[#allocation4_spill] sm:$0xff] %v5967_v37  ;;  %3011 = vst.msk [vmem:[%s5111_s9 + $0x6c] sm:$0xf] %vm2983_vm5, %v3907_v60  ;;  %v1183_v51 = vpop.permute.xlu1 %1182  ;;  %v1882_v53 = vpop.permute.xlu0 %1881  ;;  %v2372_v49 = vsel %vm652_vm2, %v2280_v54, 0.0  ;;  %v2476_v3 = vmul.f32 %v1481_v9, %v1481_v9  ;;  %v1961_v32 = vadd.f32 %v7526_v22, %v1880_v16  ;;  %v7528_v7 = vld [vmem:[#allocation120_spill] sm:$0xff]  ;;  %v2040_v16 = vsel %vm652_vm2, %v5882_v21, 0.0 }
 0x23f   : > { %v2371_v56 = vadd.f32 %v5866_v1, %v2369_v25  ;;  %v5979_v55 = vadd.f32 %v1183_v51, %v7525_v43  ;;  %v2037_v58 = vadd.f32 %v2036_v26, %v2035_v12  ;;  %v5991_v1 = vadd.f32 %v5000_v8, %v1481_v9  ;;  %v7531_v12 = vld [vmem:[#allocation77_spill] sm:$0xff] }
 0x240   : > { %v2376_v54 = vsel %vm652_vm2, %v2282_v17, 0.0  ;;  %v1482_v59 = vadd.f32 %v7530_v4, %v1402_v36  ;;  %v6002_v25 = vsel %vm2112_vm6, %v1481_v9, 0.0  ;;  %v2478_v21 = vmul.f32 %v1961_v32, %v1961_v32  ;;  %v7532_v17 = vld [vmem:[#allocation125_spill] sm:$0xff]  ;;  %v7533_v36 = vld [vmem:[#allocation124_spill] sm:$0xff] }
 0x241   : > { %1683 = vrot.lane.b32.xlu1 %v7527_v20, %s4218_s25  ;;  %7529 = vst [vmem:[#allocation42_spill] sm:$0xff] %v5991_v1  ;;  %v2373_v41 = vadd.f32 %v2372_v49, %v2371_v56  ;;  %v2699_v39 = vadd.f32 %v5315_v19, %v5979_v55  ;;  %v2157_v19 = vadd.f32 %v5798_v30, %v2155_v31  ;;  %v6009_v56 = vsel %vm2112_vm6, %v2476_v3, 0.0  ;;  %v7534_v30 = vld [vmem:[#allocation30_spill] sm:$0xff]  ;;  %v7556_v1 = vld [vmem:[#allocation92_spill] sm:$0xff] }
 0x242   : > { %1204 = vrot.lane.b32.xlu0 %v7528_v7, %s4218_s25  ;;  %v1664_v24 = vpop.permute.xlu1 %1663  ;;  %v1398_v60 = vpop.permute.xlu0 %1397  ;;  %v2554_v43 = vadd.f32 %v5842_v13, %v2552_v11  ;;  %v2039_v9 = vadd.f32 %v5886_v0, %v2037_v58  ;;  %v6020_v22 = vsel %vm2112_vm6, %v1961_v32, 0.0  ;;  %v1962_v31 = vadd.f32 %v7534_v30, %v1882_v53  ;;  %v6028_v3 = vld [vmem:[%s7195_s5] ss:$0 sm:$0xff] }
 0x243   : > { %v3916_v26 = vpack.c.bf16 %v2699_v39, %v2699_v39  ;;  %v6005_v51 = vadd.f32 %v1664_v24, %v7531_v12  ;;  %v6033_v0 = vadd.f32 %v5000_v8, %v1961_v32  ;;  %v6036_v11 = vsel %vm2112_vm6, %v1482_v59, 0.0 }
 0x244   : > { %v2477_v58 = vmul.f32 %v1482_v59, %v1482_v59  ;;  %v2041_v24 = vadd.f32 %v2040_v16, %v2039_v9  ;;  %v6039_v53 = vadd.f32 %v5000_v8, %v1482_v59  ;;  %v6047_v32 = vsel %vm2112_vm6, %v2478_v21, 0.0  ;;  %v7539_v16 = vld [vmem:[#allocation126_spill] sm:$0xff] }
 0x245   : > { %1431 = vrot.lane.b32.xlu1 %v7532_v17, %s4218_s25  ;;  %3020 = vst.msk [vmem:[%s5111_s9 + $0x90] sm:$0xf] %vm2983_vm5, %v3916_v26  ;;  %v2701_v13 = vadd.f32 %v6028_v3, %v6005_v51  ;;  %7535 = vst [vmem:[#allocation79_spill] sm:$0xff] %v6033_v0  ;;  %v2287_v26 = vmul.f32 %v5979_v55, %v5979_v55  ;;  %v7537_v17 = vld [vmem:[#allocation27_spill] sm:$0xff]  ;;  %v2159_v49 = vadd.f32 %v5858_v46, %v2157_v19 }
 0x246   : > { %1685 = vrot.lane.b32.xlu0 %v7533_v36, %s4218_s25  ;;  %v1396_v39 = vpop.permute.xlu1 %1395  ;;  %v1878_v4 = vpop.permute.xlu0 %1877  ;;  %7536 = vst [vmem:[#allocation8_spill] sm:$0xff] %v6039_v53  ;;  %v2556_v40 = vadd.f32 %v5820_v15, %v2554_v43  ;;  %v2375_v59 = vadd.f32 %v5910_v47, %v2373_v41  ;;  %v2479_v9 = vmul.f32 %v1962_v31, %v1962_v31  ;;  %v7549_v36 = vld [vmem:[#allocation39_spill] sm:$0xff] }
 0x247   : > { %v3918_v12 = vpack.c.bf16 %v2701_v13, %v2701_v13  ;;  %v6044_v30 = vadd.f32 %v1396_v39, %v7537_v17  ;;  %v7540_v13 = vld [vmem:[#allocation31_spill] sm:$0xff]  ;;  %v7542_v17 = vld [vmem:[#allocation28_spill] sm:$0xff] }
 0x248   : > { %v1480_v39 = vadd.f32 %v1398_v60, %v7540_v13  ;;  %v2377_v41 = vadd.f32 %v2376_v54, %v2375_v59  ;;  %v7543_v13 = vld [vmem:[#allocation82_spill] sm:$0xff]  ;;  %v6085_v54 = vsel %vm2112_vm6, %v1962_v31, 0.0  ;;  %v7544_v59 = vld [vmem:[#allocation127_spill] sm:$0xff] }
 0x249   : > { %1911 = vrot.lane.b32.xlu1 %v7538_v2, %s4218_s25  ;;  %3022 = vst.msk [vmem:[%s5111_s9 + $0x98] sm:$0xf] %vm2983_vm5, %v3918_v12  ;;  %v2160_v21 = vsel %vm2112_vm6, %v6044_v30, 0.0  ;;  %v2472_v46 = vmul.f32 %v6044_v30, %v6044_v30  ;;  %v6066_v2 = vadd.f32 %v5000_v8, %v1962_v31  ;;  %v6069_v12 = vsel %vm2112_vm6, %v2477_v58, 0.0 }
 0x24a   : > { %1433 = vrot.lane.b32.xlu0 %v7539_v16, %s4218_s25  ;;  %v2161_v19 = vadd.f32 %v2160_v21, %v2159_v49  ;;  %v1876_v43 = vpop.permute.xlu1 %1875  ;;  %v1185_v47 = vpop.permute.xlu0 %1184  ;;  %v6082_v49 = vsel %vm652_vm2, %v5979_v55, 0.0  ;;  %v2558_v58 = vadd.f32 %v5869_v27, %v2556_v40  ;;  %v7545_v21 = vld [vmem:[#allocation134_spill] sm:$0xff]  ;;  %v2162_v55 = vsel %vm2112_vm6, %v1480_v39, 0.0 }
 0x24b   : > { %7541 = vst [vmem:[#allocation43_spill] sm:$0xff] %v6066_v2  ;;  %v2559_v60 = vsel %vm2112_vm6, %v2472_v46, 0.0  ;;  %v6073_v16 = vadd.f32 %v1876_v43, %v7542_v17  ;;  %v6076_v33 = vadd.f32 %v1185_v47, %v7543_v13  ;;  %v6093_v46 = vsel %vm652_vm2, %v2287_v26, 0.0 }
 0x24c   : > { %v6096_v43 = vsel %vm2112_vm6, %v2479_v9, 0.0  ;;  %v2473_v47 = vmul.f32 %v1480_v39, %v1480_v39  ;;  %v2560_v17 = vadd.f32 %v2559_v60, %v2558_v58  ;;  %v2163_v27 = vadd.f32 %v2162_v55, %v2161_v19  ;;  %v7548_v60 = vld [vmem:[#allocation32_spill] sm:$0xff] }
 0x24d   : > { %1427 = vrot.lane.b32.xlu1 %v7544_v59, %s4218_s25  ;;  %v2700_v40 = vadd.f32 %v6028_v3, %v6076_v33  ;;  %v2289_v26 = vmul.f32 %v6005_v51, %v6005_v51  ;;  %v2164_v9 = vsel %vm2112_vm6, %v6073_v16, 0.0  ;;  %v6113_v19 = vsel %vm652_vm2, %v6005_v51, 0.0 }
 0x24e   : > { %1913 = vrot.lane.b32.xlu0 %v7545_v21, %s4218_s25  ;;  %v1179_v13 = vpop.permute.xlu1 %1178  ;;  %v1666_v59 = vpop.permute.xlu0 %1665  ;;  %v7546_v21 = vld [vmem:[#allocation86_spill] sm:$0xff]  ;;  %v6116_v58 = vadd.f32 %v1878_v4, %v7548_v60  ;;  %v2474_v55 = vmul.f32 %v6073_v16, %v6073_v16  ;;  %v6128_v4 = vadd.f32 %v5000_v8, %v1480_v39 }
 0x24f   : > { %v1258_v15 = vadd.f32 %v1179_v13, %v7546_v21  ;;  %v6109_v28 = vadd.f32 %v1666_v59, %v7547_v38  ;;  %v3917_v31 = vpack.c.bf16 %v2700_v40, %v2700_v40  ;;  %v2561_v38 = vsel %vm2112_vm6, %v2473_v47, 0.0 }
 0x250   : > { %v2165_v21 = vadd.f32 %v2164_v9, %v2163_v27  ;;  %v2562_v60 = vadd.f32 %v2561_v38, %v2560_v17  ;;  %v2563_v39 = vsel %vm2112_vm6, %v2474_v55, 0.0  ;;  %v7552_v27 = vld [vmem:[#allocation90_spill] sm:$0xff]  ;;  %v7555_v38 = vld [vmem:[#allocation135_spill] sm:$0xff] }
 0x251   : > { %1907 = vrot.lane.b32.xlu1 %v7549_v36, %s4218_s25  ;;  %v2042_v13 = vsel %vm652_vm2, %v1258_v15, 0.0  ;;  %v2283_v59 = vmul.f32 %v1258_v15, %v1258_v15  ;;  %v2695_v51 = vadd.f32 %v6028_v3, %v1258_v15  ;;  %3021 = vst.msk [vmem:[%s5111_s9 + $0x94] sm:$0xf] %vm2983_vm5, %v3917_v31  ;;  %v2702_v47 = vadd.f32 %v6028_v3, %v6109_v28 }
 0x252   : > { %1429 = vrot.lane.b32.xlu0 %v7550_v35, %s4218_s25  ;;  %v2043_v40 = vadd.f32 %v2042_v13, %v2041_v24  ;;  %v1660_v36 = vpop.permute.xlu1 %1659  ;;  %v1181_v7 = vpop.permute.xlu0 %1180  ;;  %v6137_v15 = vsel %vm652_vm2, %v2289_v26, 0.0  ;;  %v7553_v24 = vld [vmem:[#allocation138_spill] sm:$0xff] }
 0x253   : > { %v2378_v35 = vsel %vm652_vm2, %v2283_v59, 0.0  ;;  %v3912_v20 = vpack.c.bf16 %v2695_v51, %v2695_v51  ;;  %v1739_v0 = vadd.f32 %v1660_v36, %v7551_v50  ;;  %v1259_v31 = vadd.f32 %v1181_v7, %v7552_v27 }
 0x254   : > { %v2379_v17 = vadd.f32 %v2378_v35, %v2377_v41  ;;  %v7554_v9 = vpack.c.bf16 %v7553_v24, %v7553_v24  ;;  %v2475_v50 = vmul.f32 %v6116_v58, %v6116_v58  ;;  %v3919_v26 = vpack.c.bf16 %v2702_v47, %v2702_v47 }
 0x255   : > { %3016 = vst.msk [vmem:[%s5111_s9 + $0x80] sm:$0xf] %vm2983_vm5, %v3912_v20  ;;  %v2285_v55 = vmul.f32 %v1739_v0, %v1739_v0  ;;  %v2697_v41 = vadd.f32 %v6028_v3, %v1739_v0  ;;  %v2166_v7 = vsel %vm2112_vm6, %v6116_v58, 0.0  ;;  %v2044_v13 = vsel %vm652_vm2, %v1259_v31, 0.0 }
 0x256   : > { %3317 = vrot.lane.b32.xlu1 %v7554_v9, %s4219_s14  ;;  %1909 = vrot.lane.b32.xlu0 %v7555_v38, %s4218_s25  ;;  %v2284_v59 = vmul.f32 %v1259_v31, %v1259_v31  ;;  %v2696_v51 = vadd.f32 %v6028_v3, %v1259_v31  ;;  %v1408_v36 = vpop.permute.xlu1 %1407  ;;  %v1662_v35 = vpop.permute.xlu0 %1661  ;;  %v2167_v27 = vadd.f32 %v2166_v7, %v2165_v21  ;;  %v7557_v31 = vld [vmem:[#allocation78_spill] sm:$0xff]  ;;  %v7559_v21 = vld [vmem:[#allocation5_spill] sm:$0xff] }
 0x257   : > { %v2564_v24 = vadd.f32 %v2563_v39, %v2562_v60  ;;  %3023 = vst.msk [vmem:[%s5111_s9 + $0x9c] sm:$0xf] %vm2983_vm5, %v3919_v26  ;;  %v3914_v20 = vpack.c.bf16 %v2697_v41, %v2697_v41  ;;  %v2045_v47 = vadd.f32 %v2044_v13, %v2043_v40  ;;  %v6160_v9 = vadd.f32 %v5000_v8, %v6044_v30 }
 0x258   : > { %v2380_v38 = vsel %vm652_vm2, %v2284_v59, 0.0  ;;  %v3913_v2 = vpack.c.bf16 %v2696_v51, %v2696_v51  ;;  %v1740_v53 = vadd.f32 %v1662_v35, %v7556_v1  ;;  %v7558_v37 = vpack.c.bf16 %v7557_v31, %v7557_v31  ;;  %v7561_v35 = vld [vmem:[#allocation33_spill] sm:$0xff] }
 0x259   : > { %v7560_v60 = vpack.c.bf16 %v7559_v21, %v7559_v21  ;;  %v2565_v40 = vsel %vm2112_vm6, %v2475_v50, 0.0  ;;  %v2046_v30 = vsel %vm652_vm2, %v1739_v0, 0.0  ;;  %v2382_v39 = vsel %vm652_vm2, %v2285_v55, 0.0  ;;  %3018 = vst.msk [vmem:[%s5111_s9 + $0x88] sm:$0xf] %vm2983_vm5, %v3914_v20 }
 0x25a   : > { %3321 = vrot.lane.b32.xlu1 %v7558_v37, %s4219_s14  ;;  %v2381_v26 = vadd.f32 %v2380_v38, %v2379_v17  ;;  %3017 = vst.msk [vmem:[%s5111_s9 + $0x84] sm:$0xf] %vm2983_vm5, %v3913_v2  ;;  %v2047_v1 = vadd.f32 %v2046_v30, %v2045_v47  ;;  %v2048_v41 = vsel %vm652_vm2, %v1740_v53, 0.0  ;;  %v2286_v37 = vmul.f32 %v1740_v53, %v1740_v53  ;;  %v7563_v38 = vld [vmem:[#allocation137_spill] sm:$0xff] }
 0x25b   : > { %3315 = vrot.lane.b32.xlu0 %v7560_v60, %s4219_s14  ;;  %v2698_v7 = vadd.f32 %v6028_v3, %v1740_v53  ;;  %v1888_v13 = vpop.permute.xlu1 %1887  ;;  %v2169_v51 = vadd.f32 %v6002_v25, %v2167_v27  ;;  %v2566_v50 = vadd.f32 %v2565_v40, %v2564_v24  ;;  %v2288_v0 = vmul.f32 %v6076_v33, %v6076_v33 }
 0x25c   : > { %v1410_v59 = vpop.permute.xlu0 %1409  ;;  %v2383_v55 = vadd.f32 %v2382_v39, %v2381_v26  ;;  %v1485_v17 = vadd.f32 %v7561_v35, %v1408_v36  ;;  %v2049_v20 = vadd.f32 %v2048_v41, %v2047_v1  ;;  %v2384_v2 = vsel %vm652_vm2, %v2286_v37, 0.0  ;;  %v7565_v1 = vld [vmem:[#allocation93_spill] sm:$0xff] }
 0x25d   : > { %v3915_v47 = vpack.c.bf16 %v2698_v7, %v2698_v7  ;;  %v7562_v53 = vpack.c.bf16 %v5428_v6, %v5428_v6  ;;  %v7564_v25 = vpack.c.bf16 %v7563_v38, %v7563_v38  ;;  %v3969_v27 = vpack.c.bf16 %v6128_v4, %v6128_v4 }
 0x25e   : > { %v3968_v36 = vpack.c.bf16 %v6160_v9, %v6160_v9  ;;  %v6200_v24 = vadd.f32 %v5000_v8, %v6116_v58  ;;  %v2385_v31 = vadd.f32 %v2384_v2, %v2383_v55  ;;  %v6204_v6 = vadd.f32 %v5000_v8, %v6073_v16  ;;  %v7566_v55 = vld [vmem:[#allocation34_spill] sm:$0xff] }
 0x25f   : > { %3309 = vrot.lane.b32.xlu1 %v7562_v53, %s4219_s14  ;;  %3319 = vrot.lane.b32.xlu0 %v7564_v25, %s4219_s14  ;;  %v2052_v21 = vsel %vm652_vm2, %v6076_v33, 0.0  ;;  %v2290_v60 = vmul.f32 %v6109_v28, %v6109_v28  ;;  %v2051_v40 = vadd.f32 %v6082_v49, %v2049_v20  ;;  %3019 = vst.msk [vmem:[%s5111_s9 + $0x8c] sm:$0xf] %vm2983_vm5, %v3915_v47  ;;  %v1191_v30 = vpop.permute.xlu1 %1190  ;;  %v2388_v33 = vsel %vm652_vm2, %v2288_v0, 0.0  ;;  %v7570_v25 = vld [vmem:[#allocation99_spill] sm:$0xff] }
 0x260   : > { %v1890_v39 = vpop.permute.xlu0 %1889  ;;  %v2568_v58 = vadd.f32 %v6009_v56, %v2566_v50  ;;  %v2387_v26 = vadd.f32 %v6093_v46, %v2385_v31  ;;  %v6216_v41 = vadd.f32 %v1191_v30, %v7565_v1  ;;  %v2171_v16 = vadd.f32 %v6036_v11, %v2169_v51  ;;  %v7573_v1 = vld [vmem:[#allocation38_spill] sm:$0xff] }
 0x261   : > { %v2484_v37 = vmul.f32 %v1485_v17, %v1485_v17  ;;  %v2053_v7 = vadd.f32 %v2052_v21, %v2051_v40  ;;  %v1965_v35 = vadd.f32 %v7566_v55, %v1888_v13  ;;  %v7567_v49 = vpack.c.bf16 %v5519_v52, %v5519_v52 }
 0x262   : > { %v7568_v56 = vpack.c.bf16 %v5487_v45, %v5487_v45  ;;  %v3971_v46 = vpack.c.bf16 %v6200_v24, %v6200_v24  ;;  %v6232_v11 = vadd.f32 %v5000_v8, %v1485_v17  ;;  %v2389_v51 = vadd.f32 %v2388_v33, %v2387_v26  ;;  %v7569_v45 = vld [vmem:[#allocation37_spill] sm:$0xff] }
 0x263   : > { %3313 = vrot.lane.b32.xlu1 %v7567_v49, %s4219_s14  ;;  %v2707_v13 = vadd.f32 %v6028_v3, %v6216_v41  ;;  %v3970_v50 = vpack.c.bf16 %v6204_v6, %v6204_v6  ;;  %v2056_v52 = vsel %vm652_vm2, %v6109_v28, 0.0  ;;  %v2392_v0 = vsel %vm652_vm2, %v2290_v60, 0.0  ;;  %v1672_v2 = vpop.permute.xlu1 %1671  ;;  %v7574_v49 = vld [vmem:[#allocation35_spill] sm:$0xff] }
 0x264   : > { %3307 = vrot.lane.b32.xlu0 %v7568_v56, %s4219_s14  ;;  %v1486_v20 = vadd.f32 %v7569_v45, %v1410_v59  ;;  %v1406_v47 = vpop.permute.xlu0 %1405  ;;  %v6243_v53 = vsel %vm2112_vm6, %v1485_v17, 0.0  ;;  %v6246_v31 = vadd.f32 %v1672_v2, %v7570_v25  ;;  %v2173_v21 = vadd.f32 %v6020_v22, %v2171_v16  ;;  %v7577_v25 = vld [vmem:[#allocation40_spill] sm:$0xff] }
 0x265   : > { %v3924_v38 = vpack.c.bf16 %v2707_v13, %v2707_v13  ;;  %v6250_v40 = vsel %vm2112_vm6, %v2484_v37, 0.0  ;;  %v2486_v28 = vmul.f32 %v1965_v35, %v1965_v35  ;;  %v7571_v60 = vpack.c.bf16 %v5590_v29, %v5590_v29 }
 0x266   : > { %v7572_v59 = vpack.c.bf16 %v5523_v34, %v5523_v34  ;;  %v2570_v17 = vadd.f32 %v6069_v12, %v2568_v58  ;;  %v2055_v30 = vadd.f32 %v6113_v19, %v2053_v7  ;;  %v3980_v22 = vpack.c.bf16 %v6232_v11, %v6232_v11 }
 0x267   : > { %3333 = vrot.lane.b32.xlu1 %v7571_v60, %s4219_s14  ;;  %v6265_v26 = vsel %vm2112_vm6, %v1965_v35, 0.0  ;;  %3028 = vst.msk [vmem:[%s5111_s9 + $0xb0] sm:$0xf] %vm2983_vm5, %v3924_v38  ;;  %v1966_v29 = vadd.f32 %v7573_v1, %v1890_v39  ;;  %v2709_v16 = vadd.f32 %v6028_v3, %v6246_v31  ;;  %v6273_v34 = vadd.f32 %v5000_v8, %v1965_v35  ;;  %v1404_v58 = vpop.permute.xlu1 %1403  ;;  %v7579_v1 = vld [vmem:[#allocation100_spill] sm:$0xff] }
 0x268   : > { %3311 = vrot.lane.b32.xlu0 %v7572_v59, %s4219_s14  ;;  %v6276_v12 = vsel %vm2112_vm6, %v1486_v20, 0.0  ;;  %v2485_v19 = vmul.f32 %v1486_v20, %v1486_v20  ;;  %v1886_v33 = vpop.permute.xlu0 %1885  ;;  %v2057_v37 = vadd.f32 %v2056_v52, %v2055_v30  ;;  %v6279_v7 = vadd.f32 %v5000_v8, %v1486_v20 }
 0x269   : > { %v2295_v39 = vmul.f32 %v6216_v41, %v6216_v41  ;;  %v3926_v55 = vpack.c.bf16 %v2709_v16, %v2709_v16  ;;  %v6284_v56 = vadd.f32 %v1404_v58, %v7574_v49  ;;  %v6287_v35 = vsel %vm2112_vm6, %v2486_v28, 0.0 }
 0x26a   : > { %v2175_v13 = vadd.f32 %v6085_v54, %v2173_v21  ;;  %v2572_v45 = vadd.f32 %v6047_v32, %v2570_v17  ;;  %v7575_v52 = vpack.c.bf16 %v5617_v23, %v5617_v23  ;;  %v7576_v20 = vpack.c.bf16 %v5547_v10, %v5547_v10  ;;  %v7578_v17 = vld [vmem:[#allocation36_spill] sm:$0xff] }
 0x26b   : > { %v2391_v2 = vadd.f32 %v6137_v15, %v2389_v51  ;;  %v2487_v38 = vmul.f32 %v1966_v29, %v1966_v29  ;;  %3030 = vst.msk [vmem:[%s5111_s9 + $0xb8] sm:$0xf] %vm2983_vm5, %v3926_v55  ;;  %v1484_v28 = vadd.f32 %v1406_v47, %v7577_v25  ;;  %v2176_v32 = vsel %vm2112_vm6, %v6284_v56, 0.0  ;;  %v1884_v60 = vpop.permute.xlu1 %1883 }
 0x26c   : > { %3337 = vrot.lane.b32.xlu1 %v7575_v52, %s4219_s14  ;;  %3331 = vrot.lane.b32.xlu0 %v7576_v20, %s4219_s14  ;;  %v2480_v54 = vmul.f32 %v6284_v56, %v6284_v56  ;;  %v6310_v21 = vadd.f32 %v5000_v8, %v1966_v29  ;;  %v2177_v10 = vadd.f32 %v2176_v32, %v2175_v13  ;;  %v1193_v15 = vpop.permute.xlu0 %1192  ;;  %v6313_v59 = vsel %vm2112_vm6, %v2485_v19, 0.0  ;;  %v7582_v32 = vld [vmem:[#allocation94_spill] sm:$0xff] }
 0x26d   : > { %v2393_v51 = vadd.f32 %v2392_v0, %v2391_v2  ;;  %v6317_v30 = vadd.f32 %v1884_v60, %v7578_v17  ;;  %v6320_v16 = vadd.f32 %v1193_v15, %v7579_v1  ;;  %v3981_v58 = vpack.c.bf16 %v6279_v7, %v6279_v7  ;;  %v7583_v60 = vld [vmem:[#allocation103_spill] sm:$0xff] }
 0x26e   : > { %v2575_v47 = vsel %vm2112_vm6, %v2480_v54, 0.0  ;;  %v6326_v55 = vsel %vm652_vm2, %v6216_v41, 0.0  ;;  %v6329_v0 = vsel %vm2112_vm6, %v1966_v29, 0.0  ;;  %v2574_v19 = vadd.f32 %v6096_v43, %v2572_v45 }
 0x26f   : > { %v7580_v49 = vpack.c.bf16 %v5679_v42, %v5679_v42  ;;  %v7581_v13 = vpack.c.bf16 %v5584_v48, %v5584_v48  ;;  %v6341_v52 = vsel %vm652_vm2, %v2295_v39, 0.0  ;;  %v6344_v41 = vsel %vm2112_vm6, %v2487_v38, 0.0  ;;  %v1187_v25 = vpop.permute.xlu1 %1186 }
 0x270   : > { %v2178_v29 = vsel %vm2112_vm6, %v1484_v28, 0.0  ;;  %v2481_v20 = vmul.f32 %v1484_v28, %v1484_v28  ;;  %v2576_v45 = vadd.f32 %v2575_v47, %v2574_v19  ;;  %v2708_v2 = vadd.f32 %v6028_v3, %v6320_v16  ;;  %v1674_v48 = vpop.permute.xlu0 %1673  ;;  %v7584_v47 = vld [vmem:[#allocation44_spill] sm:$0xff] }
 0x271   : > { %3325 = vrot.lane.b32.xlu1 %v7580_v49, %s4219_s14  ;;  %3335 = vrot.lane.b32.xlu0 %v7581_v13, %s4219_s14  ;;  %v2179_v42 = vadd.f32 %v2178_v29, %v2177_v10  ;;  %v2297_v39 = vmul.f32 %v6246_v31, %v6246_v31  ;;  %v2180_v38 = vsel %vm2112_vm6, %v6317_v30, 0.0  ;;  %v1262_v54 = vadd.f32 %v1187_v25, %v7582_v32 }
 0x272   : > { %v6357_v15 = vadd.f32 %v1674_v48, %v7583_v60  ;;  %v6361_v10 = vsel %vm652_vm2, %v6246_v31, 0.0  ;;  %v6364_v17 = vadd.f32 %v1886_v33, %v7584_v47  ;;  %v2482_v1 = vmul.f32 %v6317_v30, %v6317_v30 }
 0x273   : > { %v3925_v19 = vpack.c.bf16 %v2708_v2, %v2708_v2  ;;  %v7585_v49 = vpack.c.bf16 %v5741_v62, %v5741_v62  ;;  %v7586_v13 = vpack.c.bf16 %v5709_v44, %v5709_v44  ;;  %v2577_v31 = vsel %vm2112_vm6, %v2481_v20, 0.0  ;;  %v1668_v60 = vpop.permute.xlu1 %1667 }
 0x274   : > { %v2058_v29 = vsel %vm652_vm2, %v1262_v54, 0.0  ;;  %v2291_v33 = vmul.f32 %v1262_v54, %v1262_v54  ;;  %v2703_v25 = vadd.f32 %v6028_v3, %v1262_v54  ;;  %v6380_v48 = vadd.f32 %v5000_v8, %v1484_v28  ;;  %v1189_v47 = vpop.permute.xlu0 %1188 }
 0x275   : > { %3329 = vrot.lane.b32.xlu1 %v7585_v49, %s4219_s14  ;;  %3323 = vrot.lane.b32.xlu0 %v7586_v13, %s4219_s14  ;;  %v2181_v2 = vadd.f32 %v2180_v38, %v2179_v42  ;;  %v2578_v32 = vadd.f32 %v2577_v31, %v2576_v45  ;;  %3029 = vst.msk [vmem:[%s5111_s9 + $0xb4] sm:$0xf] %vm2983_vm5, %v3925_v19  ;;  %v7587_v13 = vld [vmem:[#allocation104_spill] sm:$0xff]  ;;  %v6389_v54 = vsel %vm652_vm2, %v2297_v39, 0.0  ;;  %v2579_v28 = vsel %vm2112_vm6, %v2482_v1, 0.0  ;;  %v7588_v42 = vld [vmem:[#allocation105_spill] sm:$0xff] }
 0x276   : > { %v2059_v62 = vadd.f32 %v2058_v29, %v2057_v37  ;;  %v2394_v44 = vsel %vm652_vm2, %v2291_v33, 0.0  ;;  %v3920_v49 = vpack.c.bf16 %v2703_v25, %v2703_v25  ;;  %v2710_v20 = vadd.f32 %v6028_v3, %v6357_v15 }
 0x277   : > { %v1743_v23 = vadd.f32 %v1668_v60, %v7587_v13  ;;  %v2395_v45 = vadd.f32 %v2394_v44, %v2393_v51  ;;  %v1263_v38 = vadd.f32 %v1189_v47, %v7588_v42  ;;  %v7589_v37 = vpack.c.bf16 %v5812_v63, %v5812_v63  ;;  %v1416_v60 = vpop.permute.xlu1 %1415 }
 0x278   : > { %v7590_v19 = vpack.c.bf16 %v5745_v57, %v5745_v57  ;;  %v2483_v39 = vmul.f32 %v6364_v17, %v6364_v17  ;;  %3024 = vst.msk [vmem:[%s5111_s9 + $0xa0] sm:$0xf] %vm2983_vm5, %v3920_v49  ;;  %v3927_v1 = vpack.c.bf16 %v2710_v20, %v2710_v20  ;;  %v2182_v29 = vsel %vm2112_vm6, %v6364_v17, 0.0  ;;  %v1670_v57 = vpop.permute.xlu0 %1669 }
 0x279   : > { %3349 = vrot.lane.b32.xlu1 %v7589_v37, %s4219_s14  ;;  %v2293_v51 = vmul.f32 %v1743_v23, %v1743_v23  ;;  %v2705_v31 = vadd.f32 %v6028_v3, %v1743_v23  ;;  %v2060_v63 = vsel %vm652_vm2, %v1263_v38, 0.0  ;;  %v2292_v33 = vmul.f32 %v1263_v38, %v1263_v38 }
 0x27a   : > { %3327 = vrot.lane.b32.xlu0 %v7590_v19, %s4219_s14  ;;  %v2704_v25 = vadd.f32 %v6028_v3, %v1263_v38  ;;  %v2183_v47 = vadd.f32 %v2182_v29, %v2181_v2  ;;  %v2580_v44 = vadd.f32 %v2579_v28, %v2578_v32  ;;  %3031 = vst.msk [vmem:[%s5111_s9 + $0xbc] sm:$0xf] %vm2983_vm5, %v3927_v1  ;;  %v7591_v19 = vld [vmem:[#allocation106_spill] sm:$0xff]  ;;  %v7593_v2 = vld [vmem:[#allocation7_spill] sm:$0xff] }
 0x27b   : > { %v3922_v49 = vpack.c.bf16 %v2705_v31, %v2705_v31  ;;  %v2061_v20 = vadd.f32 %v2060_v63, %v2059_v62  ;;  %v6414_v13 = vadd.f32 %v5000_v8, %v6284_v56  ;;  %v2396_v42 = vsel %vm652_vm2, %v2292_v33, 0.0  ;;  %v1896_v33 = vpop.permute.xlu1 %1895 }
 0x27c   : > { %v3921_v37 = vpack.c.bf16 %v2704_v25, %v2704_v25  ;;  %v1744_v43 = vadd.f32 %v1670_v57, %v7591_v19  ;;  %v7592_v38 = vpack.c.bf16 %v5839_v18, %v5839_v18  ;;  %v7594_v32 = vpack.c.bf16 %v7593_v2, %v7593_v2  ;;  %v1418_v25 = vpop.permute.xlu0 %1417  ;;  %v7597_v19 = vld [vmem:[#allocation3_spill] sm:$0xff] }
 0x27d   : > { %v2581_v62 = vsel %vm2112_vm6, %v2483_v39, 0.0  ;;  %v2062_v56 = vsel %vm652_vm2, %v1743_v23, 0.0  ;;  %v2398_v28 = vsel %vm652_vm2, %v2293_v51, 0.0  ;;  %3026 = vst.msk [vmem:[%s5111_s9 + $0xa8] sm:$0xf] %vm2983_vm5, %v3922_v49  ;;  %v2397_v1 = vadd.f32 %v2396_v42, %v2395_v45  ;;  %v7595_v49 = vld [vmem:[#allocation45_spill] sm:$0xff] }
 0x27e   : > { %3353 = vrot.lane.b32.xlu1 %v7592_v38, %s4219_s14  ;;  %3347 = vrot.lane.b32.xlu0 %v7594_v32, %s4219_s14  ;;  %3025 = vst.msk [vmem:[%s5111_s9 + $0xa4] sm:$0xf] %vm2983_vm5, %v3921_v37  ;;  %v2063_v31 = vadd.f32 %v2062_v56, %v2061_v20  ;;  %v2064_v18 = vsel %vm652_vm2, %v1744_v43, 0.0  ;;  %v2294_v29 = vmul.f32 %v1744_v43, %v1744_v43  ;;  %v2068_v2 = vsel %vm652_vm2, %v6320_v16, 0.0 }
 0x27f   : > { %v2706_v63 = vadd.f32 %v6028_v3, %v1744_v43  ;;  %v2185_v57 = vadd.f32 %v6243_v53, %v2183_v47  ;;  %v2582_v39 = vadd.f32 %v2581_v62, %v2580_v44  ;;  %v2296_v23 = vmul.f32 %v6320_v16, %v6320_v16  ;;  %v1199_v56 = vpop.permute.xlu1 %1198 }
 0x280   : > { %v2399_v51 = vadd.f32 %v2398_v28, %v2397_v1  ;;  %v1489_v45 = vadd.f32 %v7595_v49, %v1416_v60  ;;  %v2065_v42 = vadd.f32 %v2064_v18, %v2063_v31  ;;  %v2400_v20 = vsel %vm652_vm2, %v2294_v29, 0.0  ;;  %v1898_v28 = vpop.permute.xlu0 %1897  ;;  %v7599_v31 = vld [vmem:[#allocation114_spill] sm:$0xff] }
 0x281   : > { %v3923_v37 = vpack.c.bf16 %v2706_v63, %v2706_v63  ;;  %v7596_v43 = vpack.c.bf16 %v5901_v5, %v5901_v5  ;;  %v7598_v53 = vpack.c.bf16 %v7597_v19, %v7597_v19  ;;  %v3977_v47 = vpack.c.bf16 %v6380_v48, %v6380_v48 }
 0x282   : > { %v3976_v60 = vpack.c.bf16 %v6414_v13, %v6414_v13  ;;  %v6454_v44 = vadd.f32 %v5000_v8, %v6364_v17  ;;  %v2401_v38 = vadd.f32 %v2400_v20, %v2399_v51  ;;  %v6458_v5 = vadd.f32 %v5000_v8, %v6317_v30  ;;  %v7600_v51 = vld [vmem:[#allocation49_spill] sm:$0xff] }
 0x283   : > { %3341 = vrot.lane.b32.xlu1 %v7596_v43, %s4219_s14  ;;  %3351 = vrot.lane.b32.xlu0 %v7598_v53, %s4219_s14  ;;  %v2298_v32 = vmul.f32 %v6357_v15, %v6357_v15  ;;  %v2067_v62 = vadd.f32 %v6326_v55, %v2065_v42  ;;  %3027 = vst.msk [vmem:[%s5111_s9 + $0xac] sm:$0xf] %vm2983_vm5, %v3923_v37  ;;  %v2404_v16 = vsel %vm652_vm2, %v2296_v23, 0.0  ;;  %v1680_v20 = vpop.permute.xlu1 %1679  ;;  %v6497_v43 = vsel %vm2112_vm6, %v1489_v45, 0.0  ;;  %v7604_v53 = vld [vmem:[#allocation119_spill] sm:$0xff] }
 0x284   : > { %v2584_v17 = vadd.f32 %v6250_v40, %v2582_v39  ;;  %v2403_v1 = vadd.f32 %v6341_v52, %v2401_v38  ;;  %v6470_v18 = vadd.f32 %v1199_v56, %v7599_v31  ;;  %v2187_v30 = vadd.f32 %v6276_v12, %v2185_v57  ;;  %v1414_v37 = vpop.permute.xlu0 %1413 }
 0x285   : > { %v2492_v29 = vmul.f32 %v1489_v45, %v1489_v45  ;;  %v2069_v63 = vadd.f32 %v2068_v2, %v2067_v62  ;;  %v1969_v49 = vadd.f32 %v7600_v51, %v1896_v33  ;;  %v7601_v55 = vpack.c.bf16 %v5963_v14, %v5963_v14 }
 0x286   : > { %v7602_v40 = vpack.c.bf16 %v5931_v61, %v5931_v61  ;;  %v3979_v52 = vpack.c.bf16 %v6454_v44, %v6454_v44  ;;  %v6486_v12 = vadd.f32 %v5000_v8, %v1489_v45  ;;  %v2405_v57 = vadd.f32 %v2404_v16, %v2403_v1  ;;  %v7603_v61 = vld [vmem:[#allocation57_spill] sm:$0xff]  ;;  %v7609_v16 = vld [vmem:[#allocation62_spill] sm:$0xff] }
 0x287   : > { %3345 = vrot.lane.b32.xlu1 %v7601_v55, %s4219_s14  ;;  %v2715_v33 = vadd.f32 %v6028_v3, %v6470_v18  ;;  %v3978_v39 = vpack.c.bf16 %v6458_v5, %v6458_v5  ;;  %v2072_v14 = vsel %vm652_vm2, %v6357_v15, 0.0  ;;  %v2408_v23 = vsel %vm652_vm2, %v2298_v32, 0.0  ;;  %v7605_v32 = vld [vmem:[#allocation4_spill] sm:$0xff] }
 0x288   : > { %3339 = vrot.lane.b32.xlu0 %v7602_v40, %s4219_s14  ;;  %v1490_v42 = vadd.f32 %v7603_v61, %v1418_v25  ;;  %v6500_v38 = vadd.f32 %v1680_v20, %v7604_v53  ;;  %v2189_v2 = vadd.f32 %v6265_v26, %v2187_v30  ;;  %v6504_v62 = vsel %vm2112_vm6, %v2492_v29, 0.0  ;;  %v7607_v25 = vld [vmem:[#allocation8_spill] sm:$0xff] }
 0x289   : > { %v3932_v19 = vpack.c.bf16 %v2715_v33, %v2715_v33  ;;  %v2494_v15 = vmul.f32 %v1969_v49, %v1969_v49  ;;  %v7606_v56 = vpack.c.bf16 %v7605_v32, %v7605_v32  ;;  %v7608_v45 = vpack.c.bf16 %v7607_v25, %v7607_v25  ;;  %v7610_v20 = vld [vmem:[#allocation52_spill] sm:$0xff] }
 0x28a   : > { %v2586_v1 = vadd.f32 %v6313_v59, %v2584_v17  ;;  %v2071_v31 = vadd.f32 %v6361_v10, %v2069_v63  ;;  %v6519_v30 = vsel %vm2112_vm6, %v1969_v49, 0.0  ;;  %v1970_v29 = vadd.f32 %v7609_v16, %v1898_v28  ;;  %v1412_v17 = vpop.permute.xlu1 %1411  ;;  %v1894_v63 = vpop.permute.xlu0 %1893 }
 0x28b   : > { %3365 = vrot.lane.b32.xlu1 %v7608_v45, %s4219_s14  ;;  %3036 = vst.msk [vmem:[%s5111_s9 + $0xd0] sm:$0xf] %vm2983_vm5, %v3932_v19  ;;  %v2717_v51 = vadd.f32 %v6028_v3, %v6500_v38  ;;  %v6527_v55 = vadd.f32 %v5000_v8, %v1969_v49  ;;  %v6530_v59 = vsel %vm2112_vm6, %v1490_v42, 0.0  ;;  %v2493_v10 = vmul.f32 %v1490_v42, %v1490_v42 }
 0x28c   : > { %3343 = vrot.lane.b32.xlu0 %v7606_v56, %s4219_s14  ;;  %v2073_v40 = vadd.f32 %v2072_v14, %v2071_v31  ;;  %v6533_v33 = vadd.f32 %v5000_v8, %v1490_v42  ;;  %v2303_v28 = vmul.f32 %v6470_v18, %v6470_v18  ;;  %v6538_v19 = vadd.f32 %v1412_v17, %v7610_v20  ;;  %v7611_v56 = vld [vmem:[#allocation42_spill] sm:$0xff]  ;;  %v7613_v42 = vld [vmem:[#allocation43_spill] sm:$0xff] }
 0x28d   : > { %v3934_v61 = vpack.c.bf16 %v2717_v51, %v2717_v51  ;;  %v6541_v49 = vsel %vm2112_vm6, %v2494_v15, 0.0  ;;  %v2191_v53 = vadd.f32 %v6329_v0, %v2189_v2  ;;  %v2588_v32 = vadd.f32 %v6287_v35, %v2586_v1  ;;  %v7615_v15 = vld [vmem:[#allocation65_spill] sm:$0xff]  ;;  %v7616_v20 = vld [vmem:[#allocation55_spill] sm:$0xff] }
 0x28e   : > { %v7612_v14 = vpack.c.bf16 %v7611_v56, %v7611_v56  ;;  %v7614_v25 = vpack.c.bf16 %v7613_v42, %v7613_v42  ;;  %v2407_v45 = vadd.f32 %v6389_v54, %v2405_v57  ;;  %v2495_v31 = vmul.f32 %v1970_v29, %v1970_v29  ;;  %v1892_v17 = vpop.permute.xlu1 %1891  ;;  %v1201_v54 = vpop.permute.xlu0 %1200 }
 0x28f   : > { %3038 = vst.msk [vmem:[%s5111_s9 + $0xd8] sm:$0xf] %vm2983_vm5, %v3934_v61  ;;  %v1488_v16 = vadd.f32 %v1414_v37, %v7615_v15  ;;  %v2192_v35 = vsel %vm2112_vm6, %v6538_v19, 0.0  ;;  %v2488_v0 = vmul.f32 %v6538_v19, %v6538_v19  ;;  %v6564_v1 = vadd.f32 %v5000_v8, %v1970_v29 }
 0x290   : > { %3363 = vrot.lane.b32.xlu0 %v7612_v14, %s4219_s14  ;;  %3369 = vrot.lane.b32.xlu1 %v7614_v25, %s4219_s14  ;;  %v2193_v51 = vadd.f32 %v2192_v35, %v2191_v53  ;;  %v2409_v57 = vadd.f32 %v2408_v23, %v2407_v45  ;;  %v6567_v61 = vsel %vm2112_vm6, %v2493_v10, 0.0  ;;  %v6571_v56 = vadd.f32 %v1892_v17, %v7616_v20  ;;  %v7617_v14 = vld [vmem:[#allocation115_spill] sm:$0xff] }
 0x291   : > { %v2591_v37 = vsel %vm2112_vm6, %v2488_v0, 0.0  ;;  %v6574_v42 = vadd.f32 %v1201_v54, %v7617_v14  ;;  %v3989_v25 = vpack.c.bf16 %v6533_v33, %v6533_v33  ;;  %v6580_v53 = vsel %vm652_vm2, %v6470_v18, 0.0  ;;  %v7618_v45 = vld [vmem:[#allocation79_spill] sm:$0xff]  ;;  %v7633_v33 = vld [vmem:[#allocation88_spill] sm:$0xff] }
 0x292   : > { %v6583_v23 = vsel %vm2112_vm6, %v1970_v29, 0.0  ;;  %v2590_v10 = vadd.f32 %v6344_v41, %v2588_v32  ;;  %v7619_v15 = vpack.c.bf16 %v7618_v45, %v7618_v45  ;;  %v6595_v35 = vsel %vm652_vm2, %v2303_v28, 0.0  ;;  %v1195_v20 = vpop.permute.xlu1 %1194  ;;  %v1682_v4 = vpop.permute.xlu0 %1681  ;;  %v7621_v45 = vld [vmem:[#allocation121_spill] sm:$0xff]  ;;  %v7623_v41 = vld [vmem:[#allocation122_spill] sm:$0xff] }
 0x293   : > { %v6598_v18 = vsel %vm2112_vm6, %v2495_v31, 0.0  ;;  %v2194_v29 = vsel %vm2112_vm6, %v1488_v16, 0.0  ;;  %v2489_v0 = vmul.f32 %v1488_v16, %v1488_v16  ;;  %v2716_v54 = vadd.f32 %v6028_v3, %v6574_v42  ;;  %v7620_v31 = vld [vmem:[#allocation116_spill] sm:$0xff] }
 0x294   : > { %3367 = vrot.lane.b32.xlu0 %v7619_v15, %s4219_s14  ;;  %3357 = vrot.lane.b32.xlu1 %v3969_v27, %s4219_s14  ;;  %v2592_v32 = vadd.f32 %v2591_v37, %v2590_v10  ;;  %v2195_v17 = vadd.f32 %v2194_v29, %v2193_v51  ;;  %v2305_v27 = vmul.f32 %v6500_v38, %v6500_v38  ;;  %v2196_v28 = vsel %vm2112_vm6, %v6571_v56, 0.0  ;;  %v7622_v37 = vld [vmem:[#allocation67_spill] sm:$0xff] }
 0x295   : > { %v1266_v14 = vadd.f32 %v1195_v20, %v7620_v31  ;;  %v6611_v15 = vadd.f32 %v1682_v4, %v7621_v45  ;;  %v6615_v51 = vsel %vm652_vm2, %v6500_v38, 0.0  ;;  %v6618_v10 = vadd.f32 %v1894_v63, %v7622_v37 }
 0x296   : > { %v2490_v29 = vmul.f32 %v6571_v56, %v6571_v56  ;;  %v3933_v2 = vpack.c.bf16 %v2716_v54, %v2716_v54  ;;  %v2593_v38 = vsel %vm2112_vm6, %v2489_v0, 0.0  ;;  %v6634_v31 = vadd.f32 %v5000_v8, %v1488_v16  ;;  %v1197_v37 = vpop.permute.xlu0 %1196 }
 0x297   : > { %v2074_v20 = vsel %vm652_vm2, %v1266_v14, 0.0  ;;  %v2299_v63 = vmul.f32 %v1266_v14, %v1266_v14  ;;  %v2711_v4 = vadd.f32 %v6028_v3, %v1266_v14  ;;  %v2197_v54 = vadd.f32 %v2196_v28, %v2195_v17  ;;  %v7624_v17 = vld [vmem:[#allocation117_spill] sm:$0xff] }
 0x298   : > { %3355 = vrot.lane.b32.xlu0 %v3968_v36, %s4219_s14  ;;  %3361 = vrot.lane.b32.xlu1 %v3971_v46, %s4219_s14  ;;  %v2594_v45 = vadd.f32 %v2593_v38, %v2592_v32  ;;  %3037 = vst.msk [vmem:[%s5111_s9 + $0xd4] sm:$0xf] %vm2983_vm5, %v3933_v2  ;;  %v2075_v9 = vadd.f32 %v2074_v20, %v2073_v40  ;;  %v1676_v36 = vpop.permute.xlu1 %1675  ;;  %v6643_v14 = vsel %vm652_vm2, %v2305_v27, 0.0  ;;  %v2595_v16 = vsel %vm2112_vm6, %v2490_v29, 0.0 }
 0x299   : > { %v2410_v24 = vsel %vm652_vm2, %v2299_v63, 0.0  ;;  %v3928_v46 = vpack.c.bf16 %v2711_v4, %v2711_v4  ;;  %v2718_v0 = vadd.f32 %v6028_v3, %v6611_v15  ;;  %v1747_v26 = vadd.f32 %v1676_v36, %v7623_v41 }
 0x29a   : > { %v2411_v32 = vadd.f32 %v2410_v24, %v2409_v57  ;;  %v1267_v28 = vadd.f32 %v1197_v37, %v7624_v17  ;;  %v2491_v40 = vmul.f32 %v6618_v10, %v6618_v10  ;;  %v2198_v27 = vsel %vm2112_vm6, %v6618_v10, 0.0  ;;  %v1678_v7 = vpop.permute.xlu0 %1677 }
 0x29b   : > { %3032 = vst.msk [vmem:[%s5111_s9 + $0xc0] sm:$0xf] %vm2983_vm5, %v3928_v46  ;;  %v3935_v2 = vpack.c.bf16 %v2718_v0, %v2718_v0  ;;  %v2301_v57 = vmul.f32 %v1747_v26, %v1747_v26  ;;  %v2713_v41 = vadd.f32 %v6028_v3, %v1747_v26  ;;  %v2596_v20 = vadd.f32 %v2595_v16, %v2594_v45  ;;  %v7625_v46 = vld [vmem:[#allocation123_spill] sm:$0xff] }
 0x29c   : > { %3359 = vrot.lane.b32.xlu0 %v3970_v50, %s4219_s14  ;;  %3381 = vrot.lane.b32.xlu1 %v3981_v58, %s4219_s14  ;;  %v2076_v6 = vsel %vm652_vm2, %v1267_v28, 0.0  ;;  %v2300_v50 = vmul.f32 %v1267_v28, %v1267_v28  ;;  %v2712_v29 = vadd.f32 %v6028_v3, %v1267_v28  ;;  %v1424_v38 = vpop.permute.xlu1 %1423  ;;  %v2199_v58 = vadd.f32 %v2198_v27, %v2197_v54  ;;  %v7627_v27 = vld [vmem:[#allocation68_spill] sm:$0xff] }
 0x29d   : > { %3039 = vst.msk [vmem:[%s5111_s9 + $0xdc] sm:$0xf] %vm2983_vm5, %v3935_v2  ;;  %v3930_v63 = vpack.c.bf16 %v2713_v41, %v2713_v41  ;;  %v2077_v4 = vadd.f32 %v2076_v6, %v2075_v9  ;;  %v6668_v36 = vadd.f32 %v5000_v8, %v6538_v19  ;;  %v1748_v0 = vadd.f32 %v1678_v7, %v7625_v46  ;;  %v7629_v46 = vld [vmem:[#allocation129_spill] sm:$0xff] }
 0x29e   : > { %v2412_v37 = vsel %vm652_vm2, %v2300_v50, 0.0  ;;  %v3929_v24 = vpack.c.bf16 %v2712_v29, %v2712_v29  ;;  %v7626_v54 = vpack.c.bf16 %v6310_v21, %v6310_v21  ;;  %v2597_v45 = vsel %vm2112_vm6, %v2491_v40, 0.0  ;;  %v1426_v21 = vpop.permute.xlu0 %1425 }
 0x29f   : > { %v2078_v19 = vsel %vm652_vm2, %v1747_v26, 0.0  ;;  %v2414_v9 = vsel %vm652_vm2, %v2301_v57, 0.0  ;;  %3034 = vst.msk [vmem:[%s5111_s9 + $0xc8] sm:$0xf] %vm2983_vm5, %v3930_v63  ;;  %v2413_v16 = vadd.f32 %v2412_v37, %v2411_v32  ;;  %v2080_v11 = vsel %vm652_vm2, %v1748_v0, 0.0 }
 0x2a0   : > { %3379 = vrot.lane.b32.xlu0 %v3980_v22, %s4219_s14  ;;  %3385 = vrot.lane.b32.xlu1 %v7626_v54, %s4219_s14  ;;  %3033 = vst.msk [vmem:[%s5111_s9 + $0xc4] sm:$0xf] %vm2983_vm5, %v3929_v24  ;;  %v2079_v17 = vadd.f32 %v2078_v19, %v2077_v4  ;;  %v2302_v22 = vmul.f32 %v1748_v0, %v1748_v0  ;;  %v1904_v2 = vpop.permute.xlu1 %1903  ;;  %v2084_v63 = vsel %vm652_vm2, %v6574_v42, 0.0  ;;  %v7630_v19 = vld [vmem:[#allocation70_spill] sm:$0xff] }
 0x2a1   : > { %v2714_v28 = vadd.f32 %v6028_v3, %v1748_v0  ;;  %v2201_v41 = vadd.f32 %v6497_v43, %v2199_v58  ;;  %v2598_v40 = vadd.f32 %v2597_v45, %v2596_v20  ;;  %v2304_v26 = vmul.f32 %v6574_v42, %v6574_v42 }
 0x2a2   : > { %v2415_v57 = vadd.f32 %v2414_v9, %v2413_v16  ;;  %v1493_v32 = vadd.f32 %v7627_v27, %v1424_v38  ;;  %v2081_v6 = vadd.f32 %v2080_v11, %v2079_v17  ;;  %v2416_v50 = vsel %vm652_vm2, %v2302_v22, 0.0  ;;  %v1906_v37 = vpop.permute.xlu0 %1905 }
 0x2a3   : > { %v3931_v29 = vpack.c.bf16 %v2714_v28, %v2714_v28  ;;  %v7628_v7 = vpack.c.bf16 %v6273_v34, %v6273_v34  ;;  %v3985_v43 = vpack.c.bf16 %v6634_v31, %v6634_v31  ;;  %v3984_v38 = vpack.c.bf16 %v6668_v36, %v6668_v36 }
 0x2a4   : > { %3373 = vrot.lane.b32.xlu1 %v3977_v47, %s4219_s14  ;;  %v6708_v58 = vadd.f32 %v5000_v8, %v6618_v10  ;;  %v2417_v20 = vadd.f32 %v2416_v50, %v2415_v57  ;;  %v6712_v34 = vadd.f32 %v5000_v8, %v6571_v56  ;;  %v2306_v48 = vmul.f32 %v6611_v15, %v6611_v15  ;;  %v1207_v4 = vpop.permute.xlu1 %1206 }
 0x2a5   : > { %3383 = vrot.lane.b32.xlu0 %v7628_v7, %s4219_s14  ;;  %v2083_v47 = vadd.f32 %v6580_v53, %v2081_v6  ;;  %3035 = vst.msk [vmem:[%s5111_s9 + $0xcc] sm:$0xf] %vm2983_vm5, %v3931_v29  ;;  %v2600_v10 = vadd.f32 %v6504_v62, %v2598_v40  ;;  %v6724_v0 = vadd.f32 %v1207_v4, %v7629_v46  ;;  %v2420_v42 = vsel %vm652_vm2, %v2304_v26, 0.0  ;;  %v7631_v53 = vld [vmem:[#allocation85_spill] sm:$0xff] }
 0x2a6   : > { %v2419_v24 = vadd.f32 %v6595_v35, %v2417_v20  ;;  %v2203_v56 = vadd.f32 %v6530_v59, %v2201_v41  ;;  %v2500_v54 = vmul.f32 %v1493_v32, %v1493_v32  ;;  %v1973_v9 = vadd.f32 %v7630_v19, %v1904_v2  ;;  %v1422_v11 = vpop.permute.xlu0 %1421  ;;  %v7632_v2 = vld [vmem:[#allocation2_spill] sm:$0xff] }
 0x2a7   : > { %v2085_v45 = vadd.f32 %v2084_v63, %v2083_v47  ;;  %v6738_v62 = vadd.f32 %v5000_v8, %v1493_v32  ;;  %v1494_v35 = vadd.f32 %v7631_v53, %v1426_v21  ;;  %v2723_v16 = vadd.f32 %v6028_v3, %v6724_v0  ;;  %v7635_v63 = vld [vmem:[#allocation75_spill] sm:$0xff]  ;;  %v7638_v53 = vld [vmem:[#allocation80_spill] sm:$0xff] }
 0x2a8   : > { %3377 = vrot.lane.b32.xlu1 %v3979_v52, %s4219_s14  ;;  %v2421_v59 = vadd.f32 %v2420_v42, %v2419_v24  ;;  %v3987_v17 = vpack.c.bf16 %v6708_v58, %v6708_v58  ;;  %v3986_v13 = vpack.c.bf16 %v6712_v34, %v6712_v34  ;;  %v2424_v44 = vsel %vm652_vm2, %v2306_v48, 0.0  ;;  %v1688_v52 = vpop.permute.xlu1 %1687 }
 0x2a9   : > { %3371 = vrot.lane.b32.xlu0 %v3976_v60, %s4219_s14  ;;  %v2088_v60 = vsel %vm652_vm2, %v6611_v15, 0.0  ;;  %v6751_v22 = vsel %vm2112_vm6, %v1493_v32, 0.0  ;;  %v3940_v28 = vpack.c.bf16 %v2723_v16, %v2723_v16  ;;  %v6754_v21 = vadd.f32 %v1688_v52, %v7632_v2  ;;  %v7639_v16 = vld [vmem:[#allocation130_spill] sm:$0xff] }
 0x2aa   : > { %v2205_v41 = vadd.f32 %v6519_v30, %v2203_v56  ;;  %v6758_v40 = vsel %vm2112_vm6, %v2500_v54, 0.0  ;;  %v2502_v26 = vmul.f32 %v1973_v9, %v1973_v9  ;;  %v2602_v15 = vadd.f32 %v6567_v61, %v2600_v10  ;;  %v1902_v50 = vpop.permute.xlu0 %1901 }
 0x2ab   : > { %v2087_v57 = vadd.f32 %v6615_v51, %v2085_v45  ;;  %v3996_v30 = vpack.c.bf16 %v6738_v62, %v6738_v62  ;;  %v6773_v27 = vadd.f32 %v5000_v8, %v1973_v9  ;;  %v6776_v32 = vadd.f32 %v5000_v8, %v1494_v35  ;;  %3044 = vst.msk [vmem:[%s5111_s9 + $0xf0] sm:$0xf] %vm2983_vm5, %v3940_v28  ;;  %v7640_v28 = vld [vmem:[#allocation97_spill] sm:$0xff] }
 0x2ac   : > { %3397 = vrot.lane.b32.xlu1 %v3989_v25, %s4219_s14  ;;  %v2725_v5 = vadd.f32 %v6028_v3, %v6754_v21  ;;  %v6786_v61 = vadd.f32 %v7633_v33, %v1906_v37  ;;  %v7634_v25 = vld [vmem:[#allocation91_spill] sm:$0xff]  ;;  %v1420_v6 = vpop.permute.xlu1 %1419  ;;  %v6790_v7 = vsel %vm2112_vm6, %v1494_v35, 0.0  ;;  %v2604_v3 = vadd.f32 %v6541_v49, %v2602_v15 }
 0x2ad   : > { %3375 = vrot.lane.b32.xlu0 %v3978_v39, %s4219_s14  ;;  %v6783_v39 = vsel %vm2112_vm6, %v1973_v9, 0.0  ;;  %v1492_v51 = vadd.f32 %v1422_v11, %v7634_v25  ;;  %v2089_v29 = vadd.f32 %v2088_v60, %v2087_v57  ;;  %v6793_v48 = vadd.f32 %v1420_v6, %v7635_v63  ;;  %v7642_v6 = vld [vmem:[#allocation131_spill] sm:$0xff] }
 0x2ae   : > { %v3942_v20 = vpack.c.bf16 %v2725_v5, %v2725_v5  ;;  %v6797_v47 = vsel %vm2112_vm6, %v2502_v26, 0.0  ;;  %v2501_v4 = vmul.f32 %v1494_v35, %v1494_v35  ;;  %v2207_v37 = vadd.f32 %v6583_v23, %v2205_v41  ;;  %v1209_v45 = vpop.permute.xlu0 %1208 }
 0x2af   : > { %v7636_v10 = vpack.c.bf16 %v6486_v12, %v6486_v12  ;;  %v7637_v24 = vpack.c.bf16 %v6564_v1, %v6564_v1  ;;  %v2423_v46 = vadd.f32 %v6643_v14, %v2421_v59  ;;  %v3998_v49 = vpack.c.bf16 %v6773_v27, %v6773_v27 }
 0x2b0   : > { %v3997_v56 = vpack.c.bf16 %v6776_v32, %v6776_v32  ;;  %3046 = vst.msk [vmem:[%s5111_s9 + $0xf8] sm:$0xf] %vm2983_vm5, %v3942_v20  ;;  %v2208_v23 = vsel %vm2112_vm6, %v6793_v48, 0.0  ;;  %v2496_v12 = vmul.f32 %v6793_v48, %v6793_v48  ;;  %v6821_v1 = vadd.f32 %v5000_v8, %v6786_v61  ;;  %v1900_v54 = vpop.permute.xlu1 %1899  ;;  %v7643_v20 = vld [vmem:[#allocation6_spill] sm:$0xff] }
 0x2b1   : > { %3395 = vrot.lane.b32.xlu0 %v7636_v10, %s4219_s14  ;;  %3401 = vrot.lane.b32.xlu1 %v7637_v24, %s4219_s14  ;;  %v2210_v14 = vsel %vm2112_vm6, %v1492_v51, 0.0  ;;  %v2209_v42 = vadd.f32 %v2208_v23, %v2207_v37  ;;  %v2425_v19 = vadd.f32 %v2424_v44, %v2423_v46  ;;  %v2606_v9 = vadd.f32 %v6598_v18, %v2604_v3 }
 0x2b2   : > { %v2607_v59 = vsel %vm2112_vm6, %v2496_v12, 0.0  ;;  %v6827_v35 = vadd.f32 %v1900_v54, %v7638_v53  ;;  %v6830_v60 = vadd.f32 %v1209_v45, %v7639_v16  ;;  %v6833_v52 = vsel %vm2112_vm6, %v2501_v4, 0.0  ;;  %v1690_v33 = vpop.permute.xlu0 %1689 }
 0x2b3   : > { %v2497_v11 = vmul.f32 %v1492_v51, %v1492_v51  ;;  %v1972_v2 = vadd.f32 %v1902_v50, %v7640_v28  ;;  %v2211_v41 = vadd.f32 %v2210_v14, %v2209_v42  ;;  %v7641_v44 = vpack.c.bf16 %v6527_v55, %v6527_v55  ;;  %v7645_v28 = vld [vmem:[#allocation132_spill] sm:$0xff] }
 0x2b4   : > { %v6846_v18 = vsel %vm652_vm2, %v6724_v0, 0.0  ;;  %v6850_v26 = vmul.f32 %v6724_v0, %v6724_v0  ;;  %v2608_v15 = vadd.f32 %v2607_v59, %v2606_v9  ;;  %v2212_v57 = vsel %vm2112_vm6, %v6827_v35, 0.0  ;;  %v1203_v5 = vpop.permute.xlu1 %1202  ;;  %v7644_v9 = vld [vmem:[#allocation41_spill] sm:$0xff] }
 0x2b5   : > { %3399 = vrot.lane.b32.xlu0 %v7641_v44, %s4219_s14  ;;  %3389 = vrot.lane.b32.xlu1 %v3985_v43, %s4219_s14  ;;  %v6855_v55 = vadd.f32 %v5000_v8, %v1492_v51  ;;  %v2213_v32 = vadd.f32 %v2212_v57, %v2211_v41  ;;  %v2498_v31 = vmul.f32 %v6827_v35, %v6827_v35  ;;  %v6862_v43 = vld [vmem:[%s7195_s5] ss:$0 sm:$0xff]  ;;  %v2609_v4 = vsel %vm2112_vm6, %v2497_v11, 0.0 }
 0x2b6   : > { %v2724_v0 = vadd.f32 %v6862_v43, %v6830_v60  ;;  %v6868_v25 = vmul.f32 %v6786_v61, %v6786_v61  ;;  %v3999_v51 = vpack.c.bf16 %v6821_v1, %v6821_v1  ;;  %v1270_v50 = vadd.f32 %v1203_v5, %v7642_v6  ;;  %v1205_v54 = vpop.permute.xlu0 %1204 }
 0x2b7   : > { %v6874_v63 = vadd.f32 %v1690_v33, %v7643_v20  ;;  %v6878_v3 = vmul.f32 %v6754_v21, %v6754_v21  ;;  %v2214_v37 = vsel %vm2112_vm6, %v1972_v2, 0.0  ;;  %v2610_v24 = vadd.f32 %v2609_v4, %v2608_v15 }
 0x2b8   : > { %v3941_v10 = vpack.c.bf16 %v2724_v0, %v2724_v0  ;;  %v2090_v46 = vsel %vm652_vm2, %v1270_v50, 0.0  ;;  %v2307_v23 = vmul.f32 %v1270_v50, %v1270_v50  ;;  %v2719_v12 = vadd.f32 %v6862_v43, %v1270_v50  ;;  %v7646_v50 = vld [vmem:[#allocation136_spill] sm:$0xff] }
 0x2b9   : > { %3387 = vrot.lane.b32.xlu0 %v3984_v38, %s4219_s14  ;;  %3393 = vrot.lane.b32.xlu1 %v3987_v17, %s4219_s14  ;;  %v3993_v1 = vpack.c.bf16 %v6855_v55, %v6855_v55  ;;  %v2215_v14 = vadd.f32 %v2214_v37, %v2213_v32  ;;  %v2611_v42 = vsel %vm2112_vm6, %v2498_v31, 0.0  ;;  %v2091_v36 = vadd.f32 %v2090_v46, %v2089_v29  ;;  %v1684_v38 = vpop.permute.xlu1 %1683 }
 0x2ba   : > { %3045 = vst.msk [vmem:[%s5111_s9 + $0xf4] sm:$0xf] %vm2983_vm5, %v3941_v10  ;;  %v2426_v58 = vsel %vm652_vm2, %v2307_v23, 0.0  ;;  %v3936_v17 = vpack.c.bf16 %v2719_v12, %v2719_v12  ;;  %v2726_v45 = vadd.f32 %v6862_v43, %v6874_v63  ;;  %v1751_v59 = vadd.f32 %v1684_v38, %v7644_v9 }
 0x2bb   : > { %v6903_v53 = vsel %vm2112_vm6, %v6786_v61, 0.0  ;;  %v2499_v16 = vmul.f32 %v1972_v2, %v1972_v2  ;;  %v2427_v11 = vadd.f32 %v2426_v58, %v2425_v19  ;;  %v1271_v41 = vadd.f32 %v1205_v54, %v7645_v28  ;;  %v7648_v28 = vld [vmem:[#allocation98_spill] sm:$0xff] }
 0x2bc   : > { %v2612_v29 = vadd.f32 %v2611_v42, %v2610_v24  ;;  %3040 = vst.msk [vmem:[%s5111_s9 + $0xe0] sm:$0xf] %vm2983_vm5, %v3936_v17  ;;  %v3943_v44 = vpack.c.bf16 %v2726_v45, %v2726_v45  ;;  %v2309_v15 = vmul.f32 %v1751_v59, %v1751_v59  ;;  %v2721_v61 = vadd.f32 %v6862_v43, %v1751_v59 }
 0x2bd   : > { %3391 = vrot.lane.b32.xlu0 %v3986_v13, %s4219_s14  ;;  %3413 = vrot.lane.b32.xlu1 %v3997_v56, %s4219_s14  ;;  %v3099_v19 = vadd.f32 %v5000_v8, %v6793_v48  ;;  %v2092_v57 = vsel %vm652_vm2, %v1271_v41, 0.0  ;;  %v2308_v55 = vmul.f32 %v1271_v41, %v1271_v41  ;;  %v2720_v32 = vadd.f32 %v6862_v43, %v1271_v41  ;;  %v1432_v34 = vpop.permute.xlu1 %1431  ;;  %v1686_v13 = vpop.permute.xlu0 %1685 }
 0x2be   : > { %v3102_v56 = vadd.f32 %v5000_v8, %v1972_v2  ;;  %v2217_v31 = vadd.f32 %v6751_v22, %v2215_v14  ;;  %3047 = vst.msk [vmem:[%s5111_s9 + $0xfc] sm:$0xf] %vm2983_vm5, %v3943_v44  ;;  %v3938_v0 = vpack.c.bf16 %v2721_v61, %v2721_v61  ;;  %v2093_v5 = vadd.f32 %v2092_v57, %v2091_v36 }
 0x2bf   : > { %v2613_v33 = vsel %vm2112_vm6, %v2499_v16, 0.0  ;;  %v2428_v48 = vsel %vm652_vm2, %v2308_v55, 0.0  ;;  %v3937_v6 = vpack.c.bf16 %v2720_v32, %v2720_v32  ;;  %v1752_v20 = vadd.f32 %v1686_v13, %v7646_v50 }
 0x2c0   : > { %v2614_v2 = vadd.f32 %v2613_v33, %v2612_v29  ;;  %v2094_v22 = vsel %vm652_vm2, %v1751_v59, 0.0  ;;  %v2430_v4 = vsel %vm652_vm2, %v2309_v15, 0.0  ;;  %3042 = vst.msk [vmem:[%s5111_s9 + $0xe8] sm:$0xf] %vm2983_vm5, %v3938_v0  ;;  %v2429_v37 = vadd.f32 %v2428_v48, %v2427_v11  ;;  %v7650_v0 = vld [vmem:[#allocation120_spill] sm:$0xff]  ;;  %v7651_v33 = vld [vmem:[#allocation102_spill] sm:$0xff] }
 0x2c1   : > { %3411 = vrot.lane.b32.xlu0 %v3996_v30, %s4219_s14  ;;  %3417 = vrot.lane.b32.xlu1 %v3999_v51, %s4219_s14  ;;  %3041 = vst.msk [vmem:[%s5111_s9 + $0xe4] sm:$0xf] %vm2983_vm5, %v3937_v6  ;;  %v2095_v10 = vadd.f32 %v2094_v22, %v2093_v5  ;;  %v2096_v24 = vsel %vm652_vm2, %v1752_v20, 0.0  ;;  %v2310_v46 = vmul.f32 %v1752_v20, %v1752_v20  ;;  %v1912_v62 = vpop.permute.xlu1 %1911  ;;  %v1434_v30 = vpop.permute.xlu0 %1433  ;;  %v2434_v51 = vsel %vm652_vm2, %v6850_v26, 0.0 }
 0x2c2   : > { %v2722_v23 = vadd.f32 %v6862_v43, %v1752_v20  ;;  %v2621_v12 = vsel %vm2112_vm6, %v6868_v25, 0.0  ;;  %v2431_v14 = vadd.f32 %v2430_v4, %v2429_v37  ;;  %v2219_v42 = vadd.f32 %v6790_v7, %v2217_v31 }
 0x2c3   : > { %v2312_v36 = vmul.f32 %v6830_v60, %v6830_v60  ;;  %v2097_v38 = vadd.f32 %v2096_v24, %v2095_v10  ;;  %v2432_v54 = vsel %vm652_vm2, %v2310_v46, 0.0  ;;  %v2102_v26 = vsel %vm652_vm2, %v6754_v21, 0.0 }
 0x2c4   : > { %v3939_v58 = vpack.c.bf16 %v2722_v23, %v2722_v23  ;;  %v2616_v43 = vadd.f32 %v6758_v40, %v2614_v2  ;;  %v3101_v7 = vadd.f32 %v5000_v8, %v6827_v35  ;;  %v2433_v25 = vadd.f32 %v2432_v54, %v2431_v14  ;;  %v7652_v2 = vld [vmem:[#allocation111_spill] sm:$0xff] }
 0x2c5   : > { %3415 = vrot.lane.b32.xlu0 %v3998_v49, %s4219_s14  ;;  %3405 = vrot.lane.b32.xlu1 %v3993_v1, %s4219_s14  ;;  %v2438_v17 = vsel %vm652_vm2, %v6878_v3, 0.0  ;;  %v3992_v45 = vpack.c.bf16 %v3099_v19, %v3099_v19  ;;  %v3995_v9 = vpack.c.bf16 %v3102_v56, %v3102_v56  ;;  %v2099_v59 = vadd.f32 %v6846_v18, %v2097_v38  ;;  %v1428_v27 = vpop.permute.xlu1 %1427  ;;  %v6961_v49 = vpop.permute.xlu0 %1913  ;;  %v7647_v1 = vld [vmem:[#allocation107_spill] sm:$0xff]  ;;  %v7649_v56 = vld [vmem:[#allocation108_spill] sm:$0xff] }
 0x2c6   : > { %3043 = vst.msk [vmem:[%s5111_s9 + $0xec] sm:$0xf] %vm2983_vm5, %v3939_v58  ;;  %v2100_v21 = vsel %vm652_vm2, %v6830_v60, 0.0  ;;  %v2435_v40 = vadd.f32 %v2434_v51, %v2433_v25  ;;  %v1495_v16 = vadd.f32 %v1428_v27, %v7647_v1  ;;  %v2221_v35 = vadd.f32 %v6783_v39, %v2219_v42 }
 0x2c7   : > { %v2436_v11 = vsel %vm652_vm2, %v2312_v36, 0.0  ;;  %v2314_v3 = vmul.f32 %v6874_v63, %v6874_v63  ;;  %v6971_v18 = vadd.f32 %v7648_v28, %v1432_v34  ;;  %v2101_v41 = vadd.f32 %v2100_v21, %v2099_v59 }
 0x2c8   : > { %v3994_v60 = vpack.c.bf16 %v3101_v7, %v3101_v7  ;;  %v2437_v29 = vadd.f32 %v2436_v11, %v2435_v40  ;;  %v2504_v44 = vmul.f32 %v1495_v16, %v1495_v16  ;;  %v2618_v15 = vadd.f32 %v6833_v52, %v2616_v43 }
 0x2c9   : > { %3403 = vrot.lane.b32.xlu0 %v3992_v45, %s4219_s14  ;;  %3409 = vrot.lane.b32.xlu1 %v3995_v9, %s4219_s14  ;;  %v2104_v39 = vsel %vm652_vm2, %v6874_v63, 0.0  ;;  %v2224_v61 = vsel %vm2112_vm6, %v1495_v16, 0.0  ;;  %v3107_v19 = vadd.f32 %v5000_v8, %v1495_v16  ;;  %v1908_v57 = vpop.permute.xlu1 %1907  ;;  %v1430_v55 = vpop.permute.xlu0 %1429  ;;  %v2103_v32 = vadd.f32 %v2102_v26, %v2101_v41 }
 0x2ca   : > { %v2223_v34 = vadd.f32 %v6903_v53, %v2221_v35  ;;  %v2620_v13 = vadd.f32 %v6797_v47, %v2618_v15  ;;  %v1975_v31 = vadd.f32 %v1908_v57, %v7649_v56  ;;  %v1496_v5 = vadd.f32 %v1430_v55, %v7650_v0  ;;  %v7654_v35 = vld [vmem:[#allocation118_spill] sm:$0xff] }
 0x2cb   : > { %v2440_v52 = vsel %vm652_vm2, %v2314_v3, 0.0  ;;  %v2508_v63 = vmul.f32 %v6971_v18, %v6971_v18  ;;  %v6995_v48 = vadd.f32 %v7651_v33, %v1912_v62  ;;  %v2623_v47 = vsel %vm2112_vm6, %v2504_v44, 0.0 }
 0x2cc   : > { %v2225_v53 = vadd.f32 %v2224_v61, %v2223_v34  ;;  %v2622_v6 = vadd.f32 %v2621_v12, %v2620_v13  ;;  %v2506_v50 = vmul.f32 %v1975_v31, %v1975_v31  ;;  %v3109_v20 = vadd.f32 %v5000_v8, %v1975_v31 }
 0x2cd   : > { %3407 = vrot.lane.b32.xlu0 %v3994_v60, %s4219_s14  ;;  %v7001_v22 = vadd.f32 %v7652_v2, %v1434_v30  ;;  %v4000_v4 = vpack.c.bf16 %v3107_v19, %v3107_v19  ;;  %v2226_v37 = vsel %vm2112_vm6, %v1496_v5, 0.0  ;;  %v2505_v10 = vmul.f32 %v1496_v5, %v1496_v5  ;;  %v3318_v24 = vpop.permute.xlu1 %3317  ;;  %v1910_v46 = vpop.permute.xlu0 %1909  ;;  %v7653_v30 = vld [vmem:[#allocation124_spill] sm:$0xff] }
 0x2ce   : > { %v2624_v23 = vadd.f32 %v2623_v47, %v2622_v6  ;;  %v2228_v62 = vsel %vm2112_vm6, %v1975_v31, 0.0  ;;  %v2627_v51 = vsel %vm2112_vm6, %v2506_v50, 0.0  ;;  %v2227_v14 = vadd.f32 %v2226_v37, %v2225_v53  ;;  %3504 = vst.msk [vmem:[%s6989_s19 + $0x14] sm:$0xf] %vm2983_vm5, %v3318_v24 }
 0x2cf   : > { %v2625_v12 = vsel %vm2112_vm6, %v2505_v10, 0.0  ;;  %v3108_v42 = vadd.f32 %v5000_v8, %v1496_v5  ;;  %v1976_v36 = vadd.f32 %v1910_v46, %v7653_v30  ;;  %v7012_v38 = vadd.f32 %v2104_v39, %v2103_v32 }
 0x2d0   : > { %v4002_v54 = vpack.c.bf16 %v3109_v20, %v3109_v20  ;;  %v2626_v58 = vadd.f32 %v2625_v12, %v2624_v23  ;;  %v2229_v26 = vadd.f32 %v2228_v62, %v2227_v14  ;;  %v2439_v43 = vadd.f32 %v2438_v17, %v2437_v29 }
 0x2d1   : > { %3419 = vrot.lane.b32.xlu0 %v4000_v4, %s4219_s14  ;;  %v4001_v7 = vpack.c.bf16 %v3108_v42, %v3108_v42  ;;  %v2230_v25 = vsel %vm2112_vm6, %v1976_v36, 0.0  ;;  %v2507_v45 = vmul.f32 %v1976_v36, %v1976_v36  ;;  %v3110_v9 = vadd.f32 %v5000_v8, %v1976_v36  ;;  %v3322_v59 = vpop.permute.xlu1 %3321  ;;  %v3316_v27 = vpop.permute.xlu0 %3315 }
 0x2d2   : > { %v2232_v21 = vsel %vm2112_vm6, %v6971_v18, 0.0  ;;  %v2628_v40 = vadd.f32 %v2627_v51, %v2626_v58  ;;  %v2231_v1 = vadd.f32 %v2230_v25, %v2229_v26  ;;  %3506 = vst.msk [vmem:[%s6989_s19 + $0x1c] sm:$0xf] %vm2983_vm5, %v3322_v59  ;;  %3503 = vst.msk [vmem:[%s6989_s19 + $0x10] sm:$0xf] %vm2983_vm5, %v3316_v27  ;;  %v7022_v16 = vadd.f32 %v2440_v52, %v2439_v43 }
 0x2d3   : > { %v2509_v17 = vmul.f32 %v7001_v22, %v7001_v22  ;;  %v1978_v11 = vadd.f32 %v7654_v35, %v6961_v49  ;;  %v2629_v3 = vsel %vm2112_vm6, %v2507_v45, 0.0  ;;  %v4003_v28 = vpack.c.bf16 %v3110_v9, %v3110_v9  ;;  %3421 = vrot.lane.b32.xlu1 %v4001_v7, %s4219_s14 }
 0x2d4   : > { %v2233_v41 = vadd.f32 %v2232_v21, %v2231_v1  ;;  %v2630_v60 = vadd.f32 %v2629_v3, %v2628_v40  ;;  %v2631_v29 = vsel %vm2112_vm6, %v2508_v63, 0.0  ;;  %v2510_v44 = vmul.f32 %v6995_v48, %v6995_v48 }
 0x2d5   : > { %3423 = vrot.lane.b32.xlu0 %v4002_v54, %s4219_s14  ;;  %v2234_v15 = vsel %vm2112_vm6, %v7001_v22, 0.0  ;;  %v3310_v39 = vpop.permute.xlu1 %3309  ;;  %v3320_v61 = vpop.permute.xlu0 %3319  ;;  %v2236_v57 = vsel %vm2112_vm6, %v6995_v48, 0.0  ;;  %v2633_v55 = vsel %vm2112_vm6, %v2509_v17, 0.0  ;;  %v2511_v32 = vmul.f32 %v1978_v11, %v1978_v11 }
 0x2d6   : > { %v2235_v49 = vadd.f32 %v2234_v15, %v2233_v41  ;;  %v2632_v19 = vadd.f32 %v2631_v29, %v2630_v60  ;;  %3500 = vst.msk [vmem:[%s6989_s19 + $0x4] sm:$0xf] %vm2983_vm5, %v3310_v39  ;;  %3505 = vst.msk [vmem:[%s6989_s19 + $0x18] sm:$0xf] %vm2983_vm5, %v3320_v61  ;;  %v2635_v56 = vsel %vm2112_vm6, %v2510_v44, 0.0  ;;  %v2238_v31 = vsel %vm2112_vm6, %v1978_v11, 0.0 }
 0x2d7   : > { %3425 = vrot.lane.b32.xlu1 %v4003_v28, %s4219_s14  ;;  %v2637_v33 = vsel %vm2112_vm6, %v2511_v32, 0.0  ;;  %v3112_v42 = vadd.f32 %v5000_v8, %v7001_v22  ;;  %v3111_v54 = vadd.f32 %v5000_v8, %v6971_v18  ;;  %v3114_v25 = vadd.f32 %v5000_v8, %v1978_v11 }
 0x2d8   : > { %v2237_v34 = vadd.f32 %v2236_v57, %v2235_v49  ;;  %v2634_v13 = vadd.f32 %v2633_v55, %v2632_v19  ;;  %v3113_v18 = vadd.f32 %v5000_v8, %v6995_v48 }
 0x2d9   : > { %v3314_v0 = vpop.permute.xlu1 %3313  ;;  %v3308_v5 = vpop.permute.xlu0 %3307  ;;  %v4005_v7 = vpack.c.bf16 %v3112_v42, %v3112_v42  ;;  %v4004_v22 = vpack.c.bf16 %v3111_v54, %v3111_v54  ;;  %v4007_v59 = vpack.c.bf16 %v3114_v25, %v3114_v25 }
 0x2da   : > { %v2636_v52 = vadd.f32 %v2635_v56, %v2634_v13  ;;  %3502 = vst.msk [vmem:[%s6989_s19 + $0xc] sm:$0xf] %vm2983_vm5, %v3314_v0  ;;  %3499 = vst.msk [vmem:[%s6989_s19] sm:$0xf] %vm2983_vm5, %v3308_v5  ;;  %v2239_v63 = vadd.f32 %v2238_v31, %v2237_v34  ;;  %v4006_v27 = vpack.c.bf16 %v3113_v18, %v3113_v18 }
 0x2dc   : > { %v2240_v47 = vrot.slane %v2239_v63, 4  ;;  %v2638_v53 = vadd.f32 %v2637_v33, %v2636_v52 }
 0x2dd   : > { %v3334_v6 = vpop.permute.xlu1 %3333  ;;  %v3312_v50 = vpop.permute.xlu0 %3311 }
 0x2de   : > { %3512 = vst.msk [vmem:[%s6989_s19 + $0x34] sm:$0xf] %vm2983_vm5, %v3334_v6  ;;  %3501 = vst.msk [vmem:[%s6989_s19 + $0x8] sm:$0xf] %vm2983_vm5, %v3312_v50  ;;  %v2241_v20 = vadd.f32 %v2240_v47, %v2239_v63  ;;  %v2639_v2 = vrot.slane %v2638_v53, 4 }
 0x2e0   : > { %v2242_v4 = vrot.slane %v2241_v20, 2  ;;  %v2640_v37 = vadd.f32 %v2639_v2, %v2638_v53 }
 0x2e1   : > { %v3338_v10 = vpop.permute.xlu1 %3337  ;;  %v3332_v24 = vpop.permute.xlu0 %3331 }
 0x2e2   : > { %3514 = vst.msk [vmem:[%s6989_s19 + $0x3c] sm:$0xf] %vm2983_vm5, %v3338_v10  ;;  %3511 = vst.msk [vmem:[%s6989_s19 + $0x30] sm:$0xf] %vm2983_vm5, %v3332_v24  ;;  %v2243_v46 = vadd.f32 %v2242_v4, %v2241_v20  ;;  %v2641_v23 = vrot.slane %v2640_v37, 2 }
 0x2e4   : > { %v2244_v62 = vrot.slane %v2243_v46, 1  ;;  %v2642_v51 = vadd.f32 %v2641_v23, %v2640_v37  ;;  %v2442_v23 = vrot.slane %v7022_v16, 4 }
 0x2e5   : > { %v3326_v14 = vpop.permute.xlu1 %3325  ;;  %v3336_v12 = vpop.permute.xlu0 %3335 }
 0x2e6   : > { %3508 = vst.msk [vmem:[%s6989_s19 + $0x24] sm:$0xf] %vm2983_vm5, %v3326_v14  ;;  %3513 = vst.msk [vmem:[%s6989_s19 + $0x38] sm:$0xf] %vm2983_vm5, %v3336_v12  ;;  %v2245_v30 = vadd.f32 %v2244_v62, %v2243_v46  ;;  %v2643_v36 = vrot.slane %v2642_v51, 1  ;;  %v2443_v14 = vadd.f32 %v2442_v23, %v7022_v16 }
 0x2e8   : > { %2247 = vrot.lane.b32.xlu1 %v2245_v30, %s4219_s14  ;;  %v2644_v58 = vadd.f32 %v2643_v36, %v2642_v51  ;;  %v2106_v51 = vrot.slane %v7012_v38, 4  ;;  %v2444_v42 = vrot.slane %v2443_v14, 2 }
 0x2e9   : > { %v3330_v26 = vpop.permute.xlu1 %3329  ;;  %v3324_v43 = vpop.permute.xlu0 %3323 }
 0x2ea   : > { %3510 = vst.msk [vmem:[%s6989_s19 + $0x2c] sm:$0xf] %vm2983_vm5, %v3330_v26  ;;  %2646 = vrot.lane.b32.xlu0 %v2644_v58, %s4219_s14  ;;  %3507 = vst.msk [vmem:[%s6989_s19 + $0x20] sm:$0xf] %vm2983_vm5, %v3324_v43  ;;  %v2107_v12 = vadd.f32 %v2106_v51, %v7012_v38  ;;  %v2445_v36 = vadd.f32 %v2444_v42, %v2443_v14 }
 0x2ec   : > { %3429 = vrot.lane.b32.xlu1 %v4005_v7, %s4219_s14  ;;  %v2108_v30 = vrot.slane %v2107_v12, 2  ;;  %v2446_v58 = vrot.slane %v2445_v36, 1 }
 0x2ed   : > { %v3350_v45 = vpop.permute.xlu1 %3349  ;;  %v3328_v9 = vpop.permute.xlu0 %3327 }
 0x2ee   : > { %3520 = vst.msk [vmem:[%s6989_s19 + $0x54] sm:$0xf] %vm2983_vm5, %v3350_v45  ;;  %3427 = vrot.lane.b32.xlu0 %v4004_v22, %s4219_s14  ;;  %3509 = vst.msk [vmem:[%s6989_s19 + $0x28] sm:$0xf] %vm2983_vm5, %v3328_v9  ;;  %v2109_v54 = vadd.f32 %v2108_v30, %v2107_v12  ;;  %v2447_v7 = vadd.f32 %v2446_v58, %v2445_v36 }
 0x2f0   : > { %3433 = vrot.lane.b32.xlu1 %v4007_v59, %s4219_s14  ;;  %v2110_v26 = vrot.slane %v2109_v54, 1 }
 0x2f1   : > { %v3354_v8 = vpop.permute.xlu1 %3353  ;;  %v3348_v48 = vpop.permute.xlu0 %3347 }
 0x2f2   : > { %3522 = vst.msk [vmem:[%s6989_s19 + $0x5c] sm:$0xf] %vm2983_vm5, %v3354_v8  ;;  %3431 = vrot.lane.b32.xlu0 %v4006_v27, %s4219_s14  ;;  %3519 = vst.msk [vmem:[%s6989_s19 + $0x50] sm:$0xf] %vm2983_vm5, %v3348_v48  ;;  %v2111_v22 = vadd.f32 %v2110_v26, %v2109_v54 }
 0x2f5   : > { %v3342_v21 = vpop.permute.xlu1 %3341  ;;  %v3352_v40 = vpop.permute.xlu0 %3351 }
 0x2f6   : > { %3516 = vst.msk [vmem:[%s6989_s19 + $0x44] sm:$0xf] %vm2983_vm5, %v3342_v21  ;;  %3521 = vst.msk [vmem:[%s6989_s19 + $0x58] sm:$0xf] %vm2983_vm5, %v3352_v40 }
 0x2f9   : > { %v3346_v1 = vpop.permute.xlu1 %3345 }
 0x2fa   : > { %v3340_v17 = vpop.permute.xlu0 %3339  ;;  %3518 = vst.msk [vmem:[%s6989_s19 + $0x4c] sm:$0xf] %vm2983_vm5, %v3346_v1 }
 0x2fb   : > { %3515 = vst.msk [vmem:[%s6989_s19 + $0x40] sm:$0xf] %vm2983_vm5, %v3340_v17 }
 0x2fd   : > { %v3366_v35 = vpop.permute.xlu1 %3365 }
 0x2fe   : > { %v3344_v11 = vpop.permute.xlu0 %3343  ;;  %3528 = vst.msk [vmem:[%s6989_s19 + $0x74] sm:$0xf] %vm2983_vm5, %v3366_v35 }
 0x2ff   : > { %3517 = vst.msk [vmem:[%s6989_s19 + $0x48] sm:$0xf] %vm2983_vm5, %v3344_v11 }
 0x302   : > { %v3370_v3 = vpop.permute.xlu1 %3369  ;;  %v3364_v28 = vpop.permute.xlu0 %3363 }
 0x303   : > { %3530 = vst.msk [vmem:[%s6989_s19 + $0x7c] sm:$0xf] %vm2983_vm5, %v3370_v3  ;;  %3527 = vst.msk [vmem:[%s6989_s19 + $0x70] sm:$0xf] %vm2983_vm5, %v3364_v28 }
 0x306   : > { %v3358_v41 = vpop.permute.xlu1 %3357  ;;  %v3368_v60 = vpop.permute.xlu0 %3367 }
 0x307   : > { %3524 = vst.msk [vmem:[%s6989_s19 + $0x64] sm:$0xf] %vm2983_vm5, %v3358_v41  ;;  %3529 = vst.msk [vmem:[%s6989_s19 + $0x78] sm:$0xf] %vm2983_vm5, %v3368_v60 }
 0x30a   : > { %v3362_v29 = vpop.permute.xlu1 %3361  ;;  %v3356_v44 = vpop.permute.xlu0 %3355 }
 0x30b   : > { %3526 = vst.msk [vmem:[%s6989_s19 + $0x6c] sm:$0xf] %vm2983_vm5, %v3362_v29  ;;  %3523 = vst.msk [vmem:[%s6989_s19 + $0x60] sm:$0xf] %vm2983_vm5, %v3356_v44 }
 0x30e   : > { %v3382_v15 = vpop.permute.xlu1 %3381  ;;  %v3360_v39 = vpop.permute.xlu0 %3359 }
 0x30f   : > { %3536 = vst.msk [vmem:[%s6989_s19 + $0x94] sm:$0xf] %vm2983_vm5, %v3382_v15  ;;  %3525 = vst.msk [vmem:[%s6989_s19 + $0x68] sm:$0xf] %vm2983_vm5, %v3360_v39 }
 0x312   : > { %v3386_v61 = vpop.permute.xlu1 %3385  ;;  %v3380_v49 = vpop.permute.xlu0 %3379 }
 0x313   : > { %3538 = vst.msk [vmem:[%s6989_s19 + $0x9c] sm:$0xf] %vm2983_vm5, %v3386_v61  ;;  %3535 = vst.msk [vmem:[%s6989_s19 + $0x90] sm:$0xf] %vm2983_vm5, %v3380_v49 }
 0x316   : > { %v3374_v19 = vpop.permute.xlu1 %3373 }
 0x317   : > { %v3384_v57 = vpop.permute.xlu0 %3383  ;;  %3532 = vst.msk [vmem:[%s6989_s19 + $0x84] sm:$0xf] %vm2983_vm5, %v3374_v19 }
 0x318   : > { %3537 = vst.msk [vmem:[%s6989_s19 + $0x98] sm:$0xf] %vm2983_vm5, %v3384_v57 }
 0x31a   : > { %v3378_v55 = vpop.permute.xlu1 %3377 }
 0x31b   : > { %v3372_v32 = vpop.permute.xlu0 %3371  ;;  %3534 = vst.msk [vmem:[%s6989_s19 + $0x8c] sm:$0xf] %vm2983_vm5, %v3378_v55 }
 0x31c   : > { %3531 = vst.msk [vmem:[%s6989_s19 + $0x80] sm:$0xf] %vm2983_vm5, %v3372_v32 }
 0x31e   : > { %v3398_v34 = vpop.permute.xlu1 %3397 }
 0x31f   : > { %v3376_v13 = vpop.permute.xlu0 %3375  ;;  %3544 = vst.msk [vmem:[%s6989_s19 + $0xb4] sm:$0xf] %vm2983_vm5, %v3398_v34 }
 0x320   : > { %3533 = vst.msk [vmem:[%s6989_s19 + $0x88] sm:$0xf] %vm2983_vm5, %v3376_v13 }
 0x323   : > { %v3402_v56 = vpop.permute.xlu1 %3401  ;;  %v3396_v31 = vpop.permute.xlu0 %3395 }
 0x324   : > { %3546 = vst.msk [vmem:[%s6989_s19 + $0xbc] sm:$0xf] %vm2983_vm5, %v3402_v56  ;;  %3543 = vst.msk [vmem:[%s6989_s19 + $0xb0] sm:$0xf] %vm2983_vm5, %v3396_v31 }
 0x327   : > { %v3390_v0 = vpop.permute.xlu1 %3389  ;;  %v3400_v5 = vpop.permute.xlu0 %3399 }
 0x328   : > { %3540 = vst.msk [vmem:[%s6989_s19 + $0xa4] sm:$0xf] %vm2983_vm5, %v3390_v0  ;;  %3545 = vst.msk [vmem:[%s6989_s19 + $0xb8] sm:$0xf] %vm2983_vm5, %v3400_v5 }
 0x32b   : > { %v3394_v52 = vpop.permute.xlu1 %3393  ;;  %v3388_v63 = vpop.permute.xlu0 %3387 }
 0x32c   : > { %3542 = vst.msk [vmem:[%s6989_s19 + $0xac] sm:$0xf] %vm2983_vm5, %v3394_v52  ;;  %3539 = vst.msk [vmem:[%s6989_s19 + $0xa0] sm:$0xf] %vm2983_vm5, %v3388_v63 }
 0x32f   : > { %v3414_v33 = vpop.permute.xlu1 %3413  ;;  %v3392_v47 = vpop.permute.xlu0 %3391 }
 0x330   : > { %3552 = vst.msk [vmem:[%s6989_s19 + $0xd4] sm:$0xf] %vm2983_vm5, %v3414_v33  ;;  %3541 = vst.msk [vmem:[%s6989_s19 + $0xa8] sm:$0xf] %vm2983_vm5, %v3392_v47 }
 0x333   : > { %v3418_v53 = vpop.permute.xlu1 %3417  ;;  %v3412_v6 = vpop.permute.xlu0 %3411 }
 0x334   : > { %3554 = vst.msk [vmem:[%s6989_s19 + $0xdc] sm:$0xf] %vm2983_vm5, %v3418_v53  ;;  %3551 = vst.msk [vmem:[%s6989_s19 + $0xd0] sm:$0xf] %vm2983_vm5, %v3412_v6 }
 0x337   : > { %v3406_v50 = vpop.permute.xlu1 %3405  ;;  %v3416_v20 = vpop.permute.xlu0 %3415 }
 0x338   : > { %3548 = vst.msk [vmem:[%s6989_s19 + $0xc4] sm:$0xf] %vm2983_vm5, %v3406_v50  ;;  %3553 = vst.msk [vmem:[%s6989_s19 + $0xd8] sm:$0xf] %vm2983_vm5, %v3416_v20 }
 0x33b   : > { %v3410_v2 = vpop.permute.xlu1 %3409  ;;  %v3404_v4 = vpop.permute.xlu0 %3403 }
 0x33c   : > { %3550 = vst.msk [vmem:[%s6989_s19 + $0xcc] sm:$0xf] %vm2983_vm5, %v3410_v2  ;;  %3547 = vst.msk [vmem:[%s6989_s19 + $0xc0] sm:$0xf] %vm2983_vm5, %v3404_v4 }
 0x33f   : > { %v3408_v37 = vpop.permute.xlu0 %3407 }
 0x340   : > { %3549 = vst.msk [vmem:[%s6989_s19 + $0xc8] sm:$0xf] %vm2983_vm5, %v3408_v37 }
 0x343   : > { %v3420_v10 = vpop.permute.xlu0 %3419 }
 0x344   : > { %3555 = vst.msk [vmem:[%s6989_s19 + $0xe0] sm:$0xf] %vm2983_vm5, %v3420_v10 }
 0x345   : > { %v3422_v24 = vpop.permute.xlu1 %3421 }
 0x346   : > { %3556 = vst.msk [vmem:[%s6989_s19 + $0xe4] sm:$0xf] %vm2983_vm5, %v3422_v24 }
 0x347   : > { %v3424_v46 = vpop.permute.xlu0 %3423 }
 0x348   : > { %3557 = vst.msk [vmem:[%s6989_s19 + $0xe8] sm:$0xf] %vm2983_vm5, %v3424_v46 }
 0x349   : > { %v3426_v62 = vpop.permute.xlu1 %3425 }
 0x34a   : > { %3558 = vst.msk [vmem:[%s6989_s19 + $0xec] sm:$0xf] %vm2983_vm5, %v3426_v62 }
 0x35a   : > { %v2248_v43 = vpop.permute.xlu1 %2247 }
 0x35b   : > { %v2250_v16 = vadd.f32 %v2248_v43, %v2111_v22 }
 0x35c   : > { %v2647_v25 = vpop.permute.xlu0 %2646 }
 0x35d   : > { %v2649_v18 = vadd.f32 %v2647_v25, %v2447_v7 }
 0x35e   : > { %v3430_v45 = vpop.permute.xlu1 %3429 }
 0x35f   : > { %v2651_v38 = vrot.slane %v2649_v18, 7  ;;  %3560 = vst.msk [vmem:[%s6989_s19 + $0xf4] sm:$0xf] %vm2983_vm5, %v3430_v45 }
 0x360   : > { %v3428_v9 = vpop.permute.xlu0 %3427 }
 0x361   : > { %v2653_v59 = vsel %vm1049_vm4, %v2250_v16, %v2651_v38  ;;  %3559 = vst.msk [vmem:[%s6989_s19 + $0xf0] sm:$0xf] %vm2983_vm5, %v3428_v9 }
 0x362   : > { %2655 = vst.msk [vmem:[%s356_s23] sm:$0x3] %vm2654_vm7, %v2653_v59  ;;  %v3434_v27 = vpop.permute.xlu1 %3433 }
 0x363   : > { %3562 = vst.msk [vmem:[%s6989_s19 + $0xfc] sm:$0xf] %vm2983_vm5, %v3434_v27 }
 0x364   : > { %v3432_v8 = vpop.permute.xlu0 %3431 }
 0x365   : > { %3561 = vst.msk [vmem:[%s6989_s19 + $0xf8] sm:$0xf] %vm2983_vm5, %v3432_v8 }
 0x366 PF: > { %s19_s27 = sadd.s32 1, %s4213_s27  }
 0x367   : > { %p16_p4 = scmp.ge.s32.totalorder %s19_s27, 4  }
 0x369   :  { %18 = sbr.rel (!%p16_p4) target bundleno = 1 (0x1), region = 104 }

// kernel: gen_block_pallas.3
= control target key start
LH: loop header
LB: loop body
LE: loop exit
PB: predicated region body
PF: predicated region fallthrough
CT: control target
= control target key end

     0   :  { %s5534_s13 = smov 0   ;;  %s8653_s0 = inlined_call_operand.vmem [shape: bf16[2,32,16,8], index: 0, kind: input, shape index: {}]   ;;  %s8654_s1 = inlined_call_operand.vmem [shape: bf16[2,32,16,8], index: 1, kind: input, shape index: {}]   ;;  %s8655_s2 = inlined_call_operand.vmem [shape: bf16[2,16,16,4], index: 2, kind: input, shape index: {}]   ;;  %s8656_s3 = inlined_call_operand.vmem [shape: f32[2,1,8], index: 3, kind: input, shape index: {}]   ;;  %s8657_s4 = inlined_call_operand.vmem [shape: f32[2,1,8], index: 4, kind: input, shape index: {}]   ;;  %s8658_s5 = inlined_call_operand.vmem [shape: bf16[24,24], index: 5, kind: input, shape index: {}]   ;;  %s8659_s6 = inlined_call_operand.vmem [shape: bf16[24,24], index: 6, kind: input, shape index: {}]   ;;  %s8660_s7 = inlined_call_operand.vmem [shape: f32[1,8], index: 7, kind: input, shape index: {}]   ;;  %s8661_s8 = inlined_call_operand.vmem [shape: bf16[4,8], index: 8, kind: input, shape index: {}]   ;;  %s8662_s9 = inlined_call_operand.vmem [shape: f32[1,8], index: 9, kind: input, shape index: {}]   ;;  %s8663_s10 = inlined_call_operand.vmem [shape: f32[2,2,32,16,8], index: 10, kind: output, shape index: {}]  }
   0x1 LB: > { %s4661_s14 = sadd.s32 4294967295, %s5472_s13   ;;  %p4665_p0 = scmp.ge.s32.totalorder %s5472_s13, 1  ;;  %s5472_s13 = sphi %s5534_s13, %s20_s13  }
   0x2   : > { %p348_p1 = scmp.lt.s32.totalorder %s5472_s13, 3 }
   0x4   : > { %p349_p2 = pnand %p4665_p0, %p348_p1 }
   0x6   : > { %352 = sbr.rel (%p349_p2) target bundleno = 1112 (0x458), region = 60 }
   0xb   : > { %p402_p3 = scmp.lt.s32.totalorder %s4661_s14, 1  ;;  %s5474_s25 = smov 8   ;;  %vm1863_vm0 = vcmask 1043456   ;;  %vm1308_vm1 = vcmask 64512   ;;  %vm1405_vm2 = vcmask 130048   ;;  %vm1798_vm3 = vcmask 195584  }
   0xc   : > { %s5475_s26 = smov 16   ;;  %vm3719_vm4 = vcmask 1041408   ;;  %vm3670_vm5 = vcmask 31744   ;;  %vm3101_vm6 = vcmask 1046528   ;;  %s5477_s27 = smov 120   ;;  %vm2652_vm7 = vcmask 1040384  }
   0xd   : > { %s9242_s14 = smov (!%p402_p3, %s4661_s14), 1  ;;  %s5478_s28 = smov 112  }
   0xe   : > { %s4844_s15 = sshll.u32 %s9242_s14, 8  ;;  %s5549_s18 = scalar_lea.vmem %s8656_s3, %s9242_s14 }
   0xf   : > { %s5556_s21 = scalar_lea.vmem %s8653_s0, %s4844_s15  ;;  %s5562_s24 = scalar_lea.vmem %s8657_s4, %s9242_s14  ;;  %v5565_v0 = vld [vmem:[%s5549_s18] ss:$0 sm:$0xff] }
  0x10   : > { %v5105_v1 = vld [vmem:[%s5556_s21 + $0x10] sm:$0xff]   ;;  %v4849_v2 = vld [vmem:[%s5556_s21] sm:$0xff]   ;;  %v5106_v7 = vld [vmem:[%s5556_s21 + $0x18] sm:$0xff]   ;;  %s5895_s29 = scalar_lea.vmem %s8654_s1, %s4844_s15  ;;  %s4846_s22 = sshll.u32 %s9242_s14, 7 }
  0x11   : > { %v4858_v3 = vunpack.c.l.bf16 %v5105_v1  ;;  %v4859_v4 = vunpack.c.h.bf16 %v5105_v1  ;;  %v4850_v5 = vunpack.c.l.bf16 %v4849_v2  ;;  %v4851_v6 = vunpack.c.h.bf16 %v4849_v2  ;;  %v5104_v8 = vld [vmem:[%s5556_s21 + $0x8] sm:$0xff]   ;;  %v5572_v9 = vld [vmem:[%s5562_s24] ss:$0 sm:$0xff]  ;;  %v5110_v40 = vld [vmem:[%s5556_s21 + $0x38] sm:$0xff]   ;;  %s4847_s15 = sshll.u32 %s9242_s14, 10 }
  0x12   : > { %v4862_v10 = vunpack.c.l.bf16 %v5106_v7  ;;  %v4863_v11 = vunpack.c.h.bf16 %v5106_v7  ;;  %v4854_v12 = vunpack.c.l.bf16 %v5104_v8  ;;  %v4855_v13 = vunpack.c.h.bf16 %v5104_v8  ;;  %v5108_v30 = vld [vmem:[%s5556_s21 + $0x28] sm:$0xff]   ;;  %v5107_v35 = vld [vmem:[%s5556_s21 + $0x20] sm:$0xff]   ;;  %v5109_v45 = vld [vmem:[%s5556_s21 + $0x30] sm:$0xff]   ;;  %s7357_s17 = scalar_lea.vmem %s8663_s10, %s4847_s15 }
  0x13   : > { %v569_v14 = vmul.f32 %v4858_v3, %v5565_v0  ;;  %v570_v15 = vmul.f32 %v4859_v4, %v5565_v0  ;;  %v565_v16 = vmul.f32 %v4850_v5, %v5565_v0  ;;  %v566_v17 = vmul.f32 %v4851_v6, %v5565_v0  ;;  %v5112_v3 = vld [vmem:[%s5556_s21 + $0x48] sm:$0xff]  }
  0x14   : > { %v571_v18 = vmul.f32 %v4862_v10, %v5565_v0  ;;  %v572_v19 = vmul.f32 %v4863_v11, %v5565_v0  ;;  %v567_v20 = vmul.f32 %v4854_v12, %v5565_v0  ;;  %v568_v21 = vmul.f32 %v4855_v13, %v5565_v0  ;;  %v5111_v13 = vld [vmem:[%s5556_s21 + $0x40] sm:$0xff]  }
  0x15   : > { %v639_v22 = vadd.f32 %v5572_v9, %v569_v14  ;;  %v640_v23 = vadd.f32 %v5572_v9, %v570_v15  ;;  %v635_v24 = vadd.f32 %v5572_v9, %v565_v16  ;;  %v636_v25 = vadd.f32 %v5572_v9, %v566_v17 }
  0x16   : > { %v641_v26 = vadd.f32 %v5572_v9, %v571_v18  ;;  %v642_v27 = vadd.f32 %v5572_v9, %v572_v19  ;;  %v637_v28 = vadd.f32 %v5572_v9, %v567_v20  ;;  %v638_v29 = vadd.f32 %v5572_v9, %v568_v21  ;;  %v5114_v18 = vld [vmem:[%s5556_s21 + $0x58] sm:$0xff]  }
  0x17   : > { %v703_v31 = vmax.f32 %v639_v22, 0.0  ;;  %v704_v32 = vmax.f32 %v640_v23, 0.0  ;;  %v699_v33 = vmax.f32 %v635_v24, 0.0  ;;  %v700_v34 = vmax.f32 %v636_v25, 0.0  ;;  %v5113_v23 = vld [vmem:[%s5556_s21 + $0x50] sm:$0xff]  }
  0x18   : > { %v705_v36 = vmax.f32 %v641_v26, 0.0  ;;  %v706_v37 = vmax.f32 %v642_v27, 0.0  ;;  %v701_v38 = vmax.f32 %v637_v28, 0.0  ;;  %v702_v39 = vmax.f32 %v638_v29, 0.0 }
  0x19   : > { %v5593_v41 = vpack.c.bf16 %v704_v32, %v703_v31  ;;  %v5595_v42 = vpack.c.bf16 %v700_v34, %v699_v33  ;;  %v4870_v43 = vunpack.c.l.bf16 %v5108_v30  ;;  %v4871_v44 = vunpack.c.h.bf16 %v5108_v30 }
  0x1a   : > { %v5598_v46 = vpack.c.bf16 %v706_v37, %v705_v36  ;;  %v5600_v47 = vpack.c.bf16 %v702_v39, %v701_v38  ;;  %v4866_v48 = vunpack.c.l.bf16 %v5107_v35  ;;  %v4867_v49 = vunpack.c.h.bf16 %v5107_v35 }
  0x1b   : > { %1183 = vrot.lane.b32.xlu1 %v5593_v41, %s5474_s25  ;;  %1179 = vrot.lane.b32.xlu0 %v5595_v42, %s5474_s25  ;;  %v575_v50 = vmul.f32 %v4870_v43, %v5565_v0  ;;  %v576_v51 = vmul.f32 %v4871_v44, %v5565_v0  ;;  %v4878_v52 = vunpack.c.l.bf16 %v5110_v40  ;;  %v4879_v53 = vunpack.c.h.bf16 %v5110_v40  ;;  %v5116_v40 = vld [vmem:[%s5556_s21 + $0x68] sm:$0xff]  }
  0x1c   : > { %v573_v54 = vmul.f32 %v4866_v48, %v5565_v0  ;;  %v574_v55 = vmul.f32 %v4867_v49, %v5565_v0  ;;  %v4874_v56 = vunpack.c.l.bf16 %v5109_v45  ;;  %v4875_v57 = vunpack.c.h.bf16 %v5109_v45 }
  0x1d   : > { %v645_v58 = vadd.f32 %v5572_v9, %v575_v50  ;;  %v646_v59 = vadd.f32 %v5572_v9, %v576_v51  ;;  %v579_v60 = vmul.f32 %v4878_v52, %v5565_v0  ;;  %v580_v61 = vmul.f32 %v4879_v53, %v5565_v0 }
  0x1e   : > { %v643_v62 = vadd.f32 %v5572_v9, %v573_v54  ;;  %v644_v63 = vadd.f32 %v5572_v9, %v574_v55  ;;  %v577_v1 = vmul.f32 %v4874_v56, %v5565_v0  ;;  %v578_v2 = vmul.f32 %v4875_v57, %v5565_v0  ;;  %v5115_v57 = vld [vmem:[%s5556_s21 + $0x60] sm:$0xff]  }
  0x1f   : > { %1185 = vrot.lane.b32.xlu1 %v5598_v46, %s5474_s25  ;;  %1181 = vrot.lane.b32.xlu0 %v5600_v47, %s5474_s25  ;;  %v709_v4 = vmax.f32 %v645_v58, 0.0  ;;  %v710_v5 = vmax.f32 %v646_v59, 0.0  ;;  %v649_v6 = vadd.f32 %v5572_v9, %v579_v60  ;;  %v650_v7 = vadd.f32 %v5572_v9, %v580_v61 }
  0x20   : > { %v707_v8 = vmax.f32 %v643_v62, 0.0  ;;  %v708_v10 = vmax.f32 %v644_v63, 0.0  ;;  %v647_v11 = vadd.f32 %v5572_v9, %v577_v1  ;;  %v648_v12 = vadd.f32 %v5572_v9, %v578_v2  ;;  %v5118_v62 = vld [vmem:[%s5556_s21 + $0x78] sm:$0xff]  }
  0x21   : > { %v5628_v14 = vpack.c.bf16 %v710_v5, %v709_v4  ;;  %v713_v15 = vmax.f32 %v649_v6, 0.0  ;;  %v714_v16 = vmax.f32 %v650_v7, 0.0  ;;  %v4886_v17 = vunpack.c.l.bf16 %v5112_v3  ;;  %v5117_v4 = vld [vmem:[%s5556_s21 + $0x70] sm:$0xff]  }
  0x22   : > { %v5631_v19 = vpack.c.bf16 %v708_v10, %v707_v8  ;;  %v711_v20 = vmax.f32 %v647_v11, 0.0  ;;  %v712_v21 = vmax.f32 %v648_v12, 0.0  ;;  %v4887_v22 = vunpack.c.h.bf16 %v5112_v3 }
  0x23   : > { %1189 = vrot.lane.b32.xlu1 %v5628_v14, %s5474_s25  ;;  %v5636_v24 = vpack.c.bf16 %v714_v16, %v713_v15  ;;  %v583_v25 = vmul.f32 %v4886_v17, %v5565_v0  ;;  %v4882_v26 = vunpack.c.l.bf16 %v5111_v13  ;;  %v4883_v27 = vunpack.c.h.bf16 %v5111_v13 }
  0x24   : > { %1187 = vrot.lane.b32.xlu0 %v5631_v19, %s5474_s25  ;;  %v5641_v28 = vpack.c.bf16 %v712_v21, %v711_v20  ;;  %v584_v29 = vmul.f32 %v4887_v22, %v5565_v0  ;;  %v4894_v30 = vunpack.c.l.bf16 %v5114_v18  ;;  %v4895_v31 = vunpack.c.h.bf16 %v5114_v18  ;;  %v5120_v20 = vld [vmem:[%s5556_s21 + $0x88] sm:$0xff]  }
  0x25   : > { %v653_v32 = vadd.f32 %v5572_v9, %v583_v25  ;;  %v581_v33 = vmul.f32 %v4882_v26, %v5565_v0  ;;  %v582_v34 = vmul.f32 %v4883_v27, %v5565_v0  ;;  %v4890_v35 = vunpack.c.l.bf16 %v5113_v23 }
  0x26   : > { %v654_v36 = vadd.f32 %v5572_v9, %v584_v29  ;;  %v587_v37 = vmul.f32 %v4894_v30, %v5565_v0  ;;  %v588_v38 = vmul.f32 %v4895_v31, %v5565_v0  ;;  %v4891_v39 = vunpack.c.h.bf16 %v5113_v23 }
  0x27   : > { %1193 = vrot.lane.b32.xlu1 %v5636_v24, %s5474_s25  ;;  %v717_v43 = vmax.f32 %v653_v32, 0.0  ;;  %v651_v44 = vadd.f32 %v5572_v9, %v581_v33  ;;  %v652_v45 = vadd.f32 %v5572_v9, %v582_v34  ;;  %v585_v48 = vmul.f32 %v4890_v35, %v5565_v0 }
  0x28   : > { %1191 = vrot.lane.b32.xlu0 %v5641_v28, %s5474_s25  ;;  %v718_v49 = vmax.f32 %v654_v36, 0.0  ;;  %v657_v50 = vadd.f32 %v5572_v9, %v587_v37  ;;  %v658_v51 = vadd.f32 %v5572_v9, %v588_v38  ;;  %v586_v52 = vmul.f32 %v4891_v39, %v5565_v0  ;;  %v5119_v39 = vld [vmem:[%s5556_s21 + $0x80] sm:$0xff]  }
  0x29   : > { %v715_v53 = vmax.f32 %v651_v44, 0.0  ;;  %v716_v54 = vmax.f32 %v652_v45, 0.0  ;;  %v655_v55 = vadd.f32 %v5572_v9, %v585_v48  ;;  %v4902_v56 = vunpack.c.l.bf16 %v5116_v40  ;;  %v5122_v48 = vld [vmem:[%s5556_s21 + $0x98] sm:$0xff]  }
  0x2a   : > { %v5663_v58 = vpack.c.bf16 %v718_v49, %v717_v43  ;;  %v721_v59 = vmax.f32 %v657_v50, 0.0  ;;  %v722_v60 = vmax.f32 %v658_v51, 0.0  ;;  %v656_v61 = vadd.f32 %v5572_v9, %v586_v52 }
  0x2b   : > { %v5667_v63 = vpack.c.bf16 %v716_v54, %v715_v53  ;;  %v719_v1 = vmax.f32 %v655_v55, 0.0  ;;  %v4903_v2 = vunpack.c.h.bf16 %v5116_v40  ;;  %v591_v3 = vmul.f32 %v4902_v56, %v5565_v0  ;;  %v5121_v53 = vld [vmem:[%s5556_s21 + $0x90] sm:$0xff]  }
  0x2c   : > { %8805 = vst [vmem:[#allocation2_spill] sm:$0xff] %v5663_v58  ;;  %1197 = vrot.lane.b32.xlu1 %v5663_v58, %s5474_s25  ;;  %v5673_v5 = vpack.c.bf16 %v722_v60, %v721_v59  ;;  %v720_v6 = vmax.f32 %v656_v61, 0.0  ;;  %v4898_v7 = vunpack.c.l.bf16 %v5115_v57  ;;  %v4899_v8 = vunpack.c.h.bf16 %v5115_v57 }
  0x2d   : > { %1195 = vrot.lane.b32.xlu0 %v5667_v63, %s5474_s25  ;;  %v592_v10 = vmul.f32 %v4903_v2, %v5565_v0  ;;  %v661_v11 = vadd.f32 %v5572_v9, %v591_v3  ;;  %v4910_v12 = vunpack.c.l.bf16 %v5118_v62  ;;  %v4911_v13 = vunpack.c.h.bf16 %v5118_v62 }
  0x2e   : > { %8806 = vst [vmem:[#allocation3_spill] sm:$0xff] %v5673_v5  ;;  %v5679_v15 = vpack.c.bf16 %v720_v6, %v719_v1  ;;  %v589_v16 = vmul.f32 %v4898_v7, %v5565_v0  ;;  %v590_v17 = vmul.f32 %v4899_v8, %v5565_v0  ;;  %v4906_v18 = vunpack.c.l.bf16 %v5117_v4  ;;  %v5124_v6 = vld [vmem:[%s5556_s21 + $0xa8] sm:$0xff]  }
  0x2f   : > { %v662_v21 = vadd.f32 %v5572_v9, %v592_v10  ;;  %v725_v22 = vmax.f32 %v661_v11, 0.0  ;;  %v595_v23 = vmul.f32 %v4910_v12, %v5565_v0  ;;  %v596_v25 = vmul.f32 %v4911_v13, %v5565_v0 }
  0x30   : > { %8807 = vst [vmem:[#allocation4_spill] sm:$0xff] %v5679_v15  ;;  %1201 = vrot.lane.b32.xlu1 %v5673_v5, %s5474_s25  ;;  %v659_v26 = vadd.f32 %v5572_v9, %v589_v16  ;;  %v660_v27 = vadd.f32 %v5572_v9, %v590_v17  ;;  %v4907_v29 = vunpack.c.h.bf16 %v5117_v4  ;;  %v593_v30 = vmul.f32 %v4906_v18, %v5565_v0 }
  0x31   : > { %1199 = vrot.lane.b32.xlu0 %v5679_v15, %s5474_s25  ;;  %v726_v31 = vmax.f32 %v662_v21, 0.0  ;;  %v665_v32 = vadd.f32 %v5572_v9, %v595_v23  ;;  %v666_v33 = vadd.f32 %v5572_v9, %v596_v25  ;;  %v4918_v34 = vunpack.c.l.bf16 %v5120_v20  ;;  %v5123_v23 = vld [vmem:[%s5556_s21 + $0xa0] sm:$0xff]  }
  0x32   : > { %v723_v35 = vmax.f32 %v659_v26, 0.0  ;;  %v724_v36 = vmax.f32 %v660_v27, 0.0  ;;  %v594_v37 = vmul.f32 %v4907_v29, %v5565_v0  ;;  %v663_v38 = vadd.f32 %v5572_v9, %v593_v30 }
  0x33   : > { %v5699_v40 = vpack.c.bf16 %v726_v31, %v725_v22  ;;  %v729_v43 = vmax.f32 %v665_v32, 0.0  ;;  %v730_v44 = vmax.f32 %v666_v33, 0.0  ;;  %v4919_v45 = vunpack.c.h.bf16 %v5120_v20 }
  0x34   : > { %v5702_v49 = vpack.c.bf16 %v724_v36, %v723_v35  ;;  %v664_v50 = vadd.f32 %v5572_v9, %v594_v37  ;;  %v727_v51 = vmax.f32 %v663_v38, 0.0  ;;  %v599_v52 = vmul.f32 %v4918_v34, %v5565_v0  ;;  %v5126_v34 = vld [vmem:[%s5556_s21 + $0xb8] sm:$0xff]  }
  0x35   : > { %8808 = vst [vmem:[#allocation5_spill] sm:$0xff] %v5699_v40  ;;  %1205 = vrot.lane.b32.xlu1 %v5699_v40, %s5474_s25  ;;  %v5709_v54 = vpack.c.bf16 %v730_v44, %v729_v43  ;;  %v600_v55 = vmul.f32 %v4919_v45, %v5565_v0  ;;  %v4914_v56 = vunpack.c.l.bf16 %v5119_v39  ;;  %v4915_v57 = vunpack.c.h.bf16 %v5119_v39  ;;  %v5125_v39 = vld [vmem:[%s5556_s21 + $0xb0] sm:$0xff]  }
  0x36   : > { %8809 = vst [vmem:[#allocation6_spill] sm:$0xff] %v5702_v49  ;;  %1203 = vrot.lane.b32.xlu0 %v5702_v49, %s5474_s25  ;;  %v728_v59 = vmax.f32 %v664_v50, 0.0  ;;  %v669_v60 = vadd.f32 %v5572_v9, %v599_v52  ;;  %v4926_v61 = vunpack.c.l.bf16 %v5122_v48  ;;  %v4927_v62 = vunpack.c.h.bf16 %v5122_v48 }
  0x37   : > { %8810 = vst [vmem:[#allocation7_spill] sm:$0xff] %v5709_v54  ;;  %v670_v1 = vadd.f32 %v5572_v9, %v600_v55  ;;  %v597_v2 = vmul.f32 %v4914_v56, %v5565_v0  ;;  %v598_v3 = vmul.f32 %v4915_v57, %v5565_v0  ;;  %v4922_v4 = vunpack.c.l.bf16 %v5121_v53 }
  0x38   : > { %v5719_v7 = vpack.c.bf16 %v728_v59, %v727_v51  ;;  %v733_v8 = vmax.f32 %v669_v60, 0.0  ;;  %v603_v10 = vmul.f32 %v4926_v61, %v5565_v0  ;;  %v604_v11 = vmul.f32 %v4927_v62, %v5565_v0  ;;  %v5128_v60 = vld [vmem:[%s5556_s21 + $0xc8] sm:$0xff]  }
  0x39   : > { %1209 = vrot.lane.b32.xlu1 %v5709_v54, %s5474_s25  ;;  %v734_v12 = vmax.f32 %v670_v1, 0.0  ;;  %v667_v13 = vadd.f32 %v5572_v9, %v597_v2  ;;  %v668_v16 = vadd.f32 %v5572_v9, %v598_v3  ;;  %v4923_v17 = vunpack.c.h.bf16 %v5121_v53 }
  0x3a   : > { %8811 = vst [vmem:[#allocation8_spill] sm:$0xff] %v5719_v7  ;;  %1207 = vrot.lane.b32.xlu0 %v5719_v7, %s5474_s25  ;;  %v673_v18 = vadd.f32 %v5572_v9, %v603_v10  ;;  %v674_v20 = vadd.f32 %v5572_v9, %v604_v11  ;;  %v601_v21 = vmul.f32 %v4922_v4, %v5565_v0  ;;  %v4934_v22 = vunpack.c.l.bf16 %v5124_v6 }
  0x3b   : > { %v5733_v25 = vpack.c.bf16 %v734_v12, %v733_v8  ;;  %v731_v26 = vmax.f32 %v667_v13, 0.0  ;;  %v732_v27 = vmax.f32 %v668_v16, 0.0  ;;  %v602_v29 = vmul.f32 %v4923_v17, %v5565_v0  ;;  %v5127_v16 = vld [vmem:[%s5556_s21 + $0xc0] sm:$0xff]  }
  0x3c   : > { %v737_v30 = vmax.f32 %v673_v18, 0.0  ;;  %v738_v31 = vmax.f32 %v674_v20, 0.0  ;;  %v671_v32 = vadd.f32 %v5572_v9, %v601_v21  ;;  %v4935_v33 = vunpack.c.h.bf16 %v5124_v6 }
  0x3d   : > { %8812 = vst [vmem:[#allocation9_spill] sm:$0xff] %v5733_v25  ;;  %1213 = vrot.lane.b32.xlu1 %v5733_v25, %s5474_s25  ;;  %v5740_v35 = vpack.c.bf16 %v732_v27, %v731_v26  ;;  %v672_v36 = vadd.f32 %v5572_v9, %v602_v29  ;;  %v607_v37 = vmul.f32 %v4934_v22, %v5565_v0  ;;  %v4930_v38 = vunpack.c.l.bf16 %v5123_v23  ;;  %v5130_v29 = vld [vmem:[%s5556_s21 + $0xd8] sm:$0xff]  }
  0x3e   : > { %v5745_v43 = vpack.c.bf16 %v738_v31, %v737_v30  ;;  %v735_v44 = vmax.f32 %v671_v32, 0.0  ;;  %v608_v45 = vmul.f32 %v4935_v33, %v5565_v0  ;;  %v4931_v48 = vunpack.c.h.bf16 %v5123_v23 }
  0x3f   : > { %8813 = vst [vmem:[#allocation10_spill] sm:$0xff] %v5740_v35  ;;  %1211 = vrot.lane.b32.xlu0 %v5740_v35, %s5474_s25  ;;  %v736_v50 = vmax.f32 %v672_v36, 0.0  ;;  %v677_v51 = vadd.f32 %v5572_v9, %v607_v37  ;;  %v605_v52 = vmul.f32 %v4930_v38, %v5565_v0  ;;  %v4942_v53 = vunpack.c.l.bf16 %v5126_v34 }
  0x40   : > { %8814 = vst [vmem:[#allocation11_spill] sm:$0xff] %v5745_v43  ;;  %v678_v55 = vadd.f32 %v5572_v9, %v608_v45  ;;  %v606_v56 = vmul.f32 %v4931_v48, %v5565_v0  ;;  %v4943_v57 = vunpack.c.h.bf16 %v5126_v34  ;;  %v4938_v59 = vunpack.c.l.bf16 %v5125_v39 }
  0x41   : > { %1217 = vrot.lane.b32.xlu1 %v5745_v43, %s5474_s25  ;;  %v5757_v61 = vpack.c.bf16 %v736_v50, %v735_v44  ;;  %v741_v62 = vmax.f32 %v677_v51, 0.0  ;;  %v675_v1 = vadd.f32 %v5572_v9, %v605_v52  ;;  %v611_v2 = vmul.f32 %v4942_v53, %v5565_v0 }
  0x42   : > { %v742_v3 = vmax.f32 %v678_v55, 0.0  ;;  %v676_v4 = vadd.f32 %v5572_v9, %v606_v56  ;;  %v612_v6 = vmul.f32 %v4943_v57, %v5565_v0  ;;  %v4939_v8 = vunpack.c.h.bf16 %v5125_v39  ;;  %v5129_v39 = vld [vmem:[%s5556_s21 + $0xd0] sm:$0xff]   ;;  %v5132_v56 = vld [vmem:[%s5556_s21 + $0xe8] sm:$0xff]  }
  0x43   : > { %8815 = vst [vmem:[#allocation12_spill] sm:$0xff] %v5757_v61  ;;  %1215 = vrot.lane.b32.xlu0 %v5757_v61, %s5474_s25  ;;  %v739_v10 = vmax.f32 %v675_v1, 0.0  ;;  %v681_v11 = vadd.f32 %v5572_v9, %v611_v2  ;;  %v609_v12 = vmul.f32 %v4938_v59, %v5565_v0  ;;  %v4950_v13 = vunpack.c.l.bf16 %v5128_v60 }
  0x44   : > { %v5768_v17 = vpack.c.bf16 %v742_v3, %v741_v62  ;;  %v740_v18 = vmax.f32 %v676_v4, 0.0  ;;  %v682_v20 = vadd.f32 %v5572_v9, %v612_v6  ;;  %v610_v21 = vmul.f32 %v4939_v8, %v5565_v0 }
  0x45   : > { %v745_v22 = vmax.f32 %v681_v11, 0.0  ;;  %v679_v23 = vadd.f32 %v5572_v9, %v609_v12  ;;  %v4951_v26 = vunpack.c.h.bf16 %v5128_v60  ;;  %v615_v27 = vmul.f32 %v4950_v13, %v5565_v0  ;;  %v5131_v12 = vld [vmem:[%s5556_s21 + $0xe0] sm:$0xff]  }
  0x46   : > { %8816 = vst [vmem:[#allocation13_spill] sm:$0xff] %v5768_v17  ;;  %1221 = vrot.lane.b32.xlu1 %v5768_v17, %s5474_s25  ;;  %v5777_v30 = vpack.c.bf16 %v740_v18, %v739_v10  ;;  %v746_v31 = vmax.f32 %v682_v20, 0.0  ;;  %v680_v32 = vadd.f32 %v5572_v9, %v610_v21  ;;  %v4946_v33 = vunpack.c.l.bf16 %v5127_v16 }
  0x47   : > { %v743_v34 = vmax.f32 %v679_v23, 0.0  ;;  %v616_v36 = vmul.f32 %v4951_v26, %v5565_v0  ;;  %v685_v37 = vadd.f32 %v5572_v9, %v615_v27  ;;  %v4947_v38 = vunpack.c.h.bf16 %v5127_v16  ;;  %v5134_v27 = vld [vmem:[%s5556_s21 + $0xf8] sm:$0xff]  }
  0x48   : > { %8817 = vst [vmem:[#allocation14_spill] sm:$0xff] %v5777_v30  ;;  %1219 = vrot.lane.b32.xlu0 %v5777_v30, %s5474_s25  ;;  %v5785_v44 = vpack.c.bf16 %v746_v31, %v745_v22  ;;  %v744_v45 = vmax.f32 %v680_v32, 0.0  ;;  %v613_v48 = vmul.f32 %v4946_v33, %v5565_v0  ;;  %v4958_v50 = vunpack.c.l.bf16 %v5130_v29 }
  0x49   : > { %v686_v51 = vadd.f32 %v5572_v9, %v616_v36  ;;  %v749_v52 = vmax.f32 %v685_v37, 0.0  ;;  %v614_v53 = vmul.f32 %v4947_v38, %v5565_v0  ;;  %v4959_v55 = vunpack.c.h.bf16 %v5130_v29 }
  0x4a   : > { %8818 = vst [vmem:[#allocation15_spill] sm:$0xff] %v5785_v44  ;;  %1225 = vrot.lane.b32.xlu1 %v5785_v44, %s5474_s25  ;;  %v5793_v57 = vpack.c.bf16 %v744_v45, %v743_v34  ;;  %v683_v59 = vadd.f32 %v5572_v9, %v613_v48  ;;  %v619_v60 = vmul.f32 %v4958_v50, %v5565_v0  ;;  %v4954_v62 = vunpack.c.l.bf16 %v5129_v39 }
  0x4b   : > { %v750_v1 = vmax.f32 %v686_v51, 0.0  ;;  %v684_v2 = vadd.f32 %v5572_v9, %v614_v53  ;;  %v620_v3 = vmul.f32 %v4959_v55, %v5565_v0  ;;  %v4955_v4 = vunpack.c.h.bf16 %v5129_v39  ;;  %v5133_v39 = vld [vmem:[%s5556_s21 + $0xf0] sm:$0xff]  }
  0x4c   : > { %8819 = vst [vmem:[#allocation16_spill] sm:$0xff] %v5793_v57  ;;  %1223 = vrot.lane.b32.xlu0 %v5793_v57, %s5474_s25  ;;  %v747_v6 = vmax.f32 %v683_v59, 0.0  ;;  %v689_v8 = vadd.f32 %v5572_v9, %v619_v60  ;;  %v617_v10 = vmul.f32 %v4954_v62, %v5565_v0  ;;  %v4966_v11 = vunpack.c.l.bf16 %v5132_v56 }
  0x4d   : > { %v5804_v13 = vpack.c.bf16 %v750_v1, %v749_v52  ;;  %v748_v16 = vmax.f32 %v684_v2, 0.0  ;;  %v690_v18 = vadd.f32 %v5572_v9, %v620_v3  ;;  %v618_v20 = vmul.f32 %v4955_v4, %v5565_v0 }
  0x4e   : > { %v753_v21 = vmax.f32 %v689_v8, 0.0  ;;  %v687_v22 = vadd.f32 %v5572_v9, %v617_v10  ;;  %v4967_v23 = vunpack.c.h.bf16 %v5132_v56  ;;  %v623_v26 = vmul.f32 %v4966_v11, %v5565_v0 }
  0x4f   : > { %8820 = vst [vmem:[#allocation17_spill] sm:$0xff] %v5804_v13  ;;  %1229 = vrot.lane.b32.xlu1 %v5804_v13, %s5474_s25  ;;  %v5813_v29 = vpack.c.bf16 %v748_v16, %v747_v6  ;;  %v754_v31 = vmax.f32 %v690_v18, 0.0  ;;  %v688_v32 = vadd.f32 %v5572_v9, %v618_v20  ;;  %v4962_v33 = vunpack.c.l.bf16 %v5131_v12 }
  0x50   : > { %v751_v34 = vmax.f32 %v687_v22, 0.0  ;;  %v624_v36 = vmul.f32 %v4967_v23, %v5565_v0  ;;  %v693_v37 = vadd.f32 %v5572_v9, %v623_v26  ;;  %v4963_v38 = vunpack.c.h.bf16 %v5131_v12 }
  0x51   : > { %8821 = vst [vmem:[#allocation18_spill] sm:$0xff] %v5813_v29  ;;  %1227 = vrot.lane.b32.xlu0 %v5813_v29, %s5474_s25  ;;  %v5821_v45 = vpack.c.bf16 %v754_v31, %v753_v21  ;;  %v752_v48 = vmax.f32 %v688_v32, 0.0  ;;  %v621_v50 = vmul.f32 %v4962_v33, %v5565_v0  ;;  %v4974_v51 = vunpack.c.l.bf16 %v5134_v27 }
  0x52   : > { %v694_v52 = vadd.f32 %v5572_v9, %v624_v36  ;;  %v757_v53 = vmax.f32 %v693_v37, 0.0  ;;  %v622_v55 = vmul.f32 %v4963_v38, %v5565_v0  ;;  %v4975_v56 = vunpack.c.h.bf16 %v5134_v27  ;;  %v5135_v36 = vld [vmem:[%s5895_s29 + $0x8] sm:$0xff]   ;;  %v4977_v37 = vld [vmem:[%s5895_s29] sm:$0xff]  }
  0x53   : > { %8822 = vst [vmem:[#allocation19_spill] sm:$0xff] %v5821_v45  ;;  %1233 = vrot.lane.b32.xlu1 %v5821_v45, %s5474_s25  ;;  %v5828_v59 = vpack.c.bf16 %v752_v48, %v751_v34  ;;  %v691_v60 = vadd.f32 %v5572_v9, %v621_v50  ;;  %v627_v62 = vmul.f32 %v4974_v51, %v5565_v0  ;;  %v4970_v1 = vunpack.c.l.bf16 %v5133_v39  ;;  %v5137_v50 = vld [vmem:[%s5895_s29 + $0x18] sm:$0xff]   ;;  %v5136_v51 = vld [vmem:[%s5895_s29 + $0x10] sm:$0xff]  }
  0x54   : > { %v758_v2 = vmax.f32 %v694_v52, 0.0  ;;  %v692_v3 = vadd.f32 %v5572_v9, %v622_v55  ;;  %v628_v4 = vmul.f32 %v4975_v56, %v5565_v0  ;;  %v4971_v6 = vunpack.c.h.bf16 %v5133_v39  ;;  %v5139_v55 = vld [vmem:[%s5895_s29 + $0x28] sm:$0xff]  }
  0x55   : > { %8823 = vst [vmem:[#allocation20_spill] sm:$0xff] %v5828_v59  ;;  %1231 = vrot.lane.b32.xlu0 %v5828_v59, %s5474_s25  ;;  %v755_v8 = vmax.f32 %v691_v60, 0.0  ;;  %v697_v10 = vadd.f32 %v5572_v9, %v627_v62  ;;  %v625_v11 = vmul.f32 %v4970_v1, %v5565_v0  ;;  %v4982_v38 = vunpack.c.l.bf16 %v5135_v36  ;;  %v5442_v56 = vld [vmem:[%s8658_s5 + $0x8] ss:$0 sps:$4 sm:$0xff]   ;;  %v5138_v1 = vld [vmem:[%s5895_s29 + $0x20] sm:$0xff]  }
  0x56   : > { %v5838_v12 = vpack.c.bf16 %v758_v2, %v757_v53  ;;  %v756_v16 = vmax.f32 %v692_v3, 0.0  ;;  %v698_v18 = vadd.f32 %v5572_v9, %v628_v4  ;;  %v626_v20 = vmul.f32 %v4971_v6, %v5565_v0  ;;  %v5141_v6 = vld [vmem:[%s5895_s29 + $0x38] sm:$0xff]   ;;  %5425 = vmatprep.subr.msk.bf16.mxu0 %vm1863_vm0, %v5442_v56  ;;  %5426 = vmatprep.subr.msk.bf16.mxu1 %vm1863_vm0, %v5442_v56 }
  0x57   : > { %v761_v21 = vmax.f32 %v697_v10, 0.0  ;;  %v695_v22 = vadd.f32 %v5572_v9, %v625_v11  ;;  %v4983_v39 = vunpack.c.h.bf16 %v5135_v36  ;;  %v4978_v48 = vunpack.c.l.bf16 %v4977_v37 }
  0x58   : > { %8824 = vst [vmem:[#allocation21_spill] sm:$0xff] %v5838_v12  ;;  %1237 = vrot.lane.b32.xlu1 %v5838_v12, %s5474_s25  ;;  %v5845_v23 = vpack.c.bf16 %v756_v16, %v755_v8  ;;  %v762_v26 = vmax.f32 %v698_v18, 0.0  ;;  %v696_v27 = vadd.f32 %v5572_v9, %v626_v20  ;;  %v925_v52 = vmul.f32 %v4982_v38, %v5565_v0 }
  0x59   : > { %v759_v31 = vmax.f32 %v695_v22, 0.0  ;;  %v4979_v53 = vunpack.c.h.bf16 %v4977_v37  ;;  %v926_v60 = vmul.f32 %v4983_v39, %v5565_v0  ;;  %v4990_v62 = vunpack.c.l.bf16 %v5137_v50 }
  0x5a   : > { %8825 = vst [vmem:[#allocation22_spill] sm:$0xff] %v5845_v23  ;;  %1235 = vrot.lane.b32.xlu0 %v5845_v23, %s5474_s25  ;;  %v5850_v32 = vpack.c.bf16 %v762_v26, %v761_v21  ;;  %v760_v33 = vmax.f32 %v696_v27, 0.0  ;;  %v923_v2 = vmul.f32 %v4978_v48, %v5565_v0  ;;  %v4991_v3 = vunpack.c.h.bf16 %v5137_v50  ;;  %v5443_v27 = vld [vmem:[%s8658_s5] sm:$0xff]   ;;  %v5140_v50 = vld [vmem:[%s5895_s29 + $0x30] sm:$0xff]  }
  0x5b   : > { %v4986_v4 = vunpack.c.l.bf16 %v5136_v51  ;;  %v4987_v8 = vunpack.c.h.bf16 %v5136_v51  ;;  %v4998_v10 = vunpack.c.l.bf16 %v5139_v55  ;;  %v4999_v11 = vunpack.c.h.bf16 %v5139_v55 }
  0x5c   : > { %1241 = vrot.lane.b32.xlu1 %v5850_v32, %s5474_s25  ;;  %v5854_v34 = vpack.c.bf16 %v760_v33, %v759_v31  ;;  %v5929_v20 = vadd.f32 %v5572_v9, %v925_v52  ;;  %v924_v21 = vmul.f32 %v4979_v53, %v5565_v0  ;;  %v4994_v22 = vunpack.c.l.bf16 %v5138_v1 }
  0x5d   : > { %v4995_v26 = vunpack.c.h.bf16 %v5138_v1  ;;  %v5940_v31 = vadd.f32 %v5572_v9, %v926_v60  ;;  %v929_v33 = vmul.f32 %v4990_v62, %v5565_v0  ;;  %v5006_v36 = vunpack.c.l.bf16 %v5141_v6  ;;  %v5143_v60 = vld [vmem:[%s5895_s29 + $0x48] sm:$0xff]  }
  0x5e   : > { %8826 = vst [vmem:[#allocation23_spill] sm:$0xff] %v5854_v34  ;;  %1239 = vrot.lane.b32.xlu0 %v5854_v34, %s5474_s25  ;;  %v5007_v37 = vunpack.c.h.bf16 %v5141_v6  ;;  %v5944_v38 = vadd.f32 %v5572_v9, %v923_v2  ;;  %v930_v39 = vmul.f32 %v4991_v3, %v5565_v0  ;;  %v927_v48 = vmul.f32 %v4986_v4, %v5565_v0 }
  0x5f   : > { %v1865_v51 = vsel %vm1863_vm0, %v5442_v56, 0  ;;  %v928_v52 = vmul.f32 %v4987_v8, %v5565_v0  ;;  %v933_v53 = vmul.f32 %v4998_v10, %v5565_v0  ;;  %v934_v55 = vmul.f32 %v4999_v11, %v5565_v0 }
  0x60   : > { %1246 = vrot.lane.b32.xlu1 %v5593_v41, %s5475_s26  ;;  %5252 = vmatpush3.bf16.msra.mxu0 %v1865_v51  ;;  %v1053_v2 = vmax.f32 %v5929_v20, 0.0  ;;  %v988_v3 = vadd.f32 %v5572_v9, %v924_v21  ;;  %v931_v56 = vmul.f32 %v4994_v22, %v5565_v0  ;;  %v932_v4 = vmul.f32 %v4995_v26, %v5565_v0 }
  0x61   : > { %5253 = vmatprep.subr.bf16.mxu0 %v5443_v27  ;;  %5423 = vmatpush3.bf16.msra.mxu1 %v1865_v51  ;;  %v937_v6 = vmul.f32 %v5006_v36, %v5565_v0  ;;  %v938_v8 = vmul.f32 %v5007_v37, %v5565_v0  ;;  %v5002_v10 = vunpack.c.l.bf16 %v5140_v50  ;;  %v5003_v11 = vunpack.c.h.bf16 %v5140_v50 }
  0x62   : > { %1244 = vrot.lane.b32.xlu0 %v5600_v47, %s5475_s26  ;;  %v994_v20 = vadd.f32 %v5572_v9, %v930_v39  ;;  %v991_v21 = vadd.f32 %v5572_v9, %v927_v48  ;;  %v5014_v22 = vunpack.c.l.bf16 %v5143_v60  ;;  %5422 = vmatprep.subr.bf16.mxu1 %v5443_v27  ;;  %v1054_v26 = vmax.f32 %v5940_v31, 0.0 }
  0x63   : > { %v992_v51 = vadd.f32 %v5572_v9, %v928_v52  ;;  %v997_v36 = vadd.f32 %v5572_v9, %v933_v53  ;;  %v998_v37 = vadd.f32 %v5572_v9, %v934_v55  ;;  %v1051_v39 = vmax.f32 %v5944_v38, 0.0 }
  0x64   : > { %1250 = vrot.lane.b32.xlu1 %v5631_v19, %s5475_s26  ;;  %5254 = vmatpush3.bf16.msra.mxu0 %v5443_v27  ;;  %v1052_v48 = vmax.f32 %v988_v3, 0.0  ;;  %v995_v50 = vadd.f32 %v5572_v9, %v931_v56  ;;  %v1001_v52 = vadd.f32 %v5572_v9, %v937_v6  ;;  %v1002_v53 = vadd.f32 %v5572_v9, %v938_v8  ;;  %v5142_v3 = vld [vmem:[%s5895_s29 + $0x40] sm:$0xff]   ;;  %v5145_v6 = vld [vmem:[%s5895_s29 + $0x58] sm:$0xff]  }
  0x65   : > { %5424 = vmatpush3.bf16.msra.mxu1 %v5443_v27  ;;  %v935_v55 = vmul.f32 %v5002_v10, %v5565_v0  ;;  %v936_v38 = vmul.f32 %v5003_v11, %v5565_v0  ;;  %v1058_v56 = vmax.f32 %v994_v20, 0.0  ;;  %v941_v27 = vmul.f32 %v5014_v22, %v5565_v0 }
  0x66   : > { %1248 = vrot.lane.b32.xlu0 %v5598_v46, %s5475_s26  ;;  %v1059_v8 = vmax.f32 %v995_v50, 0.0  ;;  %v5011_v11 = vunpack.c.h.bf16 %v5142_v3  ;;  %v1066_v20 = vmax.f32 %v1002_v53, 0.0  ;;  %v6008_v50 = vpack.c.bf16 %v1054_v26, %v1053_v2 }
  0x67   : > { %v1000_v22 = vadd.f32 %v5572_v9, %v936_v38 }
  0x68   : > { %1254 = vrot.lane.b32.xlu1 %v5641_v28, %s5475_s26 }
  0x6a   : > { %1252 = vrot.lane.b32.xlu0 %v5628_v14, %s5475_s26 }
  0x6c   : > { %1258 = vrot.lane.b32.xlu1 %v5667_v63, %s5475_s26 }
  0x6e   : > { %1256 = vrot.lane.b32.xlu0 %v5636_v24, %s5475_s26 }
  0x70   : > { %1262 = vrot.lane.b32.xlu1 %v5679_v15, %s5475_s26 }
  0x72   : > { %1260 = vrot.lane.b32.xlu0 %v5663_v58, %s5475_s26 }
  0x74   : > { %1266 = vrot.lane.b32.xlu1 %v5702_v49, %s5475_s26 }
  0x76   : > { %1264 = vrot.lane.b32.xlu0 %v5673_v5, %s5475_s26 }
  0x78   : > { %1270 = vrot.lane.b32.xlu1 %v5719_v7, %s5475_s26 }
  0x7a   : > { %1268 = vrot.lane.b32.xlu0 %v5699_v40, %s5475_s26 }
  0x7c   : > { %1274 = vrot.lane.b32.xlu1 %v5740_v35, %s5475_s26 }
  0x7e   : > { %1272 = vrot.lane.b32.xlu0 %v5709_v54, %s5475_s26 }
  0x80   : > { %1278 = vrot.lane.b32.xlu1 %v5757_v61, %s5475_s26  ;;  %v1056_v61 = vmax.f32 %v992_v51, 0.0 }
  0x82   : > { %1276 = vrot.lane.b32.xlu0 %v5733_v25, %s5475_s26  ;;  %v1061_v25 = vmax.f32 %v997_v36, 0.0  ;;  %v5022_v36 = vunpack.c.l.bf16 %v5145_v6 }
  0x84   : > { %1282 = vrot.lane.b32.xlu1 %v5777_v30, %s5475_s26 }
  0x86   : > { %1280 = vrot.lane.b32.xlu0 %v5745_v43, %s5475_s26  ;;  %v5015_v43 = vunpack.c.h.bf16 %v5143_v60  ;;  %v1065_v60 = vmax.f32 %v1001_v52, 0.0 }
  0x88   : > { %1286 = vrot.lane.b32.xlu1 %v5793_v57, %s5475_s26  ;;  %v993_v57 = vadd.f32 %v5572_v9, %v929_v33  ;;  %v942_v51 = vmul.f32 %v5015_v43, %v5565_v0 }
  0x8a   : > { %1284 = vrot.lane.b32.xlu0 %v5768_v17, %s5475_s26  ;;  %v996_v17 = vadd.f32 %v5572_v9, %v932_v4  ;;  %v1057_v30 = vmax.f32 %v993_v57, 0.0  ;;  %v1055_v4 = vmax.f32 %v991_v21, 0.0  ;;  %v999_v21 = vadd.f32 %v5572_v9, %v935_v55  ;;  %v5144_v55 = vld [vmem:[%s5895_s29 + $0x50] sm:$0xff]  }
  0x8b   : > { %v1006_v26 = vadd.f32 %v5572_v9, %v942_v51 }
  0x8c   : > { %1290 = vrot.lane.b32.xlu1 %v5813_v29, %s5475_s26  ;;  %v1060_v10 = vmax.f32 %v996_v17, 0.0  ;;  %v6005_v17 = vadd.f32 %v5572_v9, %v941_v27  ;;  %v6012_v52 = vpack.c.bf16 %v1058_v56, %v1057_v30  ;;  %v6014_v53 = vpack.c.bf16 %v1056_v61, %v1055_v4  ;;  %v5149_v4 = vld [vmem:[%s5895_s29 + $0x78] sm:$0xff]   ;;  %v5152_v29 = vld [vmem:[%s5895_s29 + $0x90] sm:$0xff]  }
  0x8d   : > { %v5924_v16 = vpop.permute.xlu1 %1183  ;;  %v5926_v18 = vpop.permute.xlu0 %1179  ;;  %v940_v27 = vmul.f32 %v5011_v11, %v5565_v0  ;;  %v6029_v61 = vpack.c.bf16 %v1066_v20, %v1065_v60  ;;  %v5018_v56 = vunpack.c.l.bf16 %v5144_v55 }
  0x8e   : > { %1288 = vrot.lane.b32.xlu0 %v5785_v44, %s5475_s26  ;;  %v6027_v30 = vpack.c.bf16 %v1060_v10, %v1059_v8 }
  0x8f   : > { %v1004_v20 = vadd.f32 %v5572_v9, %v940_v27 }
  0x90   : > { %1294 = vrot.lane.b32.xlu1 %v5828_v59, %s5475_s26  ;;  %v5151_v59 = vld [vmem:[%s5895_s29 + $0x88] sm:$0xff]  }
  0x91   : > { %v5956_v62 = vpop.permute.xlu1 %1185  ;;  %v5958_v1 = vpop.permute.xlu0 %1181  ;;  %v1068_v7 = vmax.f32 %v1004_v20, 0.0  ;;  %v5047_v40 = vunpack.c.h.bf16 %v5151_v59 }
  0x92   : > { %1292 = vrot.lane.b32.xlu0 %v5804_v13, %s5475_s26 }
  0x94   : > { %1298 = vrot.lane.b32.xlu1 %v5845_v23, %s5475_s26  ;;  %v1062_v23 = vmax.f32 %v998_v37, 0.0  ;;  %v5476_v37 = vmov 0  }
  0x95   : > { %v5977_v33 = vpop.permute.xlu1 %1189 }
  0x96   : > { %1296 = vrot.lane.b32.xlu0 %v5821_v45, %s5475_s26  ;;  %v5984_v31 = vpop.permute.xlu0 %1187  ;;  %v5010_v45 = vunpack.c.l.bf16 %v5142_v3  ;;  %v6010_v3 = vpack.c.bf16 %v1052_v48, %v1051_v39  ;;  %v6017_v38 = vpack.c.bf16 %v1062_v23, %v1061_v25  ;;  %v1063_v25 = vmax.f32 %v999_v21, 0.0  ;;  %v6043_v21 = vld [vmem:[%s5549_s18] ss:$0 sm:$0xff] }
  0x97   : > { %v1064_v23 = vmax.f32 %v1000_v22, 0.0  ;;  %v1069_v39 = vmax.f32 %v6005_v17, 0.0  ;;  %v945_v48 = vmul.f32 %v5022_v36, %v5565_v0  ;;  %v5038_v36 = vunpack.c.l.bf16 %v5149_v4 }
  0x98   : > { %1302 = vrot.lane.b32.xlu1 %v5854_v34, %s5475_s26  ;;  %8827 = vst [vmem:[#allocation24_spill] sm:$0xff] %v6010_v3  ;;  %v939_v43 = vmul.f32 %v5010_v45, %v5565_v0  ;;  %v5023_v34 = vunpack.c.h.bf16 %v5145_v6  ;;  %v5019_v6 = vunpack.c.h.bf16 %v5144_v55  ;;  %v958_v5 = vmul.f32 %v6043_v21, %v5047_v40 }
  0x99   : > { %v5995_v35 = vpop.permute.xlu1 %1193  ;;  %v6050_v17 = vpack.c.bf16 %v1064_v23, %v1063_v25  ;;  %v5050_v40 = vunpack.c.l.bf16 %v5152_v29 }
  0x9a   : > { %1300 = vrot.lane.b32.xlu0 %v5838_v12, %s5475_s26  ;;  %v5999_v57 = vpop.permute.xlu0 %1191  ;;  %v5147_v12 = vld [vmem:[%s5895_s29 + $0x68] sm:$0xff]   ;;  %v1003_v60 = vadd.f32 %v5572_v9, %v939_v43  ;;  %v946_v0 = vmul.f32 %v6043_v21, %v5023_v34  ;;  %v1070_v43 = vmax.f32 %v1006_v26, 0.0  ;;  %v6055_v9 = vld [vmem:[%s5562_s24] ss:$0 sm:$0xff]  ;;  %v943_v34 = vmul.f32 %v6043_v21, %v5018_v56 }
  0x9b   : > { %v5030_v8 = vunpack.c.l.bf16 %v5147_v12  ;;  %v5031_v10 = vunpack.c.h.bf16 %v5147_v12  ;;  %v5039_v12 = vunpack.c.h.bf16 %v5149_v4  ;;  %v6058_v27 = vadd.f32 %v6055_v9, %v945_v48 }
  0x9c   : > { %1306 = vrot.lane.b32.xlu1 %v5476_v37, %s5475_s26  ;;  %v5146_v37 = vld [vmem:[%s5895_s29 + $0x60] sm:$0xff]   ;;  %v944_v25 = vmul.f32 %v6043_v21, %v5019_v6  ;;  %v1010_v48 = vadd.f32 %v6055_v9, %v946_v0  ;;  %v953_v56 = vmul.f32 %v6043_v21, %v5038_v36  ;;  %v1007_v20 = vadd.f32 %v6055_v9, %v943_v34 }
  0x9d   : > { %v5026_v11 = vunpack.c.l.bf16 %v5146_v37  ;;  %v5027_v22 = vunpack.c.h.bf16 %v5146_v37  ;;  %v949_v23 = vmul.f32 %v6043_v21, %v5030_v8  ;;  %v950_v4 = vmul.f32 %v6043_v21, %v5031_v10 }
  0x9e   : > { %1304 = vrot.lane.b32.xlu0 %v5850_v32, %s5475_s26  ;;  %v6025_v2 = vpop.permute.xlu1 %1197  ;;  %v5148_v32 = vld [vmem:[%s5895_s29 + $0x70] sm:$0xff]   ;;  %v5046_v8 = vunpack.c.l.bf16 %v5151_v59  ;;  %v1008_v36 = vadd.f32 %v6055_v9, %v944_v25  ;;  %v1074_v34 = vmax.f32 %v1010_v48, 0.0  ;;  %v1017_v49 = vadd.f32 %v6055_v9, %v953_v56 }
  0x9f   : > { %v6031_v45 = vpop.permute.xlu0 %1195  ;;  %v5034_v55 = vunpack.c.l.bf16 %v5148_v32  ;;  %v5035_v37 = vunpack.c.h.bf16 %v5148_v32  ;;  %v947_v26 = vmul.f32 %v6043_v21, %v5026_v11  ;;  %v948_v13 = vmul.f32 %v6043_v21, %v5027_v22 }
  0xa0   : > { %1504 = vrot.lane.b32.xlu1 %v6008_v50, %s5474_s25  ;;  %v954_v32 = vmul.f32 %v6043_v21, %v5039_v12  ;;  %v6077_v11 = vpack.c.bf16 %v1070_v43, %v1069_v39  ;;  %v1013_v12 = vadd.f32 %v6055_v9, %v949_v23  ;;  %v5150_v43 = vld [vmem:[%s5895_s29 + $0x80] sm:$0xff]   ;;  %v1072_v56 = vmax.f32 %v1008_v36, 0.0 }
  0xa1   : > { %v951_v6 = vmul.f32 %v6043_v21, %v5034_v55  ;;  %v952_v0 = vmul.f32 %v6043_v21, %v5035_v37  ;;  %v1014_v55 = vadd.f32 %v6055_v9, %v950_v4  ;;  %v1011_v39 = vadd.f32 %v6055_v9, %v947_v26  ;;  %v5153_v26 = vld [vmem:[%s5895_s29 + $0x98] sm:$0xff]  }
  0xa2   : > { %1502 = vrot.lane.b32.xlu0 %v6010_v3, %s5474_s25  ;;  %v6048_v51 = vpop.permute.xlu1 %1201  ;;  %v1067_v3 = vmax.f32 %v1003_v60, 0.0  ;;  %v1073_v60 = vmax.f32 %v6058_v27, 0.0  ;;  %v1012_v37 = vadd.f32 %v6055_v9, %v948_v13  ;;  %v1018_v25 = vadd.f32 %v6055_v9, %v954_v32 }
  0xa3   : > { %8828 = vst [vmem:[#allocation25_spill] sm:$0xff] %v6048_v51  ;;  %v6052_v54 = vpop.permute.xlu0 %1199  ;;  %v1015_v23 = vadd.f32 %v6055_v9, %v951_v6  ;;  %v957_v4 = vmul.f32 %v6043_v21, %v5046_v8  ;;  %v5042_v13 = vunpack.c.l.bf16 %v5150_v43  ;;  %v5043_v59 = vunpack.c.h.bf16 %v5150_v43  ;;  %v5156_v51 = vld [vmem:[%s5895_s29 + $0xb0] sm:$0xff]  }
  0xa4   : > { %1508 = vrot.lane.b32.xlu1 %v6012_v52, %s5474_s25  ;;  %v6091_v27 = vpack.c.bf16 %v1068_v7, %v1067_v3  ;;  %v1071_v7 = vmax.f32 %v1007_v20, 0.0  ;;  %v1016_v3 = vadd.f32 %v6055_v9, %v952_v0  ;;  %v1077_v32 = vmax.f32 %v1013_v12, 0.0 }
  0xa5   : > { %v1078_v44 = vmax.f32 %v1014_v55, 0.0  ;;  %v1075_v6 = vmax.f32 %v1011_v39, 0.0  ;;  %v1076_v8 = vmax.f32 %v1012_v37, 0.0  ;;  %v5055_v20 = vunpack.c.h.bf16 %v5153_v26 }
  0xa6   : > { %1506 = vrot.lane.b32.xlu0 %v6014_v53, %s5474_s25  ;;  %v1081_v0 = vmax.f32 %v1017_v49, 0.0  ;;  %v1082_v43 = vmax.f32 %v1018_v25, 0.0  ;;  %v1021_v15 = vadd.f32 %v6055_v9, %v957_v4  ;;  %v1080_v12 = vmax.f32 %v1016_v3, 0.0 }
  0xa7   : > { %v6075_v10 = vpop.permute.xlu1 %1205  ;;  %v955_v55 = vmul.f32 %v6043_v21, %v5042_v13  ;;  %v956_v39 = vmul.f32 %v6043_v21, %v5043_v59  ;;  %v6120_v37 = vpack.c.bf16 %v1074_v34, %v1073_v60  ;;  %v6122_v49 = vpack.c.bf16 %v1072_v56, %v1071_v7  ;;  %v5154_v59 = vld [vmem:[%s5895_s29 + $0xa0] sm:$0xff]  }
  0xa8   : > { %8829 = vst [vmem:[#allocation26_spill] sm:$0xff] %v6075_v10  ;;  %1512 = vrot.lane.b32.xlu1 %v6017_v38, %s5474_s25  ;;  %v6084_v22 = vpop.permute.xlu0 %1203  ;;  %v5051_v25 = vunpack.c.h.bf16 %v5152_v29  ;;  %v1022_v4 = vadd.f32 %v6055_v9, %v958_v5  ;;  %v962_v3 = vmul.f32 %v6043_v21, %v5055_v20  ;;  %v6132_v60 = vpack.c.bf16 %v1078_v44, %v1077_v32 }
  0xa9   : > { %8830 = vst [vmem:[#allocation27_spill] sm:$0xff] %v6084_v22  ;;  %v1079_v22 = vmax.f32 %v1015_v23, 0.0  ;;  %8834 = vst [vmem:[#allocation31_spill] sm:$0xff] %v6120_v37  ;;  %v6134_v34 = vpack.c.bf16 %v1076_v8, %v1075_v6  ;;  %v6136_v29 = vpack.c.bf16 %v1082_v43, %v1081_v0  ;;  %v1085_v7 = vmax.f32 %v1021_v15, 0.0 }
  0xaa   : > { %1510 = vrot.lane.b32.xlu0 %v6027_v30, %s5474_s25  ;;  %8836 = vst [vmem:[#allocation33_spill] sm:$0xff] %v6132_v60  ;;  %v1020_v20 = vadd.f32 %v6055_v9, %v956_v39  ;;  %v960_v44 = vmul.f32 %v6043_v21, %v5051_v25  ;;  %v5058_v6 = vunpack.c.l.bf16 %v5154_v59  ;;  %v5059_v15 = vunpack.c.h.bf16 %v5154_v59 }
  0xab   : > { %v6101_v10 = vpop.permute.xlu1 %1209  ;;  %8837 = vst [vmem:[#allocation34_spill] sm:$0xff] %v6136_v29  ;;  %v6140_v5 = vpack.c.bf16 %v1080_v12, %v1079_v22  ;;  %v1086_v22 = vmax.f32 %v1022_v4, 0.0  ;;  %v1026_v43 = vadd.f32 %v6055_v9, %v962_v3  ;;  %v5067_v25 = vunpack.c.h.bf16 %v5156_v51 }
  0xac   : > { %8831 = vst [vmem:[#allocation28_spill] sm:$0xff] %v6101_v10  ;;  %1516 = vrot.lane.b32.xlu1 %v6029_v61, %s5474_s25  ;;  %v6106_v48 = vpop.permute.xlu0 %1207  ;;  %v5054_v10 = vunpack.c.l.bf16 %v5153_v26  ;;  %v1084_v4 = vmax.f32 %v1020_v20, 0.0 }
  0xad   : > { %8832 = vst [vmem:[#allocation29_spill] sm:$0xff] %v6106_v48  ;;  %v5155_v48 = vld [vmem:[%s5895_s29 + $0xa8] sm:$0xff]   ;;  %8839 = vst [vmem:[#allocation36_spill] sm:$0xff] %v6140_v5  ;;  %v6174_v20 = vpack.c.bf16 %v1086_v22, %v1085_v7  ;;  %v5158_v7 = vld [vmem:[%s5895_s29 + $0xc0] sm:$0xff]  }
  0xae   : > { %1514 = vrot.lane.b32.xlu0 %v6050_v17, %s5474_s25  ;;  %v961_v26 = vmul.f32 %v6043_v21, %v5054_v10  ;;  %v5062_v13 = vunpack.c.l.bf16 %v5155_v48  ;;  %v1019_v10 = vadd.f32 %v6055_v9, %v955_v55  ;;  %v5063_v32 = vunpack.c.h.bf16 %v5155_v48  ;;  %v5444_v55 = vld [vmem:[%s8659_s6 + $0x8] ss:$0 sps:$4 sm:$0xff]  }
  0xaf   : > { %v6114_v36 = vpop.permute.xlu1 %1213  ;;  %5427 = vmatprep.subr.msk.bf16.mxu1 %vm1863_vm0, %v5444_v55  ;;  %v6163_v3 = vsel %vm1863_vm0, %v5444_v55, 0  ;;  %8843 = vst [vmem:[#allocation40_spill] sm:$0xff] %v6174_v20  ;;  %v1090_v55 = vmax.f32 %v1026_v43, 0.0 }
  0xb0   : > { %8833 = vst [vmem:[#allocation30_spill] sm:$0xff] %v6114_v36  ;;  %1520 = vrot.lane.b32.xlu1 %v6077_v11, %s5474_s25  ;;  %v959_v36 = vmul.f32 %v6043_v21, %v5050_v40  ;;  %v1025_v0 = vadd.f32 %v6055_v9, %v961_v26  ;;  %v965_v12 = vmul.f32 %v6043_v21, %v5062_v13  ;;  %v5066_v40 = vunpack.c.l.bf16 %v5156_v51 }
  0xb1   : > { %v6124_v23 = vpop.permute.xlu0 %1211  ;;  %v1083_v59 = vmax.f32 %v1019_v10, 0.0  ;;  %8841 = vst [vmem:[#allocation38_spill] sm:$0xff] %v6163_v3  ;;  %v963_v51 = vmul.f32 %v6043_v21, %v5058_v6  ;;  %v964_v10 = vmul.f32 %v6043_v21, %v5059_v15  ;;  %v968_v15 = vmul.f32 %v6043_v21, %v5067_v25  ;;  %v5161_v25 = vld [vmem:[%s5895_s29 + $0xd8] sm:$0xff]  }
  0xb2   : > { %8835 = vst [vmem:[#allocation32_spill] sm:$0xff] %v6124_v23  ;;  %1518 = vrot.lane.b32.xlu0 %v6091_v27, %s5474_s25  ;;  %v5157_v23 = vld [vmem:[%s5895_s29 + $0xb8] sm:$0xff]   ;;  %v1023_v26 = vadd.f32 %v6055_v9, %v959_v36  ;;  %v5159_v36 = vld [vmem:[%s5895_s29 + $0xc8] sm:$0xff]   ;;  %v1029_v3 = vadd.f32 %v6055_v9, %v965_v12  ;;  %v967_v6 = vmul.f32 %v6043_v21, %v5066_v40 }
  0xb3   : > { %v6138_v56 = vpop.permute.xlu1 %1217  ;;  %v5070_v48 = vunpack.c.l.bf16 %v5157_v23  ;;  %v5071_v39 = vunpack.c.h.bf16 %v5157_v23  ;;  %v966_v23 = vmul.f32 %v6043_v21, %v5063_v32  ;;  %v6186_v22 = vpack.c.bf16 %v1084_v4, %v1083_v59 }
  0xb4   : > { %8838 = vst [vmem:[#allocation35_spill] sm:$0xff] %v6138_v56  ;;  %1524 = vrot.lane.b32.xlu1 %v6120_v37, %s5474_s25  ;;  %v1024_v56 = vadd.f32 %v6055_v9, %v960_v44  ;;  %v5078_v43 = vunpack.c.l.bf16 %v5159_v36  ;;  %v5079_v12 = vunpack.c.h.bf16 %v5159_v36  ;;  %v1028_v40 = vadd.f32 %v6055_v9, %v964_v10  ;;  %v5160_v10 = vld [vmem:[%s5895_s29 + $0xd0] sm:$0xff]  }
  0xb5   : > { %v6150_v8 = vpop.permute.xlu0 %1215  ;;  %v969_v44 = vmul.f32 %v6043_v21, %v5070_v48  ;;  %v970_v32 = vmul.f32 %v6043_v21, %v5071_v39  ;;  %v1030_v48 = vadd.f32 %v6055_v9, %v966_v23  ;;  %v1027_v39 = vadd.f32 %v6055_v9, %v963_v51 }
  0xb6   : > { %8840 = vst [vmem:[#allocation37_spill] sm:$0xff] %v6150_v8  ;;  %1522 = vrot.lane.b32.xlu0 %v6122_v49, %s5474_s25  ;;  %v1089_v8 = vmax.f32 %v1025_v0, 0.0  ;;  %v1087_v0 = vmax.f32 %v1023_v26, 0.0  ;;  %v1093_v59 = vmax.f32 %v1029_v3, 0.0  ;;  %v5074_v4 = vunpack.c.l.bf16 %v5158_v7 }
  0xb7   : > { %v5075_v26 = vunpack.c.h.bf16 %v5158_v7  ;;  %v1031_v23 = vadd.f32 %v6055_v9, %v967_v6  ;;  %v1032_v51 = vadd.f32 %v6055_v9, %v968_v15  ;;  %v974_v3 = vmul.f32 %v6043_v21, %v5079_v12  ;;  %v5163_v12 = vld [vmem:[%s5895_s29 + $0xe8] sm:$0xff]  }
  0xb8   : > { %1528 = vrot.lane.b32.xlu1 %v6132_v60, %s5474_s25  ;;  %v6167_v13 = vpop.permute.xlu1 %1221  ;;  %v6196_v37 = vpack.c.bf16 %v1090_v55, %v1089_v8  ;;  %v973_v8 = vmul.f32 %v6043_v21, %v5078_v43  ;;  %v5086_v55 = vunpack.c.l.bf16 %v5161_v25  ;;  %v5087_v7 = vunpack.c.h.bf16 %v5161_v25 }
  0xb9   : > { %8842 = vst [vmem:[#allocation39_spill] sm:$0xff] %v6167_v13  ;;  %v971_v6 = vmul.f32 %v6043_v21, %v5074_v4  ;;  %v972_v15 = vmul.f32 %v6043_v21, %v5075_v26  ;;  %v5082_v43 = vunpack.c.l.bf16 %v5160_v10  ;;  %v5083_v58 = vunpack.c.h.bf16 %v5160_v10  ;;  %v5162_v10 = vld [vmem:[%s5895_s29 + $0xe0] sm:$0xff]  }
  0xba   : > { %1526 = vrot.lane.b32.xlu0 %v6134_v34, %s5474_s25  ;;  %v6179_v13 = vpop.permute.xlu0 %1219  ;;  %8846 = vst [vmem:[#allocation43_spill] sm:$0xff] %v6196_v37  ;;  %v977_v4 = vmul.f32 %v6043_v21, %v5086_v55  ;;  %v978_v26 = vmul.f32 %v6043_v21, %v5087_v7 }
  0xbb   : > { %8844 = vst [vmem:[#allocation41_spill] sm:$0xff] %v6179_v13  ;;  %v1088_v13 = vmax.f32 %v1024_v56, 0.0  ;;  %v1034_v56 = vadd.f32 %v6055_v9, %v970_v32  ;;  %v1092_v32 = vmax.f32 %v1028_v40, 0.0  ;;  %v1038_v40 = vadd.f32 %v6055_v9, %v974_v3 }
  0xbc   : > { %1532 = vrot.lane.b32.xlu1 %v6136_v29, %s5474_s25  ;;  %v6190_v60 = vpop.permute.xlu1 %1225  ;;  %v1091_v29 = vmax.f32 %v1027_v39, 0.0  ;;  %v1037_v39 = vadd.f32 %v6055_v9, %v973_v8  ;;  %v1035_v8 = vadd.f32 %v6055_v9, %v971_v6  ;;  %v1036_v3 = vadd.f32 %v6055_v9, %v972_v15 }
  0xbd   : > { %8845 = vst [vmem:[#allocation42_spill] sm:$0xff] %v6190_v60  ;;  %v1033_v60 = vadd.f32 %v6055_v9, %v969_v44  ;;  %v1094_v44 = vmax.f32 %v1030_v48, 0.0  ;;  %v975_v55 = vmul.f32 %v6043_v21, %v5082_v43  ;;  %v976_v7 = vmul.f32 %v6043_v21, %v5083_v58 }
  0xbe   : > { %1530 = vrot.lane.b32.xlu0 %v6140_v5, %s5474_s25  ;;  %v6200_v36 = vpop.permute.xlu0 %1223  ;;  %v1102_v6 = vmax.f32 %v1038_v40, 0.0  ;;  %v1041_v15 = vadd.f32 %v6055_v9, %v977_v4  ;;  %v1042_v43 = vadd.f32 %v6055_v9, %v978_v26 }
  0xbf   : > { %8847 = vst [vmem:[#allocation44_spill] sm:$0xff] %v6200_v36  ;;  %v6211_v36 = vpack.c.bf16 %v1088_v13, %v1087_v0  ;;  %v1097_v25 = vmax.f32 %v1033_v60, 0.0  ;;  %v1095_v13 = vmax.f32 %v1031_v23, 0.0  ;;  %v1096_v0 = vmax.f32 %v1032_v51, 0.0 }
  0xc0   : > { %1536 = vrot.lane.b32.xlu1 %v6174_v20, %s5474_s25  ;;  %v1098_v20 = vmax.f32 %v1034_v56, 0.0  ;;  %v6231_v60 = vpack.c.bf16 %v1092_v32, %v1091_v29  ;;  %v5094_v56 = vunpack.c.l.bf16 %v5163_v12  ;;  %v5095_v23 = vunpack.c.h.bf16 %v5163_v12 }
  0xc1   : > { %v6213_v5 = vpop.permute.xlu1 %1229  ;;  %v6244_v29 = vpack.c.bf16 %v1096_v0, %v1095_v13  ;;  %v5091_v32 = vunpack.c.h.bf16 %v5162_v10  ;;  %v1099_v0 = vmax.f32 %v1035_v8, 0.0  ;;  %v1106_v8 = vmax.f32 %v1042_v43, 0.0 }
  0xc2   : > { %8848 = vst [vmem:[#allocation45_spill] sm:$0xff] %v6213_v5  ;;  %1534 = vrot.lane.b32.xlu0 %v6186_v22, %s5474_s25  ;;  %v6229_v5 = vpack.c.bf16 %v1094_v44, %v1093_v59  ;;  %v6242_v59 = vpack.c.bf16 %v1098_v20, %v1097_v25  ;;  %v5090_v44 = vunpack.c.l.bf16 %v5162_v10  ;;  %v981_v58 = vmul.f32 %v6043_v21, %v5094_v56 }
  0xc3   : > { %v6220_v48 = vpop.permute.xlu0 %1227  ;;  %v982_v20 = vmul.f32 %v6043_v21, %v5095_v23  ;;  %v1100_v10 = vmax.f32 %v1036_v3, 0.0  ;;  %v980_v26 = vmul.f32 %v6043_v21, %v5091_v32 }
  0xc4   : > { %8849 = vst [vmem:[#allocation46_spill] sm:$0xff] %v6220_v48  ;;  %1540 = vrot.lane.b32.xlu1 %v6196_v37, %s5474_s25  ;;  %8850 = vst [vmem:[#allocation47_spill] sm:$0xff] %v6229_v5  ;;  %v5165_v48 = vld [vmem:[%s5895_s29 + $0xf8] sm:$0xff]   ;;  %v5164_v37 = vld [vmem:[%s5895_s29 + $0xf0] sm:$0xff]   ;;  %v979_v4 = vmul.f32 %v6043_v21, %v5090_v44 }
  0xc5   : > { %v6233_v51 = vpop.permute.xlu1 %1233  ;;  %v5102_v25 = vunpack.c.l.bf16 %v5165_v48  ;;  %v5103_v13 = vunpack.c.h.bf16 %v5165_v48  ;;  %v5098_v56 = vunpack.c.l.bf16 %v5164_v37  ;;  %v1105_v48 = vmax.f32 %v1041_v15, 0.0 }
  0xc6   : > { %8851 = vst [vmem:[#allocation48_spill] sm:$0xff] %v6233_v51  ;;  %1538 = vrot.lane.b32.xlu0 %v6211_v36, %s5474_s25  ;;  %v1101_v51 = vmax.f32 %v1037_v39, 0.0  ;;  %v1040_v39 = vadd.f32 %v6055_v9, %v976_v7  ;;  %v1046_v7 = vadd.f32 %v6055_v9, %v982_v20  ;;  %v6273_v32 = vpack.c.bf16 %v1100_v10, %v1099_v0 }
  0xc7   : > { %v6246_v12 = vpop.permute.xlu0 %1231  ;;  %v986_v44 = vmul.f32 %v6043_v21, %v5103_v13  ;;  %v1043_v15 = vadd.f32 %v6055_v9, %v979_v4  ;;  %v1044_v43 = vadd.f32 %v6055_v9, %v980_v26 }
  0xc8   : > { %8852 = vst [vmem:[#allocation49_spill] sm:$0xff] %v6246_v12  ;;  %1544 = vrot.lane.b32.xlu1 %v6229_v5, %s5474_s25  ;;  %v1039_v12 = vadd.f32 %v6055_v9, %v975_v55  ;;  %v5099_v5 = vunpack.c.h.bf16 %v5164_v37  ;;  %v6263_v23 = vpack.c.bf16 %v1102_v6, %v1101_v51  ;;  %v1045_v55 = vadd.f32 %v6055_v9, %v981_v58 }
  0xc9   : > { %v1104_v51 = vmax.f32 %v1040_v39, 0.0  ;;  %v983_v58 = vmul.f32 %v6043_v21, %v5098_v56  ;;  %v1110_v0 = vmax.f32 %v1046_v7, 0.0  ;;  %v1050_v39 = vadd.f32 %v6055_v9, %v986_v44 }
  0xca   : > { %1542 = vrot.lane.b32.xlu0 %v6231_v60, %s5474_s25  ;;  %v6259_v40 = vpop.permute.xlu1 %1237  ;;  %v1103_v37 = vmax.f32 %v1039_v12, 0.0  ;;  %v984_v20 = vmul.f32 %v6043_v21, %v5099_v5  ;;  %v1109_v12 = vmax.f32 %v1045_v55, 0.0  ;;  %v1107_v5 = vmax.f32 %v1043_v15, 0.0 }
  0xcb   : > { %8853 = vst [vmem:[#allocation50_spill] sm:$0xff] %v6259_v40  ;;  %v985_v40 = vmul.f32 %v6043_v21, %v5102_v25  ;;  %v6283_v25 = vpack.c.bf16 %v1106_v8, %v1105_v48  ;;  %v1108_v26 = vmax.f32 %v1044_v43, 0.0  ;;  %v1047_v56 = vadd.f32 %v6055_v9, %v983_v58 }
  0xcc   : > { %v6265_v3 = vpop.permute.xlu0 %1235  ;;  %1548 = vrot.lane.b32.xlu1 %v6242_v59, %s5474_s25  ;;  %v6291_v4 = vpack.c.bf16 %v1104_v51, %v1103_v37  ;;  %v1048_v48 = vadd.f32 %v6055_v9, %v984_v20  ;;  %v1311_v8 = vsel %vm1308_vm1, 0, %v5926_v18  ;;  %v6305_v44 = vpack.c.bf16 %v1110_v0, %v1109_v12 }
  0xcd   : > { %8854 = vst [vmem:[#allocation51_spill] sm:$0xff] %v6283_v25  ;;  %v1049_v10 = vadd.f32 %v6055_v9, %v985_v40  ;;  %v1314_v40 = vsel %vm1308_vm1, %v5595_v42, %v5958_v1  ;;  %v1114_v51 = vmax.f32 %v1050_v39, 0.0  ;;  %v6311_v42 = vpack.c.bf16 %v1108_v26, %v1107_v5 }
  0xce   : > { %1546 = vrot.lane.b32.xlu0 %v6244_v29, %s5474_s25  ;;  %v6277_v6 = vpop.permute.xlu1 %1241  ;;  %8855 = vst [vmem:[#allocation52_spill] sm:$0xff] %v6291_v4  ;;  %8856 = vst [vmem:[#allocation53_spill] sm:$0xff] %v6305_v44  ;;  %v1111_v1 = vmax.f32 %v1047_v56, 0.0  ;;  %v1112_v15 = vmax.f32 %v1048_v48, 0.0  ;;  %v1317_v43 = vsel %vm1308_vm1, %v5600_v47, %v5924_v16  ;;  %v1320_v47 = vsel %vm1308_vm1, %v5593_v41, %v5956_v62 }
  0xcf   : > { %v1113_v37 = vmax.f32 %v1049_v10, 0.0  ;;  %8857 = vst [vmem:[#allocation54_spill] sm:$0xff] %v6311_v42  ;;  %v1323_v16 = vsel %vm1308_vm1, %v5598_v46, %v5984_v31  ;;  %v1326_v62 = vsel %vm1308_vm1, %v5631_v19, %v5977_v33  ;;  %v1329_v31 = vsel %vm1308_vm1, %v5628_v14, %v5999_v57 }
  0xd0   : > { %v6285_v13 = vpop.permute.xlu0 %1239  ;;  %1552 = vrot.lane.b32.xlu1 %v6263_v23, %s5474_s25  ;;  %v6325_v10 = vpack.c.bf16 %v1112_v15, %v1111_v1  ;;  %v1332_v33 = vsel %vm1308_vm1, %v5641_v28, %v5995_v35  ;;  %v1335_v57 = vsel %vm1308_vm1, %v5636_v24, %v6031_v45  ;;  %v1338_v35 = vsel %vm1308_vm1, %v5667_v63, %v6025_v2  ;;  %v8859_v45 = vld [vmem:[#allocation2_spill] sm:$0xff]  ;;  %v8860_v15 = vld [vmem:[#allocation31_spill] sm:$0xff]  ;;  %v8861_v63 = vld [vmem:[#allocation36_spill] sm:$0xff] }
  0xd1   : > { %v6319_v20 = vpack.c.bf16 %v1114_v51, %v1113_v37 }
  0xd2   : > { %1550 = vrot.lane.b32.xlu0 %v6273_v32, %s5474_s25  ;;  %v1247_v21 = vpop.permute.xlu1 %1246  ;;  %8858 = vst [vmem:[#allocation55_spill] sm:$0xff] %v6325_v10 }
  0xd3   : > { %v1409_v55 = vsel %vm1405_vm2, %v1314_v40, %v1247_v21 }
  0xd4   : > { %v1245_v7 = vpop.permute.xlu0 %1244  ;;  %1556 = vrot.lane.b32.xlu1 %v6283_v25, %s5474_s25 }
  0xd5   : > { %v1407_v9 = vsel %vm1405_vm2, %v1311_v8, %v1245_v7 }
  0xd6   : > { %1554 = vrot.lane.b32.xlu0 %v6291_v4, %s5474_s25  ;;  %5255 = vmatprep.mubr.msk.bf16.mxu0 %vm1798_vm3, %v1407_v9  ;;  %v1251_v18 = vpop.permute.xlu1 %1250 }
  0xd7   : > { %5256 = vmatmul.mubr.msk.bf16.vlgmr.msra.gmra.mxu0 %vm1798_vm3, %v1409_v55  ;;  %v1413_v21 = vsel %vm1405_vm2, %v1320_v47, %v1251_v18  ;;  %v1341_v18 = vsel %vm1308_vm1, %v8859_v45, %v6052_v54  ;;  %v8862_v54 = vld [vmem:[#allocation33_spill] sm:$0xff]  ;;  %v8864_v47 = vld [vmem:[#allocation4_spill] sm:$0xff]  ;;  %v8873_v45 = vld [vmem:[#allocation26_spill] sm:$0xff] }
  0xd8   : > { %v1249_v58 = vpop.permute.xlu0 %1248  ;;  %1560 = vrot.lane.b32.xlu1 %v6305_v44, %s5474_s25 }
  0xd9   : > { %v1411_v12 = vsel %vm1405_vm2, %v1317_v43, %v1249_v58 }
  0xda   : > { %1558 = vrot.lane.b32.xlu0 %v6311_v42, %s5474_s25  ;;  %5259 = vmatprep.mubr.msk.bf16.mxu0 %vm1798_vm3, %v1411_v12  ;;  %v1255_v0 = vpop.permute.xlu1 %1254 }
  0xdb   : > { %v1417_v48 = vsel %vm1405_vm2, %v1326_v62, %v1255_v0 }
  0xdc   : > { %v1253_v39 = vpop.permute.xlu0 %1252  ;;  %1564 = vrot.lane.b32.xlu1 %v6319_v20, %s5474_s25 }
  0xdd   : > { %v1415_v26 = vsel %vm1405_vm2, %v1323_v16, %v1253_v39  ;;  %v8863_v39 = vld [vmem:[#allocation25_spill] sm:$0xff] }
  0xde   : > { %1562 = vrot.lane.b32.xlu0 %v6325_v10, %s5474_s25  ;;  %v1259_v5 = vpop.permute.xlu1 %1258  ;;  %v1344_v16 = vsel %vm1308_vm1, %v8864_v47, %v8863_v39  ;;  %v8875_v39 = vld [vmem:[#allocation29_spill] sm:$0xff] }
  0xdf   : > { %5260 = vmatmul.mubr.msk.bf16.gmra.mxu0 %vm1798_vm3, %v1413_v21  ;;  %v1421_v7 = vsel %vm1405_vm2, %v1332_v33, %v1259_v5  ;;  %v8865_v21 = vld [vmem:[#allocation27_spill] sm:$0xff]  ;;  %v8876_v47 = vld [vmem:[#allocation5_spill] sm:$0xff] }
  0xe0   : > { %5263 = vmatprep.mubr.msk.bf16.mxu0 %vm1798_vm3, %v1415_v26  ;;  %v1257_v56 = vpop.permute.xlu0 %1256  ;;  %1568 = vrot.lane.b32.xlu1 %v6014_v53, %s5475_s26  ;;  %v8866_v5 = vld [vmem:[#allocation3_spill] sm:$0xff] }
  0xe1   : > { %v1419_v40 = vsel %vm1405_vm2, %v1329_v31, %v1257_v56  ;;  %v1347_v26 = vsel %vm1308_vm1, %v8866_v5, %v8865_v21  ;;  %v8877_v5 = vld [vmem:[#allocation43_spill] sm:$0xff] }
  0xe2   : > { %1566 = vrot.lane.b32.xlu0 %v6008_v50, %s5475_s26  ;;  %v1263_v41 = vpop.permute.xlu1 %1262 }
  0xe3   : > { %v1425_v1 = vsel %vm1405_vm2, %v1338_v35, %v1263_v41  ;;  %v8867_v41 = vld [vmem:[#allocation34_spill] sm:$0xff] }
  0xe4   : > { %v1261_v46 = vpop.permute.xlu0 %1260  ;;  %1572 = vrot.lane.b32.xlu1 %v6027_v30, %s5475_s26 }
  0xe5   : > { %v1423_v51 = vsel %vm1405_vm2, %v1335_v57, %v1261_v46  ;;  %v8871_v57 = vld [vmem:[#allocation46_spill] sm:$0xff] }
  0xe6   : > { %1570 = vrot.lane.b32.xlu0 %v6012_v52, %s5475_s26  ;;  %v1267_v8 = vpop.permute.xlu1 %1266 }
  0xe7   : > { %5264 = vmatmul.mubr.msk.bf16.gmra.mxu0 %vm1798_vm3, %v1417_v48  ;;  %v1429_v56 = vsel %vm1405_vm2, %v1344_v16, %v1267_v8  ;;  %v8868_v48 = vld [vmem:[#allocation40_spill] sm:$0xff]  ;;  %v1353_v16 = vsel %vm1308_vm1, %v8876_v47, %v8875_v39  ;;  %v8887_v47 = vld [vmem:[#allocation7_spill] sm:$0xff] }
  0xe8   : > { %5267 = vmatprep.mubr.msk.bf16.mxu0 %vm1798_vm3, %v1419_v40  ;;  %v1265_v55 = vpop.permute.xlu0 %1264  ;;  %1576 = vrot.lane.b32.xlu1 %v6050_v17, %s5475_s26  ;;  %v8869_v40 = vld [vmem:[#allocation45_spill] sm:$0xff]  ;;  %v8886_v39 = vld [vmem:[#allocation32_spill] sm:$0xff] }
  0xe9   : > { %v1427_v58 = vsel %vm1405_vm2, %v1341_v18, %v1265_v55  ;;  %v8870_v55 = vld [vmem:[#allocation18_spill] sm:$0xff] }
  0xea   : > { %1574 = vrot.lane.b32.xlu0 %v6017_v38, %s5475_s26  ;;  %v1271_v14 = vpop.permute.xlu1 %1270  ;;  %v1386_v33 = vsel %vm1308_vm1, %v8870_v55, %v8869_v40  ;;  %v8874_v18 = vld [vmem:[#allocation6_spill] sm:$0xff]  ;;  %v8879_v40 = vld [vmem:[#allocation17_spill] sm:$0xff] }
  0xec   : > { %v1269_v19 = vpop.permute.xlu0 %1268  ;;  %1580 = vrot.lane.b32.xlu1 %v6091_v27, %s5475_s26 }
  0xed   : > { %v1431_v62 = vsel %vm1405_vm2, %v1347_v26, %v1269_v19 }
  0xee   : > { %1578 = vrot.lane.b32.xlu0 %v6029_v61, %s5475_s26  ;;  %v6374_v37 = vpop.permute.xlu1 %1274 }
  0xef   : > { %5268 = vmatmul.mubr.msk.bf16.gmra.mxu0 %vm1798_vm3, %v1421_v7  ;;  %v8872_v7 = vld [vmem:[#allocation15_spill] sm:$0xff] }
  0xf0   : > { %5271 = vmatprep.mubr.msk.bf16.mxu0 %vm1798_vm3, %v1423_v51  ;;  %v1273_v9 = vpop.permute.xlu0 %1272  ;;  %1584 = vrot.lane.b32.xlu1 %v6122_v49, %s5475_s26  ;;  %v1383_v19 = vsel %vm1308_vm1, %v8872_v7, %v8871_v57  ;;  %v8881_v57 = vld [vmem:[#allocation47_spill] sm:$0xff] }
  0xf2   : > { %1582 = vrot.lane.b32.xlu0 %v6077_v11, %s5475_s26  ;;  %v6383_v24 = vpop.permute.xlu1 %1278 }
  0xf4   : > { %v6385_v28 = vpop.permute.xlu0 %1276  ;;  %1588 = vrot.lane.b32.xlu1 %v6134_v34, %s5475_s26 }
  0xf6   : > { %1586 = vrot.lane.b32.xlu0 %v8860_v15, %s5475_s26  ;;  %v6398_v43 = vpop.permute.xlu1 %1282 }
  0xf7   : > { %5272 = vmatmul.mubr.msk.bf16.gmra.mxu0 %vm1798_vm3, %v1425_v1  ;;  %v1350_v1 = vsel %vm1308_vm1, %v8874_v18, %v8873_v45  ;;  %v8884_v18 = vld [vmem:[#allocation48_spill] sm:$0xff] }
  0xf8   : > { %5275 = vmatprep.mubr.msk.bf16.mxu0 %vm1798_vm3, %v1427_v58  ;;  %v6403_v12 = vpop.permute.xlu0 %1280  ;;  %1592 = vrot.lane.b32.xlu1 %v8861_v63, %s5475_s26  ;;  %v1433_v21 = vsel %vm1405_vm2, %v1350_v1, %v1271_v14  ;;  %v8885_v1 = vld [vmem:[#allocation20_spill] sm:$0xff] }
  0xfa   : > { %1590 = vrot.lane.b32.xlu0 %v8862_v54, %s5475_s26  ;;  %v6409_v2 = vpop.permute.xlu1 %1286 }
  0xfc   : > { %v6411_v0 = vpop.permute.xlu0 %1284  ;;  %1596 = vrot.lane.b32.xlu1 %v6186_v22, %s5475_s26 }
  0xfe   : > { %1594 = vrot.lane.b32.xlu0 %v8867_v41, %s5475_s26  ;;  %v6424_v46 = vpop.permute.xlu1 %1290 }
  0xff   : > { %5276 = vmatmul.mubr.msk.bf16.gmra.mxu0 %vm1798_vm3, %v1429_v56  ;;  %v1435_v56 = vsel %vm1405_vm2, %v1353_v16, %v1273_v9  ;;  %v1359_v16 = vsel %vm1308_vm1, %v8887_v47, %v8886_v39 }
 0x100   : > { %5279 = vmatprep.mubr.msk.bf16.mxu0 %vm1798_vm3, %v1431_v62  ;;  %v6429_v31 = vpop.permute.xlu0 %1288  ;;  %1600 = vrot.lane.b32.xlu1 %v6211_v36, %s5475_s26  ;;  %v5445_v62 = vld [vmem:[%s8659_s6] sm:$0xff]  }
 0x102   : > { %1598 = vrot.lane.b32.xlu0 %v8868_v48, %s5475_s26  ;;  %v1295_v8 = vpop.permute.xlu1 %1294 }
 0x103   : > { %v1457_v51 = vsel %vm1405_vm2, %v1386_v33, %v1295_v8  ;;  %v8878_v8 = vld [vmem:[#allocation49_spill] sm:$0xff]  ;;  %v8880_v33 = vld [vmem:[#allocation38_spill] sm:$0xff] }
 0x104   : > { %v1293_v35 = vpop.permute.xlu0 %1292  ;;  %1604 = vrot.lane.b32.xlu1 %v6231_v60, %s5475_s26  ;;  %v1389_v14 = vsel %vm1308_vm1, %v8879_v40, %v8878_v8 }
 0x105   : > { %v1455_v58 = vsel %vm1405_vm2, %v1383_v19, %v1293_v35  ;;  %v8883_v35 = vld [vmem:[#allocation8_spill] sm:$0xff] }
 0x106   : > { %1602 = vrot.lane.b32.xlu0 %v8877_v5, %s5475_s26  ;;  %5303 = vmatprep.mubr.msk.bf16.mxu1 %vm1798_vm3, %v1455_v58  ;;  %v1299_v26 = vpop.permute.xlu1 %1298  ;;  %v1392_v58 = vsel %vm1308_vm1, %v8885_v1, %v8884_v18  ;;  %v8895_v18 = vld [vmem:[#allocation9_spill] sm:$0xff] }
 0x107   : > { %5280 = vmatmul.mubr.msk.bf16.gmra.mxu0 %vm1798_vm3, %v1433_v21  ;;  %5304 = vmatmul.mubr.msk.bf16.vlgmr.msra.gmra.mxu1 %vm1798_vm3, %v1457_v51  ;;  %v8882_v51 = vld [vmem:[#allocation28_spill] sm:$0xff]  ;;  %v8888_v21 = vld [vmem:[#allocation19_spill] sm:$0xff]  ;;  %v1461_v40 = vsel %vm1405_vm2, %v1392_v58, %v1299_v26  ;;  %v8890_v26 = vld [vmem:[#allocation30_spill] sm:$0xff] }
 0x108   : > { %5283 = vmatprep.mubr.msk.bf16.mxu0 %vm1798_vm3, %v1435_v56  ;;  %v1297_v55 = vpop.permute.xlu0 %1296  ;;  %1608 = vrot.lane.b32.xlu1 %v6244_v29, %s5475_s26  ;;  %v1356_v45 = vsel %vm1308_vm1, %v8883_v35, %v8882_v51  ;;  %v1395_v56 = vsel %vm1308_vm1, %v8888_v21, %v6265_v3  ;;  %v8893_v51 = vld [vmem:[#allocation22_spill] sm:$0xff]  ;;  %v8896_v58 = vld [vmem:[#allocation21_spill] sm:$0xff] }
 0x109   : > { %v1459_v9 = vsel %vm1405_vm2, %v1389_v14, %v1297_v55  ;;  %5320 = vmatpush3.bf16.msra.mxu1 %v8880_v33  ;;  %v1437_v8 = vsel %vm1405_vm2, %v1356_v45, %v6374_v37  ;;  %v8894_v45 = vld [vmem:[#allocation37_spill] sm:$0xff]  ;;  %v1401_v39 = vsel %vm1308_vm1, %v8896_v58, %v6285_v13 }
 0x10a   : > { %1606 = vrot.lane.b32.xlu0 %v8881_v57, %s5475_s26  ;;  %5307 = vmatprep.mubr.msk.bf16.mxu1 %vm1798_vm3, %v1459_v9  ;;  %v1303_v7 = vpop.permute.xlu1 %1302  ;;  %v8891_v9 = vld [vmem:[#allocation10_spill] sm:$0xff]  ;;  %v1365_v1 = vsel %vm1308_vm1, %v8895_v18, %v8894_v45 }
 0x10b   : > { %5321 = vmatprep.subr.bf16.mxu1 %v5445_v62  ;;  %v1362_v33 = vsel %vm1308_vm1, %v8891_v9, %v8890_v26  ;;  %v8900_v26 = vld [vmem:[#allocation41_spill] sm:$0xff]  ;;  %v8901_v9 = vld [vmem:[#allocation11_spill] sm:$0xff] }
 0x10c   : > { %v1301_v19 = vpop.permute.xlu0 %1300  ;;  %1612 = vrot.lane.b32.xlu1 %v6273_v32, %s5475_s26  ;;  %v1441_v47 = vsel %vm1405_vm2, %v1362_v33, %v6383_v24  ;;  %v1371_v33 = vsel %vm1308_vm1, %v8901_v9, %v8900_v26 }
 0x10d   : > { %5322 = vmatpush3.bf16.msra.mxu1 %v5445_v62  ;;  %v1439_v62 = vsel %vm1405_vm2, %v1359_v16, %v6385_v28  ;;  %v1463_v55 = vsel %vm1405_vm2, %v1395_v56, %v1301_v19  ;;  %v8892_v19 = vld [vmem:[#allocation50_spill] sm:$0xff]  ;;  %v1443_v56 = vsel %vm1405_vm2, %v1365_v1, %v6403_v12  ;;  %v1447_v45 = vsel %vm1405_vm2, %v1371_v33, %v6411_v0 }
 0x10e   : > { %1610 = vrot.lane.b32.xlu0 %v6242_v59, %s5475_s26  ;;  %v6491_v14 = vpop.permute.xlu1 %1306  ;;  %v1398_v35 = vsel %vm1308_vm1, %v8893_v51, %v8892_v19  ;;  %v8903_v1 = vld [vmem:[#allocation14_spill] sm:$0xff] }
 0x10f   : > { %8889 = vst [vmem:[#allocation2_spill] sm:$0xff] %v6491_v14  ;;  %5284 = vmatmul.mubr.msk.bf16.gmra.mxu0 %vm1798_vm3, %v1437_v8  ;;  %5308 = vmatmul.mubr.msk.bf16.gmra.mxu1 %vm1798_vm3, %v1461_v40  ;;  %v1465_v16 = vsel %vm1405_vm2, %v1398_v35, %v1303_v7  ;;  %v8897_v7 = vld [vmem:[#allocation35_spill] sm:$0xff]  ;;  %v8898_v40 = vld [vmem:[#allocation12_spill] sm:$0xff] }
 0x110   : > { %5287 = vmatprep.mubr.msk.bf16.mxu0 %vm1798_vm3, %v1439_v62  ;;  %5311 = vmatprep.mubr.msk.bf16.mxu1 %vm1798_vm3, %v1463_v55  ;;  %v1305_v3 = vpop.permute.xlu0 %1304  ;;  %v1368_v62 = vsel %vm1308_vm1, %v8898_v40, %v8897_v7  ;;  %v8899_v55 = vld [vmem:[#allocation23_spill] sm:$0xff] }
 0x111   : > { %1616 = vrot.lane.b32.xlu1 %v6291_v4, %s5475_s26  ;;  %v1467_v8 = vsel %vm1405_vm2, %v1401_v39, %v1305_v3  ;;  %v1404_v3 = vsel %vm1308_vm1, %v8899_v55, %v6277_v6  ;;  %v1445_v19 = vsel %vm1405_vm2, %v1368_v62, %v6398_v43  ;;  %v8904_v39 = vld [vmem:[#allocation44_spill] sm:$0xff]  ;;  %v8906_v55 = vld [vmem:[#allocation42_spill] sm:$0xff] }
 0x112   : > { %1614 = vrot.lane.b32.xlu0 %v6263_v23, %s5475_s26  ;;  %v6504_v37 = vpop.permute.xlu1 %1504  ;;  %v1469_v51 = vsel %vm1405_vm2, %v1404_v3, %v6491_v14  ;;  %v8907_v3 = vld [vmem:[#allocation16_spill] sm:$0xff] }
 0x113   : > { %v1380_v26 = vsel %vm1308_vm1, %v8907_v3, %v8906_v55 }
 0x114   : > { %v6506_v28 = vpop.permute.xlu0 %1502 }
 0x115   : > { %1620 = vrot.lane.b32.xlu1 %v6311_v42, %s5475_s26 }
 0x116   : > { %1618 = vrot.lane.b32.xlu0 %v6283_v25, %s5475_s26  ;;  %v6527_v21 = vpop.permute.xlu1 %1508  ;;  %v1629_v25 = vsel %vm1308_vm1, 0, %v6506_v28 }
 0x117   : > { %5288 = vmatmul.mubr.msk.bf16.gmra.mxu0 %vm1798_vm3, %v1441_v47  ;;  %5312 = vmatmul.mubr.msk.bf16.gmra.mxu1 %vm1798_vm3, %v1465_v16  ;;  %v8905_v47 = vld [vmem:[#allocation13_spill] sm:$0xff] }
 0x118   : > { %5291 = vmatprep.mubr.msk.bf16.mxu0 %vm1798_vm3, %v1443_v56  ;;  %5315 = vmatprep.mubr.msk.bf16.mxu1 %vm1798_vm3, %v1467_v8  ;;  %v6536_v13 = vpop.permute.xlu0 %1506  ;;  %v1377_v0 = vsel %vm1308_vm1, %v8905_v47, %v8904_v39 }
 0x119   : > { %1624 = vrot.lane.b32.xlu1 %v6325_v10, %s5475_s26  ;;  %v1451_v8 = vsel %vm1405_vm2, %v1377_v0, %v6429_v31  ;;  %v3582_v0 = vld [vmem:[%s8661_s8] sm:$0x3] }
 0x11a   : > { %1622 = vrot.lane.b32.xlu0 %v6305_v44, %s5475_s26  ;;  %v6542_v24 = vpop.permute.xlu1 %1512  ;;  %5428 = vmatprep.subr.msk.bf16.mxu0 %vm3719_vm4, %v3582_v0 }
 0x11c   : > { %v6544_v12 = vpop.permute.xlu0 %1510 }
 0x11e   : > { %1626 = vrot.lane.b32.xlu0 %v6319_v20, %s5475_s26  ;;  %v6561_v35 = vpop.permute.xlu1 %1516  ;;  %v8902_v20 = vld [vmem:[#allocation39_spill] sm:$0xff]  ;;  %s6633_s26 = scalar_lea.vmem %s8655_s2, %s4846_s22 }
 0x11f   : > { %5292 = vmatmul.mubr.msk.bf16.gmra.mxu0 %vm1798_vm3, %v1445_v19  ;;  %5316 = vmatmul.mubr.msk.bf16.gmra.mxu1 %vm1798_vm3, %v1469_v51  ;;  %v1374_v58 = vsel %vm1308_vm1, %v8903_v1, %v8902_v20  ;;  %v5446_v55 = vld [vmem:[%s6633_s26] sm:$0xff]  }
 0x120   : > { %5295 = vmatprep.mubr.msk.bf16.mxu0 %vm1798_vm3, %v1447_v45  ;;  %v6568_v6 = vpop.permute.xlu0 %1514  ;;  %v1449_v16 = vsel %vm1405_vm2, %v1374_v58, %v6409_v2  ;;  %v1453_v2 = vsel %vm1405_vm2, %v1380_v26, %v6424_v46  ;;  %v5447_v26 = vld [vmem:[%s6633_s26 + $0x8] sm:$0xff]  }
 0x122   : > { %v6570_v43 = vpop.permute.xlu1 %1520 }
 0x124   : > { %v6572_v18 = vpop.permute.xlu0 %1518 }
 0x126   : > { %v6582_v56 = vpop.permute.xlu1 %1524 }
 0x127   : > { %5296 = vmatmul.mubr.msk.bf16.gmra.mxu0 %vm1798_vm3, %v1449_v16 }
 0x128   : > { %5299 = vmatprep.mubr.msk.bf16.mxu0 %vm1798_vm3, %v1451_v8  ;;  %v6588_v7 = vpop.permute.xlu0 %1522  ;;  %v3721_v8 = vsel %vm3719_vm4, %v3582_v0, 0 }
 0x129   : > { %5388 = vmatpush3.bf16.msra.mxu0 %v3721_v8  ;;  %v8911_v8 = vld [vmem:[#allocation24_spill] sm:$0xff] }
 0x12a   : > { %v6590_v40 = vpop.permute.xlu1 %1528  ;;  %v1632_v42 = vsel %vm1308_vm1, %v8911_v8, %v6504_v37 }
 0x12c   : > { %v6592_v62 = vpop.permute.xlu0 %1526 }
 0x12e   : > { %v6599_v9 = vpop.permute.xlu1 %1532 }
 0x12f   : > { %5300 = vmatmul.mubr.msk.bf16.gmra.mxu0 %vm1798_vm3, %v1453_v2 }
 0x130   : > { %v6602_v31 = vpop.permute.xlu0 %1530  ;;  %5389 = vmatprep.mubr.msk.bf16.mxu0 %vm3670_vm5, %v5446_v55 }
 0x132   : > { %v6604_v33 = vpop.permute.xlu1 %1536 }
 0x134   : > { %v6606_v19 = vpop.permute.xlu0 %1534 }
 0x136   : > { %v6608_v51 = vpop.permute.xlu1 %1540 }
 0x137   : > { %5390 = vmatmul.mubr.msk.bf16.vlgmr.msra.gmra.mxu0 %vm3670_vm5, %v5447_v26  ;;  %v1635_v26 = vsel %vm1308_vm1, %v6008_v50, %v6536_v13  ;;  %v5448_v13 = vld [vmem:[%s6633_s26 + $0x10] sm:$0xff]  }
 0x138   : > { %v6610_v45 = vpop.permute.xlu0 %1538  ;;  %5393 = vmatprep.mubr.msk.bf16.mxu0 %vm3670_vm5, %v5448_v13 }
 0x13a   : > { %v6612_v20 = vpop.permute.xlu1 %1544 }
 0x13c   : > { %v6614_v1 = vpop.permute.xlu0 %1542 }
 0x13e   : > { %v6616_v46 = vpop.permute.xlu1 %1548 }
 0x140   : > { %v6618_v58 = vpop.permute.xlu0 %1546 }
 0x142   : > { %v6620_v39 = vpop.permute.xlu1 %1552 }
 0x144   : > { %v6622_v47 = vpop.permute.xlu0 %1550 }
 0x146   : > { %v6628_v16 = vpop.permute.xlu1 %1556 }
 0x148   : > { %v6636_v3 = vpop.permute.xlu0 %1554 }
 0x14a   : > { %v6640_v2 = vpop.permute.xlu1 %1560 }
 0x14b   : > { %8908 = vst [vmem:[#allocation31_spill] sm:$0xff] %v6640_v2 }
 0x14c   : > { %v6643_v0 = vpop.permute.xlu0 %1558 }
 0x14e   : > { %v6645_v14 = vpop.permute.xlu1 %1564 }
 0x14f   : > { %8909 = vst [vmem:[#allocation36_spill] sm:$0xff] %v6645_v14 }
 0x150   : > { %v6647_v10 = vpop.permute.xlu0 %1562 }
 0x151   : > { %8910 = vst [vmem:[#allocation33_spill] sm:$0xff] %v6647_v10 }
 0x152   : > { %v1569_v44 = vpop.permute.xlu1 %1568 }
 0x153   : > { %v1726_v55 = vsel %vm1405_vm2, %v1632_v42, %v1569_v44 }
 0x154   : > { %v1567_v4 = vpop.permute.xlu0 %1566 }
 0x155   : > { %v1724_v2 = vsel %vm1405_vm2, %v1629_v25, %v1567_v4  ;;  %v1638_v25 = vsel %vm1308_vm1, %v6014_v53, %v6527_v21  ;;  %v1641_v4 = vsel %vm1308_vm1, %v6012_v52, %v6544_v12  ;;  %v1647_v53 = vsel %vm1308_vm1, %v6017_v38, %v6568_v6  ;;  %v5449_v12 = vld [vmem:[%s6633_s26 + $0x18] sm:$0xff]  }
 0x156   : > { %5323 = vmatprep.mubr.msk.bf16.mxu1 %vm1798_vm3, %v1724_v2  ;;  %v1573_v37 = vpop.permute.xlu1 %1572  ;;  %5394 = vmatmul.mubr.msk.bf16.gmra.mxu0 %vm3670_vm5, %v5449_v12  ;;  %v1650_v38 = vsel %vm1308_vm1, %v6050_v17, %v6561_v35  ;;  %v1653_v6 = vsel %vm1308_vm1, %v6029_v61, %v6572_v18  ;;  %v1659_v17 = vsel %vm1308_vm1, %v6077_v11, %v6588_v7  ;;  %v5450_v35 = vld [vmem:[%s6633_s26 + $0x20] sm:$0xff]   ;;  %v5451_v18 = vld [vmem:[%s6633_s26 + $0x28] sm:$0xff]  }
 0x157   : > { %5324 = vmatmul.mubr.msk.bf16.vlgmr.msra.gmra.mxu1 %vm1798_vm3, %v1726_v55  ;;  %v1730_v44 = vsel %vm1405_vm2, %v1638_v25, %v1573_v37  ;;  %v1656_v37 = vsel %vm1308_vm1, %v6091_v27, %v6570_v43  ;;  %5397 = vmatprep.mubr.msk.bf16.mxu0 %vm3670_vm5, %v5450_v35  ;;  %v1662_v11 = vsel %vm1308_vm1, %v6122_v49, %v6582_v56 }
 0x158   : > { %v1571_v14 = vpop.permute.xlu0 %1570  ;;  %v1665_v43 = vsel %vm1308_vm1, %v8860_v15, %v6592_v62  ;;  %v1671_v49 = vsel %vm1308_vm1, %v8862_v54, %v6602_v31  ;;  %v1686_v12 = vsel %vm1308_vm1, %v6211_v36, %v6608_v51 }
 0x159   : > { %v1728_v10 = vsel %vm1405_vm2, %v1635_v26, %v1571_v14  ;;  %v1644_v14 = vsel %vm1308_vm1, %v6027_v30, %v6542_v24 }
 0x15a   : > { %5327 = vmatprep.mubr.msk.bf16.mxu1 %vm1798_vm3, %v1728_v10  ;;  %v1577_v42 = vpop.permute.xlu1 %1576 }
 0x15b   : > { %v1734_v52 = vsel %vm1405_vm2, %v1644_v14, %v1577_v42  ;;  %v1668_v42 = vsel %vm1308_vm1, %v6134_v34, %v6590_v40  ;;  %v1674_v14 = vsel %vm1308_vm1, %v8861_v63, %v6599_v9  ;;  %v1677_v34 = vsel %vm1308_vm1, %v8867_v41, %v6606_v19 }
 0x15c   : > { %v1575_v28 = vpop.permute.xlu0 %1574  ;;  %v1683_v63 = vsel %vm1308_vm1, %v8868_v48, %v6610_v45 }
 0x15d   : > { %v1732_v50 = vsel %vm1405_vm2, %v1641_v4, %v1575_v28 }
 0x15e   : > { %v1581_v30 = vpop.permute.xlu1 %1580  ;;  %5398 = vmatmul.mubr.msk.bf16.gmra.mxu0 %vm3670_vm5, %v5451_v18 }
 0x15f   : > { %5328 = vmatmul.mubr.msk.bf16.gmra.mxu1 %vm1798_vm3, %v1730_v44  ;;  %v1738_v2 = vsel %vm1405_vm2, %v1650_v38, %v1581_v30  ;;  %v1689_v38 = vsel %vm1308_vm1, %v8877_v5, %v6614_v1  ;;  %v1692_v5 = vsel %vm1308_vm1, %v6231_v60, %v6612_v20  ;;  %v1695_v1 = vsel %vm1308_vm1, %v8881_v57, %v6618_v58 }
 0x160   : > { %5331 = vmatprep.mubr.msk.bf16.mxu1 %vm1798_vm3, %v1732_v50  ;;  %v1579_v10 = vpop.permute.xlu0 %1578  ;;  %v1698_v57 = vsel %vm1308_vm1, %v6244_v29, %v6616_v46  ;;  %v1701_v20 = vsel %vm1308_vm1, %v6242_v59, %v6622_v47  ;;  %v1707_v29 = vsel %vm1308_vm1, %v6263_v23, %v6636_v3  ;;  %v8913_v23 = vld [vmem:[#allocation51_spill] sm:$0xff] }
 0x161   : > { %v1736_v21 = vsel %vm1405_vm2, %v1647_v53, %v1579_v10  ;;  %v1713_v3 = vsel %vm1308_vm1, %v8913_v23, %v6643_v0  ;;  %v5455_v0 = vld [vmem:[%s6633_s26 + $0x48] sm:$0xff]  }
 0x162   : > { %v1585_v55 = vpop.permute.xlu1 %1584 }
 0x163   : > { %v1742_v61 = vsel %vm1405_vm2, %v1656_v37, %v1585_v55  ;;  %v5452_v55 = vld [vmem:[%s6633_s26 + $0x30] sm:$0xff]   ;;  %v5453_v37 = vld [vmem:[%s6633_s26 + $0x38] sm:$0xff]  }
 0x164   : > { %v1583_v24 = vpop.permute.xlu0 %1582  ;;  %5401 = vmatprep.mubr.msk.bf16.mxu0 %vm3670_vm5, %v5452_v55 }
 0x165   : > { %v1740_v8 = vsel %vm1405_vm2, %v1653_v6, %v1583_v24 }
 0x166   : > { %v1589_v25 = vpop.permute.xlu1 %1588  ;;  %5402 = vmatmul.mubr.msk.bf16.gmra.mxu0 %vm3670_vm5, %v5453_v37 }
 0x167   : > { %5332 = vmatmul.mubr.msk.bf16.gmra.mxu1 %vm1798_vm3, %v1734_v52  ;;  %v1746_v7 = vsel %vm1405_vm2, %v1662_v11, %v1589_v25  ;;  %v1680_v52 = vsel %vm1308_vm1, %v6186_v22, %v6604_v33 }
 0x168   : > { %5335 = vmatprep.mubr.msk.bf16.mxu1 %vm1798_vm3, %v1736_v21  ;;  %v1587_v26 = vpop.permute.xlu0 %1586 }
 0x169   : > { %v1744_v28 = vsel %vm1405_vm2, %v1659_v17, %v1587_v26 }
 0x16a   : > { %v1593_v44 = vpop.permute.xlu1 %1592 }
 0x16b   : > { %v1750_v15 = vsel %vm1405_vm2, %v1668_v42, %v1593_v44  ;;  %v5454_v42 = vld [vmem:[%s6633_s26 + $0x40] sm:$0xff]  }
 0x16c   : > { %v1591_v27 = vpop.permute.xlu0 %1590  ;;  %5405 = vmatprep.mubr.msk.bf16.mxu0 %vm3670_vm5, %v5454_v42 }
 0x16d   : > { %v1748_v4 = vsel %vm1405_vm2, %v1665_v43, %v1591_v27 }
 0x16e   : > { %v1597_v62 = vpop.permute.xlu1 %1596  ;;  %5406 = vmatmul.mubr.msk.bf16.gmra.mxu0 %vm3670_vm5, %v5455_v0 }
 0x16f   : > { %5336 = vmatmul.mubr.msk.bf16.gmra.mxu1 %vm1798_vm3, %v1738_v2  ;;  %v1754_v54 = vsel %vm1405_vm2, %v1674_v14, %v1597_v62  ;;  %v8917_v62 = vld [vmem:[#allocation53_spill] sm:$0xff] }
 0x170   : > { %5339 = vmatprep.mubr.msk.bf16.mxu1 %vm1798_vm3, %v1740_v8  ;;  %v1595_v50 = vpop.permute.xlu0 %1594 }
 0x171   : > { %v1752_v56 = vsel %vm1405_vm2, %v1671_v49, %v1595_v50  ;;  %v8915_v49 = vld [vmem:[#allocation54_spill] sm:$0xff] }
 0x172   : > { %v1601_v31 = vpop.permute.xlu1 %1600 }
 0x173   : > { %v1758_v41 = vsel %vm1405_vm2, %v1680_v52, %v1601_v31 }
 0x174   : > { %v1599_v10 = vpop.permute.xlu0 %1598 }
 0x175   : > { %v1756_v40 = vsel %vm1405_vm2, %v1677_v34, %v1599_v10 }
 0x176   : > { %v1605_v22 = vpop.permute.xlu1 %1604 }
 0x177   : > { %5340 = vmatmul.mubr.msk.bf16.gmra.mxu1 %vm1798_vm3, %v1742_v61  ;;  %v1762_v6 = vsel %vm1405_vm2, %v1686_v12, %v1605_v22 }
 0x178   : > { %5343 = vmatprep.mubr.msk.bf16.mxu1 %vm1798_vm3, %v1744_v28  ;;  %v1603_v53 = vpop.permute.xlu0 %1602  ;;  %v1704_v28 = vsel %vm1308_vm1, %v6273_v32, %v6620_v39  ;;  %v8912_v32 = vld [vmem:[#allocation52_spill] sm:$0xff] }
 0x179   : > { %v1760_v9 = vsel %vm1405_vm2, %v1683_v63, %v1603_v53  ;;  %v1710_v39 = vsel %vm1308_vm1, %v8912_v32, %v6628_v16  ;;  %v8914_v16 = vld [vmem:[#allocation31_spill] sm:$0xff]  ;;  %v8921_v63 = vld [vmem:[#allocation36_spill] sm:$0xff] }
 0x17a   : > { %v1609_v36 = vpop.permute.xlu1 %1608 }
 0x17b   : > { %v1766_v8 = vsel %vm1405_vm2, %v1692_v5, %v1609_v36  ;;  %v8925_v36 = vld [vmem:[#allocation2_spill] sm:$0xff] }
 0x17c   : > { %v1607_v45 = vpop.permute.xlu0 %1606 }
 0x17d   : > { %v1764_v2 = vsel %vm1405_vm2, %v1689_v38, %v1607_v45  ;;  %v5456_v45 = vld [vmem:[%s6633_s26 + $0x50] sm:$0xff]   ;;  %v5457_v38 = vld [vmem:[%s6633_s26 + $0x58] sm:$0xff]  }
 0x17e   : > { %v1613_v17 = vpop.permute.xlu1 %1612  ;;  %5409 = vmatprep.mubr.msk.bf16.mxu0 %vm3670_vm5, %v5456_v45 }
 0x17f   : > { %5344 = vmatmul.mubr.msk.bf16.gmra.mxu1 %vm1798_vm3, %v1746_v7  ;;  %v1770_v58 = vsel %vm1405_vm2, %v1698_v57, %v1613_v17  ;;  %5410 = vmatmul.mubr.msk.bf16.gmra.mxu0 %vm3670_vm5, %v5457_v38 }
 0x180   : > { %5347 = vmatprep.mubr.msk.bf16.mxu1 %vm1798_vm3, %v1748_v4  ;;  %v1611_v51 = vpop.permute.xlu0 %1610 }
 0x181   : > { %v1768_v26 = vsel %vm1405_vm2, %v1695_v1, %v1611_v51 }
 0x183   : > { %v1617_v35 = vpop.permute.xlu1 %1616 }
 0x184   : > { %v1615_v60 = vpop.permute.xlu0 %1614  ;;  %v1774_v59 = vsel %vm1405_vm2, %v1704_v28, %v1617_v35 }
 0x185   : > { %v1772_v61 = vsel %vm1405_vm2, %v1701_v20, %v1615_v60  ;;  %v5458_v60 = vld [vmem:[%s6633_s26 + $0x60] sm:$0xff]  }
 0x186   : > { %5413 = vmatprep.mubr.msk.bf16.mxu0 %vm3670_vm5, %v5458_v60 }
 0x187   : > { %5348 = vmatmul.mubr.msk.bf16.gmra.mxu1 %vm1798_vm3, %v1750_v15  ;;  %v1621_v25 = vpop.permute.xlu1 %1620  ;;  %v1716_v15 = vsel %vm1308_vm1, %v8915_v49, %v8914_v16 }
 0x188   : > { %5351 = vmatprep.mubr.msk.bf16.mxu1 %vm1798_vm3, %v1752_v56  ;;  %v1619_v18 = vpop.permute.xlu0 %1618  ;;  %v1778_v11 = vsel %vm1405_vm2, %v1710_v39, %v1621_v25  ;;  %v8916_v56 = vld [vmem:[#allocation33_spill] sm:$0xff]  ;;  %v5460_v39 = vld [vmem:[%s6633_s26 + $0x70] sm:$0xff]  }
 0x189   : > { %v1776_v46 = vsel %vm1405_vm2, %v1707_v29, %v1619_v18  ;;  %v1719_v10 = vsel %vm1308_vm1, %v8917_v62, %v8916_v56 }
 0x18b   : > { %v1625_v44 = vpop.permute.xlu1 %1624 }
 0x18c   : > { %v1623_v27 = vpop.permute.xlu0 %1622  ;;  %v1782_v14 = vsel %vm1405_vm2, %v1716_v15, %v1625_v44 }
 0x18d   : > { %v1780_v7 = vsel %vm1405_vm2, %v1713_v3, %v1623_v27 }
 0x18f   : > { %5352 = vmatmul.mubr.msk.bf16.gmra.mxu1 %vm1798_vm3, %v1754_v54 }
 0x190   : > { %5355 = vmatprep.mubr.msk.bf16.mxu1 %vm1798_vm3, %v1756_v40  ;;  %v1627_v50 = vpop.permute.xlu0 %1626 }
 0x191   : > { %v1784_v40 = vsel %vm1405_vm2, %v1719_v10, %v1627_v50 }
 0x197   : > { %v6749_v19 = vpop.f32.mrf.mxu0  ;;  %5356 = vmatmul.mubr.msk.bf16.gmra.mxu1 %vm1798_vm3, %v1758_v41  ;;  %v8922_v41 = vld [vmem:[#allocation55_spill] sm:$0xff] }
 0x198   : > { %5359 = vmatprep.mubr.msk.bf16.mxu1 %vm1798_vm3, %v1760_v9  ;;  %v3105_v33 = vrot.slane %v6749_v19, 1  ;;  %v1722_v9 = vsel %vm1308_vm1, %v8922_v41, %v8921_v63 }
 0x199   : > { %v6753_v21 = vpop.f32.mrf.mxu0  ;;  %v1785_v51 = vsel %vm1405_vm2, %v1722_v9, %v8925_v36 }
 0x19a   : > { %v3102_v5 = vrot.slane %v6753_v21, 1 }
 0x19b   : > { %v6755_v13 = vpop.f32.mrf.mxu0 }
 0x19c   : > { %v3106_v48 = vrot.slane %v6755_v13, 1 }
 0x19d   : > { %v6807_v47 = vpop.f32.mrf.mxu0 }
 0x19e   : > { %v3231_v30 = vsel %vm3101_vm6, %v3106_v48, 0.0  ;;  %v3107_v24 = vsel %vm3101_vm6, %v3105_v33, %v3106_v48  ;;  %v3103_v12 = vrot.slane %v6807_v47, 1 }
 0x19f   : > { %3300 = vrot.lane.b32.xlu0 %v3231_v30, %s5477_s27  ;;  %3298 = vrot.lane.b32.xlu1 %v3107_v24, %s5477_s27  ;;  %v6816_v43 = vpop.f32.mrf.mxu0 }
 0x1a0   : > { %5360 = vmatmul.mubr.msk.bf16.gmra.mxu1 %vm1798_vm3, %v1762_v6  ;;  %v3104_v55 = vsel %vm3101_vm6, %v3102_v5, %v3103_v12  ;;  %v3111_v28 = vrot.slane %v6816_v43, 1 }
 0x1a1   : > { %5363 = vmatprep.mubr.msk.bf16.mxu1 %vm1798_vm3, %v1764_v2  ;;  %v6821_v4 = vpop.f32.mrf.mxu0 }
 0x1a2   : > { %v3108_v32 = vrot.slane %v6821_v4, 1 }
 0x1a3   : > { %v6832_v34 = vpop.f32.mrf.mxu0 }
 0x1a4   : > { %v3112_v57 = vrot.slane %v6832_v34, 1 }
 0x1a5   : > { %v6843_v53 = vpop.f32.mrf.mxu0 }
 0x1a6   : > { %v3109_v29 = vrot.slane %v6843_v53, 1 }
 0x1a7   : > { %v6859_v6 = vpop.f32.mrf.mxu0 }
 0x1a8   : > { %5364 = vmatmul.mubr.msk.bf16.gmra.mxu1 %vm1798_vm3, %v1766_v8  ;;  %v3230_v8 = vsel %vm3101_vm6, %v3103_v12, 0.0  ;;  %v3232_v3 = vsel %vm3101_vm6, %v3109_v29, 0.0  ;;  %v3117_v0 = vrot.slane %v6859_v6, 1 }
 0x1a9   : > { %5367 = vmatprep.mubr.msk.bf16.mxu1 %vm1798_vm3, %v1768_v26  ;;  %v6874_v26 = vpop.f32.mrf.mxu0 }
 0x1ab   : > { %v6886_v35 = vpop.f32.mrf.mxu0 }
 0x1ac   : > { %v3118_v42 = vrot.slane %v6886_v35, 1 }
 0x1ad   : > { %v6898_v25 = vpop.f32.mrf.mxu0 }
 0x1ae   : > { %v3115_v56 = vrot.slane %v6898_v25, 1  ;;  %v3235_v62 = vsel %vm3101_vm6, %v3118_v42, 0.0  ;;  %v3119_v10 = vsel %vm3101_vm6, %v3117_v0, %v3118_v42 }
 0x1af   : > { %v6910_v44 = vpop.f32.mrf.mxu0 }
 0x1b0   : > { %5368 = vmatmul.mubr.msk.bf16.gmra.mxu1 %vm1798_vm3, %v1770_v58  ;;  %v3234_v41 = vsel %vm3101_vm6, %v3115_v56, 0.0 }
 0x1b1   : > { %5371 = vmatprep.mubr.msk.bf16.mxu1 %vm1798_vm3, %v1772_v61  ;;  %v5459_v61 = vld [vmem:[%s6633_s26 + $0x68] sm:$0xff]   ;;  %v6920_v15 = vpop.f32.mrf.mxu0 }
 0x1b2   : > { %5414 = vmatmul.mubr.msk.bf16.gmra.mxu0 %vm3670_vm5, %v5459_v61 }
 0x1b3   : > { %5417 = vmatprep.mubr.msk.bf16.mxu0 %vm3670_vm5, %v5460_v39 }
 0x1b8   : > { %5372 = vmatmul.mubr.msk.bf16.gmra.mxu1 %vm1798_vm3, %v1774_v59  ;;  %v3233_v59 = vsel %vm3101_vm6, %v3112_v57, 0.0 }
 0x1b9   : > { %5375 = vmatprep.mubr.msk.bf16.mxu1 %vm1798_vm3, %v1776_v46  ;;  %v3113_v46 = vsel %vm3101_vm6, %v3111_v28, %v3112_v57 }
 0x1c0   : > { %5376 = vmatmul.mubr.msk.bf16.gmra.mxu1 %vm1798_vm3, %v1778_v11  ;;  %v3110_v11 = vsel %vm3101_vm6, %v3108_v32, %v3109_v29 }
 0x1c1   : > { %5379 = vmatprep.mubr.msk.bf16.mxu1 %vm1798_vm3, %v1780_v7  ;;  %v5461_v7 = vld [vmem:[%s6633_s26 + $0x78] sm:$0xff]  }
 0x1c2   : > { %5418 = vmatmul.mubr.msk.bf16.gmra.mxu0 %vm3670_vm5, %v5461_v7 }
 0x1c7   : > { %v6834_v54 = vpop.f32.mrf.mxu1 }
 0x1c8   : > { %8918 = vst [vmem:[#allocation25_spill] sm:$0xff] %v6834_v54  ;;  %5380 = vmatmul.mubr.msk.bf16.gmra.mxu1 %vm1798_vm3, %v1782_v14  ;;  %v3177_v22 = vrot.slane %v6834_v54, 1  ;;  %v6928_v14 = vpop.f32.mrf.mxu0 }
 0x1c9   : > { %5383 = vmatprep.mubr.msk.bf16.mxu1 %vm1798_vm3, %v1784_v40  ;;  %v6841_v31 = vpop.f32.mrf.mxu1  ;;  %8929 = vst [vmem:[#allocation46_spill] sm:$0xff] %v6928_v14  ;;  %v3114_v40 = vrot.slane %v6874_v26, 1  ;;  %v3124_v63 = vrot.slane %v6928_v14, 1 }
 0x1ca   : > { %8919 = vst [vmem:[#allocation4_spill] sm:$0xff] %v6841_v31  ;;  %v3174_v17 = vrot.slane %v6841_v31, 1 }
 0x1cb   : > { %v6845_v52 = vpop.f32.mrf.mxu1  ;;  %v3116_v9 = vsel %vm3101_vm6, %v3114_v40, %v3115_v56  ;;  %v3237_v12 = vsel %vm3101_vm6, %v3124_v63, 0.0 }
 0x1cc   : > { %8920 = vst [vmem:[#allocation27_spill] sm:$0xff] %v6845_v52  ;;  %v3178_v33 = vrot.slane %v6845_v52, 1 }
 0x1cd   : > { %v6852_v48 = vpop.f32.mrf.mxu1 }
 0x1ce   : > { %8923 = vst [vmem:[#allocation3_spill] sm:$0xff] %v6852_v48  ;;  %v3255_v30 = vsel %vm3101_vm6, %v3178_v33, 0.0  ;;  %v3179_v24 = vsel %vm3101_vm6, %v3177_v22, %v3178_v33  ;;  %v3175_v1 = vrot.slane %v6852_v48, 1  ;;  %v6936_v22 = vpop.f32.mrf.mxu0  ;;  %v3123_v33 = vrot.slane %v6910_v44, 1 }
 0x1cf   : > { %3396 = vrot.lane.b32.xlu0 %v3255_v30, %s5477_s27  ;;  %3394 = vrot.lane.b32.xlu1 %v3179_v24, %s5477_s27  ;;  %v6863_v2 = vpop.f32.mrf.mxu1  ;;  %8930 = vst [vmem:[#allocation15_spill] sm:$0xff] %v6936_v22  ;;  %v3121_v45 = vrot.slane %v6936_v22, 1  ;;  %v3120_v24 = vrot.slane %v6920_v15, 1 }
 0x1d0   : > { %8924 = vst [vmem:[#allocation34_spill] sm:$0xff] %v6863_v2  ;;  %5384 = vmatmul.mubr.msk.bf16.gmra.mxu1 %vm1798_vm3, %v1785_v51  ;;  %v3254_v20 = vsel %vm3101_vm6, %v3175_v1, 0.0  ;;  %v3176_v58 = vsel %vm3101_vm6, %v3174_v17, %v3175_v1  ;;  %v3125_v30 = vsel %vm3101_vm6, %v3123_v33, %v3124_v63  ;;  %v6955_v1 = vpop.f32.mrf.mxu0 }
 0x1d1   : > { %v6876_v37 = vpop.f32.mrf.mxu1  ;;  %v3236_v38 = vsel %vm3101_vm6, %v3121_v45, 0.0  ;;  %v3122_v36 = vsel %vm3101_vm6, %v3120_v24, %v3121_v45  ;;  %8933 = vst [vmem:[#allocation29_spill] sm:$0xff] %v6955_v1  ;;  %v3129_v56 = vrot.slane %v6955_v1, 1 }
 0x1d2   : > { %8926 = vst [vmem:[#allocation40_spill] sm:$0xff] %v6876_v37  ;;  %v3180_v50 = vrot.slane %v6876_v37, 1 }
 0x1d3   : > { %3296 = vrot.lane.b32.xlu0 %v3230_v8, %s5477_s27  ;;  %3294 = vrot.lane.b32.xlu1 %v3104_v55, %s5477_s27  ;;  %v6888_v18 = vpop.f32.mrf.mxu1  ;;  %v6959_v55 = vpop.f32.mrf.mxu0 }
 0x1d4   : > { %8927 = vst [vmem:[#allocation45_spill] sm:$0xff] %v6888_v18  ;;  %8935 = vst [vmem:[#allocation43_spill] sm:$0xff] %v6959_v55  ;;  %v3126_v45 = vrot.slane %v6959_v55, 1 }
 0x1d5   : > { %v6900_v27 = vpop.f32.mrf.mxu1  ;;  %v6963_v60 = vpop.f32.mrf.mxu0 }
 0x1d6   : > { %8928 = vst [vmem:[#allocation18_spill] sm:$0xff] %v6900_v27  ;;  %v3181_v23 = vrot.slane %v6900_v27, 1  ;;  %8937 = vst [vmem:[#allocation17_spill] sm:$0xff] %v6963_v60  ;;  %v3130_v42 = vrot.slane %v6963_v60, 1 }
 0x1d7   : > { %3392 = vrot.lane.b32.xlu0 %v3254_v20, %s5477_s27  ;;  %3390 = vrot.lane.b32.xlu1 %v3176_v58, %s5477_s27  ;;  %v6951_v51 = vpop.f32.mrf.mxu1  ;;  %v6967_v20 = vpop.f32.mrf.mxu0 }
 0x1d8   : > { %v3256_v16 = vsel %vm3101_vm6, %v3181_v23, 0.0  ;;  %v3182_v49 = vsel %vm3101_vm6, %v3180_v50, %v3181_v23  ;;  %8931 = vst [vmem:[#allocation26_spill] sm:$0xff] %v6951_v51  ;;  %8939 = vst [vmem:[#allocation47_spill] sm:$0xff] %v6967_v20  ;;  %v3131_v63 = vsel %vm3101_vm6, %v3129_v56, %v3130_v42  ;;  %v3239_v33 = vsel %vm3101_vm6, %v3130_v42, 0.0 }
 0x1d9   : > { %v6953_v5 = vpop.f32.mrf.mxu1  ;;  %v6971_v61 = vpop.f32.mrf.mxu0 }
 0x1da   : > { %8932 = vst [vmem:[#allocation6_spill] sm:$0xff] %v6953_v5  ;;  %8941 = vst [vmem:[#allocation8_spill] sm:$0xff] %v6971_v61  ;;  %v3135_v27 = vrot.slane %v6971_v61, 1 }
 0x1db   : > { %3308 = vrot.lane.b32.xlu0 %v3233_v59, %s5477_s27  ;;  %3306 = vrot.lane.b32.xlu1 %v3113_v46, %s5477_s27  ;;  %v6957_v8 = vpop.f32.mrf.mxu1  ;;  %v6975_v29 = vpop.f32.mrf.mxu0 }
 0x1dc   : > { %8934 = vst [vmem:[#allocation5_spill] sm:$0xff] %v6957_v8  ;;  %8943 = vst [vmem:[#allocation20_spill] sm:$0xff] %v6975_v29 }
 0x1dd   : > { %v6961_v17 = vpop.f32.mrf.mxu1  ;;  %v6979_v46 = vpop.f32.mrf.mxu0 }
 0x1de   : > { %8936 = vst [vmem:[#allocation49_spill] sm:$0xff] %v6961_v17  ;;  %8945 = vst [vmem:[#allocation7_spill] sm:$0xff] %v6979_v46 }
 0x1df   : > { %3304 = vrot.lane.b32.xlu0 %v3232_v3, %s5477_s27  ;;  %3302 = vrot.lane.b32.xlu1 %v3110_v11, %s5477_s27  ;;  %v6965_v57 = vpop.f32.mrf.mxu1  ;;  %v6986_v3 = vpop.f32.mrf.mxu0 }
 0x1e0   : > { %8938 = vst [vmem:[#allocation38_spill] sm:$0xff] %v6965_v57  ;;  %8946 = vst [vmem:[#allocation19_spill] sm:$0xff] %v6986_v3 }
 0x1e1   : > { %v6969_v58 = vpop.f32.mrf.mxu1 }
 0x1e2   : > { %8940 = vst [vmem:[#allocation28_spill] sm:$0xff] %v6969_v58 }
 0x1e3   : > { %3400 = vrot.lane.b32.xlu0 %v3256_v16, %s5477_s27  ;;  %3398 = vrot.lane.b32.xlu1 %v3182_v49, %s5477_s27  ;;  %v6973_v28 = vpop.f32.mrf.mxu1  ;;  %v6996_v49 = vpop.f32.mrf.mxu0 }
 0x1e4   : > { %8942 = vst [vmem:[#allocation48_spill] sm:$0xff] %v6973_v28  ;;  %8947 = vst [vmem:[#allocation30_spill] sm:$0xff] %v6996_v49 }
 0x1e5   : > { %v6977_v59 = vpop.f32.mrf.mxu1 }
 0x1e6   : > { %8944 = vst [vmem:[#allocation32_spill] sm:$0xff] %v6977_v59 }
 0x1e7   : > { %3316 = vrot.lane.b32.xlu0 %v3235_v62, %s5477_s27  ;;  %3314 = vrot.lane.b32.xlu1 %v3119_v10, %s5477_s27  ;;  %v3127_v10 = vrot.slane %v6967_v20, 1 }
 0x1e9   : > { %v3128_v24 = vsel %vm3101_vm6, %v3126_v45, %v3127_v10 }
 0x1eb   : > { %3312 = vrot.lane.b32.xlu0 %v3234_v41, %s5477_s27  ;;  %3310 = vrot.lane.b32.xlu1 %v3116_v9, %s5477_s27  ;;  %v7008_v41 = vpop.f32.mrf.mxu0 }
 0x1ec   : > { %8948 = vst [vmem:[#allocation10_spill] sm:$0xff] %v7008_v41 }
 0x1ef   : > { %3324 = vrot.lane.b32.xlu0 %v3237_v12, %s5477_s27  ;;  %3322 = vrot.lane.b32.xlu1 %v3125_v30, %s5477_s27 }
 0x1f3   : > { %3320 = vrot.lane.b32.xlu0 %v3236_v38, %s5477_s27  ;;  %3318 = vrot.lane.b32.xlu1 %v3122_v36, %s5477_s27  ;;  %v7020_v38 = vpop.f32.mrf.mxu0 }
 0x1f4   : > { %8949 = vst [vmem:[#allocation50_spill] sm:$0xff] %v7020_v38 }
 0x211   : > { %v7136_v2 = vpop.permute.xlu1 %3298 }
 0x212   : > { %8975 = vst [vmem:[#allocation56_spill] sm:$0xff] %v7136_v2 }
 0x217   : > { %v6981_v32 = vpop.f32.mrf.mxu1 }
 0x218   : > { %v2656_v39 = vrot.slane %v6981_v32, 7 }
 0x219   : > { %v6984_v23 = vpop.f32.mrf.mxu1 }
 0x21a   : > { %2753 = vrot.lane.b32.xlu1 %v2656_v39, %s5478_s28  ;;  %v2653_v7 = vrot.slane %v6984_v23, 7 }
 0x21b   : > { %v6989_v11 = vpop.f32.mrf.mxu1 }
 0x21c   : > { %v2657_v50 = vrot.slane %v6989_v11, 7 }
 0x21d   : > { %v6994_v16 = vpop.f32.mrf.mxu1 }
 0x21e   : > { %2749 = vrot.lane.b32.xlu1 %v2653_v7, %s5478_s28  ;;  %v2658_v0 = vsel %vm2652_vm7, %v2656_v39, %v2657_v50  ;;  %v2654_v9 = vrot.slane %v6994_v16, 7 }
 0x21f   : > { %2755 = vrot.lane.b32.xlu0 %v2658_v0, %s5478_s28  ;;  %v7002_v62 = vpop.f32.mrf.mxu1  ;;  %v7030_v0 = vpop.f32.mrf.mxu0 }
 0x220   : > { %v2655_v36 = vsel %vm2652_vm7, %v2653_v7, %v2654_v9  ;;  %v2662_v50 = vrot.slane %v7002_v62, 7  ;;  %8950 = vst [vmem:[#allocation22_spill] sm:$0xff] %v7030_v0  ;;  %v3136_v9 = vrot.slane %v6979_v46, 1 }
 0x221   : > { %v7005_v40 = vpop.f32.mrf.mxu1 }
 0x222   : > { %3330 = vrot.lane.b32.xlu1 %v3131_v63, %s5477_s27  ;;  %v3238_v63 = vsel %vm3101_vm6, %v3127_v10, 0.0  ;;  %v2659_v7 = vrot.slane %v7005_v40, 7  ;;  %v3137_v48 = vsel %vm3101_vm6, %v3135_v27, %v3136_v9 }
 0x223   : > { %3332 = vrot.lane.b32.xlu0 %v3239_v33, %s5477_s27  ;;  %v7015_v12 = vpop.f32.mrf.mxu1 }
 0x224   : > { %v2663_v56 = vrot.slane %v7015_v12, 7 }
 0x225   : > { %v7017_v30 = vpop.f32.mrf.mxu1 }
 0x226   : > { %3326 = vrot.lane.b32.xlu1 %v3128_v24, %s5477_s27  ;;  %v7042_v24 = vpop.f32.mrf.mxu0  ;;  %v2660_v31 = vrot.slane %v7017_v30, 7 }
 0x227   : > { %2751 = vrot.lane.b32.xlu0 %v2655_v36, %s5478_s28  ;;  %v7025_v39 = vpop.f32.mrf.mxu1  ;;  %8951 = vst [vmem:[#allocation37_spill] sm:$0xff] %v7042_v24  ;;  %v2664_v36 = vsel %vm2652_vm7, %v2662_v50, %v2663_v56  ;;  %v3132_v56 = vrot.slane %v6975_v29, 1  ;;  %v3141_v29 = vrot.slane %v6996_v49, 1 }
 0x228   : > { %v7054_v52 = vpop.f32.mrf.mxu0  ;;  %v2661_v27 = vsel %vm2652_vm7, %v2659_v7, %v2660_v31 }
 0x229   : > { %v7028_v42 = vpop.f32.mrf.mxu1  ;;  %8953 = vst [vmem:[#allocation21_spill] sm:$0xff] %v7054_v52 }
 0x22a   : > { %2761 = vrot.lane.b32.xlu1 %v2662_v50, %s5478_s28  ;;  %v3241_v50 = vsel %vm3101_vm6, %v3136_v9, 0.0  ;;  %v7066_v57 = vpop.f32.mrf.mxu0  ;;  %v2668_v9 = vrot.slane %v7025_v39, 7  ;;  %v2665_v31 = vrot.slane %v7028_v42, 7 }
 0x22b   : > { %3328 = vrot.lane.b32.xlu0 %v3238_v63, %s5477_s27  ;;  %v7036_v33 = vpop.f32.mrf.mxu1  ;;  %v3133_v63 = vrot.slane %v6986_v3, 1  ;;  %8956 = vst [vmem:[#allocation23_spill] sm:$0xff] %v7066_v57 }
 0x22c   : > { %v2669_v58 = vrot.slane %v7036_v33, 7 }
 0x22d   : > { %v7040_v45 = vpop.f32.mrf.mxu1  ;;  %v3134_v3 = vsel %vm3101_vm6, %v3132_v56, %v3133_v63  ;;  %v3240_v56 = vsel %vm3101_vm6, %v3133_v63, 0.0 }
 0x22e   : > { %2757 = vrot.lane.b32.xlu1 %v2659_v7, %s5478_s28  ;;  %v3142_v7 = vrot.slane %v7020_v38, 1  ;;  %v2670_v46 = vsel %vm2652_vm7, %v2668_v9, %v2669_v58  ;;  %v2666_v61 = vrot.slane %v7040_v45, 7 }
 0x22f   : > { %2763 = vrot.lane.b32.xlu0 %v2664_v36, %s5478_s28  ;;  %v7048_v10 = vpop.f32.mrf.mxu1 }
 0x230   : > { %v3143_v38 = vsel %vm3101_vm6, %v3141_v29, %v3142_v7  ;;  %v3243_v58 = vsel %vm3101_vm6, %v3142_v7, 0.0  ;;  %v2667_v29 = vsel %vm2652_vm7, %v2665_v31, %v2666_v61  ;;  %v2674_v7 = vrot.slane %v7048_v10, 7 }
 0x231   : > { %v7051_v37 = vpop.f32.mrf.mxu1 }
 0x232   : > { %8952 = vst [vmem:[#allocation9_spill] sm:$0xff] %v7051_v37  ;;  %3338 = vrot.lane.b32.xlu1 %v3137_v48, %s5477_s27  ;;  %v2671_v61 = vrot.slane %v7051_v37, 7 }
 0x233   : > { %3340 = vrot.lane.b32.xlu0 %v3241_v50, %s5477_s27  ;;  %v7061_v36 = vpop.f32.mrf.mxu1  ;;  %v7076_v50 = vpop.f32.mrf.mxu0 }
 0x234   : > { %8954 = vst [vmem:[#allocation35_spill] sm:$0xff] %v7061_v36  ;;  %8959 = vst [vmem:[#allocation39_spill] sm:$0xff] %v7076_v50  ;;  %v2675_v17 = vrot.slane %v7061_v36, 7  ;;  %v3145_v60 = vrot.slane %v7076_v50, 1 }
 0x235   : > { %v7063_v54 = vpop.f32.mrf.mxu1  ;;  %v7088_v59 = vpop.f32.mrf.mxu0 }
 0x236   : > { %8955 = vst [vmem:[#allocation12_spill] sm:$0xff] %v7063_v54  ;;  %3334 = vrot.lane.b32.xlu1 %v3134_v3, %s5477_s27  ;;  %8962 = vst [vmem:[#allocation13_spill] sm:$0xff] %v7088_v59  ;;  %v2676_v18 = vsel %vm2652_vm7, %v2674_v7, %v2675_v17  ;;  %v2672_v2 = vrot.slane %v7063_v54, 7 }
 0x237   : > { %2759 = vrot.lane.b32.xlu0 %v2661_v27, %s5478_s28  ;;  %v7071_v48 = vpop.f32.mrf.mxu1  ;;  %v7100_v8 = vpop.f32.mrf.mxu0 }
 0x238   : > { %8957 = vst [vmem:[#allocation41_spill] sm:$0xff] %v7071_v48  ;;  %8965 = vst [vmem:[#allocation24_spill] sm:$0xff] %v7100_v8 }
 0x239   : > { %v7074_v28 = vpop.f32.mrf.mxu1  ;;  %v7112_v5 = vpop.f32.mrf.mxu0 }
 0x23a   : > { %8958 = vst [vmem:[#allocation11_spill] sm:$0xff] %v7074_v28  ;;  %2769 = vrot.lane.b32.xlu1 %v2668_v9, %s5478_s28  ;;  %v3138_v9 = vrot.slane %v7008_v41, 1  ;;  %8968 = vst [vmem:[#allocation31_spill] sm:$0xff] %v7112_v5 }
 0x23b   : > { %3336 = vrot.lane.b32.xlu0 %v3240_v56, %s5477_s27  ;;  %v7082_v3 = vpop.f32.mrf.mxu1  ;;  %v3139_v56 = vrot.slane %v7030_v0, 1 }
 0x23c   : > { %8960 = vst [vmem:[#allocation14_spill] sm:$0xff] %v7082_v3 }
 0x23d   : > { %v7086_v27 = vpop.f32.mrf.mxu1  ;;  %v3140_v0 = vsel %vm3101_vm6, %v3138_v9, %v3139_v56  ;;  %v3242_v9 = vsel %vm3101_vm6, %v3139_v56, 0.0  ;;  %v3147_v56 = vrot.slane %v7042_v24, 1 }
 0x23e   : > { %8961 = vst [vmem:[#allocation44_spill] sm:$0xff] %v7086_v27  ;;  %2765 = vrot.lane.b32.xlu1 %v2665_v31, %s5478_s28  ;;  %v3148_v31 = vrot.slane %v7066_v57, 1 }
 0x23f   : > { %2771 = vrot.lane.b32.xlu0 %v2670_v46, %s5478_s28  ;;  %v7094_v63 = vpop.f32.mrf.mxu1 }
 0x240   : > { %8963 = vst [vmem:[#allocation42_spill] sm:$0xff] %v7094_v63  ;;  %v3149_v57 = vsel %vm3101_vm6, %v3147_v56, %v3148_v31  ;;  %v3245_v17 = vsel %vm3101_vm6, %v3148_v31, 0.0 }
 0x241   : > { %v7097_v51 = vpop.f32.mrf.mxu1  ;;  %v7151_v22 = vpop.permute.xlu1 %3394 }
 0x242   : > { %8964 = vst [vmem:[#allocation16_spill] sm:$0xff] %v7097_v51  ;;  %3346 = vrot.lane.b32.xlu1 %v3143_v38, %s5477_s27  ;;  %8978 = vst [vmem:[#allocation59_spill] sm:$0xff] %v7151_v22 }
 0x243   : > { %3348 = vrot.lane.b32.xlu0 %v3243_v58, %s5477_s27  ;;  %v7107_v46 = vpop.f32.mrf.mxu1  ;;  %v7122_v58 = vpop.f32.mrf.mxu0 }
 0x244   : > { %8966 = vst [vmem:[#allocation52_spill] sm:$0xff] %v7107_v46  ;;  %8971 = vst [vmem:[#allocation53_spill] sm:$0xff] %v7122_v58 }
 0x245   : > { %v7109_v49 = vpop.f32.mrf.mxu1  ;;  %v7134_v20 = vpop.f32.mrf.mxu0 }
 0x246   : > { %8967 = vst [vmem:[#allocation51_spill] sm:$0xff] %v7109_v49  ;;  %3342 = vrot.lane.b32.xlu1 %v3140_v0, %s5477_s27  ;;  %8974 = vst [vmem:[#allocation2_spill] sm:$0xff] %v7134_v20  ;;  %v2684_v14 = vrot.slane %v7109_v49, 7 }
 0x247   : > { %2767 = vrot.lane.b32.xlu0 %v2667_v29, %s5478_s28  ;;  %v7117_v38 = vpop.f32.mrf.mxu1  ;;  %v7148_v1 = vpop.f32.mrf.mxu0 }
 0x248   : > { %8969 = vst [vmem:[#allocation54_spill] sm:$0xff] %v7117_v38  ;;  %8977 = vst [vmem:[#allocation58_spill] sm:$0xff] %v7148_v1 }
 0x249   : > { %v7120_v41 = vpop.f32.mrf.mxu1  ;;  %v7164_v36 = vpop.f32.mrf.mxu0 }
 0x24a   : > { %8970 = vst [vmem:[#allocation33_spill] sm:$0xff] %v7120_v41  ;;  %2777 = vrot.lane.b32.xlu1 %v2674_v7, %s5478_s28  ;;  %v7156_v7 = vpop.permute.xlu0 %3300  ;;  %8981 = vst [vmem:[#allocation62_spill] sm:$0xff] %v7164_v36 }
 0x24b   : > { %3344 = vrot.lane.b32.xlu0 %v3242_v9, %s5477_s27  ;;  %v7128_v0 = vpop.f32.mrf.mxu1  ;;  %8979 = vst [vmem:[#allocation60_spill] sm:$0xff] %v7156_v7  ;;  %v7174_v7 = vpop.permute.xlu1 %3294 }
 0x24c   : > { %8972 = vst [vmem:[#allocation36_spill] sm:$0xff] %v7128_v0  ;;  %8983 = vst [vmem:[#allocation64_spill] sm:$0xff] %v7174_v7 }
 0x24d   : > { %v7132_v29 = vpop.f32.mrf.mxu1 }
 0x24e   : > { %8973 = vst [vmem:[#allocation55_spill] sm:$0xff] %v7132_v29  ;;  %2773 = vrot.lane.b32.xlu1 %v2671_v61, %s5478_s28  ;;  %v7168_v22 = vpop.permute.xlu0 %3396 }
 0x24f   : > { %2779 = vrot.lane.b32.xlu0 %v2676_v18, %s5478_s28  ;;  %v7142_v9 = vpop.f32.mrf.mxu1  ;;  %v3144_v18 = vrot.slane %v7054_v52, 1  ;;  %8982 = vst [vmem:[#allocation63_spill] sm:$0xff] %v7168_v22  ;;  %v7176_v52 = vpop.f32.mrf.mxu0 }
 0x250   : > { %8976 = vst [vmem:[#allocation57_spill] sm:$0xff] %v7142_v9  ;;  %8984 = vst [vmem:[#allocation65_spill] sm:$0xff] %v7176_v52  ;;  %v7190_v7 = vpop.permute.xlu1 %3390 }
 0x251   : > { %v7145_v55 = vpop.f32.mrf.mxu1  ;;  %v3146_v56 = vsel %vm3101_vm6, %v3144_v18, %v3145_v60  ;;  %v2681_v18 = vrot.slane %v7082_v3, 7  ;;  %v7188_v22 = vpop.f32.mrf.mxu0  ;;  %8987 = vst [vmem:[#allocation68_spill] sm:$0xff] %v7190_v7 }
 0x252   : > { %3354 = vrot.lane.b32.xlu1 %v3149_v57, %s5477_s27  ;;  %v2673_v57 = vsel %vm2652_vm7, %v2671_v61, %v2672_v2  ;;  %v2677_v2 = vrot.slane %v7074_v28, 7  ;;  %v3154_v61 = vrot.slane %v7112_v5, 1  ;;  %8986 = vst [vmem:[#allocation67_spill] sm:$0xff] %v7188_v22 }
 0x253   : > { %3356 = vrot.lane.b32.xlu0 %v3245_v17, %s5477_s27  ;;  %v7159_v50 = vpop.f32.mrf.mxu1  ;;  %v2680_v17 = vrot.slane %v7071_v48, 7  ;;  %v7200_v28 = vpop.f32.mrf.mxu0 }
 0x254   : > { %8980 = vst [vmem:[#allocation61_spill] sm:$0xff] %v7159_v50  ;;  %8988 = vst [vmem:[#allocation69_spill] sm:$0xff] %v7200_v28  ;;  %v3247_v7 = vsel %vm3101_vm6, %v3154_v61, 0.0 }
 0x255   : > { %v7161_v24 = vpop.f32.mrf.mxu1  ;;  %v2682_v3 = vsel %vm2652_vm7, %v2680_v17, %v2681_v18 }
 0x256   : > { %3350 = vrot.lane.b32.xlu1 %v3146_v56, %s5477_s27  ;;  %v3244_v56 = vsel %vm3101_vm6, %v3145_v60, 0.0  ;;  %v3153_v60 = vrot.slane %v7088_v59, 1 }
 0x257   : > { %2775 = vrot.lane.b32.xlu0 %v2673_v57, %s5478_s28  ;;  %v7171_v31 = vpop.f32.mrf.mxu1  ;;  %v7186_v57 = vpop.permute.xlu0 %3296 }
 0x258   : > { %8985 = vst [vmem:[#allocation66_spill] sm:$0xff] %v7186_v57  ;;  %v3155_v5 = vsel %vm3101_vm6, %v3153_v60, %v3154_v61  ;;  %v2678_v57 = vrot.slane %v7086_v27, 7  ;;  %v2686_v61 = vrot.slane %v7094_v63, 7 }
 0x259   : > { %v7181_v54 = vpop.f32.mrf.mxu1 }
 0x25a   : > { %2785 = vrot.lane.b32.xlu1 %v2680_v17, %s5478_s28  ;;  %v3150_v17 = vrot.slane %v7100_v8, 1 }
 0x25b   : > { %3352 = vrot.lane.b32.xlu0 %v3244_v56, %s5477_s27  ;;  %v7195_v48 = vpop.f32.mrf.mxu1  ;;  %v3151_v56 = vrot.slane %v7122_v58, 1  ;;  %v7206_v18 = vpop.permute.xlu0 %3392 }
 0x25c   : > { %8989 = vst [vmem:[#allocation70_spill] sm:$0xff] %v7206_v18  ;;  %v7214_v58 = vpop.f32.mrf.mxu0 }
 0x25d   : > { %v7208_v59 = vpop.f32.mrf.mxu1  ;;  %v3152_v60 = vsel %vm3101_vm6, %v3150_v17, %v3151_v56  ;;  %8991 = vst [vmem:[#allocation72_spill] sm:$0xff] %v7214_v58  ;;  %v3246_v17 = vsel %vm3101_vm6, %v3151_v56, 0.0 }
 0x25e   : > { %2781 = vrot.lane.b32.xlu1 %v2677_v2, %s5478_s28  ;;  %v7224_v8 = vpop.f32.mrf.mxu0 }
 0x25f   : > { %2787 = vrot.lane.b32.xlu0 %v2682_v3, %s5478_s28  ;;  %v7211_v3 = vpop.permute.xlu1 %3306  ;;  %v7222_v18 = vpop.permute.xlu0 %3308  ;;  %8993 = vst [vmem:[#allocation74_spill] sm:$0xff] %v7224_v8 }
 0x260   : > { %8990 = vst [vmem:[#allocation71_spill] sm:$0xff] %v7211_v3  ;;  %v7218_v27 = vpop.f32.mrf.mxu1  ;;  %8992 = vst [vmem:[#allocation73_spill] sm:$0xff] %v7222_v18 }
 0x262   : > { %3362 = vrot.lane.b32.xlu1 %v3155_v5, %s5477_s27  ;;  %v2679_v5 = vsel %vm2652_vm7, %v2677_v2, %v2678_v57  ;;  %v2683_v2 = vrot.slane %v7097_v51, 7  ;;  %v3160_v57 = vrot.slane %v7164_v36, 1 }
 0x263   : > { %3364 = vrot.lane.b32.xlu0 %v3247_v7, %s5477_s27  ;;  %v2687_v7 = vrot.slane %v7107_v46, 7  ;;  %v7227_v3 = vpop.permute.xlu1 %3302  ;;  %v7241_v46 = vpop.permute.xlu0 %3304 }
 0x264   : > { %8994 = vst [vmem:[#allocation75_spill] sm:$0xff] %v7227_v3  ;;  %v3159_v3 = vrot.slane %v7134_v20, 1  ;;  %8995 = vst [vmem:[#allocation76_spill] sm:$0xff] %v7241_v46 }
 0x265   : > { %v2688_v18 = vsel %vm2652_vm7, %v2686_v61, %v2687_v7  ;;  %v3156_v7 = vrot.slane %v7148_v1, 1 }
 0x266   : > { %3358 = vrot.lane.b32.xlu1 %v3152_v60, %s5477_s27  ;;  %v7231_v60 = vpop.f32.mrf.mxu1  ;;  %v3161_v36 = vsel %vm3101_vm6, %v3159_v3, %v3160_v57 }
 0x267   : > { %2783 = vrot.lane.b32.xlu0 %v2679_v5, %s5478_s28  ;;  %v7236_v5 = vpop.f32.mrf.mxu0  ;;  %v7246_v56 = vpop.permute.xlu1 %3398 }
 0x268   : > { %v7243_v63 = vpop.f32.mrf.mxu1  ;;  %8996 = vst [vmem:[#allocation77_spill] sm:$0xff] %v7246_v56 }
 0x269   : > { %v7250_v51 = vpop.f32.mrf.mxu0 }
 0x26a   : > { %2793 = vrot.lane.b32.xlu1 %v2686_v61, %s5478_s28  ;;  %v3249_v61 = vsel %vm3101_vm6, %v3160_v57, 0.0  ;;  %v7256_v46 = vpop.f32.mrf.mxu1  ;;  %v2692_v57 = vrot.slane %v7117_v38, 7 }
 0x26b   : > { %3360 = vrot.lane.b32.xlu0 %v3246_v17, %s5477_s27  ;;  %v3157_v17 = vrot.slane %v7176_v52, 1  ;;  %v7262_v52 = vpop.f32.mrf.mxu0  ;;  %v7264_v3 = vpop.permute.xlu1 %3314 }
 0x26c   : > { %8998 = vst [vmem:[#allocation79_spill] sm:$0xff] %v7262_v52  ;;  %8999 = vst [vmem:[#allocation80_spill] sm:$0xff] %v7264_v3  ;;  %v7268_v20 = vpop.f32.mrf.mxu1 }
 0x26d   : > { %v3158_v56 = vsel %vm3101_vm6, %v3156_v7, %v3157_v17  ;;  %v7272_v1 = vpop.f32.mrf.mxu0  ;;  %v3248_v7 = vsel %vm3101_vm6, %v3157_v17, 0.0  ;;  %v3165_v17 = vrot.slane %v7188_v22, 1 }
 0x26e   : > { %2789 = vrot.lane.b32.xlu1 %v2683_v2, %s5478_s28  ;;  %9000 = vst [vmem:[#allocation81_spill] sm:$0xff] %v7272_v1  ;;  %v7279_v3 = vpop.f32.mrf.mxu1 }
 0x26f   : > { %2795 = vrot.lane.b32.xlu0 %v2688_v18, %s5478_s28  ;;  %v7259_v18 = vpop.permute.xlu0 %3400 }
 0x270   : > { %8997 = vst [vmem:[#allocation78_spill] sm:$0xff] %v7259_v18  ;;  %v7291_v38 = vpop.f32.mrf.mxu1 }
 0x272   : > { %3370 = vrot.lane.b32.xlu1 %v3161_v36, %s5477_s27  ;;  %v2685_v36 = vsel %vm2652_vm7, %v2683_v2, %v2684_v14  ;;  %v2689_v14 = vrot.slane %v7120_v41, 7  ;;  %v7283_v2 = vpop.permute.xlu1 %3310  ;;  %v7304_v22 = vpop.f32.mrf.mxu1 }
 0x273   : > { %3372 = vrot.lane.b32.xlu0 %v3249_v61, %s5477_s27  ;;  %v2693_v61 = vrot.slane %v7128_v0, 7  ;;  %v7277_v18 = vpop.permute.xlu0 %3316  ;;  %9002 = vst [vmem:[#allocation83_spill] sm:$0xff] %v7283_v2 }
 0x274   : > { %9001 = vst [vmem:[#allocation82_spill] sm:$0xff] %v7277_v18 }
 0x275   : > { %v2694_v0 = vsel %vm2652_vm7, %v2692_v57, %v2693_v61  ;;  %v3162_v61 = vrot.slane %v7200_v28, 1  ;;  %v7329_v28 = vld [vmem:[%s8660_s7] ss:$0 sm:$0xff] }
 0x276   : > { %3366 = vrot.lane.b32.xlu1 %v3158_v56, %s5477_s27  ;;  %v3166_v56 = vrot.slane %v7214_v58, 1  ;;  %v2690_v58 = vrot.slane %v7132_v29, 7  ;;  %v7299_v49 = vpop.permute.xlu1 %3322  ;;  %v3172_v29 = vrot.slane %v7262_v52, 1 }
 0x277   : > { %2791 = vrot.lane.b32.xlu0 %v2685_v36, %s5478_s28  ;;  %v7286_v36 = vpop.f32.mrf.mxu0  ;;  %v7295_v18 = vpop.permute.xlu0 %3312  ;;  %9004 = vst [vmem:[#allocation85_spill] sm:$0xff] %v7299_v49 }
 0x278   : > { %9003 = vst [vmem:[#allocation84_spill] sm:$0xff] %v7295_v18  ;;  %v3167_v2 = vsel %vm3101_vm6, %v3165_v17, %v3166_v56  ;;  %v7311_v17 = vld [vmem:[%s8662_s9] ss:$0 sm:$0xff]  ;;  %v7319_v49 = vpop.f32.mrf.mxu1 }
 0x279   : > { %v3757_v41 = vpop.f32.mrf.mxu0 }
 0x27a   : > { %2801 = vrot.lane.b32.xlu1 %v2692_v57, %s5478_s28  ;;  %v3251_v57 = vsel %vm3101_vm6, %v3166_v56, 0.0 }
 0x27b   : > { %3368 = vrot.lane.b32.xlu0 %v3248_v7, %s5477_s27  ;;  %v3163_v7 = vrot.slane %v7224_v8, 1  ;;  %v7313_v18 = vpop.f32.mrf.mxu0  ;;  %v7317_v56 = vpop.permute.xlu0 %3324  ;;  %v3758_v8 = vadd.f32 %v7311_v17, %v3757_v41  ;;  %v7340_v41 = vadd.f32 %v6981_v32, %v6749_v19 }
 0x27c   : > { %9005 = vst [vmem:[#allocation86_spill] sm:$0xff] %v7317_v56  ;;  %v7334_v56 = vpop.f32.mrf.mxu1 }
 0x27d   : > { %9007 = vst [vmem:[#allocation88_spill] sm:$0xff] %v7340_v41 }
 0x27e   : > { %2797 = vrot.lane.b32.xlu1 %v2689_v14, %s5478_s28  ;;  %v7360_v32 = vpop.f32.mrf.mxu1 }
 0x27f   : > { %2803 = vrot.lane.b32.xlu0 %v2694_v0, %s5478_s28  ;;  %v3164_v0 = vsel %vm3101_vm6, %v3162_v61, %v3163_v7  ;;  %v7323_v61 = vpop.permute.xlu1 %3318 }
 0x280   : > { %9006 = vst [vmem:[#allocation87_spill] sm:$0xff] %v7323_v61  ;;  %v7344_v61 = vadd.f32 %v7329_v28, %v3758_v8  ;;  %v3171_v8 = vrot.slane %v7236_v5, 1 }
 0x282   : > { %3378 = vrot.lane.b32.xlu1 %v3167_v2, %s5477_s27  ;;  %v2691_v2 = vsel %vm2652_vm7, %v2689_v14, %v2690_v58  ;;  %v2699_v58 = vrot.slane %v7159_v50, 7  ;;  %v3250_v14 = vsel %vm3101_vm6, %v3163_v7, 0.0  ;;  %v7348_v7 = vpop.permute.xlu0 %3320 }
 0x283   : > { %3380 = vrot.lane.b32.xlu0 %v3251_v57, %s5477_s27  ;;  %v2698_v57 = vrot.slane %v7142_v9, 7  ;;  %9008 = vst [vmem:[#allocation89_spill] sm:$0xff] %v7348_v7  ;;  %v3169_v7 = vrot.slane %v7272_v1, 1 }
 0x285   : > { %v2700_v19 = vsel %vm2652_vm7, %v2698_v57, %v2699_v58 }
 0x286   : > { %3374 = vrot.lane.b32.xlu1 %v3164_v0, %s5477_s27  ;;  %v3760_v0 = vpop.f32.mrf.mxu0 }
 0x287   : > { %2799 = vrot.lane.b32.xlu0 %v2691_v2, %s5478_s28  ;;  %v2695_v2 = vrot.slane %v7145_v55, 7  ;;  %v3761_v50 = vadd.f32 %v7311_v17, %v3760_v0 }
 0x289   : > { %v7373_v0 = vadd.f32 %v7329_v28, %v3761_v50  ;;  %v3168_v50 = vrot.slane %v7250_v51, 1 }
 0x28a   : > { %2809 = vrot.lane.b32.xlu1 %v2698_v57, %s5478_s28 }
 0x28b   : > { %3376 = vrot.lane.b32.xlu0 %v3250_v14, %s5477_s27 }
 0x28c   : > { %v2754_v9 = vpop.permute.xlu1 %2753 }
 0x28d   : > { %v2942_v37 = vsel %vm2652_vm7, 0.0, %v2754_v9  ;;  %v7365_v9 = vadd.f32 %v6984_v23, %v6753_v21  ;;  %v2696_v21 = vrot.slane %v7161_v24, 7 }
 0x28e   : > { %v2975_v14 = vadd.f32 %v2942_v37, %v7340_v41  ;;  %2805 = vrot.lane.b32.xlu1 %v2695_v2, %s5478_s28  ;;  %v7369_v37 = vadd.f32 %v6989_v11, %v6755_v13  ;;  %v3253_v11 = vsel %vm3101_vm6, %v3172_v29, 0.0 }
 0x28f   : > { %2811 = vrot.lane.b32.xlu0 %v2700_v19, %s5478_s28  ;;  %9009 = vst [vmem:[#allocation90_spill] sm:$0xff] %v7365_v9  ;;  %v3173_v19 = vsel %vm3101_vm6, %v3171_v8, %v3172_v29  ;;  %v2697_v29 = vsel %vm2652_vm7, %v2695_v2, %v2696_v21  ;;  %v3252_v21 = vsel %vm3101_vm6, %v3169_v7, 0.0 }
 0x290   : > { %9010 = vst [vmem:[#allocation91_spill] sm:$0xff] %v7369_v37  ;;  %v3925_v57 = vadd.f32 %v7344_v61, %v2975_v14  ;;  %v2750_v58 = vpop.permute.xlu1 %2749  ;;  %v7386_v14 = vpop.f32.mrf.mxu1 }
 0x291   : > { %v2941_v41 = vsel %vm2652_vm7, 0.0, %v2750_v58  ;;  %v2756_v52 = vpop.permute.xlu0 %2755 }
 0x292   : > { %3989 = vst.msk [vmem:[%s7357_s17 + $0x10] sm:$0xff] %vm1308_vm1, %v3925_v57  ;;  %v2973_v13 = vadd.f32 %v2941_v41, %v7365_v9  ;;  %v2976_v23 = vadd.f32 %v2756_v52, %v7369_v37  ;;  %3386 = vrot.lane.b32.xlu1 %v3173_v19, %s5477_s27  ;;  %v3170_v52 = vsel %vm3101_vm6, %v3168_v50, %v3169_v7  ;;  %v7402_v41 = vpop.f32.mrf.mxu1 }
 0x293   : > { %3388 = vrot.lane.b32.xlu0 %v3253_v11, %s5477_s27  ;;  %v7407_v19 = vadd.f32 %v6994_v16, %v6807_v47  ;;  %v3769_v47 = vadd.f32 %v7313_v18, %v7311_v17  ;;  %v7425_v16 = vadd.f32 %v7002_v62, %v6816_v43  ;;  %v2702_v18 = vrot.slane %v7208_v59, 7 }
 0x294   : > { %v3923_v8 = vadd.f32 %v7344_v61, %v2973_v13  ;;  %v3926_v58 = vadd.f32 %v7373_v0, %v2976_v23  ;;  %v7391_v1 = vpop.permute.xlu1 %3330  ;;  %v2704_v13 = vrot.slane %v7171_v31, 7  ;;  %v3766_v23 = vadd.f32 %v7286_v36, %v7311_v17 }
 0x295   : > { %9011 = vst [vmem:[#allocation92_spill] sm:$0xff] %v7391_v1  ;;  %v7393_v57 = vpop.permute.xlu0 %3332  ;;  %9013 = vst [vmem:[#allocation94_spill] sm:$0xff] %v7407_v19  ;;  %v2701_v36 = vrot.slane %v7181_v54, 7  ;;  %v7435_v1 = vpop.f32.mrf.mxu0 }
 0x296   : > { %9012 = vst [vmem:[#allocation93_spill] sm:$0xff] %v7393_v57  ;;  %3987 = vst.msk [vmem:[%s7357_s17] sm:$0xff] %vm1308_vm1, %v3923_v8  ;;  %3382 = vrot.lane.b32.xlu1 %v3170_v52, %s5477_s27  ;;  %v2705_v8 = vrot.slane %v7195_v48, 7  ;;  %v7429_v52 = vadd.f32 %v7329_v28, %v3766_v23 }
 0x297   : > { %3990 = vst.msk [vmem:[%s7357_s17 + $0x18] sm:$0xff] %vm1308_vm1, %v3926_v58  ;;  %2807 = vrot.lane.b32.xlu0 %v2697_v29, %s5478_s28  ;;  %v7418_v58 = vpop.f32.mrf.mxu1  ;;  %9015 = vst [vmem:[#allocation96_spill] sm:$0xff] %v7425_v16 }
 0x298   : > { %v7412_v11 = vpop.permute.xlu1 %3326  ;;  %v2706_v62 = vsel %vm2652_vm7, %v2704_v13, %v2705_v8 }
 0x299   : > { %9014 = vst [vmem:[#allocation95_spill] sm:$0xff] %v7412_v11  ;;  %v2752_v50 = vpop.permute.xlu0 %2751  ;;  %v7443_v23 = vpop.f32.mrf.mxu1 }
 0x29a   : > { %v2974_v2 = vadd.f32 %v2752_v50, %v7407_v19  ;;  %2817 = vrot.lane.b32.xlu1 %v2704_v13, %s5478_s28 }
 0x29b   : > { %3384 = vrot.lane.b32.xlu0 %v3252_v21, %s5477_s27  ;;  %v7451_v21 = vadd.f32 %v7005_v40, %v6821_v4  ;;  %v2703_v40 = vsel %vm2652_vm7, %v2701_v36, %v2702_v18 }
 0x29c   : > { %v3924_v29 = vadd.f32 %v7373_v0, %v2974_v2  ;;  %v2762_v50 = vpop.permute.xlu1 %2761  ;;  %v7446_v2 = vadd.f32 %v7329_v28, %v3769_v47  ;;  %v3773_v47 = vpop.f32.mrf.mxu0 }
 0x29d   : > { %v2944_v7 = vsel %vm2652_vm7, 0.0, %v2762_v50  ;;  %v7433_v57 = vpop.permute.xlu0 %3328  ;;  %9017 = vst [vmem:[#allocation98_spill] sm:$0xff] %v7451_v21  ;;  %v2710_v50 = vrot.slane %v7218_v27, 7 }
 0x29e   : > { %9016 = vst [vmem:[#allocation97_spill] sm:$0xff] %v7433_v57  ;;  %3988 = vst.msk [vmem:[%s7357_s17 + $0x8] sm:$0xff] %vm1308_vm1, %v3924_v29  ;;  %v2979_v43 = vadd.f32 %v2944_v7, %v7425_v16  ;;  %2813 = vrot.lane.b32.xlu1 %v2701_v36, %s5478_s28  ;;  %v7455_v29 = vadd.f32 %v7015_v12, %v6832_v34  ;;  %v7467_v12 = vpop.f32.mrf.mxu1 }
 0x29f   : > { %2819 = vrot.lane.b32.xlu0 %v2706_v62, %s5478_s28  ;;  %v2711_v62 = vrot.slane %v7243_v63, 7 }
 0x2a0   : > { %9018 = vst [vmem:[#allocation99_spill] sm:$0xff] %v7455_v29  ;;  %v3929_v7 = vadd.f32 %v7429_v52, %v2979_v43  ;;  %v2758_v13 = vpop.permute.xlu1 %2757  ;;  %v2707_v43 = vrot.slane %v7231_v60, 7  ;;  %v7486_v18 = vpop.f32.mrf.mxu1 }
 0x2a1   : > { %v2943_v8 = vsel %vm2652_vm7, 0.0, %v2758_v13  ;;  %v2764_v57 = vpop.permute.xlu0 %2763  ;;  %v2712_v36 = vsel %vm2652_vm7, %v2710_v50, %v2711_v62 }
 0x2a2   : > { %3993 = vst.msk [vmem:[%s7357_s17 + $0x30] sm:$0xff] %vm1308_vm1, %v3929_v7  ;;  %v2977_v4 = vadd.f32 %v2943_v8, %v7451_v21  ;;  %v2980_v34 = vadd.f32 %v2764_v57, %v7455_v29  ;;  %2825 = vrot.lane.b32.xlu1 %v2710_v50, %s5478_s28  ;;  %v7477_v8 = vpop.f32.mrf.mxu0  ;;  %v2708_v57 = vrot.slane %v7256_v46, 7 }
 0x2a3   : > { %2815 = vrot.lane.b32.xlu0 %v2703_v40, %s5478_s28 }
 0x2a4   : > { %v3927_v13 = vadd.f32 %v7429_v52, %v2977_v4  ;;  %v3930_v11 = vadd.f32 %v7446_v2, %v2980_v34  ;;  %v7473_v16 = vpop.permute.xlu1 %3338  ;;  %v7491_v4 = vadd.f32 %v7017_v30, %v6843_v53  ;;  %v2716_v34 = vrot.slane %v7268_v20, 7  ;;  %v7505_v30 = vpop.f32.mrf.mxu1 }
 0x2a5   : > { %9019 = vst [vmem:[#allocation100_spill] sm:$0xff] %v7473_v16  ;;  %v7475_v7 = vpop.permute.xlu0 %3340  ;;  %v2717_v16 = vrot.slane %v7291_v38, 7  ;;  %v2709_v62 = vsel %vm2652_vm7, %v2707_v43, %v2708_v57  ;;  %v7503_v53 = vadd.f32 %v7025_v39, %v6859_v6  ;;  %v2714_v6 = vrot.slane %v7304_v22, 7 }
 0x2a6   : > { %9020 = vst [vmem:[#allocation101_spill] sm:$0xff] %v7475_v7  ;;  %3991 = vst.msk [vmem:[%s7357_s17 + $0x20] sm:$0xff] %vm1308_vm1, %v3927_v13  ;;  %2821 = vrot.lane.b32.xlu1 %v2707_v43, %s5478_s28  ;;  %v3774_v13 = vadd.f32 %v7311_v17, %v3773_v47  ;;  %v2713_v47 = vrot.slane %v7279_v3, 7 }
 0x2a7   : > { %3994 = vst.msk [vmem:[%s7357_s17 + $0x38] sm:$0xff] %vm1308_vm1, %v3930_v11  ;;  %2827 = vrot.lane.b32.xlu0 %v2712_v36, %s5478_s28  ;;  %9021 = vst [vmem:[#allocation102_spill] sm:$0xff] %v7491_v4  ;;  %v3776_v11 = vpop.f32.mrf.mxu0 }
 0x2a8   : > { %v7494_v40 = vpop.permute.xlu1 %3334  ;;  %9023 = vst [vmem:[#allocation104_spill] sm:$0xff] %v7503_v53  ;;  %v3777_v29 = vadd.f32 %v7311_v17, %v3776_v11  ;;  %v7527_v11 = vpop.f32.mrf.mxu1 }
 0x2a9   : > { %9022 = vst [vmem:[#allocation103_spill] sm:$0xff] %v7494_v40  ;;  %v2760_v7 = vpop.permute.xlu0 %2759  ;;  %v7511_v40 = vadd.f32 %v7329_v28, %v3774_v13  ;;  %v7525_v13 = vadd.f32 %v7028_v42, %v6874_v26  ;;  %v2723_v42 = vrot.slane %v7360_v32, 7 }
 0x2aa   : > { %v2978_v50 = vadd.f32 %v2760_v7, %v7491_v4  ;;  %2833 = vrot.lane.b32.xlu1 %v2716_v34, %s5478_s28 }
 0x2ab   : > { %2823 = vrot.lane.b32.xlu0 %v2709_v62, %s5478_s28  ;;  %9025 = vst [vmem:[#allocation106_spill] sm:$0xff] %v7525_v13  ;;  %v7532_v62 = vadd.f32 %v7036_v33, %v6886_v35 }
 0x2ac   : > { %v3928_v36 = vadd.f32 %v7446_v2, %v2978_v50  ;;  %v2770_v7 = vpop.permute.xlu1 %2769  ;;  %v2718_v50 = vsel %vm2652_vm7, %v2716_v34, %v2717_v16 }
 0x2ad   : > { %v2946_v43 = vsel %vm2652_vm7, 0.0, %v2770_v7  ;;  %v7515_v57 = vpop.permute.xlu0 %3336  ;;  %9026 = vst [vmem:[#allocation107_spill] sm:$0xff] %v7532_v62 }
 0x2ae   : > { %9024 = vst [vmem:[#allocation105_spill] sm:$0xff] %v7515_v57  ;;  %3992 = vst.msk [vmem:[%s7357_s17 + $0x28] sm:$0xff] %vm1308_vm1, %v3928_v36  ;;  %v2983_v39 = vadd.f32 %v2946_v43, %v7503_v53  ;;  %2829 = vrot.lane.b32.xlu1 %v2713_v47, %s5478_s28  ;;  %v2722_v36 = vrot.slane %v7319_v49, 7  ;;  %v7537_v43 = vadd.f32 %v7329_v28, %v3777_v29  ;;  %v7547_v29 = vpop.f32.mrf.mxu1 }
 0x2af   : > { %2835 = vrot.lane.b32.xlu0 %v2718_v50, %s5478_s28  ;;  %9027 = vst [vmem:[#allocation108_spill] sm:$0xff] %v7547_v29  ;;  %v2719_v50 = vrot.slane %v7334_v56, 7 }
 0x2b0   : > { %v3933_v7 = vadd.f32 %v7511_v40, %v2983_v39  ;;  %v2766_v16 = vpop.permute.xlu1 %2765  ;;  %v2715_v39 = vsel %vm2652_vm7, %v2713_v47, %v2714_v6  ;;  %v2724_v47 = vsel %vm2652_vm7, %v2722_v36, %v2723_v42  ;;  %v7564_v6 = vpop.f32.mrf.mxu1 }
 0x2b1   : > { %v2945_v34 = vsel %vm2652_vm7, 0.0, %v2766_v16  ;;  %v2772_v26 = vpop.permute.xlu0 %2771  ;;  %9030 = vst [vmem:[#allocation111_spill] sm:$0xff] %v7564_v6 }
 0x2b2   : > { %3997 = vst.msk [vmem:[%s7357_s17 + $0x50] sm:$0xff] %vm1308_vm1, %v3933_v7  ;;  %v2981_v35 = vadd.f32 %v2945_v34, %v7525_v13  ;;  %v2984_v33 = vadd.f32 %v2772_v26, %v7532_v62  ;;  %2841 = vrot.lane.b32.xlu1 %v2722_v36, %s5478_s28  ;;  %v2720_v34 = vrot.slane %v7386_v14, 7  ;;  %v3782_v26 = vadd.f32 %v7435_v1, %v7311_v17  ;;  %v7580_v42 = vpop.f32.mrf.mxu1 }
 0x2b3   : > { %2831 = vrot.lane.b32.xlu0 %v2715_v39, %s5478_s28  ;;  %9033 = vst [vmem:[#allocation114_spill] sm:$0xff] %v7580_v42 }
 0x2b4   : > { %v3931_v16 = vadd.f32 %v7511_v40, %v2981_v35  ;;  %v3934_v57 = vadd.f32 %v7537_v43, %v2984_v33  ;;  %v7553_v53 = vpop.permute.xlu1 %3346  ;;  %v7571_v35 = vadd.f32 %v7040_v45, %v6898_v25  ;;  %v2728_v33 = vrot.slane %v7402_v41, 7 }
 0x2b5   : > { %9028 = vst [vmem:[#allocation109_spill] sm:$0xff] %v7553_v53  ;;  %v7555_v7 = vpop.permute.xlu0 %3348  ;;  %v2721_v1 = vsel %vm2652_vm7, %v2719_v50, %v2720_v34  ;;  %v7588_v25 = vadd.f32 %v7048_v10, %v6910_v44  ;;  %v2725_v45 = vrot.slane %v7418_v58, 7 }
 0x2b6   : > { %9029 = vst [vmem:[#allocation110_spill] sm:$0xff] %v7555_v7  ;;  %3995 = vst.msk [vmem:[%s7357_s17 + $0x40] sm:$0xff] %vm1308_vm1, %v3931_v16  ;;  %2837 = vrot.lane.b32.xlu1 %v2719_v50, %s5478_s28  ;;  %v2729_v16 = vrot.slane %v7443_v23, 7 }
 0x2b7   : > { %3998 = vst.msk [vmem:[%s7357_s17 + $0x58] sm:$0xff] %vm1308_vm1, %v3934_v57  ;;  %2843 = vrot.lane.b32.xlu0 %v2724_v47, %s5478_s28  ;;  %9031 = vst [vmem:[#allocation112_spill] sm:$0xff] %v7571_v35  ;;  %v7583_v47 = vadd.f32 %v7329_v28, %v3782_v26  ;;  %v7597_v26 = vpop.f32.mrf.mxu0 }
 0x2b8   : > { %v7574_v39 = vpop.permute.xlu1 %3342  ;;  %9034 = vst [vmem:[#allocation115_spill] sm:$0xff] %v7588_v25  ;;  %v2730_v10 = vsel %vm2652_vm7, %v2728_v33, %v2729_v16 }
 0x2b9   : > { %9032 = vst [vmem:[#allocation113_spill] sm:$0xff] %v7574_v39  ;;  %v2768_v57 = vpop.permute.xlu0 %2767  ;;  %v9040_v39 = vld [vmem:[#allocation35_spill] sm:$0xff] }
 0x2ba   : > { %v2982_v36 = vadd.f32 %v2768_v57, %v7571_v35  ;;  %2849 = vrot.lane.b32.xlu1 %v2728_v33, %s5478_s28  ;;  %v3785_v57 = vadd.f32 %v7477_v8, %v7311_v17  ;;  %v9036_v8 = vld [vmem:[#allocation9_spill] sm:$0xff]  ;;  %v2735_v35 = vrot.slane %v7527_v11, 7 }
 0x2bb   : > { %2839 = vrot.lane.b32.xlu0 %v2721_v1, %s5478_s28  ;;  %v2726_v1 = vrot.slane %v7467_v12, 7 }
 0x2bc   : > { %v3932_v7 = vadd.f32 %v7537_v43, %v2982_v36  ;;  %v2778_v53 = vpop.permute.xlu1 %2777  ;;  %v7607_v36 = vadd.f32 %v9036_v8, %v6920_v15  ;;  %v3789_v8 = vpop.f32.mrf.mxu0 }
 0x2bd   : > { %v2948_v50 = vsel %vm2652_vm7, 0.0, %v2778_v53  ;;  %v7595_v34 = vpop.permute.xlu0 %3344  ;;  %v7609_v53 = vpop.f32.mrf.mxu1 }
 0x2be   : > { %9035 = vst [vmem:[#allocation116_spill] sm:$0xff] %v7595_v34  ;;  %3996 = vst.msk [vmem:[%s7357_s17 + $0x48] sm:$0xff] %vm1308_vm1, %v3932_v7  ;;  %v2987_v44 = vadd.f32 %v2948_v50, %v7588_v25  ;;  %2845 = vrot.lane.b32.xlu1 %v2725_v45, %s5478_s28  ;;  %v9039_v34 = vld [vmem:[#allocation46_spill] sm:$0xff]  ;;  %v2734_v7 = vrot.slane %v7486_v18, 7  ;;  %v7618_v50 = vadd.f32 %v7329_v28, %v3785_v57 }
 0x2bf   : > { %9037 = vst [vmem:[#allocation9_spill] sm:$0xff] %v7607_v36  ;;  %9038 = vst [vmem:[#allocation117_spill] sm:$0xff] %v7609_v53  ;;  %2851 = vrot.lane.b32.xlu0 %v2730_v10, %s5478_s28  ;;  %v7614_v62 = vadd.f32 %v9040_v39, %v9039_v34  ;;  %v2727_v57 = vsel %vm2652_vm7, %v2725_v45, %v2726_v1  ;;  %v2731_v10 = vrot.slane %v7505_v30, 7 }
 0x2c0   : > { %v3937_v25 = vadd.f32 %v7583_v47, %v2987_v44  ;;  %v2774_v33 = vpop.permute.xlu1 %2773  ;;  %v7629_v44 = vpop.f32.mrf.mxu1  ;;  %v2736_v45 = vsel %vm2652_vm7, %v2734_v7, %v2735_v35 }
 0x2c1   : > { %9041 = vst [vmem:[#allocation46_spill] sm:$0xff] %v7614_v62  ;;  %v2947_v16 = vsel %vm2652_vm7, 0.0, %v2774_v33  ;;  %v2780_v15 = vpop.permute.xlu0 %2779  ;;  %9042 = vst [vmem:[#allocation35_spill] sm:$0xff] %v7629_v44 }
 0x2c2   : > { %4001 = vst.msk [vmem:[%s7357_s17 + $0x70] sm:$0xff] %vm1308_vm1, %v3937_v25  ;;  %v2985_v39 = vadd.f32 %v2947_v16, %v7607_v36  ;;  %v2988_v34 = vadd.f32 %v2780_v15, %v7614_v62  ;;  %2857 = vrot.lane.b32.xlu1 %v2734_v7, %s5478_s28  ;;  %v7639_v16 = vpop.f32.mrf.mxu0  ;;  %v2732_v15 = vrot.slane %v7547_v29, 7  ;;  %v7648_v1 = vpop.f32.mrf.mxu1  ;;  %v2741_v36 = vrot.slane %v7609_v53, 7  ;;  %v9074_v53 = vld [vmem:[#allocation42_spill] sm:$0xff] }
 0x2c3   : > { %2847 = vrot.lane.b32.xlu0 %v2727_v57, %s5478_s28  ;;  %9045 = vst [vmem:[#allocation120_spill] sm:$0xff] %v7648_v1 }
 0x2c4   : > { %v3935_v33 = vadd.f32 %v7583_v47, %v2985_v39  ;;  %v3938_v13 = vadd.f32 %v7618_v50, %v2988_v34  ;;  %v7635_v4 = vpop.permute.xlu1 %3354  ;;  %v9046_v39 = vld [vmem:[#allocation15_spill] sm:$0xff]  ;;  %v9047_v34 = vld [vmem:[#allocation12_spill] sm:$0xff]  ;;  %v2733_v7 = vsel %vm2652_vm7, %v2731_v10, %v2732_v15  ;;  %v7667_v37 = vpop.f32.mrf.mxu1 }
 0x2c5   : > { %9043 = vst [vmem:[#allocation118_spill] sm:$0xff] %v7635_v4  ;;  %v7637_v25 = vpop.permute.xlu0 %3356  ;;  %v7653_v57 = vadd.f32 %v9047_v34, %v9046_v39  ;;  %v9051_v39 = vld [vmem:[#allocation41_spill] sm:$0xff] }
 0x2c6   : > { %9044 = vst [vmem:[#allocation119_spill] sm:$0xff] %v7637_v25  ;;  %3999 = vst.msk [vmem:[%s7357_s17 + $0x60] sm:$0xff] %vm1308_vm1, %v3935_v33  ;;  %2853 = vrot.lane.b32.xlu1 %v2731_v10, %s5478_s28  ;;  %v2740_v25 = vrot.slane %v7564_v6, 7  ;;  %v3790_v33 = vadd.f32 %v7311_v17, %v3789_v8  ;;  %v2737_v8 = vrot.slane %v7580_v42, 7 }
 0x2c7   : > { %4002 = vst.msk [vmem:[%s7357_s17 + $0x78] sm:$0xff] %vm1308_vm1, %v3938_v13  ;;  %2859 = vrot.lane.b32.xlu0 %v2736_v45, %s5478_s28  ;;  %9048 = vst [vmem:[#allocation15_spill] sm:$0xff] %v7653_v57  ;;  %v3792_v13 = vpop.f32.mrf.mxu0  ;;  %v9050_v45 = vld [vmem:[#allocation29_spill] sm:$0xff] }
 0x2c8   : > { %v7656_v4 = vpop.permute.xlu1 %3350  ;;  %v7665_v34 = vadd.f32 %v9051_v39, %v9050_v45  ;;  %9053 = vst [vmem:[#allocation41_spill] sm:$0xff] %v7667_v37  ;;  %v7673_v21 = vadd.f32 %v7329_v28, %v3790_v33  ;;  %v2738_v45 = vrot.slane %v7629_v44, 7  ;;  %v9055_v33 = vld [vmem:[#allocation43_spill] sm:$0xff] }
 0x2c9   : > { %9049 = vst [vmem:[#allocation12_spill] sm:$0xff] %v7656_v4  ;;  %v2776_v62 = vpop.permute.xlu0 %2775  ;;  %v9056_v39 = vld [vmem:[#allocation11_spill] sm:$0xff] }
 0x2ca   : > { %v2986_v35 = vadd.f32 %v2776_v62, %v7653_v57  ;;  %2865 = vrot.lane.b32.xlu1 %v2740_v25, %s5478_s28  ;;  %9052 = vst [vmem:[#allocation29_spill] sm:$0xff] %v7665_v34  ;;  %v3793_v57 = vadd.f32 %v7311_v17, %v3792_v13  ;;  %v7687_v19 = vadd.f32 %v9056_v39, %v9055_v33  ;;  %v7689_v13 = vpop.f32.mrf.mxu1 }
 0x2cb   : > { %2855 = vrot.lane.b32.xlu0 %v2733_v7, %s5478_s28  ;;  %9058 = vst [vmem:[#allocation11_spill] sm:$0xff] %v7689_v13  ;;  %v2747_v39 = vrot.slane %v7689_v13, 7 }
 0x2cc   : > { %v3936_v4 = vadd.f32 %v7618_v50, %v2986_v35  ;;  %v2786_v62 = vpop.permute.xlu1 %2785  ;;  %v2742_v35 = vsel %vm2652_vm7, %v2740_v25, %v2741_v36  ;;  %9057 = vst [vmem:[#allocation43_spill] sm:$0xff] %v7687_v19 }
 0x2cd   : > { %v2950_v10 = vsel %vm2652_vm7, 0.0, %v2786_v62  ;;  %v7677_v15 = vpop.permute.xlu0 %3352  ;;  %v9059_v62 = vld [vmem:[#allocation17_spill] sm:$0xff] }
 0x2ce   : > { %9054 = vst [vmem:[#allocation121_spill] sm:$0xff] %v7677_v15  ;;  %4000 = vst.msk [vmem:[%s7357_s17 + $0x68] sm:$0xff] %vm1308_vm1, %v3936_v4  ;;  %v2991_v7 = vadd.f32 %v2950_v10, %v7665_v34  ;;  %2861 = vrot.lane.b32.xlu1 %v2737_v8, %s5478_s28  ;;  %v9060_v15 = vld [vmem:[#allocation14_spill] sm:$0xff]  ;;  %v2746_v4 = vrot.slane %v7648_v1, 7  ;;  %v7699_v34 = vadd.f32 %v7329_v28, %v3793_v57  ;;  %v7709_v57 = vpop.f32.mrf.mxu1 }
 0x2cf   : > { %2867 = vrot.lane.b32.xlu0 %v2742_v35, %s5478_s28  ;;  %v7694_v9 = vadd.f32 %v9060_v15, %v9059_v62  ;;  %9062 = vst [vmem:[#allocation14_spill] sm:$0xff] %v7709_v57  ;;  %v2743_v62 = vrot.slane %v7667_v37, 7 }
 0x2d0   : > { %v3941_v10 = vadd.f32 %v7673_v21, %v2991_v7  ;;  %v2782_v36 = vpop.permute.xlu1 %2781  ;;  %v2739_v7 = vsel %vm2652_vm7, %v2737_v8, %v2738_v45  ;;  %v2748_v8 = vsel %vm2652_vm7, %v2746_v4, %v2747_v39  ;;  %v7727_v45 = vpop.f32.mrf.mxu0 }
 0x2d1   : > { %9061 = vst [vmem:[#allocation17_spill] sm:$0xff] %v7694_v9  ;;  %v2949_v25 = vsel %vm2652_vm7, 0.0, %v2782_v36  ;;  %v2788_v33 = vpop.permute.xlu0 %2787 }
 0x2d2   : > { %4005 = vst.msk [vmem:[%s7357_s17 + $0x90] sm:$0xff] %vm1308_vm1, %v3941_v10  ;;  %v2989_v15 = vadd.f32 %v2949_v25, %v7687_v19  ;;  %v2992_v35 = vadd.f32 %v2788_v33, %v7694_v9  ;;  %2873 = vrot.lane.b32.xlu1 %v2746_v4, %s5478_s28  ;;  %v9064_v10 = vld [vmem:[#allocation45_spill] sm:$0xff]  ;;  %v2744_v33 = vrot.slane %v7709_v57, 7  ;;  %v3805_v44 = vpop.f32.mrf.mxu0 }
 0x2d3   : > { %2863 = vrot.lane.b32.xlu0 %v2739_v7, %s5478_s28  ;;  %v3184_v25 = vrot.slane %v9064_v10, 1  ;;  %v9067_v7 = vld [vmem:[#allocation47_spill] sm:$0xff] }
 0x2d4   : > { %v3939_v36 = vadd.f32 %v7673_v21, %v2989_v15  ;;  %v3942_v13 = vadd.f32 %v7699_v34, %v2992_v35  ;;  %v7715_v1 = vpop.permute.xlu1 %3362  ;;  %v9066_v15 = vld [vmem:[#allocation34_spill] sm:$0xff] }
 0x2d5   : > { %9063 = vst [vmem:[#allocation122_spill] sm:$0xff] %v7715_v1  ;;  %v7718_v19 = vpop.permute.xlu0 %3364  ;;  %v3183_v35 = vrot.slane %v9066_v15, 1  ;;  %v9068_v1 = vld [vmem:[#allocation44_spill] sm:$0xff] }
 0x2d6   : > { %9065 = vst [vmem:[#allocation45_spill] sm:$0xff] %v7718_v19  ;;  %4003 = vst.msk [vmem:[%s7357_s17 + $0x80] sm:$0xff] %vm1308_vm1, %v3939_v36  ;;  %2869 = vrot.lane.b32.xlu1 %v2743_v62, %s5478_s28  ;;  %v7733_v9 = vadd.f32 %v9068_v1, %v9067_v7  ;;  %v3798_v19 = vadd.f32 %v7597_v26, %v7311_v17  ;;  %v9072_v1 = vld [vmem:[#allocation6_spill] sm:$0xff]  ;;  %v9073_v26 = vld [vmem:[#allocation8_spill] sm:$0xff] }
 0x2d7   : > { %4006 = vst.msk [vmem:[%s7357_s17 + $0x98] sm:$0xff] %vm1308_vm1, %v3942_v13  ;;  %2875 = vrot.lane.b32.xlu0 %v2748_v8, %s5478_s28  ;;  %v9071_v13 = vld [vmem:[#allocation49_spill] sm:$0xff]  ;;  %v3185_v4 = vsel %vm3101_vm6, %v3183_v35, %v3184_v25  ;;  %v2745_v8 = vsel %vm2652_vm7, %v2743_v62, %v2744_v33  ;;  %v3186_v7 = vrot.slane %v9072_v1, 1  ;;  %v3801_v35 = vadd.f32 %v7639_v16, %v7311_v17  ;;  %v7766_v16 = vpop.f32.mrf.mxu0  ;;  %v9083_v1 = vld [vmem:[#allocation52_spill] sm:$0xff] }
 0x2d8   : > { %9069 = vst [vmem:[#allocation34_spill] sm:$0xff] %v7733_v9  ;;  %v7737_v36 = vpop.permute.xlu1 %3358  ;;  %v3187_v57 = vrot.slane %v9071_v13, 1  ;;  %v7751_v13 = vadd.f32 %v7329_v28, %v3798_v19 }
 0x2d9   : > { %9070 = vst [vmem:[#allocation47_spill] sm:$0xff] %v7737_v36  ;;  %v2784_v37 = vpop.permute.xlu0 %2783  ;;  %v7748_v36 = vadd.f32 %v9074_v53, %v9073_v26  ;;  %v3257_v53 = vsel %vm3101_vm6, %v3184_v25, 0.0 }
 0x2da   : > { %v2990_v39 = vadd.f32 %v2784_v37, %v7733_v9  ;;  %3402 = vrot.lane.b32.xlu1 %v3185_v4, %s5477_s27  ;;  %v9076_v9 = vld [vmem:[#allocation5_spill] sm:$0xff] }
 0x2db   : > { %2871 = vrot.lane.b32.xlu0 %v2745_v8, %s5478_s28  ;;  %9075 = vst [vmem:[#allocation44_spill] sm:$0xff] %v7748_v36  ;;  %v3190_v62 = vrot.slane %v9076_v9, 1  ;;  %v3188_v8 = vsel %vm3101_vm6, %v3186_v7, %v3187_v57  ;;  %v9080_v9 = vld [vmem:[#allocation16_spill] sm:$0xff]  ;;  %v9082_v7 = vld [vmem:[#allocation7_spill] sm:$0xff] }
 0x2dc   : > { %v3940_v37 = vadd.f32 %v7699_v34, %v2990_v39  ;;  %v2794_v4 = vpop.permute.xlu1 %2793  ;;  %v9078_v39 = vld [vmem:[#allocation26_spill] sm:$0xff] }
 0x2dd   : > { %v2952_v33 = vsel %vm2652_vm7, 0.0, %v2794_v4  ;;  %v7758_v42 = vpop.permute.xlu0 %3360  ;;  %v3189_v26 = vrot.slane %v9078_v39, 1  ;;  %v9079_v4 = vld [vmem:[#allocation20_spill] sm:$0xff] }
 0x2de   : > { %9077 = vst [vmem:[#allocation8_spill] sm:$0xff] %v7758_v42  ;;  %4004 = vst.msk [vmem:[%s7357_s17 + $0x88] sm:$0xff] %vm1308_vm1, %v3940_v37  ;;  %v2995_v19 = vadd.f32 %v2952_v33, %v7748_v36  ;;  %3406 = vrot.lane.b32.xlu1 %v3188_v8, %s5477_s27  ;;  %v7772_v42 = vadd.f32 %v9080_v9, %v9079_v4  ;;  %v7776_v37 = vadd.f32 %v9083_v1, %v9082_v7  ;;  %v9085_v36 = vld [vmem:[#allocation32_spill] sm:$0xff] }
 0x2df   : > { %3404 = vrot.lane.b32.xlu0 %v3257_v53, %s5477_s27  ;;  %v7779_v33 = vadd.f32 %v7329_v28, %v3801_v35  ;;  %v3193_v6 = vrot.slane %v9085_v36, 1  ;;  %v3191_v53 = vsel %vm3101_vm6, %v3189_v26, %v3190_v62  ;;  %v3258_v35 = vsel %vm3101_vm6, %v3187_v57, 0.0  ;;  %v9086_v4 = vld [vmem:[#allocation28_spill] sm:$0xff] }
 0x2e0   : > { %9081 = vst [vmem:[#allocation42_spill] sm:$0xff] %v7772_v42  ;;  %9084 = vst [vmem:[#allocation20_spill] sm:$0xff] %v7776_v37  ;;  %v3945_v8 = vadd.f32 %v7751_v13, %v2995_v19  ;;  %v2790_v25 = vpop.permute.xlu1 %2789  ;;  %v3808_v19 = vpop.f32.mrf.mxu0  ;;  %v3192_v7 = vrot.slane %v9086_v4, 1  ;;  %v3259_v57 = vsel %vm3101_vm6, %v3190_v62, 0.0 }
 0x2e1   : > { %v2951_v39 = vsel %vm2652_vm7, 0.0, %v2790_v25  ;;  %v2796_v29 = vpop.permute.xlu0 %2795 }
 0x2e2   : > { %4009 = vst.msk [vmem:[%s7357_s17 + $0xb0] sm:$0xff] %vm1308_vm1, %v3945_v8  ;;  %v2993_v9 = vadd.f32 %v2951_v39, %v7772_v42  ;;  %v2996_v1 = vadd.f32 %v2796_v29, %v7776_v37  ;;  %3410 = vrot.lane.b32.xlu1 %v3191_v53, %s5477_s27  ;;  %v7797_v8 = vpop.f32.mrf.mxu0  ;;  %v9088_v39 = vld [vmem:[#allocation48_spill] sm:$0xff]  ;;  %v3194_v53 = vsel %vm3101_vm6, %v3192_v7, %v3193_v6 }
 0x2e3   : > { %3408 = vrot.lane.b32.xlu0 %v3258_v35, %s5477_s27  ;;  %v3196_v42 = vrot.slane %v9088_v39, 1  ;;  %v9091_v35 = vld [vmem:[#allocation19_spill] sm:$0xff]  ;;  %v3806_v7 = vadd.f32 %v7311_v17, %v3805_v44 }
 0x2e4   : > { %v3943_v25 = vadd.f32 %v7751_v13, %v2993_v9  ;;  %v3946_v26 = vadd.f32 %v7779_v33, %v2996_v1  ;;  %v7795_v36 = vpop.permute.xlu1 %3370  ;;  %v9090_v9 = vld [vmem:[#allocation38_spill] sm:$0xff] }
 0x2e5   : > { %9087 = vst [vmem:[#allocation16_spill] sm:$0xff] %v7795_v36  ;;  %v7800_v29 = vpop.permute.xlu0 %3372  ;;  %v3195_v1 = vrot.slane %v9090_v9, 1  ;;  %v9092_v36 = vld [vmem:[#allocation51_spill] sm:$0xff] }
 0x2e6   : > { %9089 = vst [vmem:[#allocation7_spill] sm:$0xff] %v7800_v29  ;;  %4007 = vst.msk [vmem:[%s7357_s17 + $0xa0] sm:$0xff] %vm1308_vm1, %v3943_v25  ;;  %3414 = vrot.lane.b32.xlu1 %v3194_v53, %s5477_s27  ;;  %v7813_v37 = vadd.f32 %v9092_v36, %v9091_v35  ;;  %v7818_v25 = vpop.f32.mrf.mxu0  ;;  %v9094_v36 = vld [vmem:[#allocation30_spill] sm:$0xff] }
 0x2e7   : > { %4010 = vst.msk [vmem:[%s7357_s17 + $0xb8] sm:$0xff] %vm1308_vm1, %v3946_v26  ;;  %3412 = vrot.lane.b32.xlu0 %v3259_v57, %s5477_s27  ;;  %v3197_v53 = vsel %vm3101_vm6, %v3195_v1, %v3196_v42  ;;  %v3260_v57 = vsel %vm3101_vm6, %v3193_v6, 0.0  ;;  %v9095_v35 = vld [vmem:[#allocation54_spill] sm:$0xff]  ;;  %v3809_v1 = vadd.f32 %v7311_v17, %v3808_v19  ;;  %v9098_v19 = vld [vmem:[#allocation33_spill] sm:$0xff] }
 0x2e8   : > { %v7815_v39 = vpop.permute.xlu1 %3366  ;;  %v7827_v29 = vadd.f32 %v9095_v35, %v9094_v36  ;;  %v7834_v9 = vpop.f32.mrf.mxu0  ;;  %v9099_v36 = vld [vmem:[#allocation50_spill] sm:$0xff]  ;;  %v9100_v35 = vld [vmem:[#allocation36_spill] sm:$0xff] }
 0x2e9   : > { %9093 = vst [vmem:[#allocation52_spill] sm:$0xff] %v7815_v39  ;;  %v2792_v26 = vpop.permute.xlu0 %2791  ;;  %v7831_v39 = vadd.f32 %v7329_v28, %v3806_v7  ;;  %v3261_v7 = vsel %vm3101_vm6, %v3196_v42, 0.0 }
 0x2ea   : > { %v2994_v62 = vadd.f32 %v2792_v26, %v7813_v37  ;;  %3418 = vrot.lane.b32.xlu1 %v3197_v53, %s5477_s27 }
 0x2eb   : > { %3416 = vrot.lane.b32.xlu0 %v3260_v57, %s5477_s27 }
 0x2ec   : > { %v3944_v44 = vadd.f32 %v7779_v33, %v2994_v62  ;;  %v2802_v4 = vpop.permute.xlu1 %2801  ;;  %v9097_v62 = vld [vmem:[#allocation10_spill] sm:$0xff] }
 0x2ed   : > { %v2954_v26 = vsel %vm2652_vm7, 0.0, %v2802_v4  ;;  %v7837_v6 = vpop.permute.xlu0 %3368  ;;  %v7848_v57 = vadd.f32 %v9098_v19, %v9097_v62  ;;  %v7852_v4 = vadd.f32 %v9100_v35, %v9099_v36 }
 0x2ee   : > { %9096 = vst [vmem:[#allocation19_spill] sm:$0xff] %v7837_v6  ;;  %4008 = vst.msk [vmem:[%s7357_s17 + $0xa8] sm:$0xff] %vm1308_vm1, %v3944_v44  ;;  %v2999_v53 = vadd.f32 %v2954_v26, %v7827_v29  ;;  %4083 = vrot.lane.b32.xlu1 %v7344_v61, %s5474_s25  ;;  %v7856_v44 = vadd.f32 %v7329_v28, %v3809_v1  ;;  %v7858_v26 = vpop.f32.mrf.mxu0 }
 0x2ef   : > { %3420 = vrot.lane.b32.xlu0 %v3261_v7, %s5477_s27 }
 0x2f0   : > { %v3949_v6 = vadd.f32 %v7831_v39, %v2999_v53  ;;  %v2798_v61 = vpop.permute.xlu1 %2797  ;;  %v7873_v35 = vpop.f32.mrf.mxu0 }
 0x2f1   : > { %v2953_v42 = vsel %vm2652_vm7, 0.0, %v2798_v61  ;;  %v2804_v7 = vpop.permute.xlu0 %2803 }
 0x2f2   : > { %4013 = vst.msk [vmem:[%s7357_s17 + $0xd0] sm:$0xff] %vm1308_vm1, %v3949_v6  ;;  %v2997_v62 = vadd.f32 %v2953_v42, %v7848_v57  ;;  %v3000_v19 = vadd.f32 %v2804_v7, %v7852_v4  ;;  %4087 = vrot.lane.b32.xlu1 %v7429_v52, %s5474_s25  ;;  %v9104_v52 = vld [vmem:[#allocation55_spill] sm:$0xff]  ;;  %v3814_v42 = vadd.f32 %v7727_v45, %v7311_v17 }
 0x2f3   : > { %4085 = vrot.lane.b32.xlu0 %v7373_v0, %s5474_s25  ;;  %v9103_v0 = vld [vmem:[#allocation22_spill] sm:$0xff]  ;;  %v3817_v45 = vadd.f32 %v7766_v16, %v7311_v17  ;;  %v9109_v16 = vld [vmem:[#allocation21_spill] sm:$0xff] }
 0x2f4   : > { %v3947_v1 = vadd.f32 %v7831_v39, %v2997_v62  ;;  %v3950_v53 = vadd.f32 %v7856_v44, %v3000_v19  ;;  %v7871_v36 = vpop.permute.xlu1 %3378  ;;  %v7887_v6 = vadd.f32 %v9104_v52, %v9103_v0  ;;  %v3837_v62 = vpop.f32.mrf.mxu0  ;;  %v3905_v0 = vadd.f32 %v7329_v28, %v3814_v42 }
 0x2f5   : > { %9101 = vst [vmem:[#allocation51_spill] sm:$0xff] %v7871_v36  ;;  %v7875_v61 = vpop.permute.xlu0 %3380  ;;  %v7920_v42 = vadd.f32 %v7145_v55, %v9109_v16 }
 0x2f6   : > { %9102 = vst [vmem:[#allocation30_spill] sm:$0xff] %v7875_v61  ;;  %4011 = vst.msk [vmem:[%s7357_s17 + $0xc0] sm:$0xff] %vm1308_vm1, %v3947_v1  ;;  %4091 = vrot.lane.b32.xlu1 %v7511_v40, %s5474_s25  ;;  %v9107_v40 = vld [vmem:[#allocation57_spill] sm:$0xff] }
 0x2f7   : > { %4014 = vst.msk [vmem:[%s7357_s17 + $0xd8] sm:$0xff] %vm1308_vm1, %v3950_v53  ;;  %4089 = vrot.lane.b32.xlu0 %v7446_v2, %s5474_s25  ;;  %v9106_v2 = vld [vmem:[#allocation37_spill] sm:$0xff] }
 0x2f8   : > { %v7891_v7 = vpop.permute.xlu1 %3374  ;;  %v7900_v53 = vadd.f32 %v9107_v40, %v9106_v2  ;;  %v9111_v2 = vld [vmem:[#allocation61_spill] sm:$0xff] }
 0x2f9   : > { %9105 = vst [vmem:[#allocation54_spill] sm:$0xff] %v7891_v7  ;;  %v2800_v19 = vpop.permute.xlu0 %2799 }
 0x2fa   : > { %v2998_v1 = vadd.f32 %v2800_v19, %v7887_v6  ;;  %4095 = vrot.lane.b32.xlu1 %v7583_v47, %s5474_s25  ;;  %v7906_v19 = vpop.f32.mrf.mxu0 }
 0x2fb   : > { %4093 = vrot.lane.b32.xlu0 %v7537_v43, %s5474_s25 }
 0x2fc   : > { %v3948_v52 = vadd.f32 %v7856_v44, %v2998_v1  ;;  %v2810_v61 = vpop.permute.xlu1 %2809  ;;  %v9110_v1 = vld [vmem:[#allocation23_spill] sm:$0xff] }
 0x2fd   : > { %v2956_v47 = vsel %vm2652_vm7, 0.0, %v2810_v61  ;;  %v7909_v36 = vpop.permute.xlu0 %3376  ;;  %v7924_v40 = vadd.f32 %v9111_v2, %v9110_v1  ;;  %v3906_v61 = vadd.f32 %v7329_v28, %v3817_v45 }
 0x2fe   : > { %9108 = vst [vmem:[#allocation10_spill] sm:$0xff] %v7909_v36  ;;  %4012 = vst.msk [vmem:[%s7357_s17 + $0xc8] sm:$0xff] %vm1308_vm1, %v3948_v52  ;;  %v3003_v43 = vadd.f32 %v2956_v47, %v7900_v53  ;;  %4099 = vrot.lane.b32.xlu1 %v7673_v21, %s5474_s25  ;;  %v3840_v36 = vpop.f32.mrf.mxu0 }
 0x2ff   : > { %4097 = vrot.lane.b32.xlu0 %v7618_v50, %s5474_s25 }
 0x300   : > { %v3953_v52 = vadd.f32 %v3905_v0, %v3003_v43  ;;  %v2806_v47 = vpop.permute.xlu1 %2805  ;;  %v7938_v1 = vpop.f32.mrf.mxu0 }
 0x301   : > { %v2955_v21 = vsel %vm2652_vm7, 0.0, %v2806_v47  ;;  %v2812_v7 = vpop.permute.xlu0 %2811 }
 0x302   : > { %4017 = vst.msk [vmem:[%s7357_s17 + $0xf0] sm:$0xff] %vm1308_vm1, %v3953_v52  ;;  %v3001_v50 = vadd.f32 %v2955_v21, %v7920_v42  ;;  %v3004_v55 = vadd.f32 %v2812_v7, %v7924_v40  ;;  %4103 = vrot.lane.b32.xlu1 %v7751_v13, %s5474_s25  ;;  %v3822_v13 = vadd.f32 %v7311_v17, %v7818_v25  ;;  %v3853_v47 = vpop.f32.mrf.mxu0 }
 0x303   : > { %4101 = vrot.lane.b32.xlu0 %v7699_v34, %s5474_s25  ;;  %v9114_v34 = vld [vmem:[#allocation39_spill] sm:$0xff] }
 0x304   : > { %v3951_v45 = vadd.f32 %v3905_v0, %v3001_v50  ;;  %v3954_v43 = vadd.f32 %v3906_v61, %v3004_v55  ;;  %v7936_v16 = vpop.permute.xlu1 %3386  ;;  %v7954_v7 = vadd.f32 %v7161_v24, %v9114_v34  ;;  %v3830_v50 = vadd.f32 %v7797_v8, %v7311_v17  ;;  %v7971_v34 = vpop.f32.mrf.mxu0 }
 0x305   : > { %9112 = vst [vmem:[#allocation33_spill] sm:$0xff] %v7936_v16  ;;  %v7940_v2 = vpop.permute.xlu0 %3388  ;;  %v3825_v24 = vadd.f32 %v7311_v17, %v7858_v26  ;;  %v3833_v26 = vadd.f32 %v7834_v9, %v7311_v17  ;;  %v3846_v9 = vadd.f32 %v7873_v35, %v7311_v17 }
 0x306   : > { %9113 = vst [vmem:[#allocation50_spill] sm:$0xff] %v7940_v2  ;;  %4015 = vst.msk [vmem:[%s7357_s17 + $0xe0] sm:$0xff] %vm1308_vm1, %v3951_v45  ;;  %4107 = vrot.lane.b32.xlu1 %v7831_v39, %s5474_s25  ;;  %v3907_v39 = vadd.f32 %v7329_v28, %v3822_v13  ;;  %v3856_v2 = vpop.f32.mrf.mxu0 }
 0x307   : > { %4018 = vst.msk [vmem:[%s7357_s17 + $0xf8] sm:$0xff] %vm1308_vm1, %v3954_v43  ;;  %4105 = vrot.lane.b32.xlu0 %v7779_v33, %s5474_s25  ;;  %v9116_v33 = vld [vmem:[#allocation13_spill] sm:$0xff] }
 0x308   : > { %v7956_v52 = vpop.permute.xlu1 %3382  ;;  %v7969_v25 = vadd.f32 %v7171_v31, %v9116_v33  ;;  %v3838_v31 = vadd.f32 %v7311_v17, %v3837_v62 }
 0x309   : > { %9115 = vst [vmem:[#allocation36_spill] sm:$0xff] %v7956_v52  ;;  %v2808_v21 = vpop.permute.xlu0 %2807 }
 0x30a   : > { %v3002_v55 = vadd.f32 %v2808_v21, %v7954_v7  ;;  %4111 = vrot.lane.b32.xlu1 %v3905_v0, %s5474_s25  ;;  %v3909_v0 = vadd.f32 %v7329_v28, %v3830_v50  ;;  %v3908_v21 = vadd.f32 %v7329_v28, %v3825_v24  ;;  %v9119_v50 = vld [vmem:[#allocation31_spill] sm:$0xff]  ;;  %v3910_v24 = vadd.f32 %v7329_v28, %v3833_v26 }
 0x30b   : > { %4109 = vrot.lane.b32.xlu0 %v7856_v44, %s5474_s25  ;;  %v8018_v26 = vadd.f32 %v7329_v28, %v3846_v9 }
 0x30c   : > { %v3952_v45 = vadd.f32 %v3906_v61, %v3002_v55  ;;  %v2818_v43 = vpop.permute.xlu1 %2817  ;;  %v9118_v55 = vld [vmem:[#allocation24_spill] sm:$0xff] }
 0x30d   : > { %v2958_v8 = vsel %vm2652_vm7, 0.0, %v2818_v43  ;;  %v7974_v13 = vpop.permute.xlu0 %3384  ;;  %v7988_v33 = vadd.f32 %v7181_v54, %v9118_v55  ;;  %v8001_v54 = vadd.f32 %v7329_v28, %v3838_v31  ;;  %v9120_v55 = vld [vmem:[#allocation53_spill] sm:$0xff] }
 0x30e   : > { %9117 = vst [vmem:[#allocation22_spill] sm:$0xff] %v7974_v13  ;;  %4016 = vst.msk [vmem:[%s7357_s17 + $0xe8] sm:$0xff] %vm1308_vm1, %v3952_v45  ;;  %v3007_v44 = vadd.f32 %v2958_v8, %v7969_v25  ;;  %4115 = vrot.lane.b32.xlu1 %v3907_v39, %s5474_s25  ;;  %v7992_v45 = vadd.f32 %v7195_v48, %v9119_v50  ;;  %v8010_v35 = vadd.f32 %v7208_v59, %v9120_v55  ;;  %v9121_v50 = vld [vmem:[#allocation2_spill] sm:$0xff] }
 0x30f   : > { %4113 = vrot.lane.b32.xlu0 %v3906_v61, %s5474_s25 }
 0x310   : > { %v3957_v43 = vadd.f32 %v3907_v39, %v3007_v44  ;;  %v2814_v8 = vpop.permute.xlu1 %2813  ;;  %v3841_v44 = vadd.f32 %v7311_v17, %v3840_v36  ;;  %v3854_v36 = vadd.f32 %v7311_v17, %v3853_v47 }
 0x311   : > { %v2957_v62 = vsel %vm2652_vm7, 0.0, %v2814_v8  ;;  %v2820_v13 = vpop.permute.xlu0 %2819 }
 0x312   : > { %4021 = vst.msk [vmem:[%s7357_s17 + $0x110] sm:$0xff] %vm1308_vm1, %v3957_v43  ;;  %v3005_v61 = vadd.f32 %v2957_v62, %v7988_v33  ;;  %v3008_v48 = vadd.f32 %v2820_v13, %v7992_v45  ;;  %4119 = vrot.lane.b32.xlu1 %v3909_v0, %s5474_s25  ;;  %v8014_v43 = vadd.f32 %v7218_v27, %v9121_v50  ;;  %v5419_v13 = vpop.f32.mrf.mxu0 }
 0x313   : > { %4117 = vrot.lane.b32.xlu0 %v3908_v21, %s5474_s25  ;;  %v8032_v9 = vadd.f32 %v7329_v28, %v3841_v44  ;;  %v3862_v44 = vadd.f32 %v7938_v1, %v7311_v17  ;;  %v3857_v1 = vadd.f32 %v7311_v17, %v3856_v2 }
 0x314   : > { %v3955_v31 = vadd.f32 %v3907_v39, %v3005_v61  ;;  %v3958_v8 = vadd.f32 %v3908_v21, %v3008_v48  ;;  %v2826_v62 = vpop.permute.xlu1 %2825  ;;  %v3849_v39 = vadd.f32 %v7906_v19, %v7311_v17  ;;  %v9122_v61 = vld [vmem:[#allocation58_spill] sm:$0xff]  ;;  %v3869_v47 = vpop.f32.mrf.mxu0 }
 0x315   : > { %v2960_v16 = vsel %vm2652_vm7, 0.0, %v2826_v62  ;;  %v2816_v52 = vpop.permute.xlu0 %2815  ;;  %v8037_v48 = vadd.f32 %v7231_v60, %v9122_v61 }
 0x316   : > { %4019 = vst.msk [vmem:[%s7357_s17 + $0x100] sm:$0xff] %vm1308_vm1, %v3955_v31  ;;  %4022 = vst.msk [vmem:[%s7357_s17 + $0x118] sm:$0xff] %vm1308_vm1, %v3958_v8  ;;  %v3011_v59 = vadd.f32 %v2960_v16, %v8014_v43  ;;  %v3006_v27 = vadd.f32 %v2816_v52, %v8010_v35  ;;  %4123 = vrot.lane.b32.xlu1 %v8001_v54, %s5474_s25  ;;  %v9123_v16 = vld [vmem:[#allocation62_spill] sm:$0xff]  ;;  %v8058_v62 = vadd.f32 %v7329_v28, %v3849_v39 }
 0x317   : > { %4121 = vrot.lane.b32.xlu0 %v3910_v24, %s5474_s25  ;;  %v8041_v52 = vadd.f32 %v7243_v63, %v9123_v16  ;;  %v8052_v63 = vadd.f32 %v7329_v28, %v3854_v36  ;;  %v9125_v36 = vld [vmem:[#allocation67_spill] sm:$0xff] }
 0x318   : > { %v3961_v55 = vadd.f32 %v3909_v0, %v3011_v59  ;;  %v3956_v50 = vadd.f32 %v3908_v21, %v3006_v27  ;;  %v2822_v31 = vpop.permute.xlu1 %2821  ;;  %v9124_v59 = vld [vmem:[#allocation65_spill] sm:$0xff]  ;;  %v8069_v61 = vadd.f32 %v7268_v20, %v9125_v36  ;;  %v5464_v20 = vld [vmem:[%s8662_s9] ss:$0 sm:$0xff] }
 0x319   : > { %v2959_v8 = vsel %vm2652_vm7, 0.0, %v2822_v31  ;;  %v2828_v19 = vpop.permute.xlu0 %2827  ;;  %v8065_v27 = vadd.f32 %v7256_v46, %v9124_v59  ;;  %v5420_v31 = vpop.f32.mrf.mxu0  ;;  %v3870_v2 = vadd.f32 %v5464_v20, %v3869_v47  ;;  %v9127_v59 = vld [vmem:[#allocation72_spill] sm:$0xff] }
 0x31a   : > { %4025 = vst.msk [vmem:[%s7357_s17 + $0x130] sm:$0xff] %vm1308_vm1, %v3961_v55  ;;  %4020 = vst.msk [vmem:[%s7357_s17 + $0x108] sm:$0xff] %vm1308_vm1, %v3956_v50  ;;  %v3009_v60 = vadd.f32 %v2959_v8, %v8037_v48  ;;  %v3012_v21 = vadd.f32 %v2828_v19, %v8041_v52  ;;  %4127 = vrot.lane.b32.xlu1 %v8018_v26, %s5474_s25  ;;  %v8073_v19 = vadd.f32 %v7329_v28, %v3862_v44 }
 0x31b   : > { %4125 = vrot.lane.b32.xlu0 %v8032_v9, %s5474_s25  ;;  %v3865_v28 = vadd.f32 %v5464_v20, %v7971_v34  ;;  %v8100_v36 = vadd.f32 %v7291_v38, %v9127_v59 }
 0x31c   : > { %v3959_v16 = vadd.f32 %v3909_v0, %v3009_v60  ;;  %v3962_v55 = vadd.f32 %v3910_v24, %v3012_v21  ;;  %v2834_v50 = vpop.permute.xlu1 %2833  ;;  %v5465_v0 = vld [vmem:[%s8660_s7] ss:$0 sm:$0xff]  ;;  %v9126_v60 = vld [vmem:[#allocation69_spill] sm:$0xff] }
 0x31d   : > { %v2962_v39 = vsel %vm2652_vm7, 0.0, %v2834_v50  ;;  %v2824_v8 = vpop.permute.xlu0 %2823  ;;  %v8090_v44 = vadd.f32 %v5465_v0, %v3857_v1  ;;  %v8096_v21 = vadd.f32 %v7279_v3, %v9126_v60  ;;  %v8124_v60 = vadd.f32 %v7319_v49, %v7236_v5 }
 0x31e   : > { %4023 = vst.msk [vmem:[%s7357_s17 + $0x120] sm:$0xff] %vm1308_vm1, %v3959_v16  ;;  %4026 = vst.msk [vmem:[%s7357_s17 + $0x138] sm:$0xff] %vm1308_vm1, %v3962_v55  ;;  %v3015_v46 = vadd.f32 %v2962_v39, %v8069_v61  ;;  %v3010_v17 = vadd.f32 %v2824_v8, %v8065_v27  ;;  %4131 = vrot.lane.b32.xlu1 %v8052_v63, %s5474_s25  ;;  %v3872_v55 = vpop.f32.mrf.mxu0  ;;  %v3878_v39 = vadd.f32 %v5464_v20, %v5419_v13 }
 0x31f   : > { %4129 = vrot.lane.b32.xlu0 %v8058_v62, %s5474_s25  ;;  %v8109_v8 = vadd.f32 %v5465_v0, %v3870_v2  ;;  %v3881_v5 = vadd.f32 %v5464_v20, %v5420_v31 }
 0x320   : > { %v3965_v47 = vadd.f32 %v8001_v54, %v3015_v46  ;;  %v3960_v34 = vadd.f32 %v3910_v24, %v3010_v17  ;;  %v2830_v16 = vpop.permute.xlu1 %2829  ;;  %v8114_v24 = vadd.f32 %v5465_v0, %v3865_v28  ;;  %v3873_v46 = vadd.f32 %v5464_v20, %v3872_v55  ;;  %v9128_v17 = vld [vmem:[#allocation74_spill] sm:$0xff] }
 0x321   : > { %v2961_v50 = vsel %vm2652_vm7, 0.0, %v2830_v16  ;;  %v2836_v1 = vpop.permute.xlu0 %2835  ;;  %v8120_v13 = vadd.f32 %v7304_v22, %v9128_v17  ;;  %v8129_v16 = vadd.f32 %v5465_v0, %v3878_v39  ;;  %v8145_v55 = vadd.f32 %v7334_v56, %v7250_v51  ;;  %v9131_v17 = vld [vmem:[#allocation25_spill] sm:$0xff] }
 0x322   : > { %4029 = vst.msk [vmem:[%s7357_s17 + $0x150] sm:$0xff] %vm1308_vm1, %v3965_v47  ;;  %4024 = vst.msk [vmem:[%s7357_s17 + $0x128] sm:$0xff] %vm1308_vm1, %v3960_v34  ;;  %v3013_v3 = vadd.f32 %v2961_v50, %v8096_v21  ;;  %v3016_v38 = vadd.f32 %v2836_v1, %v8100_v36  ;;  %4135 = vrot.lane.b32.xlu1 %v8073_v19, %s5474_s25  ;;  %v9129_v50 = vld [vmem:[#allocation79_spill] sm:$0xff] }
 0x323   : > { %4133 = vrot.lane.b32.xlu0 %v8090_v44, %s5474_s25  ;;  %v8149_v1 = vadd.f32 %v7360_v32, %v9129_v50  ;;  %v8162_v32 = vadd.f32 %v5465_v0, %v3881_v5 }
 0x324   : > { %v3963_v2 = vadd.f32 %v8001_v54, %v3013_v3  ;;  %v3966_v59 = vadd.f32 %v8032_v9, %v3016_v38  ;;  %v2842_v47 = vpop.permute.xlu1 %2841  ;;  %v8139_v54 = vadd.f32 %v5465_v0, %v3873_v46 }
 0x325   : > { %v2964_v28 = vsel %vm2652_vm7, 0.0, %v2842_v47  ;;  %v2832_v34 = vpop.permute.xlu0 %2831 }
 0x326   : > { %4027 = vst.msk [vmem:[%s7357_s17 + $0x140] sm:$0xff] %vm1308_vm1, %v3963_v2  ;;  %4030 = vst.msk [vmem:[%s7357_s17 + $0x158] sm:$0xff] %vm1308_vm1, %v3966_v59  ;;  %v3019_v22 = vadd.f32 %v2964_v28, %v8124_v60  ;;  %v3014_v49 = vadd.f32 %v2832_v34, %v8120_v13  ;;  %4139 = vrot.lane.b32.xlu1 %v8109_v8, %s5474_s25  ;;  %v8172_v2 = vadd.f32 %v7402_v41, %v9131_v17  ;;  %v9132_v41 = vld [vmem:[#allocation4_spill] sm:$0xff] }
 0x327   : > { %4137 = vrot.lane.b32.xlu0 %v8114_v24, %s5474_s25 }
 0x328   : > { %v3969_v39 = vadd.f32 %v8018_v26, %v3019_v22  ;;  %v3964_v3 = vadd.f32 %v8032_v9, %v3014_v49  ;;  %v2838_v38 = vpop.permute.xlu1 %2837  ;;  %v9130_v9 = vld [vmem:[#allocation81_spill] sm:$0xff]  ;;  %v9133_v49 = vld [vmem:[#allocation27_spill] sm:$0xff] }
 0x329   : > { %v2963_v31 = vsel %vm2652_vm7, 0.0, %v2838_v38  ;;  %v2844_v20 = vpop.permute.xlu0 %2843  ;;  %v8168_v46 = vadd.f32 %v7386_v14, %v9130_v9  ;;  %v8191_v5 = vadd.f32 %v7443_v23, %v9133_v49  ;;  %v9134_v23 = vld [vmem:[#allocation3_spill] sm:$0xff] }
 0x32a   : > { %4033 = vst.msk [vmem:[%s7357_s17 + $0x170] sm:$0xff] %vm1308_vm1, %v3969_v39  ;;  %4028 = vst.msk [vmem:[%s7357_s17 + $0x148] sm:$0xff] %vm1308_vm1, %v3964_v3  ;;  %v3017_v51 = vadd.f32 %v2963_v31, %v8145_v55  ;;  %v3020_v56 = vadd.f32 %v2844_v20, %v8149_v1  ;;  %4143 = vrot.lane.b32.xlu1 %v8129_v16, %s5474_s25 }
 0x32b   : > { %4141 = vrot.lane.b32.xlu0 %v8139_v54, %s5474_s25 }
 0x32c   : > { %v3967_v59 = vadd.f32 %v8018_v26, %v3017_v51  ;;  %v3970_v47 = vadd.f32 %v8058_v62, %v3020_v56  ;;  %v2850_v28 = vpop.permute.xlu1 %2849  ;;  %v8187_v26 = vadd.f32 %v7418_v58, %v9132_v41  ;;  %v8204_v51 = vadd.f32 %v7467_v12, %v9134_v23 }
 0x32d   : > { %v2966_v0 = vsel %vm2652_vm7, 0.0, %v2850_v28  ;;  %v2840_v34 = vpop.permute.xlu0 %2839 }
 0x32e   : > { %4031 = vst.msk [vmem:[%s7357_s17 + $0x160] sm:$0xff] %vm1308_vm1, %v3967_v59  ;;  %4034 = vst.msk [vmem:[%s7357_s17 + $0x178] sm:$0xff] %vm1308_vm1, %v3970_v47  ;;  %v3023_v14 = vadd.f32 %v2966_v0, %v8172_v2  ;;  %v3018_v22 = vadd.f32 %v2840_v34, %v8168_v46 }
 0x32f   : > { %4145 = vrot.lane.b32.xlu0 %v8162_v32, %s5474_s25 }
 0x330   : > { %v3973_v50 = vadd.f32 %v8052_v63, %v3023_v14  ;;  %v3968_v39 = vadd.f32 %v8058_v62, %v3018_v22  ;;  %v2846_v3 = vpop.permute.xlu1 %2845  ;;  %v8208_v62 = vadd.f32 %v7486_v18, %v9066_v15  ;;  %v9135_v18 = vld [vmem:[#allocation40_spill] sm:$0xff] }
 0x331   : > { %v2965_v38 = vsel %vm2652_vm7, 0.0, %v2846_v3  ;;  %v2852_v31 = vpop.permute.xlu0 %2851  ;;  %v8221_v15 = vadd.f32 %v7505_v30, %v9135_v18  ;;  %v9139_v3 = vld [vmem:[#allocation111_spill] sm:$0xff] }
 0x332   : > { %4037 = vst.msk [vmem:[%s7357_s17 + $0x190] sm:$0xff] %vm1308_vm1, %v3973_v50  ;;  %4032 = vst.msk [vmem:[%s7357_s17 + $0x168] sm:$0xff] %vm1308_vm1, %v3968_v39  ;;  %v3021_v58 = vadd.f32 %v2965_v38, %v8187_v26  ;;  %v3024_v20 = vadd.f32 %v2852_v31, %v8191_v5  ;;  %v9138_v39 = vld [vmem:[#allocation26_spill] sm:$0xff] }
 0x334   : > { %v3971_v56 = vadd.f32 %v8052_v63, %v3021_v58  ;;  %v3974_v9 = vadd.f32 %v8090_v44, %v3024_v20  ;;  %v2858_v17 = vpop.permute.xlu1 %2857  ;;  %v8225_v63 = vadd.f32 %v7527_v11, %v9064_v10  ;;  %v9136_v11 = vld [vmem:[#allocation18_spill] sm:$0xff]  ;;  %v9137_v10 = vld [vmem:[#allocation108_spill] sm:$0xff] }
 0x335   : > { %v2968_v59 = vsel %vm2652_vm7, 0.0, %v2858_v17  ;;  %v2848_v47 = vpop.permute.xlu0 %2847  ;;  %v8238_v50 = vadd.f32 %v9137_v10, %v9136_v11  ;;  %v9140_v17 = vld [vmem:[#allocation6_spill] sm:$0xff]  ;;  %v9145_v11 = vld [vmem:[#allocation35_spill] sm:$0xff] }
 0x336   : > { %4035 = vst.msk [vmem:[%s7357_s17 + $0x180] sm:$0xff] %vm1308_vm1, %v3971_v56  ;;  %4038 = vst.msk [vmem:[%s7357_s17 + $0x198] sm:$0xff] %vm1308_vm1, %v3974_v9  ;;  %v3027_v12 = vadd.f32 %v2968_v59, %v8208_v62  ;;  %v3022_v28 = vadd.f32 %v2848_v47, %v8204_v51  ;;  %v9141_v59 = vld [vmem:[#allocation114_spill] sm:$0xff] }
 0x337   : > { %v8255_v47 = vadd.f32 %v9141_v59, %v9140_v17  ;;  %v9148_v17 = vld [vmem:[#allocation28_spill] sm:$0xff]  ;;  %v9149_v59 = vld [vmem:[#allocation41_spill] sm:$0xff] }
 0x338   : > { %v3977_v0 = vadd.f32 %v8073_v19, %v3027_v12  ;;  %v3972_v34 = vadd.f32 %v8090_v44, %v3022_v28  ;;  %v2854_v14 = vpop.permute.xlu1 %2853  ;;  %v8242_v44 = vadd.f32 %v9139_v3, %v9138_v39  ;;  %v9143_v12 = vld [vmem:[#allocation117_spill] sm:$0xff]  ;;  %v9146_v39 = vld [vmem:[#allocation38_spill] sm:$0xff]  ;;  %v9147_v3 = vld [vmem:[#allocation120_spill] sm:$0xff] }
 0x339   : > { %v2967_v22 = vsel %vm2652_vm7, 0.0, %v2854_v14  ;;  %v2860_v41 = vpop.permute.xlu0 %2859 }
 0x33a   : > { %4041 = vst.msk [vmem:[%s7357_s17 + $0x1b0] sm:$0xff] %vm1308_vm1, %v3977_v0  ;;  %4036 = vst.msk [vmem:[%s7357_s17 + $0x188] sm:$0xff] %vm1308_vm1, %v3972_v34  ;;  %v3025_v30 = vadd.f32 %v2967_v22, %v8221_v15  ;;  %v3028_v49 = vadd.f32 %v2860_v41, %v8225_v63 }
 0x33c   : > { %v3975_v38 = vadd.f32 %v8073_v19, %v3025_v30  ;;  %v3978_v31 = vadd.f32 %v8114_v24, %v3028_v49  ;;  %v2866_v58 = vpop.permute.xlu1 %2865  ;;  %v9142_v19 = vld [vmem:[#allocation5_spill] sm:$0xff] }
 0x33d   : > { %v2970_v20 = vsel %vm2652_vm7, 0.0, %v2866_v58  ;;  %v2856_v23 = vpop.permute.xlu0 %2855  ;;  %v8259_v28 = vadd.f32 %v9143_v12, %v9142_v19  ;;  %v9144_v49 = vld [vmem:[#allocation49_spill] sm:$0xff]  ;;  %v8286_v19 = vadd.f32 %v9149_v59, %v9148_v17  ;;  %v9151_v12 = vld [vmem:[#allocation11_spill] sm:$0xff] }
 0x33e   : > { %4039 = vst.msk [vmem:[%s7357_s17 + $0x1a0] sm:$0xff] %vm1308_vm1, %v3975_v38  ;;  %4042 = vst.msk [vmem:[%s7357_s17 + $0x1b8] sm:$0xff] %vm1308_vm1, %v3978_v31  ;;  %v3031_v56 = vadd.f32 %v2970_v20, %v8242_v44  ;;  %v3026_v9 = vadd.f32 %v2856_v23, %v8238_v50  ;;  %v8272_v10 = vadd.f32 %v9145_v11, %v9144_v49  ;;  %v9152_v11 = vld [vmem:[#allocation32_spill] sm:$0xff] }
 0x340   : > { %v3981_v18 = vadd.f32 %v8109_v8, %v3031_v56  ;;  %v3976_v0 = vadd.f32 %v8114_v24, %v3026_v9  ;;  %v2862_v34 = vpop.permute.xlu1 %2861  ;;  %v2586_v24 = vadd.f32 %v9147_v3, %v9146_v39  ;;  %v9153_v39 = vld [vmem:[#allocation14_spill] sm:$0xff] }
 0x341   : > { %v2969_v14 = vsel %vm2652_vm7, 0.0, %v2862_v34  ;;  %v2868_v22 = vpop.permute.xlu0 %2867  ;;  %v8300_v3 = vadd.f32 %v9153_v39, %v9152_v11  ;;  %v9161_v39 = vld [vmem:[#allocation88_spill] sm:$0xff] }
 0x342   : > { %4045 = vst.msk [vmem:[%s7357_s17 + $0x1d0] sm:$0xff] %vm1308_vm1, %v3981_v18  ;;  %4040 = vst.msk [vmem:[%s7357_s17 + $0x1a8] sm:$0xff] %vm1308_vm1, %v3976_v0  ;;  %v3029_v41 = vadd.f32 %v2969_v14, %v8255_v47  ;;  %v3032_v30 = vadd.f32 %v2868_v22, %v8259_v28 }
 0x343   : > { %9154 = vst [vmem:[#allocation55_spill] sm:$0xff] %v8300_v3 }
 0x344   : > { %v3979_v38 = vadd.f32 %v8109_v8, %v3029_v41  ;;  %v3982_v31 = vadd.f32 %v8139_v54, %v3032_v30  ;;  %v2874_v58 = vpop.permute.xlu1 %2873  ;;  %v9150_v8 = vld [vmem:[#allocation48_spill] sm:$0xff] }
 0x345   : > { %v2972_v20 = vsel %vm2652_vm7, 0.0, %v2874_v58  ;;  %v2864_v23 = vpop.permute.xlu0 %2863  ;;  %v2587_v18 = vadd.f32 %v9151_v12, %v9150_v8 }
 0x346   : > { %4043 = vst.msk [vmem:[%s7357_s17 + $0x1c0] sm:$0xff] %vm1308_vm1, %v3979_v38  ;;  %4046 = vst.msk [vmem:[%s7357_s17 + $0x1d8] sm:$0xff] %vm1308_vm1, %v3982_v31  ;;  %v3035_v56 = vadd.f32 %v2972_v20, %v2586_v24  ;;  %v3030_v9 = vadd.f32 %v2864_v23, %v8272_v10 }
 0x348   : > { %v3985_v0 = vadd.f32 %v8129_v16, %v3035_v56  ;;  %v3980_v34 = vadd.f32 %v8139_v54, %v3030_v9  ;;  %v2870_v14 = vpop.permute.xlu1 %2869 }
 0x349   : > { %v2971_v22 = vsel %vm2652_vm7, 0.0, %v2870_v14  ;;  %v2876_v41 = vpop.permute.xlu0 %2875  ;;  %v9159_v14 = vld [vmem:[#allocation64_spill] sm:$0xff] }
 0x34a   : > { %4049 = vst.msk [vmem:[%s7357_s17 + $0x1f0] sm:$0xff] %vm1308_vm1, %v3985_v0  ;;  %4044 = vst.msk [vmem:[%s7357_s17 + $0x1c8] sm:$0xff] %vm1308_vm1, %v3980_v34  ;;  %v3033_v30 = vadd.f32 %v2971_v22, %v8286_v19  ;;  %v3036_v49 = vadd.f32 %v2876_v41, %v2587_v18 }
 0x34c   : > { %v3983_v38 = vadd.f32 %v8129_v16, %v3033_v30  ;;  %v3986_v54 = vadd.f32 %v8162_v32, %v3036_v49  ;;  %v8304_v31 = vpop.permute.xlu1 %3402 }
 0x34d   : > { %v2872_v58 = vpop.permute.xlu0 %2871 }
 0x34e   : > { %4047 = vst.msk [vmem:[%s7357_s17 + $0x1e0] sm:$0xff] %vm1308_vm1, %v3983_v38  ;;  %4050 = vst.msk [vmem:[%s7357_s17 + $0x1f8] sm:$0xff] %vm1308_vm1, %v3986_v54  ;;  %v3034_v20 = vadd.f32 %v2872_v58, %v8300_v3  ;;  %v9162_v38 = vld [vmem:[#allocation56_spill] sm:$0xff]  ;;  %v9163_v58 = vld [vmem:[#allocation94_spill] sm:$0xff] }
 0x34f   : > { %v3488_v54 = vadd.f32 %v9162_v38, %v9161_v39  ;;  %v9165_v3 = vld [vmem:[#allocation98_spill] sm:$0xff]  ;;  %v9170_v38 = vld [vmem:[#allocation71_spill] sm:$0xff] }
 0x350   : > { %v3984_v23 = vadd.f32 %v8162_v32, %v3034_v20  ;;  %v8312_v56 = vpop.permute.xlu1 %3406  ;;  %v9158_v32 = vld [vmem:[#allocation90_spill] sm:$0xff] }
 0x351   : > { %v8314_v9 = vpop.permute.xlu0 %3404  ;;  %v3486_v22 = vadd.f32 %v9159_v14, %v9158_v32  ;;  %v9164_v20 = vld [vmem:[#allocation66_spill] sm:$0xff]  ;;  %v9167_v14 = vld [vmem:[#allocation91_spill] sm:$0xff] }
 0x352   : > { %4048 = vst.msk [vmem:[%s7357_s17 + $0x1e8] sm:$0xff] %vm1308_vm1, %v3984_v23  ;;  %v3487_v23 = vadd.f32 %v9164_v20, %v9163_v58 }
 0x354   : > { %v8318_v16 = vpop.permute.xlu1 %3410 }
 0x355   : > { %v8320_v17 = vpop.permute.xlu0 %3408 }
 0x358   : > { %v8322_v59 = vpop.permute.xlu1 %3414 }
 0x359   : > { %v8324_v8 = vpop.permute.xlu0 %3412 }
 0x35a   : > { %9155 = vst [vmem:[#allocation37_spill] sm:$0xff] %v8324_v8  ;;  %v9166_v8 = vld [vmem:[#allocation75_spill] sm:$0xff] }
 0x35b   : > { %v3490_v32 = vadd.f32 %v9166_v8, %v9165_v3 }
 0x35c   : > { %v3419_v12 = vpop.permute.xlu1 %3418 }
 0x35d   : > { %v8326_v0 = vadd.f32 %v3419_v12, %v2586_v24  ;;  %v8328_v34 = vpop.permute.xlu0 %3416 }
 0x35e   : > { %9157 = vst [vmem:[#allocation21_spill] sm:$0xff] %v8328_v34 }
 0x35f   : > { %9156 = vst [vmem:[#allocation57_spill] sm:$0xff] %v8326_v0 }
 0x360   : > { %v4084_v41 = vpop.permute.xlu1 %4083 }
 0x361   : > { %v4179_v30 = vadd.f32 %v4084_v41, %v3486_v22  ;;  %v3421_v49 = vpop.permute.xlu0 %3420  ;;  %v4181_v24 = vadd.f32 %v4084_v41, %v3488_v54  ;;  %v9171_v41 = vld [vmem:[#allocation102_spill] sm:$0xff]  ;;  %v9172_v54 = vld [vmem:[#allocation76_spill] sm:$0xff] }
 0x362   : > { %v8332_v11 = vadd.f32 %v3421_v49, %v2587_v18  ;;  %v9168_v18 = vld [vmem:[#allocation60_spill] sm:$0xff]  ;;  %v3491_v20 = vadd.f32 %v9172_v54, %v9171_v41 }
 0x363   : > { %4307 = vrot.lane.b32.xlu1 %v4179_v30, %s5477_s27  ;;  %v3489_v22 = vadd.f32 %v9168_v18, %v9167_v14  ;;  %v9169_v30 = vld [vmem:[#allocation96_spill] sm:$0xff]  ;;  %v9174_v14 = vld [vmem:[#allocation83_spill] sm:$0xff] }
 0x364   : > { %9160 = vst [vmem:[#allocation23_spill] sm:$0xff] %v8332_v11  ;;  %v4088_v0 = vpop.permute.xlu1 %4087  ;;  %v3492_v11 = vadd.f32 %v9170_v38, %v9169_v30  ;;  %v9177_v30 = vld [vmem:[#allocation104_spill] sm:$0xff] }
 0x365   : > { %v4086_v12 = vpop.permute.xlu0 %4085  ;;  %v4183_v49 = vadd.f32 %v4088_v0, %v3490_v32  ;;  %v9178_v38 = vld [vmem:[#allocation80_spill] sm:$0xff] }
 0x366   : > { %v4180_v34 = vadd.f32 %v4086_v12, %v3487_v23  ;;  %v4182_v39 = vadd.f32 %v4086_v12, %v3489_v22  ;;  %v4185_v3 = vadd.f32 %v4088_v0, %v3492_v11  ;;  %v9176_v12 = vld [vmem:[#allocation73_spill] sm:$0xff]  ;;  %v3496_v41 = vadd.f32 %v9178_v38, %v9177_v30  ;;  %v9179_v0 = vld [vmem:[#allocation112_spill] sm:$0xff]  ;;  %v9185_v30 = vld [vmem:[#allocation115_spill] sm:$0xff] }
 0x367   : > { %4311 = vrot.lane.b32.xlu1 %v4181_v24, %s5477_s27  ;;  %v9173_v24 = vld [vmem:[#allocation106_spill] sm:$0xff]  ;;  %v9180_v11 = vld [vmem:[#allocation84_spill] sm:$0xff]  ;;  %v9186_v38 = vld [vmem:[#allocation85_spill] sm:$0xff] }
 0x368   : > { %4309 = vrot.lane.b32.xlu0 %v4180_v34, %s5477_s27  ;;  %v4092_v8 = vpop.permute.xlu1 %4091  ;;  %v3494_v18 = vadd.f32 %v9174_v14, %v9173_v24  ;;  %v9175_v34 = vld [vmem:[#allocation99_spill] sm:$0xff]  ;;  %v9181_v14 = vld [vmem:[#allocation9_spill] sm:$0xff] }
 0x369   : > { %v4090_v58 = vpop.permute.xlu0 %4089  ;;  %v3493_v32 = vadd.f32 %v9176_v12, %v9175_v34  ;;  %v9182_v34 = vld [vmem:[#allocation87_spill] sm:$0xff] }
 0x36a   : > { %v4184_v23 = vadd.f32 %v4090_v58, %v3491_v20  ;;  %v4187_v22 = vadd.f32 %v4092_v8, %v3494_v18  ;;  %v4189_v20 = vadd.f32 %v4092_v8, %v3496_v41  ;;  %v3498_v12 = vadd.f32 %v9182_v34, %v9181_v14  ;;  %v9187_v8 = vld [vmem:[#allocation15_spill] sm:$0xff] }
 0x36b   : > { %4315 = vrot.lane.b32.xlu1 %v4183_v49, %s5477_s27  ;;  %v4186_v49 = vadd.f32 %v4090_v58, %v3493_v32  ;;  %v9183_v58 = vld [vmem:[#allocation107_spill] sm:$0xff] }
 0x36c   : > { %4313 = vrot.lane.b32.xlu0 %v4182_v39, %s5477_s27  ;;  %v3495_v39 = vadd.f32 %v9180_v11, %v9179_v0  ;;  %v3500_v0 = vadd.f32 %v9186_v38, %v9185_v30  ;;  %v9189_v34 = vld [vmem:[#allocation43_spill] sm:$0xff]  ;;  %v9193_v30 = vld [vmem:[#allocation29_spill] sm:$0xff]  ;;  %v9194_v38 = vld [vmem:[#allocation92_spill] sm:$0xff] }
 0x36d   : > { %v4094_v54 = vpop.permute.xlu0 %4093 }
 0x36e   : > { %v4188_v24 = vadd.f32 %v4094_v54, %v3495_v39 }
 0x36f   : > { %4319 = vrot.lane.b32.xlu1 %v4185_v3, %s5477_s27  ;;  %v4096_v3 = vpop.permute.xlu1 %4095 }
 0x370   : > { %4317 = vrot.lane.b32.xlu0 %v4184_v23, %s5477_s27  ;;  %v9184_v23 = vld [vmem:[#allocation82_spill] sm:$0xff]  ;;  %v4191_v32 = vadd.f32 %v4096_v3, %v3498_v12  ;;  %v4193_v39 = vadd.f32 %v4096_v3, %v3500_v0 }
 0x371   : > { %v3497_v18 = vadd.f32 %v9184_v23, %v9183_v58  ;;  %v4098_v11 = vpop.permute.xlu0 %4097  ;;  %v9190_v58 = vld [vmem:[#allocation95_spill] sm:$0xff]  ;;  %v9195_v3 = vld [vmem:[#allocation34_spill] sm:$0xff] }
 0x372   : > { %v3502_v23 = vadd.f32 %v9190_v58, %v9189_v34  ;;  %v9197_v58 = vld [vmem:[#allocation42_spill] sm:$0xff] }
 0x373   : > { %4323 = vrot.lane.b32.xlu1 %v4187_v22, %s5477_s27  ;;  %v4190_v22 = vadd.f32 %v4094_v54, %v3497_v18  ;;  %v9191_v54 = vld [vmem:[#allocation46_spill] sm:$0xff] }
 0x374   : > { %4321 = vrot.lane.b32.xlu0 %v4186_v49, %s5477_s27  ;;  %v9188_v49 = vld [vmem:[#allocation89_spill] sm:$0xff] }
 0x375   : > { %v3499_v41 = vadd.f32 %v9188_v49, %v9187_v8  ;;  %v3504_v8 = vadd.f32 %v9194_v38, %v9193_v30  ;;  %v4102_v49 = vpop.permute.xlu0 %4101  ;;  %v9201_v30 = vld [vmem:[#allocation44_spill] sm:$0xff] }
 0x376   : > { %v9202_v38 = vld [vmem:[#allocation100_spill] sm:$0xff] }
 0x377   : > { %4327 = vrot.lane.b32.xlu1 %v4189_v20, %s5477_s27  ;;  %v4100_v20 = vpop.permute.xlu1 %4099  ;;  %v4192_v14 = vadd.f32 %v4098_v11, %v3499_v41 }
 0x378   : > { %4325 = vrot.lane.b32.xlu0 %v4188_v24, %s5477_s27  ;;  %v9192_v24 = vld [vmem:[#allocation86_spill] sm:$0xff]  ;;  %v4195_v18 = vadd.f32 %v4100_v20, %v3502_v23  ;;  %v4197_v41 = vadd.f32 %v4100_v20, %v3504_v8  ;;  %v9203_v20 = vld [vmem:[#allocation105_spill] sm:$0xff] }
 0x379   : > { %v3501_v12 = vadd.f32 %v9192_v24, %v9191_v54  ;;  %v9198_v54 = vld [vmem:[#allocation103_spill] sm:$0xff] }
 0x37a   : > { %v3506_v24 = vadd.f32 %v9198_v54, %v9197_v58  ;;  %v9204_v58 = vld [vmem:[#allocation113_spill] sm:$0xff] }
 0x37b   : > { %4331 = vrot.lane.b32.xlu1 %v4191_v32, %s5477_s27  ;;  %v4194_v32 = vadd.f32 %v4098_v11, %v3501_v12  ;;  %v9199_v11 = vld [vmem:[#allocation17_spill] sm:$0xff]  ;;  %v3510_v54 = vadd.f32 %v9204_v58, %v7848_v57 }
 0x37c   : > { %4329 = vrot.lane.b32.xlu0 %v4190_v22, %s5477_s27  ;;  %v9196_v22 = vld [vmem:[#allocation97_spill] sm:$0xff] }
 0x37d   : > { %v3503_v0 = vadd.f32 %v9196_v22, %v9195_v3  ;;  %v3508_v3 = vadd.f32 %v9202_v38, %v9201_v30  ;;  %v4106_v22 = vpop.permute.xlu0 %4105 }
 0x37f   : > { %4335 = vrot.lane.b32.xlu1 %v4193_v39, %s5477_s27  ;;  %v4104_v39 = vpop.permute.xlu1 %4103  ;;  %v4196_v34 = vadd.f32 %v4102_v49, %v3503_v0 }
 0x380   : > { %4333 = vrot.lane.b32.xlu0 %v4192_v14, %s5477_s27  ;;  %v9200_v14 = vld [vmem:[#allocation93_spill] sm:$0xff]  ;;  %v4199_v12 = vadd.f32 %v4104_v39, %v3506_v24  ;;  %v4201_v8 = vadd.f32 %v4104_v39, %v3508_v3  ;;  %v9208_v39 = vld [vmem:[#allocation116_spill] sm:$0xff] }
 0x381   : > { %v3505_v23 = vadd.f32 %v9200_v14, %v9199_v11  ;;  %v9209_v3 = vld [vmem:[#allocation12_spill] sm:$0xff] }
 0x383   : > { %4339 = vrot.lane.b32.xlu1 %v4195_v18, %s5477_s27  ;;  %v4198_v18 = vadd.f32 %v4102_v49, %v3505_v23  ;;  %v4108_v0 = vpop.permute.xlu1 %4107  ;;  %v9205_v49 = vld [vmem:[#allocation20_spill] sm:$0xff]  ;;  %v9207_v23 = vld [vmem:[#allocation109_spill] sm:$0xff] }
 0x384   : > { %4337 = vrot.lane.b32.xlu0 %v4194_v32, %s5477_s27  ;;  %v3507_v32 = vadd.f32 %v9203_v20, %v7813_v37  ;;  %v4203_v11 = vadd.f32 %v4108_v0, %v3510_v54  ;;  %v3512_v37 = vadd.f32 %v9207_v23, %v7827_v29  ;;  %v3514_v20 = vadd.f32 %v9209_v3, %v7920_v42  ;;  %v9218_v3 = vld [vmem:[#allocation45_spill] sm:$0xff] }
 0x386   : > { %v4205_v57 = vadd.f32 %v4108_v0, %v3512_v37  ;;  %v9212_v0 = vld [vmem:[#allocation121_spill] sm:$0xff]  ;;  %v9215_v37 = vld [vmem:[#allocation122_spill] sm:$0xff] }
 0x387   : > { %4343 = vrot.lane.b32.xlu1 %v4197_v41, %s5477_s27  ;;  %v4200_v41 = vadd.f32 %v4106_v22, %v3507_v32  ;;  %v4112_v30 = vpop.permute.xlu1 %4111  ;;  %v3515_v54 = vadd.f32 %v9212_v0, %v7954_v7  ;;  %v3520_v7 = vadd.f32 %v9215_v37, %v7969_v25  ;;  %v9226_v37 = vld [vmem:[#allocation30_spill] sm:$0xff] }
 0x388   : > { %4341 = vrot.lane.b32.xlu0 %v4196_v34, %s5477_s27  ;;  %v9206_v34 = vld [vmem:[#allocation101_spill] sm:$0xff]  ;;  %v4207_v29 = vadd.f32 %v4112_v30, %v3514_v20  ;;  %v3521_v20 = vadd.f32 %v9218_v3, %v7992_v45  ;;  %v9221_v45 = vld [vmem:[#allocation54_spill] sm:$0xff] }
 0x389   : > { %v3509_v24 = vadd.f32 %v9206_v34, %v9205_v49  ;;  %v3526_v0 = vadd.f32 %v9221_v45, %v8096_v21  ;;  %v9230_v3 = vld [vmem:[#allocation50_spill] sm:$0xff] }
 0x38b   : > { %4347 = vrot.lane.b32.xlu1 %v4199_v12, %s5477_s27  ;;  %v4202_v14 = vadd.f32 %v4106_v22, %v3509_v24  ;;  %v4110_v12 = vpop.permute.xlu0 %4109  ;;  %v9210_v22 = vld [vmem:[#allocation110_spill] sm:$0xff]  ;;  %v4116_v49 = vpop.permute.xlu1 %4115 }
 0x38c   : > { %4345 = vrot.lane.b32.xlu0 %v4198_v18, %s5477_s27  ;;  %v3511_v18 = vadd.f32 %v9208_v39, %v7887_v6  ;;  %v3513_v32 = vadd.f32 %v9210_v22, %v7852_v4  ;;  %v9213_v4 = vld [vmem:[#allocation47_spill] sm:$0xff]  ;;  %v9216_v39 = vld [vmem:[#allocation8_spill] sm:$0xff] }
 0x38d   : > { %v3518_v24 = vadd.f32 %v9213_v4, %v7988_v33  ;;  %v4213_v33 = vadd.f32 %v4116_v49, %v3520_v7  ;;  %v3529_v7 = vadd.f32 %v9226_v37, %v8100_v36  ;;  %v9229_v36 = vld [vmem:[#allocation68_spill] sm:$0xff] }
 0x38e   : > { %v4204_v38 = vadd.f32 %v4110_v12, %v3511_v18  ;;  %v3519_v18 = vadd.f32 %v9216_v39, %v8010_v35  ;;  %v9227_v39 = vld [vmem:[#allocation33_spill] sm:$0xff] }
 0x38f   : > { %4351 = vrot.lane.b32.xlu1 %v4201_v8, %s5477_s27  ;;  %v4206_v8 = vadd.f32 %v4110_v12, %v3513_v32  ;;  %v4114_v58 = vpop.permute.xlu0 %4113  ;;  %v9219_v32 = vld [vmem:[#allocation16_spill] sm:$0xff] }
 0x390   : > { %4349 = vrot.lane.b32.xlu0 %v4200_v41, %s5477_s27  ;;  %v9211_v41 = vld [vmem:[#allocation118_spill] sm:$0xff]  ;;  %v4208_v34 = vadd.f32 %v4114_v58, %v3515_v54  ;;  %v3524_v35 = vadd.f32 %v9219_v32, %v8014_v43  ;;  %v9222_v54 = vld [vmem:[#allocation7_spill] sm:$0xff] }
 0x391   : > { %v3516_v6 = vadd.f32 %v9211_v41, %v7900_v53  ;;  %v4211_v53 = vadd.f32 %v4116_v49, %v3518_v24  ;;  %v9224_v24 = vld [vmem:[#allocation10_spill] sm:$0xff] }
 0x393   : > { %4355 = vrot.lane.b32.xlu1 %v4203_v11, %s5477_s27  ;;  %v4209_v42 = vadd.f32 %v4112_v30, %v3516_v6  ;;  %v9214_v11 = vld [vmem:[#allocation119_spill] sm:$0xff]  ;;  %v4118_v12 = vpop.permute.xlu0 %4117 }
 0x394   : > { %4353 = vrot.lane.b32.xlu0 %v4202_v14, %s5477_s27  ;;  %v3517_v14 = vadd.f32 %v9214_v11, %v7924_v40  ;;  %v4212_v30 = vadd.f32 %v4118_v12, %v3519_v18  ;;  %v9217_v40 = vld [vmem:[#allocation52_spill] sm:$0xff]  ;;  %v4214_v22 = vadd.f32 %v4118_v12, %v3521_v20  ;;  %v3527_v11 = vadd.f32 %v9224_v24, %v8120_v13 }
 0x395   : > { %v3532_v13 = vadd.f32 %v9227_v39, %v8124_v60  ;;  %v3533_v20 = vadd.f32 %v9230_v3, %v8149_v1  ;;  %v9233_v1 = vld [vmem:[#allocation77_spill] sm:$0xff] }
 0x396   : > { %v4210_v23 = vadd.f32 %v4114_v58, %v3517_v14 }
 0x397   : > { %4359 = vrot.lane.b32.xlu1 %v4205_v57, %s5477_s27  ;;  %v4120_v57 = vpop.permute.xlu1 %4119 }
 0x398   : > { %4357 = vrot.lane.b32.xlu0 %v4204_v38, %s5477_s27  ;;  %v3522_v38 = vadd.f32 %v9217_v40, %v8037_v48  ;;  %v4217_v48 = vadd.f32 %v4120_v57, %v3524_v35  ;;  %v9232_v35 = vld [vmem:[#allocation70_spill] sm:$0xff] }
 0x39a   : > { %v4215_v25 = vadd.f32 %v4120_v57, %v3522_v38  ;;  %v3534_v38 = vadd.f32 %v9229_v36, %v8187_v26 }
 0x39b   : > { %4363 = vrot.lane.b32.xlu1 %v4207_v29, %s5477_s27  ;;  %v4122_v29 = vpop.permute.xlu0 %4121  ;;  %v4124_v6 = vpop.permute.xlu1 %4123 }
 0x39c   : > { %4361 = vrot.lane.b32.xlu0 %v4206_v8, %s5477_s27  ;;  %v9220_v8 = vld [vmem:[#allocation19_spill] sm:$0xff]  ;;  %v4219_v43 = vadd.f32 %v4124_v6, %v3526_v0 }
 0x39d   : > { %v3523_v41 = vadd.f32 %v9220_v8, %v8065_v27 }
 0x39f   : > { %4367 = vrot.lane.b32.xlu1 %v4209_v42, %s5477_s27  ;;  %v4216_v58 = vadd.f32 %v4122_v29, %v3523_v41  ;;  %v3525_v42 = vadd.f32 %v9222_v54, %v8041_v52  ;;  %v4126_v4 = vpop.permute.xlu0 %4125  ;;  %v4128_v14 = vpop.permute.xlu1 %4127  ;;  %v9225_v52 = vld [vmem:[#allocation36_spill] sm:$0xff] }
 0x3a0   : > { %4365 = vrot.lane.b32.xlu0 %v4208_v34, %s5477_s27  ;;  %v9223_v34 = vld [vmem:[#allocation51_spill] sm:$0xff]  ;;  %v4222_v12 = vadd.f32 %v4126_v4, %v3529_v7 }
 0x3a1   : > { %v4218_v49 = vadd.f32 %v4122_v29, %v3525_v42  ;;  %v3528_v27 = vadd.f32 %v9223_v34, %v8069_v61  ;;  %v3535_v29 = vadd.f32 %v9232_v35, %v8204_v51  ;;  %v3540_v51 = vadd.f32 %v8304_v31, %v8208_v62  ;;  %v9235_v42 = vld [vmem:[#allocation78_spill] sm:$0xff] }
 0x3a2   : > { %v3541_v34 = vadd.f32 %v8314_v9, %v8225_v63 }
 0x3a3   : > { %4371 = vrot.lane.b32.xlu1 %v4211_v53, %s5477_s27  ;;  %v4221_v21 = vadd.f32 %v4124_v6, %v3528_v27  ;;  %v4220_v53 = vadd.f32 %v4126_v4, %v3527_v11  ;;  %v4130_v18 = vpop.permute.xlu0 %4129  ;;  %v9234_v6 = vld [vmem:[#allocation63_spill] sm:$0xff]  ;;  %v3546_v11 = vadd.f32 %v8322_v59, %v8286_v19  ;;  %v9238_v59 = vld [vmem:[#allocation21_spill] sm:$0xff] }
 0x3a4   : > { %4369 = vrot.lane.b32.xlu0 %v4210_v23, %s5477_s27  ;;  %v3530_v23 = vadd.f32 %v9225_v52, %v8145_v55  ;;  %v4225_v55 = vadd.f32 %v4128_v14, %v3532_v13  ;;  %v9237_v19 = vld [vmem:[#allocation55_spill] sm:$0xff] }
 0x3a6   : > { %v4223_v61 = vadd.f32 %v4128_v14, %v3530_v23 }
 0x3a7   : > { %4375 = vrot.lane.b32.xlu1 %v4213_v33, %s5477_s27  ;;  %v9228_v33 = vld [vmem:[#allocation22_spill] sm:$0xff]  ;;  %v4134_v32 = vpop.permute.xlu0 %4133 }
 0x3a8   : > { %4373 = vrot.lane.b32.xlu0 %v4212_v30, %s5477_s27  ;;  %v3531_v57 = vadd.f32 %v9228_v33, %v8168_v46  ;;  %v4132_v30 = vpop.permute.xlu1 %4131  ;;  %v4228_v41 = vadd.f32 %v4134_v32, %v3535_v29 }
 0x3a9   : > { %v4227_v60 = vadd.f32 %v4132_v30, %v3534_v38 }
 0x3aa   : > { %v4224_v40 = vadd.f32 %v4130_v18, %v3531_v57 }
 0x3ab   : > { %4379 = vrot.lane.b32.xlu1 %v4215_v25, %s5477_s27  ;;  %v4226_v25 = vadd.f32 %v4130_v18, %v3533_v20  ;;  %v4138_v0 = vpop.permute.xlu0 %4137 }
 0x3ac   : > { %4377 = vrot.lane.b32.xlu0 %v4214_v22, %s5477_s27  ;;  %v9231_v22 = vld [vmem:[#allocation59_spill] sm:$0xff]  ;;  %v4136_v8 = vpop.permute.xlu1 %4135  ;;  %v4234_v4 = vadd.f32 %v4138_v0, %v3541_v34 }
 0x3ad   : > { %v3536_v46 = vadd.f32 %v9231_v22, %v8172_v2 }
 0x3af   : > { %4383 = vrot.lane.b32.xlu1 %v4217_v48, %s5477_s27  ;;  %v4229_v26 = vadd.f32 %v4132_v30, %v3536_v46  ;;  %v3538_v48 = vadd.f32 %v9233_v1, %v8221_v15  ;;  %v4233_v15 = vadd.f32 %v4136_v8, %v3540_v51  ;;  %v4142_v62 = vpop.permute.xlu0 %4141 }
 0x3b0   : > { %4381 = vrot.lane.b32.xlu0 %v4216_v58, %s5477_s27  ;;  %v3537_v58 = vadd.f32 %v9234_v6, %v8191_v5  ;;  %v4140_v54 = vpop.permute.xlu1 %4139  ;;  %v3542_v5 = vadd.f32 %v8312_v56, %v8255_v47  ;;  %v3543_v47 = vadd.f32 %v8320_v17, %v8272_v10 }
 0x3b1   : > { %v4231_v2 = vadd.f32 %v4136_v8, %v3538_v48 }
 0x3b2   : > { %v4230_v45 = vadd.f32 %v4134_v32, %v3537_v58  ;;  %v4235_v31 = vadd.f32 %v4140_v54, %v3542_v5  ;;  %v4236_v9 = vadd.f32 %v4142_v62, %v3543_v47 }
 0x3b3   : > { %4387 = vrot.lane.b32.xlu1 %v4219_v43, %s5477_s27  ;;  %v3539_v43 = vadd.f32 %v9235_v42, %v8238_v50  ;;  %v3544_v50 = vadd.f32 %v8318_v16, %v8242_v44  ;;  %v4146_v24 = vpop.permute.xlu0 %4145  ;;  %v9236_v44 = vld [vmem:[#allocation37_spill] sm:$0xff] }
 0x3b4   : > { %4385 = vrot.lane.b32.xlu0 %v4218_v49, %s5477_s27  ;;  %v4144_v27 = vpop.permute.xlu1 %4143  ;;  %v3545_v16 = vadd.f32 %v9236_v44, %v8259_v28  ;;  %v9239_v28 = vld [vmem:[#allocation57_spill] sm:$0xff] }
 0x3b5   : > { %v4232_v49 = vadd.f32 %v4138_v0, %v3539_v43  ;;  %v4237_v56 = vadd.f32 %v4140_v54, %v3544_v50  ;;  %v4239_v10 = vadd.f32 %v4144_v27, %v3546_v11  ;;  %v4241_v52 = vadd.f32 %v4144_v27, %v9239_v28 }
 0x3b7   : > { %4391 = vrot.lane.b32.xlu1 %v4221_v21, %s5477_s27  ;;  %v4238_v21 = vadd.f32 %v4142_v62, %v3545_v16 }
 0x3b8   : > { %4389 = vrot.lane.b32.xlu0 %v4220_v53, %s5477_s27  ;;  %v3547_v53 = vadd.f32 %v9238_v59, %v9237_v19 }
 0x3ba   : > { %v4240_v37 = vadd.f32 %v4146_v24, %v3547_v53 }
 0x3bb   : > { %4395 = vrot.lane.b32.xlu1 %v4223_v61, %s5477_s27 }
 0x3bc   : > { %4393 = vrot.lane.b32.xlu0 %v4222_v12, %s5477_s27  ;;  %v9240_v12 = vld [vmem:[#allocation23_spill] sm:$0xff] }
 0x3bd   : > { %v4242_v39 = vadd.f32 %v4146_v24, %v9240_v12 }
 0x3bf   : > { %4399 = vrot.lane.b32.xlu1 %v4225_v55, %s5477_s27 }
 0x3c0   : > { %4397 = vrot.lane.b32.xlu0 %v4224_v40, %s5477_s27 }
 0x3c3   : > { %4403 = vrot.lane.b32.xlu1 %v4227_v60, %s5477_s27 }
 0x3c4   : > { %4401 = vrot.lane.b32.xlu0 %v4226_v25, %s5477_s27 }
 0x3c7   : > { %4407 = vrot.lane.b32.xlu1 %v4229_v26, %s5477_s27 }
 0x3c8   : > { %4405 = vrot.lane.b32.xlu0 %v4228_v41, %s5477_s27 }
 0x3cb   : > { %4411 = vrot.lane.b32.xlu1 %v4231_v2, %s5477_s27 }
 0x3cc   : > { %4409 = vrot.lane.b32.xlu0 %v4230_v45, %s5477_s27 }
 0x3cf   : > { %4415 = vrot.lane.b32.xlu1 %v4233_v15, %s5477_s27 }
 0x3d0   : > { %4413 = vrot.lane.b32.xlu0 %v4232_v49, %s5477_s27 }
 0x3d3   : > { %4419 = vrot.lane.b32.xlu1 %v4235_v31, %s5477_s27 }
 0x3d4   : > { %4417 = vrot.lane.b32.xlu0 %v4234_v4, %s5477_s27 }
 0x3d5   : > { %v4308_v63 = vpop.permute.xlu1 %4307 }
 0x3d6   : > { %4778 = vst.msk [vmem:[%s7357_s17 + $0x200] sm:$0xff] %vm1308_vm1, %v4308_v63 }
 0x3d7   : > { %4423 = vrot.lane.b32.xlu1 %v4237_v56, %s5477_s27 }
 0x3d8   : > { %4421 = vrot.lane.b32.xlu0 %v4236_v9, %s5477_s27 }
 0x3d9   : > { %v4312_v17 = vpop.permute.xlu1 %4311 }
 0x3da   : > { %4780 = vst.msk [vmem:[%s7357_s17 + $0x210] sm:$0xff] %vm1308_vm1, %v4312_v17  ;;  %v4310_v14 = vpop.permute.xlu0 %4309 }
 0x3db   : > { %4779 = vst.msk [vmem:[%s7357_s17 + $0x208] sm:$0xff] %vm1308_vm1, %v4310_v14  ;;  %4427 = vrot.lane.b32.xlu1 %v4239_v10, %s5477_s27 }
 0x3dc   : > { %4425 = vrot.lane.b32.xlu0 %v4238_v21, %s5477_s27 }
 0x3dd   : > { %v4316_v23 = vpop.permute.xlu1 %4315 }
 0x3de   : > { %4782 = vst.msk [vmem:[%s7357_s17 + $0x220] sm:$0xff] %vm1308_vm1, %v4316_v23  ;;  %v4314_v7 = vpop.permute.xlu0 %4313 }
 0x3df   : > { %4781 = vst.msk [vmem:[%s7357_s17 + $0x218] sm:$0xff] %vm1308_vm1, %v4314_v7  ;;  %4431 = vrot.lane.b32.xlu1 %v4241_v52, %s5477_s27 }
 0x3e0   : > { %4429 = vrot.lane.b32.xlu0 %v4240_v37, %s5477_s27 }
 0x3e1   : > { %v4320_v61 = vpop.permute.xlu1 %4319 }
 0x3e2   : > { %4784 = vst.msk [vmem:[%s7357_s17 + $0x230] sm:$0xff] %vm1308_vm1, %v4320_v61  ;;  %v4318_v13 = vpop.permute.xlu0 %4317 }
 0x3e3   : > { %4783 = vst.msk [vmem:[%s7357_s17 + $0x228] sm:$0xff] %vm1308_vm1, %v4318_v13 }
 0x3e4   : > { %4433 = vrot.lane.b32.xlu0 %v4242_v39, %s5477_s27 }
 0x3e5   : > { %v4324_v18 = vpop.permute.xlu1 %4323 }
 0x3e6   : > { %4786 = vst.msk [vmem:[%s7357_s17 + $0x240] sm:$0xff] %vm1308_vm1, %v4324_v18  ;;  %v4322_v33 = vpop.permute.xlu0 %4321 }
 0x3e7   : > { %4785 = vst.msk [vmem:[%s7357_s17 + $0x238] sm:$0xff] %vm1308_vm1, %v4322_v33 }
 0x3e9   : > { %v4328_v57 = vpop.permute.xlu1 %4327 }
 0x3ea   : > { %4788 = vst.msk [vmem:[%s7357_s17 + $0x250] sm:$0xff] %vm1308_vm1, %v4328_v57  ;;  %v4326_v55 = vpop.permute.xlu0 %4325 }
 0x3eb   : > { %4787 = vst.msk [vmem:[%s7357_s17 + $0x248] sm:$0xff] %vm1308_vm1, %v4326_v55 }
 0x3ed   : > { %v4332_v30 = vpop.permute.xlu1 %4331 }
 0x3ee   : > { %4790 = vst.msk [vmem:[%s7357_s17 + $0x260] sm:$0xff] %vm1308_vm1, %v4332_v30  ;;  %v4330_v40 = vpop.permute.xlu0 %4329 }
 0x3ef   : > { %4789 = vst.msk [vmem:[%s7357_s17 + $0x258] sm:$0xff] %vm1308_vm1, %v4330_v40 }
 0x3f1   : > { %v4336_v36 = vpop.permute.xlu1 %4335 }
 0x3f2   : > { %4792 = vst.msk [vmem:[%s7357_s17 + $0x270] sm:$0xff] %vm1308_vm1, %v4336_v36  ;;  %v4334_v38 = vpop.permute.xlu0 %4333 }
 0x3f3   : > { %4791 = vst.msk [vmem:[%s7357_s17 + $0x268] sm:$0xff] %vm1308_vm1, %v4334_v38 }
 0x3f5   : > { %v4340_v3 = vpop.permute.xlu1 %4339 }
 0x3f6   : > { %4794 = vst.msk [vmem:[%s7357_s17 + $0x280] sm:$0xff] %vm1308_vm1, %v4340_v3  ;;  %v4338_v20 = vpop.permute.xlu0 %4337 }
 0x3f7   : > { %4793 = vst.msk [vmem:[%s7357_s17 + $0x278] sm:$0xff] %vm1308_vm1, %v4338_v20 }
 0x3f9   : > { %v4344_v60 = vpop.permute.xlu1 %4343 }
 0x3fa   : > { %4796 = vst.msk [vmem:[%s7357_s17 + $0x290] sm:$0xff] %vm1308_vm1, %v4344_v60  ;;  %v4342_v25 = vpop.permute.xlu0 %4341 }
 0x3fb   : > { %4795 = vst.msk [vmem:[%s7357_s17 + $0x288] sm:$0xff] %vm1308_vm1, %v4342_v25 }
 0x3fd   : > { %v4348_v22 = vpop.permute.xlu1 %4347 }
 0x3fe   : > { %4798 = vst.msk [vmem:[%s7357_s17 + $0x2a0] sm:$0xff] %vm1308_vm1, %v4348_v22  ;;  %v4346_v46 = vpop.permute.xlu0 %4345 }
 0x3ff   : > { %4797 = vst.msk [vmem:[%s7357_s17 + $0x298] sm:$0xff] %vm1308_vm1, %v4346_v46 }
 0x401   : > { %v4352_v32 = vpop.permute.xlu1 %4351 }
 0x402   : > { %4800 = vst.msk [vmem:[%s7357_s17 + $0x2b0] sm:$0xff] %vm1308_vm1, %v4352_v32  ;;  %v4350_v35 = vpop.permute.xlu0 %4349 }
 0x403   : > { %4799 = vst.msk [vmem:[%s7357_s17 + $0x2a8] sm:$0xff] %vm1308_vm1, %v4350_v35 }
 0x405   : > { %v4356_v29 = vpop.permute.xlu1 %4355 }
 0x406   : > { %4802 = vst.msk [vmem:[%s7357_s17 + $0x2c0] sm:$0xff] %vm1308_vm1, %v4356_v29  ;;  %v4354_v26 = vpop.permute.xlu0 %4353 }
 0x407   : > { %4801 = vst.msk [vmem:[%s7357_s17 + $0x2b8] sm:$0xff] %vm1308_vm1, %v4354_v26 }
 0x409   : > { %v4360_v8 = vpop.permute.xlu1 %4359 }
 0x40a   : > { %4804 = vst.msk [vmem:[%s7357_s17 + $0x2d0] sm:$0xff] %vm1308_vm1, %v4360_v8  ;;  %v4358_v41 = vpop.permute.xlu0 %4357 }
 0x40b   : > { %4803 = vst.msk [vmem:[%s7357_s17 + $0x2c8] sm:$0xff] %vm1308_vm1, %v4358_v41 }
 0x40d   : > { %v4364_v1 = vpop.permute.xlu1 %4363 }
 0x40e   : > { %4806 = vst.msk [vmem:[%s7357_s17 + $0x2e0] sm:$0xff] %vm1308_vm1, %v4364_v1  ;;  %v4362_v48 = vpop.permute.xlu0 %4361 }
 0x40f   : > { %4805 = vst.msk [vmem:[%s7357_s17 + $0x2d8] sm:$0xff] %vm1308_vm1, %v4362_v48 }
 0x411   : > { %v4368_v6 = vpop.permute.xlu1 %4367 }
 0x412   : > { %4808 = vst.msk [vmem:[%s7357_s17 + $0x2f0] sm:$0xff] %vm1308_vm1, %v4368_v6  ;;  %v4366_v58 = vpop.permute.xlu0 %4365 }
 0x413   : > { %4807 = vst.msk [vmem:[%s7357_s17 + $0x2e8] sm:$0xff] %vm1308_vm1, %v4366_v58 }
 0x415   : > { %v4372_v2 = vpop.permute.xlu1 %4371 }
 0x416   : > { %4810 = vst.msk [vmem:[%s7357_s17 + $0x300] sm:$0xff] %vm1308_vm1, %v4372_v2  ;;  %v4370_v45 = vpop.permute.xlu0 %4369 }
 0x417   : > { %4809 = vst.msk [vmem:[%s7357_s17 + $0x2f8] sm:$0xff] %vm1308_vm1, %v4370_v45 }
 0x419   : > { %v4376_v0 = vpop.permute.xlu1 %4375 }
 0x41a   : > { %4812 = vst.msk [vmem:[%s7357_s17 + $0x310] sm:$0xff] %vm1308_vm1, %v4376_v0  ;;  %v4374_v51 = vpop.permute.xlu0 %4373 }
 0x41b   : > { %4811 = vst.msk [vmem:[%s7357_s17 + $0x308] sm:$0xff] %vm1308_vm1, %v4374_v51 }
 0x41d   : > { %v4380_v54 = vpop.permute.xlu1 %4379 }
 0x41e   : > { %4814 = vst.msk [vmem:[%s7357_s17 + $0x320] sm:$0xff] %vm1308_vm1, %v4380_v54  ;;  %v4378_v42 = vpop.permute.xlu0 %4377 }
 0x41f   : > { %4813 = vst.msk [vmem:[%s7357_s17 + $0x318] sm:$0xff] %vm1308_vm1, %v4378_v42 }
 0x421   : > { %v4384_v43 = vpop.permute.xlu1 %4383 }
 0x422   : > { %4816 = vst.msk [vmem:[%s7357_s17 + $0x330] sm:$0xff] %vm1308_vm1, %v4384_v43  ;;  %v4382_v15 = vpop.permute.xlu0 %4381 }
 0x423   : > { %4815 = vst.msk [vmem:[%s7357_s17 + $0x328] sm:$0xff] %vm1308_vm1, %v4382_v15 }
 0x425   : > { %v4388_v49 = vpop.permute.xlu1 %4387 }
 0x426   : > { %4818 = vst.msk [vmem:[%s7357_s17 + $0x340] sm:$0xff] %vm1308_vm1, %v4388_v49  ;;  %v4386_v5 = vpop.permute.xlu0 %4385 }
 0x427   : > { %4817 = vst.msk [vmem:[%s7357_s17 + $0x338] sm:$0xff] %vm1308_vm1, %v4386_v5 }
 0x429   : > { %v4392_v34 = vpop.permute.xlu1 %4391 }
 0x42a   : > { %4820 = vst.msk [vmem:[%s7357_s17 + $0x350] sm:$0xff] %vm1308_vm1, %v4392_v34  ;;  %v4390_v62 = vpop.permute.xlu0 %4389 }
 0x42b   : > { %4819 = vst.msk [vmem:[%s7357_s17 + $0x348] sm:$0xff] %vm1308_vm1, %v4390_v62 }
 0x42d   : > { %v4396_v31 = vpop.permute.xlu1 %4395 }
 0x42e   : > { %4822 = vst.msk [vmem:[%s7357_s17 + $0x360] sm:$0xff] %vm1308_vm1, %v4396_v31  ;;  %v4394_v27 = vpop.permute.xlu0 %4393 }
 0x42f   : > { %4821 = vst.msk [vmem:[%s7357_s17 + $0x358] sm:$0xff] %vm1308_vm1, %v4394_v27 }
 0x431   : > { %v4400_v4 = vpop.permute.xlu1 %4399 }
 0x432   : > { %4824 = vst.msk [vmem:[%s7357_s17 + $0x370] sm:$0xff] %vm1308_vm1, %v4400_v4  ;;  %v4398_v50 = vpop.permute.xlu0 %4397 }
 0x433   : > { %4823 = vst.msk [vmem:[%s7357_s17 + $0x368] sm:$0xff] %vm1308_vm1, %v4398_v50 }
 0x435   : > { %v4404_v47 = vpop.permute.xlu1 %4403 }
 0x436   : > { %4826 = vst.msk [vmem:[%s7357_s17 + $0x380] sm:$0xff] %vm1308_vm1, %v4404_v47  ;;  %v4402_v56 = vpop.permute.xlu0 %4401 }
 0x437   : > { %4825 = vst.msk [vmem:[%s7357_s17 + $0x378] sm:$0xff] %vm1308_vm1, %v4402_v56 }
 0x439   : > { %v4408_v63 = vpop.permute.xlu1 %4407 }
 0x43a   : > { %4828 = vst.msk [vmem:[%s7357_s17 + $0x390] sm:$0xff] %vm1308_vm1, %v4408_v63  ;;  %v4406_v9 = vpop.permute.xlu0 %4405 }
 0x43b   : > { %4827 = vst.msk [vmem:[%s7357_s17 + $0x388] sm:$0xff] %vm1308_vm1, %v4406_v9 }
 0x43d   : > { %v4412_v24 = vpop.permute.xlu1 %4411 }
 0x43e   : > { %4830 = vst.msk [vmem:[%s7357_s17 + $0x3a0] sm:$0xff] %vm1308_vm1, %v4412_v24  ;;  %v4410_v11 = vpop.permute.xlu0 %4409 }
 0x43f   : > { %4829 = vst.msk [vmem:[%s7357_s17 + $0x398] sm:$0xff] %vm1308_vm1, %v4410_v11 }
 0x441   : > { %v4416_v44 = vpop.permute.xlu1 %4415 }
 0x442   : > { %4832 = vst.msk [vmem:[%s7357_s17 + $0x3b0] sm:$0xff] %vm1308_vm1, %v4416_v44  ;;  %v4414_v16 = vpop.permute.xlu0 %4413 }
 0x443   : > { %4831 = vst.msk [vmem:[%s7357_s17 + $0x3a8] sm:$0xff] %vm1308_vm1, %v4414_v16 }
 0x445   : > { %v4420_v10 = vpop.permute.xlu1 %4419 }
 0x446   : > { %4834 = vst.msk [vmem:[%s7357_s17 + $0x3c0] sm:$0xff] %vm1308_vm1, %v4420_v10  ;;  %v4418_v17 = vpop.permute.xlu0 %4417 }
 0x447   : > { %4833 = vst.msk [vmem:[%s7357_s17 + $0x3b8] sm:$0xff] %vm1308_vm1, %v4418_v17 }
 0x449   : > { %v4424_v21 = vpop.permute.xlu1 %4423 }
 0x44a   : > { %4836 = vst.msk [vmem:[%s7357_s17 + $0x3d0] sm:$0xff] %vm1308_vm1, %v4424_v21  ;;  %v4422_v14 = vpop.permute.xlu0 %4421 }
 0x44b   : > { %4835 = vst.msk [vmem:[%s7357_s17 + $0x3c8] sm:$0xff] %vm1308_vm1, %v4422_v14 }
 0x44d   : > { %v4428_v19 = vpop.permute.xlu1 %4427 }
 0x44e   : > { %4838 = vst.msk [vmem:[%s7357_s17 + $0x3e0] sm:$0xff] %vm1308_vm1, %v4428_v19  ;;  %v4426_v59 = vpop.permute.xlu0 %4425 }
 0x44f   : > { %4837 = vst.msk [vmem:[%s7357_s17 + $0x3d8] sm:$0xff] %vm1308_vm1, %v4426_v59 }
 0x451   : > { %v4432_v53 = vpop.permute.xlu1 %4431 }
 0x452   : > { %4840 = vst.msk [vmem:[%s7357_s17 + $0x3f0] sm:$0xff] %vm1308_vm1, %v4432_v53  ;;  %v4430_v28 = vpop.permute.xlu0 %4429 }
 0x453   : > { %4839 = vst.msk [vmem:[%s7357_s17 + $0x3e8] sm:$0xff] %vm1308_vm1, %v4430_v28 }
 0x456   : > { %v4434_v52 = vpop.permute.xlu0 %4433 }
 0x457   : > { %4841 = vst.msk [vmem:[%s7357_s17 + $0x3f8] sm:$0xff] %vm1308_vm1, %v4434_v52 }
 0x458 PF: > { %s20_s13 = sadd.s32 1, %s5472_s13  }
 0x459   : > { %p17_p4 = scmp.ge.s32.totalorder %s20_s13, 4  }
 0x45b   :  { %19 = sbr.rel (!%p17_p4) target bundleno = 1 (0x1), region = 103 }

</bundles_post_ra>
